<compile_context>
chip_gen: v7x
topology: tpu7x:2x2x1
jax: 0.10.0
libtpu: 0.0.40
codegen_flags: <defaults>
</compile_context>

<pallas_src>
import jax
import jax.numpy as jnp
from jax.experimental import pallas as pl
from jax.experimental.pallas import tpu as pltpu

NEG_SLOPE = 0.1   # nn.LeakyReLU(negative_slope=0.1)
BN_EPS = 1e-5     # nn.BatchNorm2d default eps

DEPTH2BLOCKS = {21: [1, 1, 2, 2, 1], 53: [1, 2, 8, 8, 4]}


# ----------------------------------------------------------------------------
# helpers
# ----------------------------------------------------------------------------
def _round_up(x, m):
    return (x + m - 1) // m * m


_TM_CANDIDATES = (1024, 512, 256, 128, 64, 32, 16)   # multiples of 16 (bf16)


def _plan_m(m):
    """Padded M (multiple of 16) and the largest M-tile that divides it."""
    mp = _round_up(m, 16)
    for tm in _TM_CANDIDATES:
        if mp % tm == 0:
            return mp, tm
    return mp, 16


def _pick_divisor(dim, candidates):
    for c in candidates:
        if dim % c == 0:
            return c
    return candidates[-1]


# ----------------------------------------------------------------------------
# Pallas kernel: tiled GEMM -> (+bias) -> LeakyReLU -> (+ residual), bf16 out
# ----------------------------------------------------------------------------
def _make_kernel(has_res):
    def kernel(*refs):
        if has_res:
            p_ref, w_ref, b_ref, r_ref, o_ref, acc_ref = refs
        else:
            p_ref, w_ref, b_ref, o_ref, acc_ref = refs
            r_ref = None
        k = pl.program_id(2)

        @pl.when(k == 0)
        def _():
            acc_ref[...] = jnp.zeros_like(acc_ref)

        acc_ref[...] += jnp.dot(p_ref[...], w_ref[...],
                                preferred_element_type=jnp.float32)

        @pl.when(k == pl.num_programs(2) - 1)
        def _():
            # BN scale already folded into the weights; only the bias remains.
            y = acc_ref[...] + b_ref[...]
            y = jnp.maximum(y, NEG_SLOPE * y)        # LeakyReLU(0.1)
            if has_res:
                y = y + r_ref[...]                   # bf16 residual, promoted
            o_ref[...] = y.astype(o_ref.dtype)       # bf16 store

    return kernel


def _fused_conv_gemm(lhs_bf16, w_bf16, bias_f32, residual_bf16=None):
    Mp, Kp = lhs_bf16.shape
    Kp2, Np = w_bf16.shape
    assert Kp == Kp2 and Mp % 16 == 0 and Kp % 128 == 0 and Np % 128 == 0
    _, tm = _plan_m(Mp)
    tk = _pick_divisor(Kp, (512, 256, 128))
    tn = _pick_divisor(Np, (512, 256, 128))
    grid = (Mp // tm, Np // tn, Kp // tk)

    in_specs = [
        pl.BlockSpec((tm, tk), lambda i, j, k: (i, k)),     # LHS (patches/act)
        pl.BlockSpec((tk, tn), lambda i, j, k: (k, j)),     # weights (BN-folded)
        pl.BlockSpec((1, tn), lambda i, j, k: (0, j)),      # bias
    ]
    args = [lhs_bf16, w_bf16, bias_f32]
    has_res = residual_bf16 is not None
    if has_res:
        in_specs.append(pl.BlockSpec((tm, tn), lambda i, j, k: (i, j)))
        args.append(residual_bf16)

    bytes_accessed = sum(int(a.size) * a.dtype.itemsize for a in args)
    bytes_accessed += Mp * Np * 2                            # bf16 output
    cost = pl.CostEstimate(flops=2 * Mp * Kp * Np, transcendentals=0,
                           bytes_accessed=bytes_accessed)

    return pl.pallas_call(
        _make_kernel(has_res),
        out_shape=jax.ShapeDtypeStruct((Mp, Np), jnp.bfloat16),
        grid_spec=pltpu.PrefetchScalarGridSpec(
            num_scalar_prefetch=0,
            grid=grid,
            in_specs=in_specs,
            out_specs=pl.BlockSpec((tm, tn), lambda i, j, k: (i, j)),
            scratch_shapes=[pltpu.VMEM((tm, tn), jnp.float32)]),
        compiler_params=pltpu.CompilerParams(
            dimension_semantics=("parallel", "parallel", "arbitrary"),
            vmem_limit_bytes=32 * 1024 * 1024),
        cost_estimate=cost,
    )(*args)


# ----------------------------------------------------------------------------
# Glue: im2col (Conv2d with padding=ks//2, given stride, no bias), bf16,
# with the K zero-pad folded directly into the channel concatenation.
# ----------------------------------------------------------------------------
def _im2col(x_nhwc, ks, stride, k_padded):
    N, H, W, C = x_nhwc.shape
    pad = ks // 2
    xp = jnp.pad(x_nhwc, ((0, 0), (pad, pad), (pad, pad), (0, 0)))
    Ho = (H + 2 * pad - ks) // stride + 1
    Wo = (W + 2 * pad - ks) // stride + 1
    cols = []
    for dy in range(ks):
        for dx in range(ks):
            cols.append(
                xp[:, dy:dy + stride * Ho:stride, dx:dx + stride * Wo:stride, :])
    k_extra = k_padded - ks * ks * C
    if k_extra > 0:                       # lane pad folded into the concat
        cols.append(jnp.zeros((N, Ho, Wo, k_extra), x_nhwc.dtype))
    # channel ordering: (dy, dx, cin) == HWIO weight reshape ordering
    patches = jnp.concatenate(cols, axis=-1)          # (N, Ho, Wo, Kp)
    return patches.reshape(N * Ho * Wo, k_padded), Ho, Wo


def conv_spatial_apply(x_nhwc_bf16, p, residual_gemm=None):
    """ks x ks conv on a spatial NHWC bf16 input.  Returns the padded bf16
    GEMM-form output (Mp, Cp) plus (N, Ho, Wo, Cout) metadata.  The residual
    (same padded GEMM form) is added AFTER the LeakyReLU, matching ResLayer's
    `x + out`."""
    N = x_nhwc_bf16.shape[0]
    Kp, Cp = p["w"].shape
    patches, Ho, Wo = _im2col(x_nhwc_bf16, p["ks"], p["stride"], Kp)
    M = N * Ho * Wo
    Mp, _ = _plan_m(M)
    if Mp > M:                            # only for the tiny deep-stage layers
        patches = jnp.pad(patches, ((0, Mp - M), (0, 0)))
    if residual_gemm is not None:
        assert residual_gemm.shape == (Mp, Cp)
    out = _fused_conv_gemm(patches, p["w"], p["b"], residual_gemm)
    return out, (N, Ho, Wo, p["cout"])


def conv_1x1_apply(x_gemm_bf16, p):
    """1x1 stride-1 conv directly on the padded (Mp, Cp_in) bf16 GEMM form of
    the previous layer (its im2col is the identity); padded channels hit zero
    weight rows, so no slicing / re-padding is needed."""
    assert p["ks"] == 1 and p["stride"] == 1
    assert x_gemm_bf16.shape[1] == p["w"].shape[0]
    return _fused_conv_gemm(x_gemm_bf16, p["w"], p["b"], None)


def _gemm_to_nhwc(g, meta):
    N, H, W, C = meta
    M = N * H * W
    return g[:M, :C].reshape(N, H, W, C)


def _gemm_to_nchw_f32(g, meta):
    return jnp.transpose(_gemm_to_nhwc(g, meta), (0, 3, 1, 2)).astype(jnp.float32)


# ----------------------------------------------------------------------------
# Deterministic synthetic parameters (shapes as in the PyTorch __init__)
# ----------------------------------------------------------------------------
def init_conv_bn_lrelu(key, cin, cout, ks, stride):
    k1, k2, k3, k4, k5 = jax.random.split(key, 5)
    # Conv2d weight is stored here directly in HWIO order and flattened to the
    # (ks*ks*Cin, Cout) GEMM matrix matching the im2col (dy, dx, cin) order.
    # NOTE: real PyTorch OIHW weights would need a transpose to HWIO first.
    w = jax.random.normal(k1, (ks, ks, cin, cout), jnp.float32) * 0.1
    gamma = jax.random.uniform(k2, (cout,), jnp.float32, 0.5, 1.5)
    beta = jax.random.normal(k3, (cout,), jnp.float32) * 0.1
    rmean = jax.random.normal(k4, (cout,), jnp.float32) * 0.1
    rvar = jax.random.uniform(k5, (cout,), jnp.float32, 0.5, 1.5)
    # BatchNorm (inference mode) folded to a per-channel affine; the scale is
    # further folded into the weight columns (host-side), leaving only a bias.
    scale = gamma / jnp.sqrt(rvar + BN_EPS)
    bias = beta - rmean * scale
    K = ks * ks * cin
    wmat = w.reshape(K, cout) * scale[None, :]
    # Zero-pad K and Cout to multiples of 128 (lane-dense GEMM); padded rows /
    # columns / bias entries are zero so the math (and the zero padded output
    # channels) is unchanged.
    Kp = _round_up(K, 128)
    Cp = _round_up(cout, 128)
    wpad = jnp.zeros((Kp, Cp), jnp.float32).at[:K, :cout].set(wmat)
    bpad = jnp.zeros((1, Cp), jnp.float32).at[0, :cout].set(bias)
    return {"ks": ks, "stride": stride, "K": K, "cout": cout,
            "w": wpad.astype(jnp.bfloat16), "b": bpad}


def build_darknet_params(key, depth=21, ch_in=3, nf=8):
    blocks = DEPTH2BLOCKS[depth]
    key, sk = jax.random.split(key)
    params = {"stem": init_conv_bn_lrelu(sk, ch_in, nf, 3, 1), "stages": []}
    for nb in blocks:
        stage = {"res": []}
        key, sk = jax.random.split(key)
        # make_group_layer: conv_bn_lrelu(nf, 2*nf, ks=3, stride=2)
        stage["down"] = init_conv_bn_lrelu(sk, nf, nf * 2, 3, 2)
        for _ in range(nb):
            key, k1 = jax.random.split(key)
            key, k2 = jax.random.split(key)
            # ResLayer(2*nf): 1x1 (2nf->nf) then 3x3 (nf->2nf)
            stage["res"].append(
                (init_conv_bn_lrelu(k1, nf * 2, nf, 1, 1),
                 init_conv_bn_lrelu(k2, nf, nf * 2, 3, 1)))
        nf *= 2
        params["stages"].append(stage)
    return params


# ----------------------------------------------------------------------------
# Darknet forward (num_classes=None path; out_features default = last stage)
# ----------------------------------------------------------------------------
# TODO(synk): the optional num_classes head (AdaptiveAvgPool2d+Flatten+Linear)
# is not implemented (default num_classes=None in the reference module).
def darknet_forward(x_nchw, params, out_features=None):
    nstages = len(params["stages"])
    if out_features is None:
        out_features = ["dark" + str(nstages)]
    x_sp = jnp.transpose(x_nchw, (0, 2, 3, 1)).astype(jnp.bfloat16)  # NCHW->NHWC
    g, meta = conv_spatial_apply(x_sp, params["stem"])
    outputs = {}
    if "stem" in out_features:
        outputs["stem"] = _gemm_to_nchw_f32(g, meta)
    for i, stage in enumerate(params["stages"]):
        g, meta = conv_spatial_apply(_gemm_to_nhwc(g, meta), stage["down"])
        for (p1, p2) in stage["res"]:
            y = conv_1x1_apply(g, p1)                       # layer1 (1x1)
            y_meta = (meta[0], meta[1], meta[2], p1["cout"])
            g, meta = conv_spatial_apply(_gemm_to_nhwc(y, y_meta), p2,
                                         residual_gemm=g)   # x + layer2(...)
        name = "dark" + str(i + 1)
        if name in out_features:
            outputs[name] = _gemm_to_nchw_f32(g, meta)       # back to NCHW f32
    return outputs


if __name__ == "__main__":
    key = jax.random.PRNGKey(0)
    pkey, xkey = jax.random.split(key)
    # Darknet(depth=21, ch_in=3, nf=8) at a small spatial size.
    params = build_darknet_params(pkey, depth=21, ch_in=3, nf=8)
    x = jax.random.normal(xkey, (2, 3, 32, 32), jnp.float32)

    fwd = jax.jit(lambda inp: darknet_forward(inp, params,
                                              out_features=("dark5",)))
    outs = fwd(x)
    jax.block_until_ready(outs)
    assert set(outs.keys()) == {"dark5"}
    assert outs["dark5"].shape == (2, 256, 1, 1)  # nf * 2**5 channels, /32 stride
    assert bool(jnp.all(jnp.isfinite(outs["dark5"])))
    print("KERNEL_OK")
</pallas_src>

<mosaic_0001>
module attributes {stable_mosaic.version = 11 : i64} {
  func.func @kernel(%arg0: i32, %arg1: i32, %arg2: i32, %arg3: memref<1024x128xbf16, #tpu.memory_space<vmem>>, %arg4: memref<128x128xbf16, #tpu.memory_space<vmem>>, %arg5: memref<1x128xf32, #tpu.memory_space<vmem>>, %arg6: memref<1024x128xbf16, #tpu.memory_space<vmem>>, %arg7: memref<1024x128xf32, #tpu.memory_space<vmem>>) attributes {dimension_semantics = [#tpu.dimension_semantics<parallel>, #tpu.dimension_semantics<parallel>, #tpu.dimension_semantics<arbitrary>], iteration_bounds = array<i64: 2, 1, 1>, scalar_prefetch = 0 : i64, scratch_operands = 1 : i64, tpu.core_type = #tpu.core_type<tc>, window_params = [{transform_indices = @transform_0, window_bounds = array<i64: 1024, 128>}, {transform_indices = @transform_1, window_bounds = array<i64: 128, 128>}, {transform_indices = @transform_2, window_bounds = array<i64: 1, 128>}, {transform_indices = @transform_3, window_bounds = array<i64: 1024, 128>}]} {
    %c0_i32 = arith.constant 0 : i32
    %0 = arith.cmpi eq, %arg2, %c0_i32 : i32
    %1 = arith.extui %0 : i1 to i32
    %c0_i32_0 = arith.constant 0 : i32
    %2 = arith.cmpi ne, %1, %c0_i32_0 : i32
    scf.if %2 {
      %cst_10 = arith.constant 0.000000e+00 : f32
      %12 = vector.broadcast %cst_10 : f32 to vector<1024x128xf32>
      %c0_11 = arith.constant 0 : index
      %c0_12 = arith.constant 0 : index
      %13 = vector.load %arg7[%c0_11, %c0_12] : memref<1024x128xf32, #tpu.memory_space<vmem>>, vector<1024x128xf32>
      tpu.vector_store %arg7[%c0_11, %c0_12], %12 {strides = array<i32>} : memref<1024x128xf32, #tpu.memory_space<vmem>>, vector<1024x128xf32>,
    } else {
    }
    %c0 = arith.constant 0 : index
    %c0_1 = arith.constant 0 : index
    %3 = vector.load %arg7[%c0, %c0_1] : memref<1024x128xf32, #tpu.memory_space<vmem>>, vector<1024x128xf32>
    %c0_2 = arith.constant 0 : index
    %c0_3 = arith.constant 0 : index
    %4 = vector.load %arg3[%c0_2, %c0_3] : memref<1024x128xbf16, #tpu.memory_space<vmem>>, vector<1024x128xbf16>
    %c0_4 = arith.constant 0 : index
    %c0_5 = arith.constant 0 : index
    %5 = vector.load %arg4[%c0_4, %c0_5] : memref<128x128xbf16, #tpu.memory_space<vmem>>, vector<128x128xbf16>
    %cst = arith.constant dense<0.000000e+00> : vector<1024x128xf32>
    %6 = tpu.matmul %4, %5, %cst {dimension_numbers = #tpu.dot_dimension_numbers<[1], [0], [0], [1], [0, 0, 1, 1], [], []>} : vector<1024x128xbf16>, vector<128x128xbf16>, vector<1024x128xf32> -> vector<1024x128xf32>
    %7 = arith.addf %3, %6 : vector<1024x128xf32>
    %c0_6 = arith.constant 0 : index
    %c0_7 = arith.constant 0 : index
    %8 = vector.load %arg7[%c0_6, %c0_7] : memref<1024x128xf32, #tpu.memory_space<vmem>>, vector<1024x128xf32>
    tpu.vector_store %arg7[%c0_6, %c0_7], %7 {strides = array<i32>} : memref<1024x128xf32, #tpu.memory_space<vmem>>, vector<1024x128xf32>,
    %c0_i32_8 = arith.constant 0 : i32
    %9 = arith.cmpi eq, %arg2, %c0_i32_8 : i32
    %10 = arith.extui %9 : i1 to i32
    %c0_i32_9 = arith.constant 0 : i32
    %11 = arith.cmpi ne, %10, %c0_i32_9 : i32
    scf.if %11 {
      %c0_10 = arith.constant 0 : index
      %c0_11 = arith.constant 0 : index
      %12 = vector.load %arg7[%c0_10, %c0_11] : memref<1024x128xf32, #tpu.memory_space<vmem>>, vector<1024x128xf32>
      %c0_12 = arith.constant 0 : index
      %c0_13 = arith.constant 0 : index
      %13 = vector.load %arg5[%c0_12, %c0_13] : memref<1x128xf32, #tpu.memory_space<vmem>>, vector<1x128xf32>
      %14 = vector.broadcast %13 : vector<1x128xf32> to vector<1024x128xf32>
      %15 = arith.addf %12, %14 : vector<1024x128xf32>
      %cst_14 = arith.constant 1.000000e-01 : f32
      %16 = vector.broadcast %cst_14 : f32 to vector<1024x128xf32>
      %17 = arith.mulf %16, %15 : vector<1024x128xf32>
      %18 = arith.maximumf %15, %17 : vector<1024x128xf32>
      %19 = arith.truncf %18 : vector<1024x128xf32> to vector<1024x128xbf16>
      %c0_15 = arith.constant 0 : index
      %c0_16 = arith.constant 0 : index
      %20 = vector.load %arg6[%c0_15, %c0_16] : memref<1024x128xbf16, #tpu.memory_space<vmem>>, vector<1024x128xbf16>
      tpu.vector_store %arg6[%c0_15, %c0_16], %19 {strides = array<i32>} : memref<1024x128xbf16, #tpu.memory_space<vmem>>, vector<1024x128xbf16>,
    } else {
    }
    return
  }
  func.func @transform_0(%arg0: i32, %arg1: i32, %arg2: i32) -> (i32, i32) {
    %c0_i32 = arith.constant 0 : i32
    return %arg0, %arg2 : i32, i32
  }
  func.func @transform_1(%arg0: i32, %arg1: i32, %arg2: i32) -> (i32, i32) {
    %c0_i32 = arith.constant 0 : i32
    return %arg2, %arg1 : i32, i32
  }
  func.func @transform_2(%arg0: i32, %arg1: i32, %arg2: i32) -> (i32, i32) {
    %c0_i32 = arith.constant 0 : i32
    %c0_i32_0 = arith.constant 0 : i32
    return %c0_i32, %arg1 : i32, i32
  }
  func.func @transform_3(%arg0: i32, %arg1: i32, %arg2: i32) -> (i32, i32) {
    %c0_i32 = arith.constant 0 : i32
    return %arg0, %arg1 : i32, i32
  }
}

module attributes {stable_mosaic.version = 11 : i64} {
  func.func @kernel(%arg0: i32, %arg1: i32, %arg2: i32, %arg3: memref<512x128xbf16, #tpu.memory_space<vmem>>, %arg4: memref<128x128xbf16, #tpu.memory_space<vmem>>, %arg5: memref<1x128xf32, #tpu.memory_space<vmem>>, %arg6: memref<512x128xbf16, #tpu.memory_space<vmem>>, %arg7: memref<512x128xf32, #tpu.memory_space<vmem>>) attributes {dimension_semantics = [#tpu.dimension_semantics<parallel>, #tpu.dimension_semantics<parallel>, #tpu.dimension_semantics<arbitrary>], iteration_bounds = array<i64: 1, 1, 1>, scalar_prefetch = 0 : i64, scratch_operands = 1 : i64, tpu.core_type = #tpu.core_type<tc>, window_params = [{transform_indices = @transform_0, window_bounds = array<i64: 512, 128>}, {transform_indices = @transform_1, window_bounds = array<i64: 128, 128>}, {transform_indices = @transform_2, window_bounds = array<i64: 1, 128>}, {transform_indices = @transform_3, window_bounds = array<i64: 512, 128>}]} {
    %c0_i32 = arith.constant 0 : i32
    %0 = arith.cmpi eq, %arg2, %c0_i32 : i32
    %1 = arith.extui %0 : i1 to i32
    %c0_i32_0 = arith.constant 0 : i32
    %2 = arith.cmpi ne, %1, %c0_i32_0 : i32
    scf.if %2 {
      %cst_10 = arith.constant 0.000000e+00 : f32
      %12 = vector.broadcast %cst_10 : f32 to vector<512x128xf32>
      %c0_11 = arith.constant 0 : index
      %c0_12 = arith.constant 0 : index
      %13 = vector.load %arg7[%c0_11, %c0_12] : memref<512x128xf32, #tpu.memory_space<vmem>>, vector<512x128xf32>
      tpu.vector_store %arg7[%c0_11, %c0_12], %12 {strides = array<i32>} : memref<512x128xf32, #tpu.memory_space<vmem>>, vector<512x128xf32>,
    } else {
    }
    %c0 = arith.constant 0 : index
    %c0_1 = arith.constant 0 : index
    %3 = vector.load %arg7[%c0, %c0_1] : memref<512x128xf32, #tpu.memory_space<vmem>>, vector<512x128xf32>
    %c0_2 = arith.constant 0 : index
    %c0_3 = arith.constant 0 : index
    %4 = vector.load %arg3[%c0_2, %c0_3] : memref<512x128xbf16, #tpu.memory_space<vmem>>, vector<512x128xbf16>
    %c0_4 = arith.constant 0 : index
    %c0_5 = arith.constant 0 : index
    %5 = vector.load %arg4[%c0_4, %c0_5] : memref<128x128xbf16, #tpu.memory_space<vmem>>, vector<128x128xbf16>
    %cst = arith.constant dense<0.000000e+00> : vector<512x128xf32>
    %6 = tpu.matmul %4, %5, %cst {dimension_numbers = #tpu.dot_dimension_numbers<[1], [0], [0], [1], [0, 0, 1, 1], [], []>} : vector<512x128xbf16>, vector<128x128xbf16>, vector<512x128xf32> -> vector<512x128xf32>
    %7 = arith.addf %3, %6 : vector<512x128xf32>
    %c0_6 = arith.constant 0 : index
    %c0_7 = arith.constant 0 : index
    %8 = vector.load %arg7[%c0_6, %c0_7] : memref<512x128xf32, #tpu.memory_space<vmem>>, vector<512x128xf32>
    tpu.vector_store %arg7[%c0_6, %c0_7], %7 {strides = array<i32>} : memref<512x128xf32, #tpu.memory_space<vmem>>, vector<512x128xf32>,
    %c0_i32_8 = arith.constant 0 : i32
    %9 = arith.cmpi eq, %arg2, %c0_i32_8 : i32
    %10 = arith.extui %9 : i1 to i32
    %c0_i32_9 = arith.constant 0 : i32
    %11 = arith.cmpi ne, %10, %c0_i32_9 : i32
    scf.if %11 {
      %c0_10 = arith.constant 0 : index
      %c0_11 = arith.constant 0 : index
      %12 = vector.load %arg7[%c0_10, %c0_11] : memref<512x128xf32, #tpu.memory_space<vmem>>, vector<512x128xf32>
      %c0_12 = arith.constant 0 : index
      %c0_13 = arith.constant 0 : index
      %13 = vector.load %arg5[%c0_12, %c0_13] : memref<1x128xf32, #tpu.memory_space<vmem>>, vector<1x128xf32>
      %14 = vector.broadcast %13 : vector<1x128xf32> to vector<512x128xf32>
      %15 = arith.addf %12, %14 : vector<512x128xf32>
      %cst_14 = arith.constant 1.000000e-01 : f32
      %16 = vector.broadcast %cst_14 : f32 to vector<512x128xf32>
      %17 = arith.mulf %16, %15 : vector<512x128xf32>
      %18 = arith.maximumf %15, %17 : vector<512x128xf32>
      %19 = arith.truncf %18 : vector<512x128xf32> to vector<512x128xbf16>
      %c0_15 = arith.constant 0 : index
      %c0_16 = arith.constant 0 : index
      %20 = vector.load %arg6[%c0_15, %c0_16] : memref<512x128xbf16, #tpu.memory_space<vmem>>, vector<512x128xbf16>
      tpu.vector_store %arg6[%c0_15, %c0_16], %19 {strides = array<i32>} : memref<512x128xbf16, #tpu.memory_space<vmem>>, vector<512x128xbf16>,
    } else {
    }
    return
  }
  func.func @transform_0(%arg0: i32, %arg1: i32, %arg2: i32) -> (i32, i32) {
    %c0_i32 = arith.constant 0 : i32
    return %arg0, %arg2 : i32, i32
  }
  func.func @transform_1(%arg0: i32, %arg1: i32, %arg2: i32) -> (i32, i32) {
    %c0_i32 = arith.constant 0 : i32
    return %arg2, %arg1 : i32, i32
  }
  func.func @transform_2(%arg0: i32, %arg1: i32, %arg2: i32) -> (i32, i32) {
    %c0_i32 = arith.constant 0 : i32
    %c0_i32_0 = arith.constant 0 : i32
    return %c0_i32, %arg1 : i32, i32
  }
  func.func @transform_3(%arg0: i32, %arg1: i32, %arg2: i32) -> (i32, i32) {
    %c0_i32 = arith.constant 0 : i32
    return %arg0, %arg1 : i32, i32
  }
}

module attributes {stable_mosaic.version = 11 : i64} {
  func.func @kernel(%arg0: i32, %arg1: i32, %arg2: i32, %arg3: memref<512x128xbf16, #tpu.memory_space<vmem>>, %arg4: memref<128x128xbf16, #tpu.memory_space<vmem>>, %arg5: memref<1x128xf32, #tpu.memory_space<vmem>>, %arg6: memref<512x128xbf16, #tpu.memory_space<vmem>>, %arg7: memref<512x128xbf16, #tpu.memory_space<vmem>>, %arg8: memref<512x128xf32, #tpu.memory_space<vmem>>) attributes {dimension_semantics = [#tpu.dimension_semantics<parallel>, #tpu.dimension_semantics<parallel>, #tpu.dimension_semantics<arbitrary>], iteration_bounds = array<i64: 1, 1, 1>, scalar_prefetch = 0 : i64, scratch_operands = 1 : i64, tpu.core_type = #tpu.core_type<tc>, window_params = [{transform_indices = @transform_0, window_bounds = array<i64: 512, 128>}, {transform_indices = @transform_1, window_bounds = array<i64: 128, 128>}, {transform_indices = @transform_2, window_bounds = array<i64: 1, 128>}, {transform_indices = @transform_3, window_bounds = array<i64: 512, 128>}, {transform_indices = @transform_4, window_bounds = array<i64: 512, 128>}]} {
    %c0_i32 = arith.constant 0 : i32
    %0 = arith.cmpi eq, %arg2, %c0_i32 : i32
    %1 = arith.extui %0 : i1 to i32
    %c0_i32_0 = arith.constant 0 : i32
    %2 = arith.cmpi ne, %1, %c0_i32_0 : i32
    scf.if %2 {
      %cst_10 = arith.constant 0.000000e+00 : f32
      %12 = vector.broadcast %cst_10 : f32 to vector<512x128xf32>
      %c0_11 = arith.constant 0 : index
      %c0_12 = arith.constant 0 : index
      %13 = vector.load %arg8[%c0_11, %c0_12] : memref<512x128xf32, #tpu.memory_space<vmem>>, vector<512x128xf32>
      tpu.vector_store %arg8[%c0_11, %c0_12], %12 {strides = array<i32>} : memref<512x128xf32, #tpu.memory_space<vmem>>, vector<512x128xf32>,
    } else {
    }
    %c0 = arith.constant 0 : index
    %c0_1 = arith.constant 0 : index
    %3 = vector.load %arg8[%c0, %c0_1] : memref<512x128xf32, #tpu.memory_space<vmem>>, vector<512x128xf32>
    %c0_2 = arith.constant 0 : index
    %c0_3 = arith.constant 0 : index
    %4 = vector.load %arg3[%c0_2, %c0_3] : memref<512x128xbf16, #tpu.memory_space<vmem>>, vector<512x128xbf16>
    %c0_4 = arith.constant 0 : index
    %c0_5 = arith.constant 0 : index
    %5 = vector.load %arg4[%c0_4, %c0_5] : memref<128x128xbf16, #tpu.memory_space<vmem>>, vector<128x128xbf16>
    %cst = arith.constant dense<0.000000e+00> : vector<512x128xf32>
    %6 = tpu.matmul %4, %5, %cst {dimension_numbers = #tpu.dot_dimension_numbers<[1], [0], [0], [1], [0, 0, 1, 1], [], []>} : vector<512x128xbf16>, vector<128x128xbf16>, vector<512x128xf32> -> vector<512x128xf32>
    %7 = arith.addf %3, %6 : vector<512x128xf32>
    %c0_6 = arith.constant 0 : index
    %c0_7 = arith.constant 0 : index
    %8 = vector.load %arg8[%c0_6, %c0_7] : memref<512x128xf32, #tpu.memory_space<vmem>>, vector<512x128xf32>
    tpu.vector_store %arg8[%c0_6, %c0_7], %7 {strides = array<i32>} : memref<512x128xf32, #tpu.memory_space<vmem>>, vector<512x128xf32>,
    %c0_i32_8 = arith.constant 0 : i32
    %9 = arith.cmpi eq, %arg2, %c0_i32_8 : i32
    %10 = arith.extui %9 : i1 to i32
    %c0_i32_9 = arith.constant 0 : i32
    %11 = arith.cmpi ne, %10, %c0_i32_9 : i32
    scf.if %11 {
      %c0_10 = arith.constant 0 : index
      %c0_11 = arith.constant 0 : index
      %12 = vector.load %arg8[%c0_10, %c0_11] : memref<512x128xf32, #tpu.memory_space<vmem>>, vector<512x128xf32>
      %c0_12 = arith.constant 0 : index
      %c0_13 = arith.constant 0 : index
      %13 = vector.load %arg5[%c0_12, %c0_13] : memref<1x128xf32, #tpu.memory_space<vmem>>, vector<1x128xf32>
      %14 = vector.broadcast %13 : vector<1x128xf32> to vector<512x128xf32>
      %15 = arith.addf %12, %14 : vector<512x128xf32>
      %cst_14 = arith.constant 1.000000e-01 : f32
      %16 = vector.broadcast %cst_14 : f32 to vector<512x128xf32>
      %17 = arith.mulf %16, %15 : vector<512x128xf32>
      %18 = arith.maximumf %15, %17 : vector<512x128xf32>
      %c0_15 = arith.constant 0 : index
      %c0_16 = arith.constant 0 : index
      %19 = vector.load %arg6[%c0_15, %c0_16] : memref<512x128xbf16, #tpu.memory_space<vmem>>, vector<512x128xbf16>
      %20 = arith.extf %19 : vector<512x128xbf16> to vector<512x128xf32>
      %21 = arith.addf %18, %20 : vector<512x128xf32>
      %22 = arith.truncf %21 : vector<512x128xf32> to vector<512x128xbf16>
      %c0_17 = arith.constant 0 : index
      %c0_18 = arith.constant 0 : index
      %23 = vector.load %arg7[%c0_17, %c0_18] : memref<512x128xbf16, #tpu.memory_space<vmem>>, vector<512x128xbf16>
      tpu.vector_store %arg7[%c0_17, %c0_18], %22 {strides = array<i32>} : memref<512x128xbf16, #tpu.memory_space<vmem>>, vector<512x128xbf16>,
    } else {
    }
    return
  }
  func.func @transform_0(%arg0: i32, %arg1: i32, %arg2: i32) -> (i32, i32) {
    %c0_i32 = arith.constant 0 : i32
    return %arg0, %arg2 : i32, i32
  }
  func.func @transform_1(%arg0: i32, %arg1: i32, %arg2: i32) -> (i32, i32) {
    %c0_i32 = arith.constant 0 : i32
    return %arg2, %arg1 : i32, i32
  }
  func.func @transform_2(%arg0: i32, %arg1: i32, %arg2: i32) -> (i32, i32) {
    %c0_i32 = arith.constant 0 : i32
    %c0_i32_0 = arith.constant 0 : i32
    return %c0_i32, %arg1 : i32, i32
  }
  func.func @transform_3(%arg0: i32, %arg1: i32, %arg2: i32) -> (i32, i32) {
    %c0_i32 = arith.constant 0 : i32
    return %arg0, %arg1 : i32, i32
  }
  func.func @transform_4(%arg0: i32, %arg1: i32, %arg2: i32) -> (i32, i32) {
    %c0_i32 = arith.constant 0 : i32
    return %arg0, %arg1 : i32, i32
  }
}

module attributes {stable_mosaic.version = 11 : i64} {
  func.func @kernel(%arg0: i32, %arg1: i32, %arg2: i32, %arg3: memref<128x128xbf16, #tpu.memory_space<vmem>>, %arg4: memref<128x128xbf16, #tpu.memory_space<vmem>>, %arg5: memref<1x128xf32, #tpu.memory_space<vmem>>, %arg6: memref<128x128xbf16, #tpu.memory_space<vmem>>, %arg7: memref<128x128xf32, #tpu.memory_space<vmem>>) attributes {dimension_semantics = [#tpu.dimension_semantics<parallel>, #tpu.dimension_semantics<parallel>, #tpu.dimension_semantics<arbitrary>], iteration_bounds = array<i64: 1, 1, 1>, scalar_prefetch = 0 : i64, scratch_operands = 1 : i64, tpu.core_type = #tpu.core_type<tc>, window_params = [{transform_indices = @transform_0, window_bounds = array<i64: 128, 128>}, {transform_indices = @transform_1, window_bounds = array<i64: 128, 128>}, {transform_indices = @transform_2, window_bounds = array<i64: 1, 128>}, {transform_indices = @transform_3, window_bounds = array<i64: 128, 128>}]} {
    %c0_i32 = arith.constant 0 : i32
    %0 = arith.cmpi eq, %arg2, %c0_i32 : i32
    %1 = arith.extui %0 : i1 to i32
    %c0_i32_0 = arith.constant 0 : i32
    %2 = arith.cmpi ne, %1, %c0_i32_0 : i32
    scf.if %2 {
      %cst_10 = arith.constant 0.000000e+00 : f32
      %12 = vector.broadcast %cst_10 : f32 to vector<128x128xf32>
      %c0_11 = arith.constant 0 : index
      %c0_12 = arith.constant 0 : index
      %13 = vector.load %arg7[%c0_11, %c0_12] : memref<128x128xf32, #tpu.memory_space<vmem>>, vector<128x128xf32>
      tpu.vector_store %arg7[%c0_11, %c0_12], %12 {strides = array<i32>} : memref<128x128xf32, #tpu.memory_space<vmem>>, vector<128x128xf32>,
    } else {
    }
    %c0 = arith.constant 0 : index
    %c0_1 = arith.constant 0 : index
    %3 = vector.load %arg7[%c0, %c0_1] : memref<128x128xf32, #tpu.memory_space<vmem>>, vector<128x128xf32>
    %c0_2 = arith.constant 0 : index
    %c0_3 = arith.constant 0 : index
    %4 = vector.load %arg3[%c0_2, %c0_3] : memref<128x128xbf16, #tpu.memory_space<vmem>>, vector<128x128xbf16>
    %c0_4 = arith.constant 0 : index
    %c0_5 = arith.constant 0 : index
    %5 = vector.load %arg4[%c0_4, %c0_5] : memref<128x128xbf16, #tpu.memory_space<vmem>>, vector<128x128xbf16>
    %cst = arith.constant dense<0.000000e+00> : vector<128x128xf32>
    %6 = tpu.matmul %4, %5, %cst {dimension_numbers = #tpu.dot_dimension_numbers<[1], [0], [0], [1], [0, 0, 1, 1], [], []>} : vector<128x128xbf16>, vector<128x128xbf16>, vector<128x128xf32> -> vector<128x128xf32>
    %7 = arith.addf %3, %6 : vector<128x128xf32>
    %c0_6 = arith.constant 0 : index
    %c0_7 = arith.constant 0 : index
    %8 = vector.load %arg7[%c0_6, %c0_7] : memref<128x128xf32, #tpu.memory_space<vmem>>, vector<128x128xf32>
    tpu.vector_store %arg7[%c0_6, %c0_7], %7 {strides = array<i32>} : memref<128x128xf32, #tpu.memory_space<vmem>>, vector<128x128xf32>,
    %c0_i32_8 = arith.constant 0 : i32
    %9 = arith.cmpi eq, %arg2, %c0_i32_8 : i32
    %10 = arith.extui %9 : i1 to i32
    %c0_i32_9 = arith.constant 0 : i32
    %11 = arith.cmpi ne, %10, %c0_i32_9 : i32
    scf.if %11 {
      %c0_10 = arith.constant 0 : index
      %c0_11 = arith.constant 0 : index
      %12 = vector.load %arg7[%c0_10, %c0_11] : memref<128x128xf32, #tpu.memory_space<vmem>>, vector<128x128xf32>
      %c0_12 = arith.constant 0 : index
      %c0_13 = arith.constant 0 : index
      %13 = vector.load %arg5[%c0_12, %c0_13] : memref<1x128xf32, #tpu.memory_space<vmem>>, vector<1x128xf32>
      %14 = vector.broadcast %13 : vector<1x128xf32> to vector<128x128xf32>
      %15 = arith.addf %12, %14 : vector<128x128xf32>
      %cst_14 = arith.constant 1.000000e-01 : f32
      %16 = vector.broadcast %cst_14 : f32 to vector<128x128xf32>
      %17 = arith.mulf %16, %15 : vector<128x128xf32>
      %18 = arith.maximumf %15, %17 : vector<128x128xf32>
      %19 = arith.truncf %18 : vector<128x128xf32> to vector<128x128xbf16>
      %c0_15 = arith.constant 0 : index
      %c0_16 = arith.constant 0 : index
      %20 = vector.load %arg6[%c0_15, %c0_16] : memref<128x128xbf16, #tpu.memory_space<vmem>>, vector<128x128xbf16>
      tpu.vector_store %arg6[%c0_15, %c0_16], %19 {strides = array<i32>} : memref<128x128xbf16, #tpu.memory_space<vmem>>, vector<128x128xbf16>,
    } else {
    }
    return
  }
  func.func @transform_0(%arg0: i32, %arg1: i32, %arg2: i32) -> (i32, i32) {
    %c0_i32 = arith.constant 0 : i32
    return %arg0, %arg2 : i32, i32
  }
  func.func @transform_1(%arg0: i32, %arg1: i32, %arg2: i32) -> (i32, i32) {
    %c0_i32 = arith.constant 0 : i32
    return %arg2, %arg1 : i32, i32
  }
  func.func @transform_2(%arg0: i32, %arg1: i32, %arg2: i32) -> (i32, i32) {
    %c0_i32 = arith.constant 0 : i32
    %c0_i32_0 = arith.constant 0 : i32
    return %c0_i32, %arg1 : i32, i32
  }
  func.func @transform_3(%arg0: i32, %arg1: i32, %arg2: i32) -> (i32, i32) {
    %c0_i32 = arith.constant 0 : i32
    return %arg0, %arg1 : i32, i32
  }
}

module attributes {stable_mosaic.version = 11 : i64} {
  func.func @kernel(%arg0: i32, %arg1: i32, %arg2: i32, %arg3: memref<128x256xbf16, #tpu.memory_space<vmem>>, %arg4: memref<256x128xbf16, #tpu.memory_space<vmem>>, %arg5: memref<1x128xf32, #tpu.memory_space<vmem>>, %arg6: memref<128x128xbf16, #tpu.memory_space<vmem>>, %arg7: memref<128x128xf32, #tpu.memory_space<vmem>>) attributes {dimension_semantics = [#tpu.dimension_semantics<parallel>, #tpu.dimension_semantics<parallel>, #tpu.dimension_semantics<arbitrary>], iteration_bounds = array<i64: 1, 1, 1>, scalar_prefetch = 0 : i64, scratch_operands = 1 : i64, tpu.core_type = #tpu.core_type<tc>, window_params = [{transform_indices = @transform_0, window_bounds = array<i64: 128, 256>}, {transform_indices = @transform_1, window_bounds = array<i64: 256, 128>}, {transform_indices = @transform_2, window_bounds = array<i64: 1, 128>}, {transform_indices = @transform_3, window_bounds = array<i64: 128, 128>}]} {
    %c0_i32 = arith.constant 0 : i32
    %0 = arith.cmpi eq, %arg2, %c0_i32 : i32
    %1 = arith.extui %0 : i1 to i32
    %c0_i32_0 = arith.constant 0 : i32
    %2 = arith.cmpi ne, %1, %c0_i32_0 : i32
    scf.if %2 {
      %cst_10 = arith.constant 0.000000e+00 : f32
      %12 = vector.broadcast %cst_10 : f32 to vector<128x128xf32>
      %c0_11 = arith.constant 0 : index
      %c0_12 = arith.constant 0 : index
      %13 = vector.load %arg7[%c0_11, %c0_12] : memref<128x128xf32, #tpu.memory_space<vmem>>, vector<128x128xf32>
      tpu.vector_store %arg7[%c0_11, %c0_12], %12 {strides = array<i32>} : memref<128x128xf32, #tpu.memory_space<vmem>>, vector<128x128xf32>,
    } else {
    }
    %c0 = arith.constant 0 : index
    %c0_1 = arith.constant 0 : index
    %3 = vector.load %arg7[%c0, %c0_1] : memref<128x128xf32, #tpu.memory_space<vmem>>, vector<128x128xf32>
    %c0_2 = arith.constant 0 : index
    %c0_3 = arith.constant 0 : index
    %4 = vector.load %arg3[%c0_2, %c0_3] : memref<128x256xbf16, #tpu.memory_space<vmem>>, vector<128x256xbf16>
    %c0_4 = arith.constant 0 : index
    %c0_5 = arith.constant 0 : index
    %5 = vector.load %arg4[%c0_4, %c0_5] : memref<256x128xbf16, #tpu.memory_space<vmem>>, vector<256x128xbf16>
    %cst = arith.constant dense<0.000000e+00> : vector<128x128xf32>
    %6 = tpu.matmul %4, %5, %cst {dimension_numbers = #tpu.dot_dimension_numbers<[1], [0], [0], [1], [0, 0, 1, 1], [], []>} : vector<128x256xbf16>, vector<256x128xbf16>, vector<128x128xf32> -> vector<128x128xf32>
    %7 = arith.addf %3, %6 : vector<128x128xf32>
    %c0_6 = arith.constant 0 : index
    %c0_7 = arith.constant 0 : index
    %8 = vector.load %arg7[%c0_6, %c0_7] : memref<128x128xf32, #tpu.memory_space<vmem>>, vector<128x128xf32>
    tpu.vector_store %arg7[%c0_6, %c0_7], %7 {strides = array<i32>} : memref<128x128xf32, #tpu.memory_space<vmem>>, vector<128x128xf32>,
    %c0_i32_8 = arith.constant 0 : i32
    %9 = arith.cmpi eq, %arg2, %c0_i32_8 : i32
    %10 = arith.extui %9 : i1 to i32
    %c0_i32_9 = arith.constant 0 : i32
    %11 = arith.cmpi ne, %10, %c0_i32_9 : i32
    scf.if %11 {
      %c0_10 = arith.constant 0 : index
      %c0_11 = arith.constant 0 : index
      %12 = vector.load %arg7[%c0_10, %c0_11] : memref<128x128xf32, #tpu.memory_space<vmem>>, vector<128x128xf32>
      %c0_12 = arith.constant 0 : index
      %c0_13 = arith.constant 0 : index
      %13 = vector.load %arg5[%c0_12, %c0_13] : memref<1x128xf32, #tpu.memory_space<vmem>>, vector<1x128xf32>
      %14 = vector.broadcast %13 : vector<1x128xf32> to vector<128x128xf32>
      %15 = arith.addf %12, %14 : vector<128x128xf32>
      %cst_14 = arith.constant 1.000000e-01 : f32
      %16 = vector.broadcast %cst_14 : f32 to vector<128x128xf32>
      %17 = arith.mulf %16, %15 : vector<128x128xf32>
      %18 = arith.maximumf %15, %17 : vector<128x128xf32>
      %19 = arith.truncf %18 : vector<128x128xf32> to vector<128x128xbf16>
      %c0_15 = arith.constant 0 : index
      %c0_16 = arith.constant 0 : index
      %20 = vector.load %arg6[%c0_15, %c0_16] : memref<128x128xbf16, #tpu.memory_space<vmem>>, vector<128x128xbf16>
      tpu.vector_store %arg6[%c0_15, %c0_16], %19 {strides = array<i32>} : memref<128x128xbf16, #tpu.memory_space<vmem>>, vector<128x128xbf16>,
    } else {
    }
    return
  }
  func.func @transform_0(%arg0: i32, %arg1: i32, %arg2: i32) -> (i32, i32) {
    %c0_i32 = arith.constant 0 : i32
    return %arg0, %arg2 : i32, i32
  }
  func.func @transform_1(%arg0: i32, %arg1: i32, %arg2: i32) -> (i32, i32) {
    %c0_i32 = arith.constant 0 : i32
    return %arg2, %arg1 : i32, i32
  }
  func.func @transform_2(%arg0: i32, %arg1: i32, %arg2: i32) -> (i32, i32) {
    %c0_i32 = arith.constant 0 : i32
    %c0_i32_0 = arith.constant 0 : i32
    return %c0_i32, %arg1 : i32, i32
  }
  func.func @transform_3(%arg0: i32, %arg1: i32, %arg2: i32) -> (i32, i32) {
    %c0_i32 = arith.constant 0 : i32
    return %arg0, %arg1 : i32, i32
  }
}

module attributes {stable_mosaic.version = 11 : i64} {
  func.func @kernel(%arg0: i32, %arg1: i32, %arg2: i32, %arg3: memref<128x256xbf16, #tpu.memory_space<vmem>>, %arg4: memref<256x128xbf16, #tpu.memory_space<vmem>>, %arg5: memref<1x128xf32, #tpu.memory_space<vmem>>, %arg6: memref<128x128xbf16, #tpu.memory_space<vmem>>, %arg7: memref<128x128xbf16, #tpu.memory_space<vmem>>, %arg8: memref<128x128xf32, #tpu.memory_space<vmem>>) attributes {dimension_semantics = [#tpu.dimension_semantics<parallel>, #tpu.dimension_semantics<parallel>, #tpu.dimension_semantics<arbitrary>], iteration_bounds = array<i64: 1, 1, 1>, scalar_prefetch = 0 : i64, scratch_operands = 1 : i64, tpu.core_type = #tpu.core_type<tc>, window_params = [{transform_indices = @transform_0, window_bounds = array<i64: 128, 256>}, {transform_indices = @transform_1, window_bounds = array<i64: 256, 128>}, {transform_indices = @transform_2, window_bounds = array<i64: 1, 128>}, {transform_indices = @transform_3, window_bounds = array<i64: 128, 128>}, {transform_indices = @transform_4, window_bounds = array<i64: 128, 128>}]} {
    %c0_i32 = arith.constant 0 : i32
    %0 = arith.cmpi eq, %arg2, %c0_i32 : i32
    %1 = arith.extui %0 : i1 to i32
    %c0_i32_0 = arith.constant 0 : i32
    %2 = arith.cmpi ne, %1, %c0_i32_0 : i32
    scf.if %2 {
      %cst_10 = arith.constant 0.000000e+00 : f32
      %12 = vector.broadcast %cst_10 : f32 to vector<128x128xf32>
      %c0_11 = arith.constant 0 : index
      %c0_12 = arith.constant 0 : index
      %13 = vector.load %arg8[%c0_11, %c0_12] : memref<128x128xf32, #tpu.memory_space<vmem>>, vector<128x128xf32>
      tpu.vector_store %arg8[%c0_11, %c0_12], %12 {strides = array<i32>} : memref<128x128xf32, #tpu.memory_space<vmem>>, vector<128x128xf32>,
    } else {
    }
    %c0 = arith.constant 0 : index
    %c0_1 = arith.constant 0 : index
    %3 = vector.load %arg8[%c0, %c0_1] : memref<128x128xf32, #tpu.memory_space<vmem>>, vector<128x128xf32>
    %c0_2 = arith.constant 0 : index
    %c0_3 = arith.constant 0 : index
    %4 = vector.load %arg3[%c0_2, %c0_3] : memref<128x256xbf16, #tpu.memory_space<vmem>>, vector<128x256xbf16>
    %c0_4 = arith.constant 0 : index
    %c0_5 = arith.constant 0 : index
    %5 = vector.load %arg4[%c0_4, %c0_5] : memref<256x128xbf16, #tpu.memory_space<vmem>>, vector<256x128xbf16>
    %cst = arith.constant dense<0.000000e+00> : vector<128x128xf32>
    %6 = tpu.matmul %4, %5, %cst {dimension_numbers = #tpu.dot_dimension_numbers<[1], [0], [0], [1], [0, 0, 1, 1], [], []>} : vector<128x256xbf16>, vector<256x128xbf16>, vector<128x128xf32> -> vector<128x128xf32>
    %7 = arith.addf %3, %6 : vector<128x128xf32>
    %c0_6 = arith.constant 0 : index
    %c0_7 = arith.constant 0 : index
    %8 = vector.load %arg8[%c0_6, %c0_7] : memref<128x128xf32, #tpu.memory_space<vmem>>, vector<128x128xf32>
    tpu.vector_store %arg8[%c0_6, %c0_7], %7 {strides = array<i32>} : memref<128x128xf32, #tpu.memory_space<vmem>>, vector<128x128xf32>,
    %c0_i32_8 = arith.constant 0 : i32
    %9 = arith.cmpi eq, %arg2, %c0_i32_8 : i32
    %10 = arith.extui %9 : i1 to i32
    %c0_i32_9 = arith.constant 0 : i32
    %11 = arith.cmpi ne, %10, %c0_i32_9 : i32
    scf.if %11 {
      %c0_10 = arith.constant 0 : index
      %c0_11 = arith.constant 0 : index
      %12 = vector.load %arg8[%c0_10, %c0_11] : memref<128x128xf32, #tpu.memory_space<vmem>>, vector<128x128xf32>
      %c0_12 = arith.constant 0 : index
      %c0_13 = arith.constant 0 : index
      %13 = vector.load %arg5[%c0_12, %c0_13] : memref<1x128xf32, #tpu.memory_space<vmem>>, vector<1x128xf32>
      %14 = vector.broadcast %13 : vector<1x128xf32> to vector<128x128xf32>
      %15 = arith.addf %12, %14 : vector<128x128xf32>
      %cst_14 = arith.constant 1.000000e-01 : f32
      %16 = vector.broadcast %cst_14 : f32 to vector<128x128xf32>
      %17 = arith.mulf %16, %15 : vector<128x128xf32>
      %18 = arith.maximumf %15, %17 : vector<128x128xf32>
      %c0_15 = arith.constant 0 : index
      %c0_16 = arith.constant 0 : index
      %19 = vector.load %arg6[%c0_15, %c0_16] : memref<128x128xbf16, #tpu.memory_space<vmem>>, vector<128x128xbf16>
      %20 = arith.extf %19 : vector<128x128xbf16> to vector<128x128xf32>
      %21 = arith.addf %18, %20 : vector<128x128xf32>
      %22 = arith.truncf %21 : vector<128x128xf32> to vector<128x128xbf16>
      %c0_17 = arith.constant 0 : index
      %c0_18 = arith.constant 0 : index
      %23 = vector.load %arg7[%c0_17, %c0_18] : memref<128x128xbf16, #tpu.memory_space<vmem>>, vector<128x128xbf16>
      tpu.vector_store %arg7[%c0_17, %c0_18], %22 {strides = array<i32>} : memref<128x128xbf16, #tpu.memory_space<vmem>>, vector<128x128xbf16>,
    } else {
    }
    return
  }
  func.func @transform_0(%arg0: i32, %arg1: i32, %arg2: i32) -> (i32, i32) {
    %c0_i32 = arith.constant 0 : i32
    return %arg0, %arg2 : i32, i32
  }
  func.func @transform_1(%arg0: i32, %arg1: i32, %arg2: i32) -> (i32, i32) {
    %c0_i32 = arith.constant 0 : i32
    return %arg2, %arg1 : i32, i32
  }
  func.func @transform_2(%arg0: i32, %arg1: i32, %arg2: i32) -> (i32, i32) {
    %c0_i32 = arith.constant 0 : i32
    %c0_i32_0 = arith.constant 0 : i32
    return %c0_i32, %arg1 : i32, i32
  }
  func.func @transform_3(%arg0: i32, %arg1: i32, %arg2: i32) -> (i32, i32) {
    %c0_i32 = arith.constant 0 : i32
    return %arg0, %arg1 : i32, i32
  }
  func.func @transform_4(%arg0: i32, %arg1: i32, %arg2: i32) -> (i32, i32) {
    %c0_i32 = arith.constant 0 : i32
    return %arg0, %arg1 : i32, i32
  }
}

module attributes {stable_mosaic.version = 11 : i64} {
  func.func @kernel(%arg0: i32, %arg1: i32, %arg2: i32, %arg3: memref<32x128xbf16, #tpu.memory_space<vmem>>, %arg4: memref<128x128xbf16, #tpu.memory_space<vmem>>, %arg5: memref<1x128xf32, #tpu.memory_space<vmem>>, %arg6: memref<32x128xbf16, #tpu.memory_space<vmem>>, %arg7: memref<32x128xf32, #tpu.memory_space<vmem>>) attributes {dimension_semantics = [#tpu.dimension_semantics<parallel>, #tpu.dimension_semantics<parallel>, #tpu.dimension_semantics<arbitrary>], iteration_bounds = array<i64: 1, 1, 1>, scalar_prefetch = 0 : i64, scratch_operands = 1 : i64, tpu.core_type = #tpu.core_type<tc>, window_params = [{transform_indices = @transform_0, window_bounds = array<i64: 32, 128>}, {transform_indices = @transform_1, window_bounds = array<i64: 128, 128>}, {transform_indices = @transform_2, window_bounds = array<i64: 1, 128>}, {transform_indices = @transform_3, window_bounds = array<i64: 32, 128>}]} {
    %c0_i32 = arith.constant 0 : i32
    %0 = arith.cmpi eq, %arg2, %c0_i32 : i32
    %1 = arith.extui %0 : i1 to i32
    %c0_i32_0 = arith.constant 0 : i32
    %2 = arith.cmpi ne, %1, %c0_i32_0 : i32
    scf.if %2 {
      %cst_10 = arith.constant 0.000000e+00 : f32
      %12 = vector.broadcast %cst_10 : f32 to vector<32x128xf32>
      %c0_11 = arith.constant 0 : index
      %c0_12 = arith.constant 0 : index
      %13 = vector.load %arg7[%c0_11, %c0_12] : memref<32x128xf32, #tpu.memory_space<vmem>>, vector<32x128xf32>
      tpu.vector_store %arg7[%c0_11, %c0_12], %12 {strides = array<i32>} : memref<32x128xf32, #tpu.memory_space<vmem>>, vector<32x128xf32>,
    } else {
    }
    %c0 = arith.constant 0 : index
    %c0_1 = arith.constant 0 : index
    %3 = vector.load %arg7[%c0, %c0_1] : memref<32x128xf32, #tpu.memory_space<vmem>>, vector<32x128xf32>
    %c0_2 = arith.constant 0 : index
    %c0_3 = arith.constant 0 : index
    %4 = vector.load %arg3[%c0_2, %c0_3] : memref<32x128xbf16, #tpu.memory_space<vmem>>, vector<32x128xbf16>
    %c0_4 = arith.constant 0 : index
    %c0_5 = arith.constant 0 : index
    %5 = vector.load %arg4[%c0_4, %c0_5] : memref<128x128xbf16, #tpu.memory_space<vmem>>, vector<128x128xbf16>
    %cst = arith.constant dense<0.000000e+00> : vector<32x128xf32>
    %6 = tpu.matmul %4, %5, %cst {dimension_numbers = #tpu.dot_dimension_numbers<[1], [0], [0], [1], [0, 0, 1, 1], [], []>} : vector<32x128xbf16>, vector<128x128xbf16>, vector<32x128xf32> -> vector<32x128xf32>
    %7 = arith.addf %3, %6 : vector<32x128xf32>
    %c0_6 = arith.constant 0 : index
    %c0_7 = arith.constant 0 : index
    %8 = vector.load %arg7[%c0_6, %c0_7] : memref<32x128xf32, #tpu.memory_space<vmem>>, vector<32x128xf32>
    tpu.vector_store %arg7[%c0_6, %c0_7], %7 {strides = array<i32>} : memref<32x128xf32, #tpu.memory_space<vmem>>, vector<32x128xf32>,
    %c0_i32_8 = arith.constant 0 : i32
    %9 = arith.cmpi eq, %arg2, %c0_i32_8 : i32
    %10 = arith.extui %9 : i1 to i32
    %c0_i32_9 = arith.constant 0 : i32
    %11 = arith.cmpi ne, %10, %c0_i32_9 : i32
    scf.if %11 {
      %c0_10 = arith.constant 0 : index
      %c0_11 = arith.constant 0 : index
      %12 = vector.load %arg7[%c0_10, %c0_11] : memref<32x128xf32, #tpu.memory_space<vmem>>, vector<32x128xf32>
      %c0_12 = arith.constant 0 : index
      %c0_13 = arith.constant 0 : index
      %13 = vector.load %arg5[%c0_12, %c0_13] : memref<1x128xf32, #tpu.memory_space<vmem>>, vector<1x128xf32>
      %14 = vector.broadcast %13 : vector<1x128xf32> to vector<32x128xf32>
      %15 = arith.addf %12, %14 : vector<32x128xf32>
      %cst_14 = arith.constant 1.000000e-01 : f32
      %16 = vector.broadcast %cst_14 : f32 to vector<32x128xf32>
      %17 = arith.mulf %16, %15 : vector<32x128xf32>
      %18 = arith.maximumf %15, %17 : vector<32x128xf32>
      %19 = arith.truncf %18 : vector<32x128xf32> to vector<32x128xbf16>
      %c0_15 = arith.constant 0 : index
      %c0_16 = arith.constant 0 : index
      %20 = vector.load %arg6[%c0_15, %c0_16] : memref<32x128xbf16, #tpu.memory_space<vmem>>, vector<32x128xbf16>
      tpu.vector_store %arg6[%c0_15, %c0_16], %19 {strides = array<i32>} : memref<32x128xbf16, #tpu.memory_space<vmem>>, vector<32x128xbf16>,
    } else {
    }
    return
  }
  func.func @transform_0(%arg0: i32, %arg1: i32, %arg2: i32) -> (i32, i32) {
    %c0_i32 = arith.constant 0 : i32
    return %arg0, %arg2 : i32, i32
  }
  func.func @transform_1(%arg0: i32, %arg1: i32, %arg2: i32) -> (i32, i32) {
    %c0_i32 = arith.constant 0 : i32
    return %arg2, %arg1 : i32, i32
  }
  func.func @transform_2(%arg0: i32, %arg1: i32, %arg2: i32) -> (i32, i32) {
    %c0_i32 = arith.constant 0 : i32
    %c0_i32_0 = arith.constant 0 : i32
    return %c0_i32, %arg1 : i32, i32
  }
  func.func @transform_3(%arg0: i32, %arg1: i32, %arg2: i32) -> (i32, i32) {
    %c0_i32 = arith.constant 0 : i32
    return %arg0, %arg1 : i32, i32
  }
}

module attributes {stable_mosaic.version = 11 : i64} {
  func.func @kernel(%arg0: i32, %arg1: i32, %arg2: i32, %arg3: memref<32x128xbf16, #tpu.memory_space<vmem>>, %arg4: memref<128x128xbf16, #tpu.memory_space<vmem>>, %arg5: memref<1x128xf32, #tpu.memory_space<vmem>>, %arg6: memref<32x128xbf16, #tpu.memory_space<vmem>>, %arg7: memref<32x128xf32, #tpu.memory_space<vmem>>) attributes {dimension_semantics = [#tpu.dimension_semantics<parallel>, #tpu.dimension_semantics<parallel>, #tpu.dimension_semantics<arbitrary>], iteration_bounds = array<i64: 1, 1, 3>, scalar_prefetch = 0 : i64, scratch_operands = 1 : i64, tpu.core_type = #tpu.core_type<tc>, window_params = [{transform_indices = @transform_0, window_bounds = array<i64: 32, 128>}, {transform_indices = @transform_1, window_bounds = array<i64: 128, 128>}, {transform_indices = @transform_2, window_bounds = array<i64: 1, 128>}, {transform_indices = @transform_3, window_bounds = array<i64: 32, 128>}]} {
    %c0_i32 = arith.constant 0 : i32
    %0 = arith.cmpi eq, %arg2, %c0_i32 : i32
    %1 = arith.extui %0 : i1 to i32
    %c0_i32_0 = arith.constant 0 : i32
    %2 = arith.cmpi ne, %1, %c0_i32_0 : i32
    scf.if %2 {
      %cst_9 = arith.constant 0.000000e+00 : f32
      %12 = vector.broadcast %cst_9 : f32 to vector<32x128xf32>
      %c0_10 = arith.constant 0 : index
      %c0_11 = arith.constant 0 : index
      %13 = vector.load %arg7[%c0_10, %c0_11] : memref<32x128xf32, #tpu.memory_space<vmem>>, vector<32x128xf32>
      tpu.vector_store %arg7[%c0_10, %c0_11], %12 {strides = array<i32>} : memref<32x128xf32, #tpu.memory_space<vmem>>, vector<32x128xf32>,
    } else {
    }
    %c0 = arith.constant 0 : index
    %c0_1 = arith.constant 0 : index
    %3 = vector.load %arg7[%c0, %c0_1] : memref<32x128xf32, #tpu.memory_space<vmem>>, vector<32x128xf32>
    %c0_2 = arith.constant 0 : index
    %c0_3 = arith.constant 0 : index
    %4 = vector.load %arg3[%c0_2, %c0_3] : memref<32x128xbf16, #tpu.memory_space<vmem>>, vector<32x128xbf16>
    %c0_4 = arith.constant 0 : index
    %c0_5 = arith.constant 0 : index
    %5 = vector.load %arg4[%c0_4, %c0_5] : memref<128x128xbf16, #tpu.memory_space<vmem>>, vector<128x128xbf16>
    %cst = arith.constant dense<0.000000e+00> : vector<32x128xf32>
    %6 = tpu.matmul %4, %5, %cst {dimension_numbers = #tpu.dot_dimension_numbers<[1], [0], [0], [1], [0, 0, 1, 1], [], []>} : vector<32x128xbf16>, vector<128x128xbf16>, vector<32x128xf32> -> vector<32x128xf32>
    %7 = arith.addf %3, %6 : vector<32x128xf32>
    %c0_6 = arith.constant 0 : index
    %c0_7 = arith.constant 0 : index
    %8 = vector.load %arg7[%c0_6, %c0_7] : memref<32x128xf32, #tpu.memory_space<vmem>>, vector<32x128xf32>
    tpu.vector_store %arg7[%c0_6, %c0_7], %7 {strides = array<i32>} : memref<32x128xf32, #tpu.memory_space<vmem>>, vector<32x128xf32>,
    %c2_i32 = arith.constant 2 : i32
    %9 = arith.cmpi eq, %arg2, %c2_i32 : i32
    %10 = arith.extui %9 : i1 to i32
    %c0_i32_8 = arith.constant 0 : i32
    %11 = arith.cmpi ne, %10, %c0_i32_8 : i32
    scf.if %11 {
      %c0_9 = arith.constant 0 : index
      %c0_10 = arith.constant 0 : index
      %12 = vector.load %arg7[%c0_9, %c0_10] : memref<32x128xf32, #tpu.memory_space<vmem>>, vector<32x128xf32>
      %c0_11 = arith.constant 0 : index
      %c0_12 = arith.constant 0 : index
      %13 = vector.load %arg5[%c0_11, %c0_12] : memref<1x128xf32, #tpu.memory_space<vmem>>, vector<1x128xf32>
      %14 = vector.broadcast %13 : vector<1x128xf32> to vector<32x128xf32>
      %15 = arith.addf %12, %14 : vector<32x128xf32>
      %cst_13 = arith.constant 1.000000e-01 : f32
      %16 = vector.broadcast %cst_13 : f32 to vector<32x128xf32>
      %17 = arith.mulf %16, %15 : vector<32x128xf32>
      %18 = arith.maximumf %15, %17 : vector<32x128xf32>
      %19 = arith.truncf %18 : vector<32x128xf32> to vector<32x128xbf16>
      %c0_14 = arith.constant 0 : index
      %c0_15 = arith.constant 0 : index
      %20 = vector.load %arg6[%c0_14, %c0_15] : memref<32x128xbf16, #tpu.memory_space<vmem>>, vector<32x128xbf16>
      tpu.vector_store %arg6[%c0_14, %c0_15], %19 {strides = array<i32>} : memref<32x128xbf16, #tpu.memory_space<vmem>>, vector<32x128xbf16>,
    } else {
    }
    return
  }
  func.func @transform_0(%arg0: i32, %arg1: i32, %arg2: i32) -> (i32, i32) {
    %c0_i32 = arith.constant 0 : i32
    return %arg0, %arg2 : i32, i32
  }
  func.func @transform_1(%arg0: i32, %arg1: i32, %arg2: i32) -> (i32, i32) {
    %c0_i32 = arith.constant 0 : i32
    return %arg2, %arg1 : i32, i32
  }
  func.func @transform_2(%arg0: i32, %arg1: i32, %arg2: i32) -> (i32, i32) {
    %c0_i32 = arith.constant 0 : i32
    %c0_i32_0 = arith.constant 0 : i32
    return %c0_i32, %arg1 : i32, i32
  }
  func.func @transform_3(%arg0: i32, %arg1: i32, %arg2: i32) -> (i32, i32) {
    %c0_i32 = arith.constant 0 : i32
    return %arg0, %arg1 : i32, i32
  }
}

module attributes {stable_mosaic.version = 11 : i64} {
  func.func @kernel(%arg0: i32, %arg1: i32, %arg2: i32, %arg3: memref<32x128xbf16, #tpu.memory_space<vmem>>, %arg4: memref<128x128xbf16, #tpu.memory_space<vmem>>, %arg5: memref<1x128xf32, #tpu.memory_space<vmem>>, %arg6: memref<32x128xbf16, #tpu.memory_space<vmem>>, %arg7: memref<32x128xbf16, #tpu.memory_space<vmem>>, %arg8: memref<32x128xf32, #tpu.memory_space<vmem>>) attributes {dimension_semantics = [#tpu.dimension_semantics<parallel>, #tpu.dimension_semantics<parallel>, #tpu.dimension_semantics<arbitrary>], iteration_bounds = array<i64: 1, 1, 3>, scalar_prefetch = 0 : i64, scratch_operands = 1 : i64, tpu.core_type = #tpu.core_type<tc>, window_params = [{transform_indices = @transform_0, window_bounds = array<i64: 32, 128>}, {transform_indices = @transform_1, window_bounds = array<i64: 128, 128>}, {transform_indices = @transform_2, window_bounds = array<i64: 1, 128>}, {transform_indices = @transform_3, window_bounds = array<i64: 32, 128>}, {transform_indices = @transform_4, window_bounds = array<i64: 32, 128>}]} {
    %c0_i32 = arith.constant 0 : i32
    %0 = arith.cmpi eq, %arg2, %c0_i32 : i32
    %1 = arith.extui %0 : i1 to i32
    %c0_i32_0 = arith.constant 0 : i32
    %2 = arith.cmpi ne, %1, %c0_i32_0 : i32
    scf.if %2 {
      %cst_9 = arith.constant 0.000000e+00 : f32
      %12 = vector.broadcast %cst_9 : f32 to vector<32x128xf32>
      %c0_10 = arith.constant 0 : index
      %c0_11 = arith.constant 0 : index
      %13 = vector.load %arg8[%c0_10, %c0_11] : memref<32x128xf32, #tpu.memory_space<vmem>>, vector<32x128xf32>
      tpu.vector_store %arg8[%c0_10, %c0_11], %12 {strides = array<i32>} : memref<32x128xf32, #tpu.memory_space<vmem>>, vector<32x128xf32>,
    } else {
    }
    %c0 = arith.constant 0 : index
    %c0_1 = arith.constant 0 : index
    %3 = vector.load %arg8[%c0, %c0_1] : memref<32x128xf32, #tpu.memory_space<vmem>>, vector<32x128xf32>
    %c0_2 = arith.constant 0 : index
    %c0_3 = arith.constant 0 : index
    %4 = vector.load %arg3[%c0_2, %c0_3] : memref<32x128xbf16, #tpu.memory_space<vmem>>, vector<32x128xbf16>
    %c0_4 = arith.constant 0 : index
    %c0_5 = arith.constant 0 : index
    %5 = vector.load %arg4[%c0_4, %c0_5] : memref<128x128xbf16, #tpu.memory_space<vmem>>, vector<128x128xbf16>
    %cst = arith.constant dense<0.000000e+00> : vector<32x128xf32>
    %6 = tpu.matmul %4, %5, %cst {dimension_numbers = #tpu.dot_dimension_numbers<[1], [0], [0], [1], [0, 0, 1, 1], [], []>} : vector<32x128xbf16>, vector<128x128xbf16>, vector<32x128xf32> -> vector<32x128xf32>
    %7 = arith.addf %3, %6 : vector<32x128xf32>
    %c0_6 = arith.constant 0 : index
    %c0_7 = arith.constant 0 : index
    %8 = vector.load %arg8[%c0_6, %c0_7] : memref<32x128xf32, #tpu.memory_space<vmem>>, vector<32x128xf32>
    tpu.vector_store %arg8[%c0_6, %c0_7], %7 {strides = array<i32>} : memref<32x128xf32, #tpu.memory_space<vmem>>, vector<32x128xf32>,
    %c2_i32 = arith.constant 2 : i32
    %9 = arith.cmpi eq, %arg2, %c2_i32 : i32
    %10 = arith.extui %9 : i1 to i32
    %c0_i32_8 = arith.constant 0 : i32
    %11 = arith.cmpi ne, %10, %c0_i32_8 : i32
    scf.if %11 {
      %c0_9 = arith.constant 0 : index
      %c0_10 = arith.constant 0 : index
      %12 = vector.load %arg8[%c0_9, %c0_10] : memref<32x128xf32, #tpu.memory_space<vmem>>, vector<32x128xf32>
      %c0_11 = arith.constant 0 : index
      %c0_12 = arith.constant 0 : index
      %13 = vector.load %arg5[%c0_11, %c0_12] : memref<1x128xf32, #tpu.memory_space<vmem>>, vector<1x128xf32>
      %14 = vector.broadcast %13 : vector<1x128xf32> to vector<32x128xf32>
      %15 = arith.addf %12, %14 : vector<32x128xf32>
      %cst_13 = arith.constant 1.000000e-01 : f32
      %16 = vector.broadcast %cst_13 : f32 to vector<32x128xf32>
      %17 = arith.mulf %16, %15 : vector<32x128xf32>
      %18 = arith.maximumf %15, %17 : vector<32x128xf32>
      %c0_14 = arith.constant 0 : index
      %c0_15 = arith.constant 0 : index
      %19 = vector.load %arg6[%c0_14, %c0_15] : memref<32x128xbf16, #tpu.memory_space<vmem>>, vector<32x128xbf16>
      %20 = arith.extf %19 : vector<32x128xbf16> to vector<32x128xf32>
      %21 = arith.addf %18, %20 : vector<32x128xf32>
      %22 = arith.truncf %21 : vector<32x128xf32> to vector<32x128xbf16>
      %c0_16 = arith.constant 0 : index
      %c0_17 = arith.constant 0 : index
      %23 = vector.load %arg7[%c0_16, %c0_17] : memref<32x128xbf16, #tpu.memory_space<vmem>>, vector<32x128xbf16>
      tpu.vector_store %arg7[%c0_16, %c0_17], %22 {strides = array<i32>} : memref<32x128xbf16, #tpu.memory_space<vmem>>, vector<32x128xbf16>,
    } else {
    }
    return
  }
  func.func @transform_0(%arg0: i32, %arg1: i32, %arg2: i32) -> (i32, i32) {
    %c0_i32 = arith.constant 0 : i32
    return %arg0, %arg2 : i32, i32
  }
  func.func @transform_1(%arg0: i32, %arg1: i32, %arg2: i32) -> (i32, i32) {
    %c0_i32 = arith.constant 0 : i32
    return %arg2, %arg1 : i32, i32
  }
  func.func @transform_2(%arg0: i32, %arg1: i32, %arg2: i32) -> (i32, i32) {
    %c0_i32 = arith.constant 0 : i32
    %c0_i32_0 = arith.constant 0 : i32
    return %c0_i32, %arg1 : i32, i32
  }
  func.func @transform_3(%arg0: i32, %arg1: i32, %arg2: i32) -> (i32, i32) {
    %c0_i32 = arith.constant 0 : i32
    return %arg0, %arg1 : i32, i32
  }
  func.func @transform_4(%arg0: i32, %arg1: i32, %arg2: i32) -> (i32, i32) {
    %c0_i32 = arith.constant 0 : i32
    return %arg0, %arg1 : i32, i32
  }
}

module attributes {stable_mosaic.version = 11 : i64} {
  func.func @kernel(%arg0: i32, %arg1: i32, %arg2: i32, %arg3: memref<16x128xbf16, #tpu.memory_space<vmem>>, %arg4: memref<128x128xbf16, #tpu.memory_space<vmem>>, %arg5: memref<1x128xf32, #tpu.memory_space<vmem>>, %arg6: memref<16x128xbf16, #tpu.memory_space<vmem>>, %arg7: memref<16x128xf32, #tpu.memory_space<vmem>>) attributes {dimension_semantics = [#tpu.dimension_semantics<parallel>, #tpu.dimension_semantics<parallel>, #tpu.dimension_semantics<arbitrary>], iteration_bounds = array<i64: 1, 1, 1>, scalar_prefetch = 0 : i64, scratch_operands = 1 : i64, tpu.core_type = #tpu.core_type<tc>, window_params = [{transform_indices = @transform_0, window_bounds = array<i64: 16, 128>}, {transform_indices = @transform_1, window_bounds = array<i64: 128, 128>}, {transform_indices = @transform_2, window_bounds = array<i64: 1, 128>}, {transform_indices = @transform_3, window_bounds = array<i64: 16, 128>}]} {
    %c0_i32 = arith.constant 0 : i32
    %0 = arith.cmpi eq, %arg2, %c0_i32 : i32
    %1 = arith.extui %0 : i1 to i32
    %c0_i32_0 = arith.constant 0 : i32
    %2 = arith.cmpi ne, %1, %c0_i32_0 : i32
    scf.if %2 {
      %cst_10 = arith.constant 0.000000e+00 : f32
      %12 = vector.broadcast %cst_10 : f32 to vector<16x128xf32>
      %c0_11 = arith.constant 0 : index
      %c0_12 = arith.constant 0 : index
      %13 = vector.load %arg7[%c0_11, %c0_12] : memref<16x128xf32, #tpu.memory_space<vmem>>, vector<16x128xf32>
      tpu.vector_store %arg7[%c0_11, %c0_12], %12 {strides = array<i32>} : memref<16x128xf32, #tpu.memory_space<vmem>>, vector<16x128xf32>,
    } else {
    }
    %c0 = arith.constant 0 : index
    %c0_1 = arith.constant 0 : index
    %3 = vector.load %arg7[%c0, %c0_1] : memref<16x128xf32, #tpu.memory_space<vmem>>, vector<16x128xf32>
    %c0_2 = arith.constant 0 : index
    %c0_3 = arith.constant 0 : index
    %4 = vector.load %arg3[%c0_2, %c0_3] : memref<16x128xbf16, #tpu.memory_space<vmem>>, vector<16x128xbf16>
    %c0_4 = arith.constant 0 : index
    %c0_5 = arith.constant 0 : index
    %5 = vector.load %arg4[%c0_4, %c0_5] : memref<128x128xbf16, #tpu.memory_space<vmem>>, vector<128x128xbf16>
    %cst = arith.constant dense<0.000000e+00> : vector<16x128xf32>
    %6 = tpu.matmul %4, %5, %cst {dimension_numbers = #tpu.dot_dimension_numbers<[1], [0], [0], [1], [0, 0, 1, 1], [], []>} : vector<16x128xbf16>, vector<128x128xbf16>, vector<16x128xf32> -> vector<16x128xf32>
    %7 = arith.addf %3, %6 : vector<16x128xf32>
    %c0_6 = arith.constant 0 : index
    %c0_7 = arith.constant 0 : index
    %8 = vector.load %arg7[%c0_6, %c0_7] : memref<16x128xf32, #tpu.memory_space<vmem>>, vector<16x128xf32>
    tpu.vector_store %arg7[%c0_6, %c0_7], %7 {strides = array<i32>} : memref<16x128xf32, #tpu.memory_space<vmem>>, vector<16x128xf32>,
    %c0_i32_8 = arith.constant 0 : i32
    %9 = arith.cmpi eq, %arg2, %c0_i32_8 : i32
    %10 = arith.extui %9 : i1 to i32
    %c0_i32_9 = arith.constant 0 : i32
    %11 = arith.cmpi ne, %10, %c0_i32_9 : i32
    scf.if %11 {
      %c0_10 = arith.constant 0 : index
      %c0_11 = arith.constant 0 : index
      %12 = vector.load %arg7[%c0_10, %c0_11] : memref<16x128xf32, #tpu.memory_space<vmem>>, vector<16x128xf32>
      %c0_12 = arith.constant 0 : index
      %c0_13 = arith.constant 0 : index
      %13 = vector.load %arg5[%c0_12, %c0_13] : memref<1x128xf32, #tpu.memory_space<vmem>>, vector<1x128xf32>
      %14 = vector.broadcast %13 : vector<1x128xf32> to vector<16x128xf32>
      %15 = arith.addf %12, %14 : vector<16x128xf32>
      %cst_14 = arith.constant 1.000000e-01 : f32
      %16 = vector.broadcast %cst_14 : f32 to vector<16x128xf32>
      %17 = arith.mulf %16, %15 : vector<16x128xf32>
      %18 = arith.maximumf %15, %17 : vector<16x128xf32>
      %19 = arith.truncf %18 : vector<16x128xf32> to vector<16x128xbf16>
      %c0_15 = arith.constant 0 : index
      %c0_16 = arith.constant 0 : index
      %20 = vector.load %arg6[%c0_15, %c0_16] : memref<16x128xbf16, #tpu.memory_space<vmem>>, vector<16x128xbf16>
      tpu.vector_store %arg6[%c0_15, %c0_16], %19 {strides = array<i32>} : memref<16x128xbf16, #tpu.memory_space<vmem>>, vector<16x128xbf16>,
    } else {
    }
    return
  }
  func.func @transform_0(%arg0: i32, %arg1: i32, %arg2: i32) -> (i32, i32) {
    %c0_i32 = arith.constant 0 : i32
    return %arg0, %arg2 : i32, i32
  }
  func.func @transform_1(%arg0: i32, %arg1: i32, %arg2: i32) -> (i32, i32) {
    %c0_i32 = arith.constant 0 : i32
    return %arg2, %arg1 : i32, i32
  }
  func.func @transform_2(%arg0: i32, %arg1: i32, %arg2: i32) -> (i32, i32) {
    %c0_i32 = arith.constant 0 : i32
    %c0_i32_0 = arith.constant 0 : i32
    return %c0_i32, %arg1 : i32, i32
  }
  func.func @transform_3(%arg0: i32, %arg1: i32, %arg2: i32) -> (i32, i32) {
    %c0_i32 = arith.constant 0 : i32
    return %arg0, %arg1 : i32, i32
  }
}

module attributes {stable_mosaic.version = 11 : i64} {
  func.func @kernel(%arg0: i32, %arg1: i32, %arg2: i32, %arg3: memref<16x128xbf16, #tpu.memory_space<vmem>>, %arg4: memref<128x128xbf16, #tpu.memory_space<vmem>>, %arg5: memref<1x128xf32, #tpu.memory_space<vmem>>, %arg6: memref<16x128xbf16, #tpu.memory_space<vmem>>, %arg7: memref<16x128xf32, #tpu.memory_space<vmem>>) attributes {dimension_semantics = [#tpu.dimension_semantics<parallel>, #tpu.dimension_semantics<parallel>, #tpu.dimension_semantics<arbitrary>], iteration_bounds = array<i64: 1, 1, 5>, scalar_prefetch = 0 : i64, scratch_operands = 1 : i64, tpu.core_type = #tpu.core_type<tc>, window_params = [{transform_indices = @transform_0, window_bounds = array<i64: 16, 128>}, {transform_indices = @transform_1, window_bounds = array<i64: 128, 128>}, {transform_indices = @transform_2, window_bounds = array<i64: 1, 128>}, {transform_indices = @transform_3, window_bounds = array<i64: 16, 128>}]} {
    %c0_i32 = arith.constant 0 : i32
    %0 = arith.cmpi eq, %arg2, %c0_i32 : i32
    %1 = arith.extui %0 : i1 to i32
    %c0_i32_0 = arith.constant 0 : i32
    %2 = arith.cmpi ne, %1, %c0_i32_0 : i32
    scf.if %2 {
      %cst_9 = arith.constant 0.000000e+00 : f32
      %12 = vector.broadcast %cst_9 : f32 to vector<16x128xf32>
      %c0_10 = arith.constant 0 : index
      %c0_11 = arith.constant 0 : index
      %13 = vector.load %arg7[%c0_10, %c0_11] : memref<16x128xf32, #tpu.memory_space<vmem>>, vector<16x128xf32>
      tpu.vector_store %arg7[%c0_10, %c0_11], %12 {strides = array<i32>} : memref<16x128xf32, #tpu.memory_space<vmem>>, vector<16x128xf32>,
    } else {
    }
    %c0 = arith.constant 0 : index
    %c0_1 = arith.constant 0 : index
    %3 = vector.load %arg7[%c0, %c0_1] : memref<16x128xf32, #tpu.memory_space<vmem>>, vector<16x128xf32>
    %c0_2 = arith.constant 0 : index
    %c0_3 = arith.constant 0 : index
    %4 = vector.load %arg3[%c0_2, %c0_3] : memref<16x128xbf16, #tpu.memory_space<vmem>>, vector<16x128xbf16>
    %c0_4 = arith.constant 0 : index
    %c0_5 = arith.constant 0 : index
    %5 = vector.load %arg4[%c0_4, %c0_5] : memref<128x128xbf16, #tpu.memory_space<vmem>>, vector<128x128xbf16>
    %cst = arith.constant dense<0.000000e+00> : vector<16x128xf32>
    %6 = tpu.matmul %4, %5, %cst {dimension_numbers = #tpu.dot_dimension_numbers<[1], [0], [0], [1], [0, 0, 1, 1], [], []>} : vector<16x128xbf16>, vector<128x128xbf16>, vector<16x128xf32> -> vector<16x128xf32>
    %7 = arith.addf %3, %6 : vector<16x128xf32>
    %c0_6 = arith.constant 0 : index
    %c0_7 = arith.constant 0 : index
    %8 = vector.load %arg7[%c0_6, %c0_7] : memref<16x128xf32, #tpu.memory_space<vmem>>, vector<16x128xf32>
    tpu.vector_store %arg7[%c0_6, %c0_7], %7 {strides = array<i32>} : memref<16x128xf32, #tpu.memory_space<vmem>>, vector<16x128xf32>,
    %c4_i32 = arith.constant 4 : i32
    %9 = arith.cmpi eq, %arg2, %c4_i32 : i32
    %10 = arith.extui %9 : i1 to i32
    %c0_i32_8 = arith.constant 0 : i32
    %11 = arith.cmpi ne, %10, %c0_i32_8 : i32
    scf.if %11 {
      %c0_9 = arith.constant 0 : index
      %c0_10 = arith.constant 0 : index
      %12 = vector.load %arg7[%c0_9, %c0_10] : memref<16x128xf32, #tpu.memory_space<vmem>>, vector<16x128xf32>
      %c0_11 = arith.constant 0 : index
      %c0_12 = arith.constant 0 : index
      %13 = vector.load %arg5[%c0_11, %c0_12] : memref<1x128xf32, #tpu.memory_space<vmem>>, vector<1x128xf32>
      %14 = vector.broadcast %13 : vector<1x128xf32> to vector<16x128xf32>
      %15 = arith.addf %12, %14 : vector<16x128xf32>
      %cst_13 = arith.constant 1.000000e-01 : f32
      %16 = vector.broadcast %cst_13 : f32 to vector<16x128xf32>
      %17 = arith.mulf %16, %15 : vector<16x128xf32>
      %18 = arith.maximumf %15, %17 : vector<16x128xf32>
      %19 = arith.truncf %18 : vector<16x128xf32> to vector<16x128xbf16>
      %c0_14 = arith.constant 0 : index
      %c0_15 = arith.constant 0 : index
      %20 = vector.load %arg6[%c0_14, %c0_15] : memref<16x128xbf16, #tpu.memory_space<vmem>>, vector<16x128xbf16>
      tpu.vector_store %arg6[%c0_14, %c0_15], %19 {strides = array<i32>} : memref<16x128xbf16, #tpu.memory_space<vmem>>, vector<16x128xbf16>,
    } else {
    }
    return
  }
  func.func @transform_0(%arg0: i32, %arg1: i32, %arg2: i32) -> (i32, i32) {
    %c0_i32 = arith.constant 0 : i32
    return %arg0, %arg2 : i32, i32
  }
  func.func @transform_1(%arg0: i32, %arg1: i32, %arg2: i32) -> (i32, i32) {
    %c0_i32 = arith.constant 0 : i32
    return %arg2, %arg1 : i32, i32
  }
  func.func @transform_2(%arg0: i32, %arg1: i32, %arg2: i32) -> (i32, i32) {
    %c0_i32 = arith.constant 0 : i32
    %c0_i32_0 = arith.constant 0 : i32
    return %c0_i32, %arg1 : i32, i32
  }
  func.func @transform_3(%arg0: i32, %arg1: i32, %arg2: i32) -> (i32, i32) {
    %c0_i32 = arith.constant 0 : i32
    return %arg0, %arg1 : i32, i32
  }
}

module attributes {stable_mosaic.version = 11 : i64} {
  func.func @kernel(%arg0: i32, %arg1: i32, %arg2: i32, %arg3: memref<16x128xbf16, #tpu.memory_space<vmem>>, %arg4: memref<128x128xbf16, #tpu.memory_space<vmem>>, %arg5: memref<1x128xf32, #tpu.memory_space<vmem>>, %arg6: memref<16x128xbf16, #tpu.memory_space<vmem>>, %arg7: memref<16x128xbf16, #tpu.memory_space<vmem>>, %arg8: memref<16x128xf32, #tpu.memory_space<vmem>>) attributes {dimension_semantics = [#tpu.dimension_semantics<parallel>, #tpu.dimension_semantics<parallel>, #tpu.dimension_semantics<arbitrary>], iteration_bounds = array<i64: 1, 1, 5>, scalar_prefetch = 0 : i64, scratch_operands = 1 : i64, tpu.core_type = #tpu.core_type<tc>, window_params = [{transform_indices = @transform_0, window_bounds = array<i64: 16, 128>}, {transform_indices = @transform_1, window_bounds = array<i64: 128, 128>}, {transform_indices = @transform_2, window_bounds = array<i64: 1, 128>}, {transform_indices = @transform_3, window_bounds = array<i64: 16, 128>}, {transform_indices = @transform_4, window_bounds = array<i64: 16, 128>}]} {
    %c0_i32 = arith.constant 0 : i32
    %0 = arith.cmpi eq, %arg2, %c0_i32 : i32
    %1 = arith.extui %0 : i1 to i32
    %c0_i32_0 = arith.constant 0 : i32
    %2 = arith.cmpi ne, %1, %c0_i32_0 : i32
    scf.if %2 {
      %cst_9 = arith.constant 0.000000e+00 : f32
      %12 = vector.broadcast %cst_9 : f32 to vector<16x128xf32>
      %c0_10 = arith.constant 0 : index
      %c0_11 = arith.constant 0 : index
      %13 = vector.load %arg8[%c0_10, %c0_11] : memref<16x128xf32, #tpu.memory_space<vmem>>, vector<16x128xf32>
      tpu.vector_store %arg8[%c0_10, %c0_11], %12 {strides = array<i32>} : memref<16x128xf32, #tpu.memory_space<vmem>>, vector<16x128xf32>,
    } else {
    }
    %c0 = arith.constant 0 : index
    %c0_1 = arith.constant 0 : index
    %3 = vector.load %arg8[%c0, %c0_1] : memref<16x128xf32, #tpu.memory_space<vmem>>, vector<16x128xf32>
    %c0_2 = arith.constant 0 : index
    %c0_3 = arith.constant 0 : index
    %4 = vector.load %arg3[%c0_2, %c0_3] : memref<16x128xbf16, #tpu.memory_space<vmem>>, vector<16x128xbf16>
    %c0_4 = arith.constant 0 : index
    %c0_5 = arith.constant 0 : index
    %5 = vector.load %arg4[%c0_4, %c0_5] : memref<128x128xbf16, #tpu.memory_space<vmem>>, vector<128x128xbf16>
    %cst = arith.constant dense<0.000000e+00> : vector<16x128xf32>
    %6 = tpu.matmul %4, %5, %cst {dimension_numbers = #tpu.dot_dimension_numbers<[1], [0], [0], [1], [0, 0, 1, 1], [], []>} : vector<16x128xbf16>, vector<128x128xbf16>, vector<16x128xf32> -> vector<16x128xf32>
    %7 = arith.addf %3, %6 : vector<16x128xf32>
    %c0_6 = arith.constant 0 : index
    %c0_7 = arith.constant 0 : index
    %8 = vector.load %arg8[%c0_6, %c0_7] : memref<16x128xf32, #tpu.memory_space<vmem>>, vector<16x128xf32>
    tpu.vector_store %arg8[%c0_6, %c0_7], %7 {strides = array<i32>} : memref<16x128xf32, #tpu.memory_space<vmem>>, vector<16x128xf32>,
    %c4_i32 = arith.constant 4 : i32
    %9 = arith.cmpi eq, %arg2, %c4_i32 : i32
    %10 = arith.extui %9 : i1 to i32
    %c0_i32_8 = arith.constant 0 : i32
    %11 = arith.cmpi ne, %10, %c0_i32_8 : i32
    scf.if %11 {
      %c0_9 = arith.constant 0 : index
      %c0_10 = arith.constant 0 : index
      %12 = vector.load %arg8[%c0_9, %c0_10] : memref<16x128xf32, #tpu.memory_space<vmem>>, vector<16x128xf32>
      %c0_11 = arith.constant 0 : index
      %c0_12 = arith.constant 0 : index
      %13 = vector.load %arg5[%c0_11, %c0_12] : memref<1x128xf32, #tpu.memory_space<vmem>>, vector<1x128xf32>
      %14 = vector.broadcast %13 : vector<1x128xf32> to vector<16x128xf32>
      %15 = arith.addf %12, %14 : vector<16x128xf32>
      %cst_13 = arith.constant 1.000000e-01 : f32
      %16 = vector.broadcast %cst_13 : f32 to vector<16x128xf32>
      %17 = arith.mulf %16, %15 : vector<16x128xf32>
      %18 = arith.maximumf %15, %17 : vector<16x128xf32>
      %c0_14 = arith.constant 0 : index
      %c0_15 = arith.constant 0 : index
      %19 = vector.load %arg6[%c0_14, %c0_15] : memref<16x128xbf16, #tpu.memory_space<vmem>>, vector<16x128xbf16>
      %20 = arith.extf %19 : vector<16x128xbf16> to vector<16x128xf32>
      %21 = arith.addf %18, %20 : vector<16x128xf32>
      %22 = arith.truncf %21 : vector<16x128xf32> to vector<16x128xbf16>
      %c0_16 = arith.constant 0 : index
      %c0_17 = arith.constant 0 : index
      %23 = vector.load %arg7[%c0_16, %c0_17] : memref<16x128xbf16, #tpu.memory_space<vmem>>, vector<16x128xbf16>
      tpu.vector_store %arg7[%c0_16, %c0_17], %22 {strides = array<i32>} : memref<16x128xbf16, #tpu.memory_space<vmem>>, vector<16x128xbf16>,
    } else {
    }
    return
  }
  func.func @transform_0(%arg0: i32, %arg1: i32, %arg2: i32) -> (i32, i32) {
    %c0_i32 = arith.constant 0 : i32
    return %arg0, %arg2 : i32, i32
  }
  func.func @transform_1(%arg0: i32, %arg1: i32, %arg2: i32) -> (i32, i32) {
    %c0_i32 = arith.constant 0 : i32
    return %arg2, %arg1 : i32, i32
  }
  func.func @transform_2(%arg0: i32, %arg1: i32, %arg2: i32) -> (i32, i32) {
    %c0_i32 = arith.constant 0 : i32
    %c0_i32_0 = arith.constant 0 : i32
    return %c0_i32, %arg1 : i32, i32
  }
  func.func @transform_3(%arg0: i32, %arg1: i32, %arg2: i32) -> (i32, i32) {
    %c0_i32 = arith.constant 0 : i32
    return %arg0, %arg1 : i32, i32
  }
  func.func @transform_4(%arg0: i32, %arg1: i32, %arg2: i32) -> (i32, i32) {
    %c0_i32 = arith.constant 0 : i32
    return %arg0, %arg1 : i32, i32
  }
}

module attributes {stable_mosaic.version = 11 : i64} {
  func.func @kernel(%arg0: i32, %arg1: i32, %arg2: i32, %arg3: memref<16x128xbf16, #tpu.memory_space<vmem>>, %arg4: memref<128x256xbf16, #tpu.memory_space<vmem>>, %arg5: memref<1x256xf32, #tpu.memory_space<vmem>>, %arg6: memref<16x256xbf16, #tpu.memory_space<vmem>>, %arg7: memref<16x256xf32, #tpu.memory_space<vmem>>) attributes {dimension_semantics = [#tpu.dimension_semantics<parallel>, #tpu.dimension_semantics<parallel>, #tpu.dimension_semantics<arbitrary>], iteration_bounds = array<i64: 1, 1, 9>, scalar_prefetch = 0 : i64, scratch_operands = 1 : i64, tpu.core_type = #tpu.core_type<tc>, window_params = [{transform_indices = @transform_0, window_bounds = array<i64: 16, 128>}, {transform_indices = @transform_1, window_bounds = array<i64: 128, 256>}, {transform_indices = @transform_2, window_bounds = array<i64: 1, 256>}, {transform_indices = @transform_3, window_bounds = array<i64: 16, 256>}]} {
    %c0_i32 = arith.constant 0 : i32
    %0 = arith.cmpi eq, %arg2, %c0_i32 : i32
    %1 = arith.extui %0 : i1 to i32
    %c0_i32_0 = arith.constant 0 : i32
    %2 = arith.cmpi ne, %1, %c0_i32_0 : i32
    scf.if %2 {
      %cst_9 = arith.constant 0.000000e+00 : f32
      %12 = vector.broadcast %cst_9 : f32 to vector<16x256xf32>
      %c0_10 = arith.constant 0 : index
      %c0_11 = arith.constant 0 : index
      %13 = vector.load %arg7[%c0_10, %c0_11] : memref<16x256xf32, #tpu.memory_space<vmem>>, vector<16x256xf32>
      tpu.vector_store %arg7[%c0_10, %c0_11], %12 {strides = array<i32>} : memref<16x256xf32, #tpu.memory_space<vmem>>, vector<16x256xf32>,
    } else {
    }
    %c0 = arith.constant 0 : index
    %c0_1 = arith.constant 0 : index
    %3 = vector.load %arg7[%c0, %c0_1] : memref<16x256xf32, #tpu.memory_space<vmem>>, vector<16x256xf32>
    %c0_2 = arith.constant 0 : index
    %c0_3 = arith.constant 0 : index
    %4 = vector.load %arg3[%c0_2, %c0_3] : memref<16x128xbf16, #tpu.memory_space<vmem>>, vector<16x128xbf16>
    %c0_4 = arith.constant 0 : index
    %c0_5 = arith.constant 0 : index
    %5 = vector.load %arg4[%c0_4, %c0_5] : memref<128x256xbf16, #tpu.memory_space<vmem>>, vector<128x256xbf16>
    %cst = arith.constant dense<0.000000e+00> : vector<16x256xf32>
    %6 = tpu.matmul %4, %5, %cst {dimension_numbers = #tpu.dot_dimension_numbers<[1], [0], [0], [1], [0, 0, 1, 1], [], []>} : vector<16x128xbf16>, vector<128x256xbf16>, vector<16x256xf32> -> vector<16x256xf32>
    %7 = arith.addf %3, %6 : vector<16x256xf32>
    %c0_6 = arith.constant 0 : index
    %c0_7 = arith.constant 0 : index
    %8 = vector.load %arg7[%c0_6, %c0_7] : memref<16x256xf32, #tpu.memory_space<vmem>>, vector<16x256xf32>
    tpu.vector_store %arg7[%c0_6, %c0_7], %7 {strides = array<i32>} : memref<16x256xf32, #tpu.memory_space<vmem>>, vector<16x256xf32>,
    %c8_i32 = arith.constant 8 : i32
    %9 = arith.cmpi eq, %arg2, %c8_i32 : i32
    %10 = arith.extui %9 : i1 to i32
    %c0_i32_8 = arith.constant 0 : i32
    %11 = arith.cmpi ne, %10, %c0_i32_8 : i32
    scf.if %11 {
      %c0_9 = arith.constant 0 : index
      %c0_10 = arith.constant 0 : index
      %12 = vector.load %arg7[%c0_9, %c0_10] : memref<16x256xf32, #tpu.memory_space<vmem>>, vector<16x256xf32>
      %c0_11 = arith.constant 0 : index
      %c0_12 = arith.constant 0 : index
      %13 = vector.load %arg5[%c0_11, %c0_12] : memref<1x256xf32, #tpu.memory_space<vmem>>, vector<1x256xf32>
      %14 = vector.broadcast %13 : vector<1x256xf32> to vector<16x256xf32>
      %15 = arith.addf %12, %14 : vector<16x256xf32>
      %cst_13 = arith.constant 1.000000e-01 : f32
      %16 = vector.broadcast %cst_13 : f32 to vector<16x256xf32>
      %17 = arith.mulf %16, %15 : vector<16x256xf32>
      %18 = arith.maximumf %15, %17 : vector<16x256xf32>
      %19 = arith.truncf %18 : vector<16x256xf32> to vector<16x256xbf16>
      %c0_14 = arith.constant 0 : index
      %c0_15 = arith.constant 0 : index
      %20 = vector.load %arg6[%c0_14, %c0_15] : memref<16x256xbf16, #tpu.memory_space<vmem>>, vector<16x256xbf16>
      tpu.vector_store %arg6[%c0_14, %c0_15], %19 {strides = array<i32>} : memref<16x256xbf16, #tpu.memory_space<vmem>>, vector<16x256xbf16>,
    } else {
    }
    return
  }
  func.func @transform_0(%arg0: i32, %arg1: i32, %arg2: i32) -> (i32, i32) {
    %c0_i32 = arith.constant 0 : i32
    return %arg0, %arg2 : i32, i32
  }
  func.func @transform_1(%arg0: i32, %arg1: i32, %arg2: i32) -> (i32, i32) {
    %c0_i32 = arith.constant 0 : i32
    return %arg2, %arg1 : i32, i32
  }
  func.func @transform_2(%arg0: i32, %arg1: i32, %arg2: i32) -> (i32, i32) {
    %c0_i32 = arith.constant 0 : i32
    %c0_i32_0 = arith.constant 0 : i32
    return %c0_i32, %arg1 : i32, i32
  }
  func.func @transform_3(%arg0: i32, %arg1: i32, %arg2: i32) -> (i32, i32) {
    %c0_i32 = arith.constant 0 : i32
    return %arg0, %arg1 : i32, i32
  }
}

module attributes {stable_mosaic.version = 11 : i64} {
  func.func @kernel(%arg0: i32, %arg1: i32, %arg2: i32, %arg3: memref<16x256xbf16, #tpu.memory_space<vmem>>, %arg4: memref<256x128xbf16, #tpu.memory_space<vmem>>, %arg5: memref<1x128xf32, #tpu.memory_space<vmem>>, %arg6: memref<16x128xbf16, #tpu.memory_space<vmem>>, %arg7: memref<16x128xf32, #tpu.memory_space<vmem>>) attributes {dimension_semantics = [#tpu.dimension_semantics<parallel>, #tpu.dimension_semantics<parallel>, #tpu.dimension_semantics<arbitrary>], iteration_bounds = array<i64: 1, 1, 1>, scalar_prefetch = 0 : i64, scratch_operands = 1 : i64, tpu.core_type = #tpu.core_type<tc>, window_params = [{transform_indices = @transform_0, window_bounds = array<i64: 16, 256>}, {transform_indices = @transform_1, window_bounds = array<i64: 256, 128>}, {transform_indices = @transform_2, window_bounds = array<i64: 1, 128>}, {transform_indices = @transform_3, window_bounds = array<i64: 16, 128>}]} {
    %c0_i32 = arith.constant 0 : i32
    %0 = arith.cmpi eq, %arg2, %c0_i32 : i32
    %1 = arith.extui %0 : i1 to i32
    %c0_i32_0 = arith.constant 0 : i32
    %2 = arith.cmpi ne, %1, %c0_i32_0 : i32
    scf.if %2 {
      %cst_10 = arith.constant 0.000000e+00 : f32
      %12 = vector.broadcast %cst_10 : f32 to vector<16x128xf32>
      %c0_11 = arith.constant 0 : index
      %c0_12 = arith.constant 0 : index
      %13 = vector.load %arg7[%c0_11, %c0_12] : memref<16x128xf32, #tpu.memory_space<vmem>>, vector<16x128xf32>
      tpu.vector_store %arg7[%c0_11, %c0_12], %12 {strides = array<i32>} : memref<16x128xf32, #tpu.memory_space<vmem>>, vector<16x128xf32>,
    } else {
    }
    %c0 = arith.constant 0 : index
    %c0_1 = arith.constant 0 : index
    %3 = vector.load %arg7[%c0, %c0_1] : memref<16x128xf32, #tpu.memory_space<vmem>>, vector<16x128xf32>
    %c0_2 = arith.constant 0 : index
    %c0_3 = arith.constant 0 : index
    %4 = vector.load %arg3[%c0_2, %c0_3] : memref<16x256xbf16, #tpu.memory_space<vmem>>, vector<16x256xbf16>
    %c0_4 = arith.constant 0 : index
    %c0_5 = arith.constant 0 : index
    %5 = vector.load %arg4[%c0_4, %c0_5] : memref<256x128xbf16, #tpu.memory_space<vmem>>, vector<256x128xbf16>
    %cst = arith.constant dense<0.000000e+00> : vector<16x128xf32>
    %6 = tpu.matmul %4, %5, %cst {dimension_numbers = #tpu.dot_dimension_numbers<[1], [0], [0], [1], [0, 0, 1, 1], [], []>} : vector<16x256xbf16>, vector<256x128xbf16>, vector<16x128xf32> -> vector<16x128xf32>
    %7 = arith.addf %3, %6 : vector<16x128xf32>
    %c0_6 = arith.constant 0 : index
    %c0_7 = arith.constant 0 : index
    %8 = vector.load %arg7[%c0_6, %c0_7] : memref<16x128xf32, #tpu.memory_space<vmem>>, vector<16x128xf32>
    tpu.vector_store %arg7[%c0_6, %c0_7], %7 {strides = array<i32>} : memref<16x128xf32, #tpu.memory_space<vmem>>, vector<16x128xf32>,
    %c0_i32_8 = arith.constant 0 : i32
    %9 = arith.cmpi eq, %arg2, %c0_i32_8 : i32
    %10 = arith.extui %9 : i1 to i32
    %c0_i32_9 = arith.constant 0 : i32
    %11 = arith.cmpi ne, %10, %c0_i32_9 : i32
    scf.if %11 {
      %c0_10 = arith.constant 0 : index
      %c0_11 = arith.constant 0 : index
      %12 = vector.load %arg7[%c0_10, %c0_11] : memref<16x128xf32, #tpu.memory_space<vmem>>, vector<16x128xf32>
      %c0_12 = arith.constant 0 : index
      %c0_13 = arith.constant 0 : index
      %13 = vector.load %arg5[%c0_12, %c0_13] : memref<1x128xf32, #tpu.memory_space<vmem>>, vector<1x128xf32>
      %14 = vector.broadcast %13 : vector<1x128xf32> to vector<16x128xf32>
      %15 = arith.addf %12, %14 : vector<16x128xf32>
      %cst_14 = arith.constant 1.000000e-01 : f32
      %16 = vector.broadcast %cst_14 : f32 to vector<16x128xf32>
      %17 = arith.mulf %16, %15 : vector<16x128xf32>
      %18 = arith.maximumf %15, %17 : vector<16x128xf32>
      %19 = arith.truncf %18 : vector<16x128xf32> to vector<16x128xbf16>
      %c0_15 = arith.constant 0 : index
      %c0_16 = arith.constant 0 : index
      %20 = vector.load %arg6[%c0_15, %c0_16] : memref<16x128xbf16, #tpu.memory_space<vmem>>, vector<16x128xbf16>
      tpu.vector_store %arg6[%c0_15, %c0_16], %19 {strides = array<i32>} : memref<16x128xbf16, #tpu.memory_space<vmem>>, vector<16x128xbf16>,
    } else {
    }
    return
  }
  func.func @transform_0(%arg0: i32, %arg1: i32, %arg2: i32) -> (i32, i32) {
    %c0_i32 = arith.constant 0 : i32
    return %arg0, %arg2 : i32, i32
  }
  func.func @transform_1(%arg0: i32, %arg1: i32, %arg2: i32) -> (i32, i32) {
    %c0_i32 = arith.constant 0 : i32
    return %arg2, %arg1 : i32, i32
  }
  func.func @transform_2(%arg0: i32, %arg1: i32, %arg2: i32) -> (i32, i32) {
    %c0_i32 = arith.constant 0 : i32
    %c0_i32_0 = arith.constant 0 : i32
    return %c0_i32, %arg1 : i32, i32
  }
  func.func @transform_3(%arg0: i32, %arg1: i32, %arg2: i32) -> (i32, i32) {
    %c0_i32 = arith.constant 0 : i32
    return %arg0, %arg1 : i32, i32
  }
}

module attributes {stable_mosaic.version = 11 : i64} {
  func.func @kernel(%arg0: i32, %arg1: i32, %arg2: i32, %arg3: memref<16x128xbf16, #tpu.memory_space<vmem>>, %arg4: memref<128x256xbf16, #tpu.memory_space<vmem>>, %arg5: memref<1x256xf32, #tpu.memory_space<vmem>>, %arg6: memref<16x256xbf16, #tpu.memory_space<vmem>>, %arg7: memref<16x256xbf16, #tpu.memory_space<vmem>>, %arg8: memref<16x256xf32, #tpu.memory_space<vmem>>) attributes {dimension_semantics = [#tpu.dimension_semantics<parallel>, #tpu.dimension_semantics<parallel>, #tpu.dimension_semantics<arbitrary>], iteration_bounds = array<i64: 1, 1, 9>, scalar_prefetch = 0 : i64, scratch_operands = 1 : i64, tpu.core_type = #tpu.core_type<tc>, window_params = [{transform_indices = @transform_0, window_bounds = array<i64: 16, 128>}, {transform_indices = @transform_1, window_bounds = array<i64: 128, 256>}, {transform_indices = @transform_2, window_bounds = array<i64: 1, 256>}, {transform_indices = @transform_3, window_bounds = array<i64: 16, 256>}, {transform_indices = @transform_4, window_bounds = array<i64: 16, 256>}]} {
    %c0_i32 = arith.constant 0 : i32
    %0 = arith.cmpi eq, %arg2, %c0_i32 : i32
    %1 = arith.extui %0 : i1 to i32
    %c0_i32_0 = arith.constant 0 : i32
    %2 = arith.cmpi ne, %1, %c0_i32_0 : i32
    scf.if %2 {
      %cst_9 = arith.constant 0.000000e+00 : f32
      %12 = vector.broadcast %cst_9 : f32 to vector<16x256xf32>
      %c0_10 = arith.constant 0 : index
      %c0_11 = arith.constant 0 : index
      %13 = vector.load %arg8[%c0_10, %c0_11] : memref<16x256xf32, #tpu.memory_space<vmem>>, vector<16x256xf32>
      tpu.vector_store %arg8[%c0_10, %c0_11], %12 {strides = array<i32>} : memref<16x256xf32, #tpu.memory_space<vmem>>, vector<16x256xf32>,
    } else {
    }
    %c0 = arith.constant 0 : index
    %c0_1 = arith.constant 0 : index
    %3 = vector.load %arg8[%c0, %c0_1] : memref<16x256xf32, #tpu.memory_space<vmem>>, vector<16x256xf32>
    %c0_2 = arith.constant 0 : index
    %c0_3 = arith.constant 0 : index
    %4 = vector.load %arg3[%c0_2, %c0_3] : memref<16x128xbf16, #tpu.memory_space<vmem>>, vector<16x128xbf16>
    %c0_4 = arith.constant 0 : index
    %c0_5 = arith.constant 0 : index
    %5 = vector.load %arg4[%c0_4, %c0_5] : memref<128x256xbf16, #tpu.memory_space<vmem>>, vector<128x256xbf16>
    %cst = arith.constant dense<0.000000e+00> : vector<16x256xf32>
    %6 = tpu.matmul %4, %5, %cst {dimension_numbers = #tpu.dot_dimension_numbers<[1], [0], [0], [1], [0, 0, 1, 1], [], []>} : vector<16x128xbf16>, vector<128x256xbf16>, vector<16x256xf32> -> vector<16x256xf32>
    %7 = arith.addf %3, %6 : vector<16x256xf32>
    %c0_6 = arith.constant 0 : index
    %c0_7 = arith.constant 0 : index
    %8 = vector.load %arg8[%c0_6, %c0_7] : memref<16x256xf32, #tpu.memory_space<vmem>>, vector<16x256xf32>
    tpu.vector_store %arg8[%c0_6, %c0_7], %7 {strides = array<i32>} : memref<16x256xf32, #tpu.memory_space<vmem>>, vector<16x256xf32>,
    %c8_i32 = arith.constant 8 : i32
    %9 = arith.cmpi eq, %arg2, %c8_i32 : i32
    %10 = arith.extui %9 : i1 to i32
    %c0_i32_8 = arith.constant 0 : i32
    %11 = arith.cmpi ne, %10, %c0_i32_8 : i32
    scf.if %11 {
      %c0_9 = arith.constant 0 : index
      %c0_10 = arith.constant 0 : index
      %12 = vector.load %arg8[%c0_9, %c0_10] : memref<16x256xf32, #tpu.memory_space<vmem>>, vector<16x256xf32>
      %c0_11 = arith.constant 0 : index
      %c0_12 = arith.constant 0 : index
      %13 = vector.load %arg5[%c0_11, %c0_12] : memref<1x256xf32, #tpu.memory_space<vmem>>, vector<1x256xf32>
      %14 = vector.broadcast %13 : vector<1x256xf32> to vector<16x256xf32>
      %15 = arith.addf %12, %14 : vector<16x256xf32>
      %cst_13 = arith.constant 1.000000e-01 : f32
      %16 = vector.broadcast %cst_13 : f32 to vector<16x256xf32>
      %17 = arith.mulf %16, %15 : vector<16x256xf32>
      %18 = arith.maximumf %15, %17 : vector<16x256xf32>
      %c0_14 = arith.constant 0 : index
      %c0_15 = arith.constant 0 : index
      %19 = vector.load %arg6[%c0_14, %c0_15] : memref<16x256xbf16, #tpu.memory_space<vmem>>, vector<16x256xbf16>
      %20 = arith.extf %19 : vector<16x256xbf16> to vector<16x256xf32>
      %21 = arith.addf %18, %20 : vector<16x256xf32>
      %22 = arith.truncf %21 : vector<16x256xf32> to vector<16x256xbf16>
      %c0_16 = arith.constant 0 : index
      %c0_17 = arith.constant 0 : index
      %23 = vector.load %arg7[%c0_16, %c0_17] : memref<16x256xbf16, #tpu.memory_space<vmem>>, vector<16x256xbf16>
      tpu.vector_store %arg7[%c0_16, %c0_17], %22 {strides = array<i32>} : memref<16x256xbf16, #tpu.memory_space<vmem>>, vector<16x256xbf16>,
    } else {
    }
    return
  }
  func.func @transform_0(%arg0: i32, %arg1: i32, %arg2: i32) -> (i32, i32) {
    %c0_i32 = arith.constant 0 : i32
    return %arg0, %arg2 : i32, i32
  }
  func.func @transform_1(%arg0: i32, %arg1: i32, %arg2: i32) -> (i32, i32) {
    %c0_i32 = arith.constant 0 : i32
    return %arg2, %arg1 : i32, i32
  }
  func.func @transform_2(%arg0: i32, %arg1: i32, %arg2: i32) -> (i32, i32) {
    %c0_i32 = arith.constant 0 : i32
    %c0_i32_0 = arith.constant 0 : i32
    return %c0_i32, %arg1 : i32, i32
  }
  func.func @transform_3(%arg0: i32, %arg1: i32, %arg2: i32) -> (i32, i32) {
    %c0_i32 = arith.constant 0 : i32
    return %arg0, %arg1 : i32, i32
  }
  func.func @transform_4(%arg0: i32, %arg1: i32, %arg2: i32) -> (i32, i32) {
    %c0_i32 = arith.constant 0 : i32
    return %arg0, %arg1 : i32, i32
  }
}

</mosaic_0001>

<bundles_post_ra>
// kernel: _lambda_.20
= control target key start
LH: loop header
LB: loop body
LE: loop exit
PB: predicated region body
PF: predicated region fallthrough
CT: control target
= control target key end

     0   :  { %s4268_s12 = smov 0   ;;  %s4270_s13 = smov 0   ;;  %s4602_s0 = inlined_call_operand.vmem [shape: bf16[2048,128], index: 0, kind: input, shape index: {}]   ;;  %s4603_s1 = inlined_call_operand.vmem [shape: bf16[128,128], index: 1, kind: input, shape index: {}]   ;;  %s4604_s2 = inlined_call_operand.vmem [shape: f32[1,128], index: 2, kind: input, shape index: {}]   ;;  %s4605_s3 = inlined_call_operand.vmem [shape: bf16[2048,128], index: 3, kind: output, shape index: {}]  }
   0x1   :  { %s4272_s14 = smov 0  }
   0x2 LB: > { %s32_s15 = sadd.s32 1, %s4242_s13  ;;  %p3176_p0 = scmp.ge.s32.totalorder %s4246_s14, 1  ;;  %s4246_s14 = sphi %s4272_s14, %s13_s14   ;;  %s4242_s13 = sphi %s4270_s13, %s4607_s13   ;;  %s4238_s12 = sphi %s4268_s12, %s4606_s12  }
   0x3   : > { %p34_p1 = scmp.ge.s32.totalorder %s32_s15, 2  ;;  %p188_p2 = scmp.lt.s32.totalorder %s4246_s14, 3 }
   0x5   : > { %s4609_s15 = smov (%p34_p1, %s32_s15), 0  ;;  %p189_p3 = pnand %p3176_p0, %p188_p2 }
   0x6   : > { %v4151_v0 = vld [vmem:[%s4603_s1] sm:$0xff] (!%p189_p3)   ;;  %s3177_s18 = sshll.u32 (!%p189_p3), %s4238_s12, 7  ;;  %v4152_v1 = vld [vmem:[%s4603_s1 + $0x8] sm:$0xff] (!%p189_p3)   ;;  %v4153_v2 = vld [vmem:[%s4603_s1 + $0x10] sm:$0xff] (!%p189_p3)  }
   0x7   : > { %192 = sbr.rel (%p189_p3) target bundleno = 384 (0x180), region = 32  ;;  %p230_p4 = scmp.lt.s32.totalorder (!%p189_p3), %s3177_s18, 255  ;;  %3967 = vmatprep.subr.bf16.mxu0 (!%p189_p3), %v4151_v0  ;;  %4111 = vmatprep.subr.bf16.mxu1 (!%p189_p3), %v4151_v0  ;;  %v4154_v3 = vld [vmem:[%s4603_s1 + $0x18] sm:$0xff] (!%p189_p3)   ;;  %v4155_v6 = vld [vmem:[%s4603_s1 + $0x20] sm:$0xff] (!%p189_p3)   ;;  %v4156_v7 = vld [vmem:[%s4603_s1 + $0x28] sm:$0xff] (!%p189_p3)  }
   0x8   : > { %3968 = vmatpush3.bf16.msra.mxu0 (!%p189_p3), %v4151_v0  ;;  %4119 = vmatpush3.bf16.msra.mxu1 (!%p189_p3), %v4151_v0  ;;  %v4157_v8 = vld [vmem:[%s4603_s1 + $0x30] sm:$0xff] (!%p189_p3)   ;;  %v4158_v9 = vld [vmem:[%s4603_s1 + $0x38] sm:$0xff] (!%p189_p3)  }
   0x9   : > { %3969 = vmatprep.subr.bf16.mxu0 (!%p189_p3), %v4152_v1  ;;  %4112 = vmatprep.subr.bf16.mxu1 (!%p189_p3), %v4152_v1 }
   0xc   : > { %3970 = vmatpush3.bf16.msra.mxu0 (!%p189_p3), %v4152_v1  ;;  %4120 = vmatpush3.bf16.msra.mxu1 (!%p189_p3), %v4152_v1 }
   0xd   : > { %3971 = vmatprep.subr.bf16.mxu0 (!%p189_p3), %v4153_v2  ;;  %4113 = vmatprep.subr.bf16.mxu1 (!%p189_p3), %v4153_v2 }
   0xe   : > { %s4611_s18 = smov (!%p230_p4, %s3177_s18), 255 }
   0xf   : > { %s3178_s23 = sshll.u32 %s4611_s18, 2 }
  0x10   : > { %s4303_s26 = scalar_lea.vmem %s4602_s0, %s3178_s23  ;;  %3972 = vmatpush3.bf16.msra.mxu0 %v4153_v2  ;;  %4121 = vmatpush3.bf16.msra.mxu1 %v4153_v2  ;;  %s4402_s17 = scalar_lea.vmem %s4605_s3, %s3178_s23 }
  0x11   : > { %v4159_v4 = vld [vmem:[%s4303_s26] sm:$0xff]   ;;  %3973 = vmatprep.subr.bf16.mxu0 %v4154_v3  ;;  %4114 = vmatprep.subr.bf16.mxu1 %v4154_v3  ;;  %v4161_v10 = vld [vmem:[%s4303_s26 + $0x8] sm:$0xff]   ;;  %v4163_v12 = vld [vmem:[%s4303_s26 + $0x10] sm:$0xff]  }
  0x12   : > { %v4160_v5 = vld [vmem:[%s4303_s26 + $0x100] sm:$0xff]   ;;  %3983 = vmatprep.mubr.bf16.mxu0 %v4159_v4  ;;  %v4162_v11 = vld [vmem:[%s4303_s26 + $0x108] sm:$0xff]   ;;  %v4164_v13 = vld [vmem:[%s4303_s26 + $0x110] sm:$0xff]  }
  0x13   : > { %4047 = vmatprep.mubr.bf16.mxu1 %v4160_v5  ;;  %v4165_v14 = vld [vmem:[%s4303_s26 + $0x18] sm:$0xff]   ;;  %v4167_v16 = vld [vmem:[%s4303_s26 + $0x20] sm:$0xff]   ;;  %v4169_v18 = vld [vmem:[%s4303_s26 + $0x28] sm:$0xff]  }
  0x14   : > { %3974 = vmatpush3.bf16.msra.mxu0 %v4154_v3  ;;  %4122 = vmatpush3.bf16.msra.mxu1 %v4154_v3  ;;  %v4166_v15 = vld [vmem:[%s4303_s26 + $0x118] sm:$0xff]   ;;  %v4168_v17 = vld [vmem:[%s4303_s26 + $0x120] sm:$0xff]   ;;  %v4170_v19 = vld [vmem:[%s4303_s26 + $0x128] sm:$0xff]  }
  0x15   : > { %3975 = vmatprep.subr.bf16.mxu0 %v4155_v6  ;;  %4115 = vmatprep.subr.bf16.mxu1 %v4155_v6  ;;  %v4171_v20 = vld [vmem:[%s4303_s26 + $0x30] sm:$0xff]   ;;  %v4173_v22 = vld [vmem:[%s4303_s26 + $0x38] sm:$0xff]   ;;  %v4175_v24 = vld [vmem:[%s4303_s26 + $0x40] sm:$0xff]  }
  0x16   : > { %v4172_v21 = vld [vmem:[%s4303_s26 + $0x130] sm:$0xff]   ;;  %v4174_v23 = vld [vmem:[%s4303_s26 + $0x138] sm:$0xff]   ;;  %v4176_v25 = vld [vmem:[%s4303_s26 + $0x140] sm:$0xff]  }
  0x17   : > { %v4177_v26 = vld [vmem:[%s4303_s26 + $0x48] sm:$0xff]   ;;  %v4179_v28 = vld [vmem:[%s4303_s26 + $0x50] sm:$0xff]   ;;  %v4181_v30 = vld [vmem:[%s4303_s26 + $0x58] sm:$0xff]  }
  0x18   : > { %3976 = vmatpush3.bf16.msra.mxu0 %v4155_v6  ;;  %4123 = vmatpush3.bf16.msra.mxu1 %v4155_v6  ;;  %v4178_v27 = vld [vmem:[%s4303_s26 + $0x148] sm:$0xff]   ;;  %v4180_v29 = vld [vmem:[%s4303_s26 + $0x150] sm:$0xff]   ;;  %v4182_v31 = vld [vmem:[%s4303_s26 + $0x158] sm:$0xff]  }
  0x19   : > { %3977 = vmatprep.subr.bf16.mxu0 %v4156_v7  ;;  %4116 = vmatprep.subr.bf16.mxu1 %v4156_v7  ;;  %v4183_v32 = vld [vmem:[%s4303_s26 + $0x60] sm:$0xff]   ;;  %v4185_v34 = vld [vmem:[%s4303_s26 + $0x68] sm:$0xff]   ;;  %v4187_v36 = vld [vmem:[%s4303_s26 + $0x70] sm:$0xff]  }
  0x1a   : > { %v4184_v33 = vld [vmem:[%s4303_s26 + $0x160] sm:$0xff]   ;;  %v4186_v35 = vld [vmem:[%s4303_s26 + $0x168] sm:$0xff]   ;;  %v4188_v37 = vld [vmem:[%s4303_s26 + $0x170] sm:$0xff]  }
  0x1b   : > { %v4189_v38 = vld [vmem:[%s4303_s26 + $0x78] sm:$0xff]   ;;  %v4191_v40 = vld [vmem:[%s4303_s26 + $0x80] sm:$0xff]   ;;  %v4193_v42 = vld [vmem:[%s4303_s26 + $0x88] sm:$0xff]  }
  0x1c   : > { %3978 = vmatpush3.bf16.msra.mxu0 %v4156_v7  ;;  %4124 = vmatpush3.bf16.msra.mxu1 %v4156_v7  ;;  %v4190_v39 = vld [vmem:[%s4303_s26 + $0x178] sm:$0xff]   ;;  %v4192_v41 = vld [vmem:[%s4303_s26 + $0x180] sm:$0xff]   ;;  %v4194_v43 = vld [vmem:[%s4303_s26 + $0x188] sm:$0xff]  }
  0x1d   : > { %3979 = vmatprep.subr.bf16.mxu0 %v4157_v8  ;;  %4117 = vmatprep.subr.bf16.mxu1 %v4157_v8  ;;  %v4195_v44 = vld [vmem:[%s4303_s26 + $0x90] sm:$0xff]   ;;  %v4197_v46 = vld [vmem:[%s4303_s26 + $0x98] sm:$0xff]   ;;  %v4199_v48 = vld [vmem:[%s4303_s26 + $0xa0] sm:$0xff]  }
  0x1e   : > { %v4196_v45 = vld [vmem:[%s4303_s26 + $0x190] sm:$0xff]   ;;  %v4198_v47 = vld [vmem:[%s4303_s26 + $0x198] sm:$0xff]   ;;  %v4200_v49 = vld [vmem:[%s4303_s26 + $0x1a0] sm:$0xff]  }
  0x1f   : > { %v4201_v50 = vld [vmem:[%s4303_s26 + $0xa8] sm:$0xff]   ;;  %v4203_v52 = vld [vmem:[%s4303_s26 + $0xb0] sm:$0xff]   ;;  %v4205_v54 = vld [vmem:[%s4303_s26 + $0xb8] sm:$0xff]  }
  0x20   : > { %3980 = vmatpush3.bf16.msra.mxu0 %v4157_v8  ;;  %4125 = vmatpush3.bf16.msra.mxu1 %v4157_v8  ;;  %v4202_v51 = vld [vmem:[%s4303_s26 + $0x1a8] sm:$0xff]   ;;  %v4204_v53 = vld [vmem:[%s4303_s26 + $0x1b0] sm:$0xff]   ;;  %v4206_v55 = vld [vmem:[%s4303_s26 + $0x1b8] sm:$0xff]  }
  0x21   : > { %3981 = vmatprep.subr.bf16.mxu0 %v4158_v9  ;;  %4118 = vmatprep.subr.bf16.mxu1 %v4158_v9  ;;  %v4207_v56 = vld [vmem:[%s4303_s26 + $0xc0] sm:$0xff]   ;;  %v4209_v58 = vld [vmem:[%s4303_s26 + $0xc8] sm:$0xff]   ;;  %v4211_v60 = vld [vmem:[%s4303_s26 + $0xd0] sm:$0xff]  }
  0x22   : > { %v4208_v57 = vld [vmem:[%s4303_s26 + $0x1c0] sm:$0xff]   ;;  %v4210_v59 = vld [vmem:[%s4303_s26 + $0x1c8] sm:$0xff]   ;;  %v4212_v61 = vld [vmem:[%s4303_s26 + $0x1d0] sm:$0xff]  }
  0x23   : > { %v4213_v62 = vld [vmem:[%s4303_s26 + $0xd8] sm:$0xff]   ;;  %v4215_v0 = vld [vmem:[%s4303_s26 + $0xe0] sm:$0xff]   ;;  %v4217_v2 = vld [vmem:[%s4303_s26 + $0xe8] sm:$0xff]  }
  0x24   : > { %3982 = vmatpush3.bf16.msra.mxu0 %v4158_v9  ;;  %4126 = vmatpush3.bf16.msra.mxu1 %v4158_v9  ;;  %v4214_v63 = vld [vmem:[%s4303_s26 + $0x1d8] sm:$0xff]   ;;  %v4216_v1 = vld [vmem:[%s4303_s26 + $0x1e0] sm:$0xff]   ;;  %v4218_v3 = vld [vmem:[%s4303_s26 + $0x1e8] sm:$0xff]  }
  0x25   : > { %v4219_v4 = vld [vmem:[%s4303_s26 + $0xf0] sm:$0xff]   ;;  %v4221_v6 = vld [vmem:[%s4303_s26 + $0xf8] sm:$0xff]   ;;  %v4387_v8 = vld [vmem:[%s4604_s2] ss:$0 sm:$0xff] }
  0x26   : > { %v4220_v5 = vld [vmem:[%s4303_s26 + $0x1f0] sm:$0xff]   ;;  %v4222_v7 = vld [vmem:[%s4303_s26 + $0x1f8] sm:$0xff]  }
  0x27   : > { %3984 = vmatmul.mubr.bf16.vlgmr.msra.gmra.mrb[0].mxu0 %v4161_v10  ;;  %4048 = vmatmul.mubr.bf16.vlgmr.msra.gmra.mrb[0].mxu1 %v4162_v11 }
  0x28   : > { %3987 = vmatprep.mubr.bf16.mxu0 %v4163_v12  ;;  %4051 = vmatprep.mubr.bf16.mxu1 %v4164_v13 }
  0x2f   : > { %3988 = vmatmul.mubr.bf16.gmra.mrb[4].mxu0 %v4165_v14  ;;  %4052 = vmatmul.mubr.bf16.gmra.mrb[4].mxu1 %v4166_v15 }
  0x30   : > { %3991 = vmatprep.mubr.bf16.mxu0 %v4167_v16  ;;  %4055 = vmatprep.mubr.bf16.mxu1 %v4168_v17 }
  0x37   : > { %3992 = vmatmul.mubr.bf16.gmra.mrb[8].mxu0 %v4169_v18  ;;  %4056 = vmatmul.mubr.bf16.gmra.mrb[8].mxu1 %v4170_v19 }
  0x38   : > { %3995 = vmatprep.mubr.bf16.mxu0 %v4171_v20  ;;  %4059 = vmatprep.mubr.bf16.mxu1 %v4172_v21 }
  0x3f   : > { %3996 = vmatmul.mubr.bf16.gmra.mrb[12].mxu0 %v4173_v22  ;;  %4060 = vmatmul.mubr.bf16.gmra.mrb[12].mxu1 %v4174_v23 }
  0x40   : > { %3999 = vmatprep.mubr.bf16.mxu0 %v4175_v24  ;;  %4063 = vmatprep.mubr.bf16.mxu1 %v4176_v25 }
  0x47   : > { %4000 = vmatmul.mubr.bf16.gmra.mrb[16].mxu0 %v4177_v26  ;;  %4064 = vmatmul.mubr.bf16.gmra.mrb[16].mxu1 %v4178_v27 }
  0x48   : > { %4003 = vmatprep.mubr.bf16.mxu0 %v4179_v28  ;;  %4067 = vmatprep.mubr.bf16.mxu1 %v4180_v29 }
  0x4f   : > { %4004 = vmatmul.mubr.bf16.gmra.mrb[20].mxu0 %v4181_v30  ;;  %4068 = vmatmul.mubr.bf16.gmra.mrb[20].mxu1 %v4182_v31 }
  0x50   : > { %4007 = vmatprep.mubr.bf16.mxu0 %v4183_v32  ;;  %4071 = vmatprep.mubr.bf16.mxu1 %v4184_v33 }
  0x57   : > { %4008 = vmatmul.mubr.bf16.gmra.mrb[24].mxu0 %v4185_v34  ;;  %4072 = vmatmul.mubr.bf16.gmra.mrb[24].mxu1 %v4186_v35 }
  0x58   : > { %4011 = vmatprep.mubr.bf16.mxu0 %v4187_v36  ;;  %4075 = vmatprep.mubr.bf16.mxu1 %v4188_v37 }
  0x5f   : > { %4012 = vmatmul.mubr.bf16.gmra.mrb[28].mxu0 %v4189_v38  ;;  %4076 = vmatmul.mubr.bf16.gmra.mrb[28].mxu1 %v4190_v39 }
  0x60   : > { %4015 = vmatprep.mubr.bf16.mxu0 %v4191_v40  ;;  %4079 = vmatprep.mubr.bf16.mxu1 %v4192_v41 }
  0x67   : > { %4016 = vmatmul.mubr.bf16.gmra.mrb[32].mxu0 %v4193_v42  ;;  %4080 = vmatmul.mubr.bf16.gmra.mrb[32].mxu1 %v4194_v43 }
  0x68   : > { %4019 = vmatprep.mubr.bf16.mxu0 %v4195_v44  ;;  %4083 = vmatprep.mubr.bf16.mxu1 %v4196_v45 }
  0x6f   : > { %4020 = vmatmul.mubr.bf16.gmra.mrb[36].mxu0 %v4197_v46  ;;  %4084 = vmatmul.mubr.bf16.gmra.mrb[36].mxu1 %v4198_v47 }
  0x70   : > { %4023 = vmatprep.mubr.bf16.mxu0 %v4199_v48  ;;  %4087 = vmatprep.mubr.bf16.mxu1 %v4200_v49 }
  0x77   : > { %4024 = vmatmul.mubr.bf16.gmra.mrb[40].mxu0 %v4201_v50  ;;  %4088 = vmatmul.mubr.bf16.gmra.mrb[40].mxu1 %v4202_v51 }
  0x78   : > { %4027 = vmatprep.mubr.bf16.mxu0 %v4203_v52  ;;  %4091 = vmatprep.mubr.bf16.mxu1 %v4204_v53 }
  0x7f   : > { %4028 = vmatmul.mubr.bf16.gmra.mrb[44].mxu0 %v4205_v54  ;;  %4092 = vmatmul.mubr.bf16.gmra.mrb[44].mxu1 %v4206_v55 }
  0x80   : > { %4031 = vmatprep.mubr.bf16.mxu0 %v4207_v56  ;;  %4095 = vmatprep.mubr.bf16.mxu1 %v4208_v57 }
  0x87   : > { %4032 = vmatmul.mubr.bf16.gmra.mrb[48].mxu0 %v4209_v58  ;;  %4096 = vmatmul.mubr.bf16.gmra.mrb[48].mxu1 %v4210_v59 }
  0x88   : > { %4035 = vmatprep.mubr.bf16.mxu0 %v4211_v60  ;;  %4099 = vmatprep.mubr.bf16.mxu1 %v4212_v61 }
  0x8f   : > { %4036 = vmatmul.mubr.bf16.gmra.mrb[52].mxu0 %v4213_v62  ;;  %4100 = vmatmul.mubr.bf16.gmra.mrb[52].mxu1 %v4214_v63 }
  0x90   : > { %4039 = vmatprep.mubr.bf16.mxu0 %v4215_v0  ;;  %4103 = vmatprep.mubr.bf16.mxu1 %v4216_v1 }
  0x97   : > { %4040 = vmatmul.mubr.bf16.gmra.mrb[56].mxu0 %v4217_v2  ;;  %4104 = vmatmul.mubr.bf16.gmra.mrb[56].mxu1 %v4218_v3 }
  0x98   : > { %4043 = vmatprep.mubr.bf16.mxu0 %v4219_v4  ;;  %4107 = vmatprep.mubr.bf16.mxu1 %v4220_v5 }
  0x9f   : > { %4044 = vmatmul.mubr.bf16.gmra.mrb[60].mxu0 %v4221_v6  ;;  %4108 = vmatmul.mubr.bf16.gmra.mrb[60].mxu1 %v4222_v7 }
  0xfa   : > { %v3985_v9 = vpop.f32.mrb[0].mxu0  ;;  %v4049_v10 = vpop.f32.mrb[0].mxu1 }
  0xfb   : > { %v2037_v11 = vadd.f32 %v3985_v9, %v4387_v8  ;;  %v2101_v12 = vadd.f32 %v4049_v10, %v4387_v8  ;;  %v1130_v13 = vpop.f32.mrb[1].mxu0  ;;  %v1386_v14 = vpop.f32.mrb[1].mxu1 }
  0xfc   : > { %v2035_v15 = vadd.f32 %v4387_v8, %v1130_v13  ;;  %v2099_v16 = vadd.f32 %v4387_v8, %v1386_v14  ;;  %v3986_v17 = vpop.f32.mrb[2].mxu0  ;;  %v4050_v18 = vpop.f32.mrb[2].mxu1 }
  0xfd   : > { %v2165_v19 = vmul.f32 0.1, %v2037_v11  ;;  %v2229_v20 = vmul.f32 0.1, %v2101_v12  ;;  %v2038_v21 = vadd.f32 %v3986_v17, %v4387_v8  ;;  %v2102_v22 = vadd.f32 %v4050_v18, %v4387_v8  ;;  %v1133_v23 = vpop.f32.mrb[3].mxu0  ;;  %v1389_v24 = vpop.f32.mrb[3].mxu1 }
  0xfe   : > { %v2163_v25 = vmul.f32 0.1, %v2035_v15  ;;  %v2227_v26 = vmul.f32 0.1, %v2099_v16  ;;  %v2036_v27 = vadd.f32 %v4387_v8, %v1133_v23  ;;  %v2100_v28 = vadd.f32 %v4387_v8, %v1389_v24 }
  0xff   : > { %v2166_v29 = vmul.f32 0.1, %v2038_v21  ;;  %v2230_v30 = vmul.f32 0.1, %v2102_v22  ;;  %v2293_v33 = vmax.f32 %v2037_v11, %v2165_v19  ;;  %v2357_v34 = vmax.f32 %v2101_v12, %v2229_v20 }
 0x100   : > { %v2164_v31 = vmul.f32 0.1, %v2036_v27  ;;  %v2228_v32 = vmul.f32 0.1, %v2100_v28  ;;  %v2291_v37 = vmax.f32 %v2035_v15, %v2163_v25  ;;  %v2355_v38 = vmax.f32 %v2099_v16, %v2227_v26 }
 0x101   : > { %v2294_v35 = vmax.f32 %v2038_v21, %v2166_v29  ;;  %v2358_v36 = vmax.f32 %v2102_v22, %v2230_v30 }
 0x102   : > { %v2292_v39 = vmax.f32 %v2036_v27, %v2164_v31  ;;  %v2356_v40 = vmax.f32 %v2100_v28, %v2228_v32  ;;  %v3989_v41 = vpop.f32.mrb[4].mxu0  ;;  %v4053_v42 = vpop.f32.mrb[4].mxu1 }
 0x103   : > { %v3520_v43 = vpack.c.bf16 %v2294_v35, %v2293_v33  ;;  %v3680_v44 = vpack.c.bf16 %v2358_v36, %v2357_v34  ;;  %v2041_v45 = vadd.f32 %v3989_v41, %v4387_v8  ;;  %v2105_v46 = vadd.f32 %v4053_v42, %v4387_v8  ;;  %v1146_v47 = vpop.f32.mrb[5].mxu0  ;;  %v1402_v48 = vpop.f32.mrb[5].mxu1 }
 0x104   : > { %v3515_v49 = vpack.c.bf16 %v2292_v39, %v2291_v37  ;;  %v3675_v50 = vpack.c.bf16 %v2356_v40, %v2355_v38  ;;  %v2039_v51 = vadd.f32 %v4387_v8, %v1146_v47  ;;  %v2103_v52 = vadd.f32 %v4387_v8, %v1402_v48  ;;  %v3990_v53 = vpop.f32.mrb[6].mxu0  ;;  %v4054_v54 = vpop.f32.mrb[6].mxu1 }
 0x105   : > { %3832 = vst [vmem:[%s4402_s17 + $0x8] sm:$0xff] %v3520_v43   ;;  %3864 = vst [vmem:[%s4402_s17 + $0x108] sm:$0xff] %v3680_v44   ;;  %v2169_v55 = vmul.f32 0.1, %v2041_v45  ;;  %v2233_v56 = vmul.f32 0.1, %v2105_v46  ;;  %v2042_v57 = vadd.f32 %v3990_v53, %v4387_v8  ;;  %v2106_v58 = vadd.f32 %v4054_v54, %v4387_v8 }
 0x106   : > { %v1149_v59 = vpop.f32.mrb[7].mxu0  ;;  %v1405_v60 = vpop.f32.mrb[7].mxu1  ;;  %3516 = vst [vmem:[%s4402_s17] sm:$0xff] %v3515_v49   ;;  %3863 = vst [vmem:[%s4402_s17 + $0x100] sm:$0xff] %v3675_v50   ;;  %v2167_v61 = vmul.f32 0.1, %v2039_v51 }
 0x107   : > { %v2231_v62 = vmul.f32 0.1, %v2103_v52  ;;  %v2040_v63 = vadd.f32 %v4387_v8, %v1149_v59  ;;  %v2104_v0 = vadd.f32 %v4387_v8, %v1405_v60  ;;  %v2170_v1 = vmul.f32 0.1, %v2042_v57 }
 0x108   : > { %v2234_v2 = vmul.f32 0.1, %v2106_v58  ;;  %v2297_v5 = vmax.f32 %v2041_v45, %v2169_v55  ;;  %v2361_v6 = vmax.f32 %v2105_v46, %v2233_v56  ;;  %v2295_v10 = vmax.f32 %v2039_v51, %v2167_v61 }
 0x109   : > { %v2168_v3 = vmul.f32 0.1, %v2040_v63  ;;  %v2232_v4 = vmul.f32 0.1, %v2104_v0  ;;  %v2298_v7 = vmax.f32 %v2042_v57, %v2170_v1  ;;  %v2359_v11 = vmax.f32 %v2103_v52, %v2231_v62 }
 0x10a   : > { %v2362_v9 = vmax.f32 %v2106_v58, %v2234_v2  ;;  %v3993_v14 = vpop.f32.mrb[8].mxu0  ;;  %v4057_v15 = vpop.f32.mrb[8].mxu1 }
 0x10b   : > { %v2296_v12 = vmax.f32 %v2040_v63, %v2168_v3  ;;  %v2360_v13 = vmax.f32 %v2104_v0, %v2232_v4  ;;  %v3530_v16 = vpack.c.bf16 %v2298_v7, %v2297_v5  ;;  %v2045_v18 = vadd.f32 %v3993_v14, %v4387_v8  ;;  %v1162_v20 = vpop.f32.mrb[9].mxu0  ;;  %v1418_v21 = vpop.f32.mrb[9].mxu1 }
 0x10c   : > { %v3690_v17 = vpack.c.bf16 %v2362_v9, %v2361_v6  ;;  %v2109_v19 = vadd.f32 %v4057_v15, %v4387_v8  ;;  %v2043_v24 = vadd.f32 %v4387_v8, %v1162_v20  ;;  %v2107_v25 = vadd.f32 %v4387_v8, %v1418_v21  ;;  %v3994_v26 = vpop.f32.mrb[10].mxu0  ;;  %v4058_v27 = vpop.f32.mrb[10].mxu1 }
 0x10d   : > { %v3525_v22 = vpack.c.bf16 %v2296_v12, %v2295_v10  ;;  %v3685_v23 = vpack.c.bf16 %v2360_v13, %v2359_v11  ;;  %3834 = vst [vmem:[%s4402_s17 + $0x18] sm:$0xff] %v3530_v16   ;;  %v2173_v28 = vmul.f32 0.1, %v2045_v18  ;;  %v2046_v30 = vadd.f32 %v3994_v26, %v4387_v8  ;;  %v1165_v32 = vpop.f32.mrb[11].mxu0  ;;  %v1421_v33 = vpop.f32.mrb[11].mxu1 }
 0x10e   : > { %3866 = vst [vmem:[%s4402_s17 + $0x118] sm:$0xff] %v3690_v17   ;;  %v2237_v29 = vmul.f32 0.1, %v2109_v19  ;;  %v2110_v31 = vadd.f32 %v4058_v27, %v4387_v8  ;;  %v2171_v34 = vmul.f32 0.1, %v2043_v24  ;;  %v2044_v36 = vadd.f32 %v4387_v8, %v1165_v32 }
 0x10f   : > { %3833 = vst [vmem:[%s4402_s17 + $0x10] sm:$0xff] %v3525_v22   ;;  %3865 = vst [vmem:[%s4402_s17 + $0x110] sm:$0xff] %v3685_v23   ;;  %v2235_v35 = vmul.f32 0.1, %v2107_v25  ;;  %v2108_v37 = vadd.f32 %v4387_v8, %v1421_v33  ;;  %v2174_v38 = vmul.f32 0.1, %v2046_v30  ;;  %v2301_v42 = vmax.f32 %v2045_v18, %v2173_v28 }
 0x110   : > { %v2238_v39 = vmul.f32 0.1, %v2110_v31  ;;  %v2172_v40 = vmul.f32 0.1, %v2044_v36  ;;  %v2365_v43 = vmax.f32 %v2109_v19, %v2237_v29  ;;  %v2299_v46 = vmax.f32 %v2043_v24, %v2171_v34 }
 0x111   : > { %v2236_v41 = vmul.f32 0.1, %v2108_v37  ;;  %v2302_v44 = vmax.f32 %v2046_v30, %v2174_v38  ;;  %v2363_v47 = vmax.f32 %v2107_v25, %v2235_v35 }
 0x112   : > { %v2366_v45 = vmax.f32 %v2110_v31, %v2238_v39  ;;  %v2300_v48 = vmax.f32 %v2044_v36, %v2172_v40  ;;  %v3997_v50 = vpop.f32.mrb[12].mxu0  ;;  %v4061_v51 = vpop.f32.mrb[12].mxu1 }
 0x113   : > { %v2364_v49 = vmax.f32 %v2108_v37, %v2236_v41  ;;  %v3540_v52 = vpack.c.bf16 %v2302_v44, %v2301_v42  ;;  %v2049_v54 = vadd.f32 %v3997_v50, %v4387_v8  ;;  %v2113_v55 = vadd.f32 %v4061_v51, %v4387_v8  ;;  %v1178_v56 = vpop.f32.mrb[13].mxu0  ;;  %v1434_v57 = vpop.f32.mrb[13].mxu1 }
 0x114   : > { %v3700_v53 = vpack.c.bf16 %v2366_v45, %v2365_v43  ;;  %v3535_v58 = vpack.c.bf16 %v2300_v48, %v2299_v46  ;;  %v2047_v60 = vadd.f32 %v4387_v8, %v1178_v56  ;;  %v2111_v61 = vadd.f32 %v4387_v8, %v1434_v57  ;;  %v3998_v62 = vpop.f32.mrb[14].mxu0  ;;  %v4062_v63 = vpop.f32.mrb[14].mxu1 }
 0x115   : > { %v3695_v59 = vpack.c.bf16 %v2364_v49, %v2363_v47  ;;  %3836 = vst [vmem:[%s4402_s17 + $0x28] sm:$0xff] %v3540_v52   ;;  %v2177_v0 = vmul.f32 0.1, %v2049_v54  ;;  %v2241_v1 = vmul.f32 0.1, %v2113_v55  ;;  %v2050_v2 = vadd.f32 %v3998_v62, %v4387_v8  ;;  %v1181_v4 = vpop.f32.mrb[15].mxu0 }
 0x116   : > { %3868 = vst [vmem:[%s4402_s17 + $0x128] sm:$0xff] %v3700_v53   ;;  %v2114_v3 = vadd.f32 %v4062_v63, %v4387_v8  ;;  %v1437_v5 = vpop.f32.mrb[15].mxu1  ;;  %3835 = vst [vmem:[%s4402_s17 + $0x20] sm:$0xff] %v3535_v58   ;;  %v2175_v6 = vmul.f32 0.1, %v2047_v60  ;;  %v2048_v9 = vadd.f32 %v4387_v8, %v1181_v4 }
 0x117   : > { %3867 = vst [vmem:[%s4402_s17 + $0x120] sm:$0xff] %v3695_v59   ;;  %v2239_v7 = vmul.f32 0.1, %v2111_v61  ;;  %v2112_v10 = vadd.f32 %v4387_v8, %v1437_v5  ;;  %v2178_v11 = vmul.f32 0.1, %v2050_v2  ;;  %v2305_v15 = vmax.f32 %v2049_v54, %v2177_v0 }
 0x118   : > { %v2242_v12 = vmul.f32 0.1, %v2114_v3  ;;  %v2176_v13 = vmul.f32 0.1, %v2048_v9  ;;  %v2369_v16 = vmax.f32 %v2113_v55, %v2241_v1  ;;  %v2303_v19 = vmax.f32 %v2047_v60, %v2175_v6 }
 0x119   : > { %v2240_v14 = vmul.f32 0.1, %v2112_v10  ;;  %v2306_v17 = vmax.f32 %v2050_v2, %v2178_v11  ;;  %v2367_v20 = vmax.f32 %v2111_v61, %v2239_v7 }
 0x11a   : > { %v2370_v18 = vmax.f32 %v2114_v3, %v2242_v12  ;;  %v2304_v21 = vmax.f32 %v2048_v9, %v2176_v13  ;;  %v4001_v23 = vpop.f32.mrb[16].mxu0  ;;  %v4065_v24 = vpop.f32.mrb[16].mxu1 }
 0x11b   : > { %v2368_v22 = vmax.f32 %v2112_v10, %v2240_v14  ;;  %v3550_v25 = vpack.c.bf16 %v2306_v17, %v2305_v15  ;;  %v2053_v27 = vadd.f32 %v4001_v23, %v4387_v8  ;;  %v2117_v28 = vadd.f32 %v4065_v24, %v4387_v8  ;;  %v1194_v29 = vpop.f32.mrb[17].mxu0  ;;  %v1450_v30 = vpop.f32.mrb[17].mxu1 }
 0x11c   : > { %v3710_v26 = vpack.c.bf16 %v2370_v18, %v2369_v16  ;;  %v3545_v31 = vpack.c.bf16 %v2304_v21, %v2303_v19  ;;  %v2051_v33 = vadd.f32 %v4387_v8, %v1194_v29  ;;  %v2115_v34 = vadd.f32 %v4387_v8, %v1450_v30  ;;  %v4002_v35 = vpop.f32.mrb[18].mxu0  ;;  %v4066_v36 = vpop.f32.mrb[18].mxu1 }
 0x11d   : > { %v3705_v32 = vpack.c.bf16 %v2368_v22, %v2367_v20  ;;  %3838 = vst [vmem:[%s4402_s17 + $0x38] sm:$0xff] %v3550_v25   ;;  %v2181_v37 = vmul.f32 0.1, %v2053_v27  ;;  %v2245_v38 = vmul.f32 0.1, %v2117_v28  ;;  %v2054_v39 = vadd.f32 %v4002_v35, %v4387_v8  ;;  %v1197_v41 = vpop.f32.mrb[19].mxu0 }
 0x11e   : > { %3870 = vst [vmem:[%s4402_s17 + $0x138] sm:$0xff] %v3710_v26   ;;  %v2118_v40 = vadd.f32 %v4066_v36, %v4387_v8  ;;  %v1453_v42 = vpop.f32.mrb[19].mxu1  ;;  %3837 = vst [vmem:[%s4402_s17 + $0x30] sm:$0xff] %v3545_v31   ;;  %v2179_v43 = vmul.f32 0.1, %v2051_v33  ;;  %v2052_v45 = vadd.f32 %v4387_v8, %v1197_v41 }
 0x11f   : > { %3869 = vst [vmem:[%s4402_s17 + $0x130] sm:$0xff] %v3705_v32   ;;  %v2243_v44 = vmul.f32 0.1, %v2115_v34  ;;  %v2116_v46 = vadd.f32 %v4387_v8, %v1453_v42  ;;  %v2182_v47 = vmul.f32 0.1, %v2054_v39  ;;  %v2309_v51 = vmax.f32 %v2053_v27, %v2181_v37 }
 0x120   : > { %v2246_v48 = vmul.f32 0.1, %v2118_v40  ;;  %v2180_v49 = vmul.f32 0.1, %v2052_v45  ;;  %v2373_v52 = vmax.f32 %v2117_v28, %v2245_v38  ;;  %v2307_v55 = vmax.f32 %v2051_v33, %v2179_v43 }
 0x121   : > { %v2244_v50 = vmul.f32 0.1, %v2116_v46  ;;  %v2310_v53 = vmax.f32 %v2054_v39, %v2182_v47  ;;  %v2371_v56 = vmax.f32 %v2115_v34, %v2243_v44 }
 0x122   : > { %v2374_v54 = vmax.f32 %v2118_v40, %v2246_v48  ;;  %v2308_v57 = vmax.f32 %v2052_v45, %v2180_v49  ;;  %v4005_v59 = vpop.f32.mrb[20].mxu0  ;;  %v4069_v60 = vpop.f32.mrb[20].mxu1 }
 0x123   : > { %v2372_v58 = vmax.f32 %v2116_v46, %v2244_v50  ;;  %v3560_v61 = vpack.c.bf16 %v2310_v53, %v2309_v51  ;;  %v2057_v63 = vadd.f32 %v4005_v59, %v4387_v8  ;;  %v2121_v0 = vadd.f32 %v4069_v60, %v4387_v8  ;;  %v1210_v1 = vpop.f32.mrb[21].mxu0  ;;  %v1466_v2 = vpop.f32.mrb[21].mxu1 }
 0x124   : > { %v3720_v62 = vpack.c.bf16 %v2374_v54, %v2373_v52  ;;  %v3555_v3 = vpack.c.bf16 %v2308_v57, %v2307_v55  ;;  %v2055_v5 = vadd.f32 %v4387_v8, %v1210_v1  ;;  %v2119_v6 = vadd.f32 %v4387_v8, %v1466_v2  ;;  %v4006_v7 = vpop.f32.mrb[22].mxu0  ;;  %v4070_v9 = vpop.f32.mrb[22].mxu1 }
 0x125   : > { %v3715_v4 = vpack.c.bf16 %v2372_v58, %v2371_v56  ;;  %3840 = vst [vmem:[%s4402_s17 + $0x48] sm:$0xff] %v3560_v61   ;;  %v2185_v10 = vmul.f32 0.1, %v2057_v63  ;;  %v2249_v11 = vmul.f32 0.1, %v2121_v0  ;;  %v2058_v12 = vadd.f32 %v4006_v7, %v4387_v8  ;;  %v1213_v14 = vpop.f32.mrb[23].mxu0 }
 0x126   : > { %3872 = vst [vmem:[%s4402_s17 + $0x148] sm:$0xff] %v3720_v62   ;;  %v2122_v13 = vadd.f32 %v4070_v9, %v4387_v8  ;;  %v1469_v15 = vpop.f32.mrb[23].mxu1  ;;  %3839 = vst [vmem:[%s4402_s17 + $0x40] sm:$0xff] %v3555_v3   ;;  %v2183_v16 = vmul.f32 0.1, %v2055_v5  ;;  %v2056_v18 = vadd.f32 %v4387_v8, %v1213_v14 }
 0x127   : > { %3871 = vst [vmem:[%s4402_s17 + $0x140] sm:$0xff] %v3715_v4   ;;  %v2247_v17 = vmul.f32 0.1, %v2119_v6  ;;  %v2120_v19 = vadd.f32 %v4387_v8, %v1469_v15  ;;  %v2186_v20 = vmul.f32 0.1, %v2058_v12  ;;  %v2313_v24 = vmax.f32 %v2057_v63, %v2185_v10 }
 0x128   : > { %v2250_v21 = vmul.f32 0.1, %v2122_v13  ;;  %v2184_v22 = vmul.f32 0.1, %v2056_v18  ;;  %v2377_v25 = vmax.f32 %v2121_v0, %v2249_v11  ;;  %v2311_v28 = vmax.f32 %v2055_v5, %v2183_v16 }
 0x129   : > { %v2248_v23 = vmul.f32 0.1, %v2120_v19  ;;  %v2314_v26 = vmax.f32 %v2058_v12, %v2186_v20  ;;  %v2375_v29 = vmax.f32 %v2119_v6, %v2247_v17 }
 0x12a   : > { %v2378_v27 = vmax.f32 %v2122_v13, %v2250_v21  ;;  %v2312_v30 = vmax.f32 %v2056_v18, %v2184_v22  ;;  %v4009_v32 = vpop.f32.mrb[24].mxu0  ;;  %v4073_v33 = vpop.f32.mrb[24].mxu1 }
 0x12b   : > { %v2376_v31 = vmax.f32 %v2120_v19, %v2248_v23  ;;  %v3570_v34 = vpack.c.bf16 %v2314_v26, %v2313_v24  ;;  %v2061_v36 = vadd.f32 %v4009_v32, %v4387_v8  ;;  %v2125_v37 = vadd.f32 %v4073_v33, %v4387_v8  ;;  %v1226_v38 = vpop.f32.mrb[25].mxu0  ;;  %v1482_v39 = vpop.f32.mrb[25].mxu1 }
 0x12c   : > { %v3730_v35 = vpack.c.bf16 %v2378_v27, %v2377_v25  ;;  %v3565_v40 = vpack.c.bf16 %v2312_v30, %v2311_v28  ;;  %v2059_v42 = vadd.f32 %v4387_v8, %v1226_v38  ;;  %v2123_v43 = vadd.f32 %v4387_v8, %v1482_v39  ;;  %v4010_v44 = vpop.f32.mrb[26].mxu0  ;;  %v4074_v45 = vpop.f32.mrb[26].mxu1 }
 0x12d   : > { %v3725_v41 = vpack.c.bf16 %v2376_v31, %v2375_v29  ;;  %3842 = vst [vmem:[%s4402_s17 + $0x58] sm:$0xff] %v3570_v34   ;;  %v2189_v46 = vmul.f32 0.1, %v2061_v36  ;;  %v2253_v47 = vmul.f32 0.1, %v2125_v37  ;;  %v2062_v48 = vadd.f32 %v4010_v44, %v4387_v8  ;;  %v1229_v50 = vpop.f32.mrb[27].mxu0 }
 0x12e   : > { %3874 = vst [vmem:[%s4402_s17 + $0x158] sm:$0xff] %v3730_v35   ;;  %v2126_v49 = vadd.f32 %v4074_v45, %v4387_v8  ;;  %v1485_v51 = vpop.f32.mrb[27].mxu1  ;;  %3841 = vst [vmem:[%s4402_s17 + $0x50] sm:$0xff] %v3565_v40   ;;  %v2187_v52 = vmul.f32 0.1, %v2059_v42  ;;  %v2060_v54 = vadd.f32 %v4387_v8, %v1229_v50 }
 0x12f   : > { %3873 = vst [vmem:[%s4402_s17 + $0x150] sm:$0xff] %v3725_v41   ;;  %v2251_v53 = vmul.f32 0.1, %v2123_v43  ;;  %v2124_v55 = vadd.f32 %v4387_v8, %v1485_v51  ;;  %v2190_v56 = vmul.f32 0.1, %v2062_v48  ;;  %v2317_v60 = vmax.f32 %v2061_v36, %v2189_v46 }
 0x130   : > { %v2254_v57 = vmul.f32 0.1, %v2126_v49  ;;  %v2188_v58 = vmul.f32 0.1, %v2060_v54  ;;  %v2381_v61 = vmax.f32 %v2125_v37, %v2253_v47  ;;  %v2315_v0 = vmax.f32 %v2059_v42, %v2187_v52 }
 0x131   : > { %v2252_v59 = vmul.f32 0.1, %v2124_v55  ;;  %v2318_v62 = vmax.f32 %v2062_v48, %v2190_v56  ;;  %v2379_v1 = vmax.f32 %v2123_v43, %v2251_v53 }
 0x132   : > { %v2382_v63 = vmax.f32 %v2126_v49, %v2254_v57  ;;  %v2316_v2 = vmax.f32 %v2060_v54, %v2188_v58  ;;  %v4013_v4 = vpop.f32.mrb[28].mxu0  ;;  %v4077_v5 = vpop.f32.mrb[28].mxu1 }
 0x133   : > { %v2380_v3 = vmax.f32 %v2124_v55, %v2252_v59  ;;  %v3580_v6 = vpack.c.bf16 %v2318_v62, %v2317_v60  ;;  %v2065_v9 = vadd.f32 %v4013_v4, %v4387_v8  ;;  %v2129_v10 = vadd.f32 %v4077_v5, %v4387_v8  ;;  %v1242_v11 = vpop.f32.mrb[29].mxu0  ;;  %v1498_v12 = vpop.f32.mrb[29].mxu1 }
 0x134   : > { %v3740_v7 = vpack.c.bf16 %v2382_v63, %v2381_v61  ;;  %v3575_v13 = vpack.c.bf16 %v2316_v2, %v2315_v0  ;;  %v2063_v15 = vadd.f32 %v4387_v8, %v1242_v11  ;;  %v2127_v16 = vadd.f32 %v4387_v8, %v1498_v12  ;;  %v4014_v17 = vpop.f32.mrb[30].mxu0  ;;  %v4078_v18 = vpop.f32.mrb[30].mxu1 }
 0x135   : > { %v3735_v14 = vpack.c.bf16 %v2380_v3, %v2379_v1  ;;  %3844 = vst [vmem:[%s4402_s17 + $0x68] sm:$0xff] %v3580_v6   ;;  %v2193_v19 = vmul.f32 0.1, %v2065_v9  ;;  %v2257_v20 = vmul.f32 0.1, %v2129_v10  ;;  %v2066_v21 = vadd.f32 %v4014_v17, %v4387_v8  ;;  %v1245_v23 = vpop.f32.mrb[31].mxu0 }
 0x136   : > { %3876 = vst [vmem:[%s4402_s17 + $0x168] sm:$0xff] %v3740_v7   ;;  %v2130_v22 = vadd.f32 %v4078_v18, %v4387_v8  ;;  %v1501_v24 = vpop.f32.mrb[31].mxu1  ;;  %3843 = vst [vmem:[%s4402_s17 + $0x60] sm:$0xff] %v3575_v13   ;;  %v2191_v25 = vmul.f32 0.1, %v2063_v15  ;;  %v2064_v27 = vadd.f32 %v4387_v8, %v1245_v23 }
 0x137   : > { %3875 = vst [vmem:[%s4402_s17 + $0x160] sm:$0xff] %v3735_v14   ;;  %v2255_v26 = vmul.f32 0.1, %v2127_v16  ;;  %v2128_v28 = vadd.f32 %v4387_v8, %v1501_v24  ;;  %v2194_v29 = vmul.f32 0.1, %v2066_v21  ;;  %v2321_v33 = vmax.f32 %v2065_v9, %v2193_v19 }
 0x138   : > { %v2258_v30 = vmul.f32 0.1, %v2130_v22  ;;  %v2192_v31 = vmul.f32 0.1, %v2064_v27  ;;  %v2385_v34 = vmax.f32 %v2129_v10, %v2257_v20  ;;  %v2319_v37 = vmax.f32 %v2063_v15, %v2191_v25 }
 0x139   : > { %v2256_v32 = vmul.f32 0.1, %v2128_v28  ;;  %v2322_v35 = vmax.f32 %v2066_v21, %v2194_v29  ;;  %v2383_v38 = vmax.f32 %v2127_v16, %v2255_v26 }
 0x13a   : > { %v2386_v36 = vmax.f32 %v2130_v22, %v2258_v30  ;;  %v2320_v39 = vmax.f32 %v2064_v27, %v2192_v31  ;;  %v4017_v41 = vpop.f32.mrb[32].mxu0  ;;  %v4081_v42 = vpop.f32.mrb[32].mxu1 }
 0x13b   : > { %v2384_v40 = vmax.f32 %v2128_v28, %v2256_v32  ;;  %v3590_v43 = vpack.c.bf16 %v2322_v35, %v2321_v33  ;;  %v2069_v45 = vadd.f32 %v4017_v41, %v4387_v8  ;;  %v2133_v46 = vadd.f32 %v4081_v42, %v4387_v8  ;;  %v1258_v47 = vpop.f32.mrb[33].mxu0  ;;  %v1514_v48 = vpop.f32.mrb[33].mxu1 }
 0x13c   : > { %v3750_v44 = vpack.c.bf16 %v2386_v36, %v2385_v34  ;;  %v3585_v49 = vpack.c.bf16 %v2320_v39, %v2319_v37  ;;  %v2067_v51 = vadd.f32 %v4387_v8, %v1258_v47  ;;  %v2131_v52 = vadd.f32 %v4387_v8, %v1514_v48  ;;  %v4018_v53 = vpop.f32.mrb[34].mxu0  ;;  %v4082_v54 = vpop.f32.mrb[34].mxu1 }
 0x13d   : > { %v3745_v50 = vpack.c.bf16 %v2384_v40, %v2383_v38  ;;  %3846 = vst [vmem:[%s4402_s17 + $0x78] sm:$0xff] %v3590_v43   ;;  %v2197_v55 = vmul.f32 0.1, %v2069_v45  ;;  %v2261_v56 = vmul.f32 0.1, %v2133_v46  ;;  %v2070_v57 = vadd.f32 %v4018_v53, %v4387_v8  ;;  %v1261_v59 = vpop.f32.mrb[35].mxu0 }
 0x13e   : > { %3878 = vst [vmem:[%s4402_s17 + $0x178] sm:$0xff] %v3750_v44   ;;  %v2134_v58 = vadd.f32 %v4082_v54, %v4387_v8  ;;  %v1517_v60 = vpop.f32.mrb[35].mxu1  ;;  %3845 = vst [vmem:[%s4402_s17 + $0x70] sm:$0xff] %v3585_v49   ;;  %v2195_v61 = vmul.f32 0.1, %v2067_v51  ;;  %v2068_v63 = vadd.f32 %v4387_v8, %v1261_v59 }
 0x13f   : > { %3877 = vst [vmem:[%s4402_s17 + $0x170] sm:$0xff] %v3745_v50   ;;  %v2259_v62 = vmul.f32 0.1, %v2131_v52  ;;  %v2132_v0 = vadd.f32 %v4387_v8, %v1517_v60  ;;  %v2198_v1 = vmul.f32 0.1, %v2070_v57  ;;  %v2325_v5 = vmax.f32 %v2069_v45, %v2197_v55 }
 0x140   : > { %v2262_v2 = vmul.f32 0.1, %v2134_v58  ;;  %v2196_v3 = vmul.f32 0.1, %v2068_v63  ;;  %v2389_v6 = vmax.f32 %v2133_v46, %v2261_v56  ;;  %v2323_v10 = vmax.f32 %v2067_v51, %v2195_v61 }
 0x141   : > { %v2260_v4 = vmul.f32 0.1, %v2132_v0  ;;  %v2326_v7 = vmax.f32 %v2070_v57, %v2198_v1  ;;  %v2387_v11 = vmax.f32 %v2131_v52, %v2259_v62 }
 0x142   : > { %v2390_v9 = vmax.f32 %v2134_v58, %v2262_v2  ;;  %v2324_v12 = vmax.f32 %v2068_v63, %v2196_v3  ;;  %v4021_v14 = vpop.f32.mrb[36].mxu0  ;;  %v4085_v15 = vpop.f32.mrb[36].mxu1 }
 0x143   : > { %v2388_v13 = vmax.f32 %v2132_v0, %v2260_v4  ;;  %v3600_v16 = vpack.c.bf16 %v2326_v7, %v2325_v5  ;;  %v2073_v18 = vadd.f32 %v4021_v14, %v4387_v8  ;;  %v2137_v19 = vadd.f32 %v4085_v15, %v4387_v8  ;;  %v1274_v20 = vpop.f32.mrb[37].mxu0  ;;  %v1530_v21 = vpop.f32.mrb[37].mxu1 }
 0x144   : > { %v3760_v17 = vpack.c.bf16 %v2390_v9, %v2389_v6  ;;  %v3595_v22 = vpack.c.bf16 %v2324_v12, %v2323_v10  ;;  %v2071_v24 = vadd.f32 %v4387_v8, %v1274_v20  ;;  %v2135_v25 = vadd.f32 %v4387_v8, %v1530_v21  ;;  %v4022_v26 = vpop.f32.mrb[38].mxu0  ;;  %v4086_v27 = vpop.f32.mrb[38].mxu1 }
 0x145   : > { %v3755_v23 = vpack.c.bf16 %v2388_v13, %v2387_v11  ;;  %3848 = vst [vmem:[%s4402_s17 + $0x88] sm:$0xff] %v3600_v16   ;;  %v2201_v28 = vmul.f32 0.1, %v2073_v18  ;;  %v2265_v29 = vmul.f32 0.1, %v2137_v19  ;;  %v2074_v30 = vadd.f32 %v4022_v26, %v4387_v8  ;;  %v1277_v32 = vpop.f32.mrb[39].mxu0 }
 0x146   : > { %3880 = vst [vmem:[%s4402_s17 + $0x188] sm:$0xff] %v3760_v17   ;;  %v2138_v31 = vadd.f32 %v4086_v27, %v4387_v8  ;;  %v1533_v33 = vpop.f32.mrb[39].mxu1  ;;  %3847 = vst [vmem:[%s4402_s17 + $0x80] sm:$0xff] %v3595_v22   ;;  %v2199_v34 = vmul.f32 0.1, %v2071_v24  ;;  %v2072_v36 = vadd.f32 %v4387_v8, %v1277_v32 }
 0x147   : > { %3879 = vst [vmem:[%s4402_s17 + $0x180] sm:$0xff] %v3755_v23   ;;  %v2263_v35 = vmul.f32 0.1, %v2135_v25  ;;  %v2136_v37 = vadd.f32 %v4387_v8, %v1533_v33  ;;  %v2202_v38 = vmul.f32 0.1, %v2074_v30  ;;  %v2329_v42 = vmax.f32 %v2073_v18, %v2201_v28 }
 0x148   : > { %v2266_v39 = vmul.f32 0.1, %v2138_v31  ;;  %v2200_v40 = vmul.f32 0.1, %v2072_v36  ;;  %v2393_v43 = vmax.f32 %v2137_v19, %v2265_v29  ;;  %v2327_v46 = vmax.f32 %v2071_v24, %v2199_v34 }
 0x149   : > { %v2264_v41 = vmul.f32 0.1, %v2136_v37  ;;  %v2330_v44 = vmax.f32 %v2074_v30, %v2202_v38  ;;  %v2391_v47 = vmax.f32 %v2135_v25, %v2263_v35 }
 0x14a   : > { %v2394_v45 = vmax.f32 %v2138_v31, %v2266_v39  ;;  %v2328_v48 = vmax.f32 %v2072_v36, %v2200_v40  ;;  %v4025_v50 = vpop.f32.mrb[40].mxu0  ;;  %v4089_v51 = vpop.f32.mrb[40].mxu1 }
 0x14b   : > { %v2392_v49 = vmax.f32 %v2136_v37, %v2264_v41  ;;  %v3610_v52 = vpack.c.bf16 %v2330_v44, %v2329_v42  ;;  %v2077_v54 = vadd.f32 %v4025_v50, %v4387_v8  ;;  %v2141_v55 = vadd.f32 %v4089_v51, %v4387_v8  ;;  %v1290_v56 = vpop.f32.mrb[41].mxu0  ;;  %v1546_v57 = vpop.f32.mrb[41].mxu1 }
 0x14c   : > { %v3770_v53 = vpack.c.bf16 %v2394_v45, %v2393_v43  ;;  %v3605_v58 = vpack.c.bf16 %v2328_v48, %v2327_v46  ;;  %v2075_v60 = vadd.f32 %v4387_v8, %v1290_v56  ;;  %v2139_v61 = vadd.f32 %v4387_v8, %v1546_v57  ;;  %v4026_v62 = vpop.f32.mrb[42].mxu0  ;;  %v4090_v63 = vpop.f32.mrb[42].mxu1 }
 0x14d   : > { %v3765_v59 = vpack.c.bf16 %v2392_v49, %v2391_v47  ;;  %3850 = vst [vmem:[%s4402_s17 + $0x98] sm:$0xff] %v3610_v52   ;;  %v2205_v0 = vmul.f32 0.1, %v2077_v54  ;;  %v2269_v1 = vmul.f32 0.1, %v2141_v55  ;;  %v2078_v2 = vadd.f32 %v4026_v62, %v4387_v8  ;;  %v1293_v4 = vpop.f32.mrb[43].mxu0 }
 0x14e   : > { %3882 = vst [vmem:[%s4402_s17 + $0x198] sm:$0xff] %v3770_v53   ;;  %v2142_v3 = vadd.f32 %v4090_v63, %v4387_v8  ;;  %v1549_v5 = vpop.f32.mrb[43].mxu1  ;;  %3849 = vst [vmem:[%s4402_s17 + $0x90] sm:$0xff] %v3605_v58   ;;  %v2203_v6 = vmul.f32 0.1, %v2075_v60  ;;  %v2076_v9 = vadd.f32 %v4387_v8, %v1293_v4 }
 0x14f   : > { %3881 = vst [vmem:[%s4402_s17 + $0x190] sm:$0xff] %v3765_v59   ;;  %v2267_v7 = vmul.f32 0.1, %v2139_v61  ;;  %v2140_v10 = vadd.f32 %v4387_v8, %v1549_v5  ;;  %v2206_v11 = vmul.f32 0.1, %v2078_v2  ;;  %v2333_v15 = vmax.f32 %v2077_v54, %v2205_v0 }
 0x150   : > { %v2270_v12 = vmul.f32 0.1, %v2142_v3  ;;  %v2204_v13 = vmul.f32 0.1, %v2076_v9  ;;  %v2397_v16 = vmax.f32 %v2141_v55, %v2269_v1  ;;  %v2331_v19 = vmax.f32 %v2075_v60, %v2203_v6 }
 0x151   : > { %v2268_v14 = vmul.f32 0.1, %v2140_v10  ;;  %v2334_v17 = vmax.f32 %v2078_v2, %v2206_v11  ;;  %v2395_v20 = vmax.f32 %v2139_v61, %v2267_v7 }
 0x152   : > { %v2398_v18 = vmax.f32 %v2142_v3, %v2270_v12  ;;  %v2332_v21 = vmax.f32 %v2076_v9, %v2204_v13  ;;  %v4029_v23 = vpop.f32.mrb[44].mxu0  ;;  %v4093_v24 = vpop.f32.mrb[44].mxu1 }
 0x153   : > { %v2396_v22 = vmax.f32 %v2140_v10, %v2268_v14  ;;  %v3620_v25 = vpack.c.bf16 %v2334_v17, %v2333_v15  ;;  %v2081_v27 = vadd.f32 %v4029_v23, %v4387_v8  ;;  %v2145_v28 = vadd.f32 %v4093_v24, %v4387_v8  ;;  %v1306_v29 = vpop.f32.mrb[45].mxu0  ;;  %v1562_v30 = vpop.f32.mrb[45].mxu1 }
 0x154   : > { %v3780_v26 = vpack.c.bf16 %v2398_v18, %v2397_v16  ;;  %v3615_v31 = vpack.c.bf16 %v2332_v21, %v2331_v19  ;;  %v2079_v33 = vadd.f32 %v4387_v8, %v1306_v29  ;;  %v2143_v34 = vadd.f32 %v4387_v8, %v1562_v30  ;;  %v4030_v35 = vpop.f32.mrb[46].mxu0  ;;  %v4094_v36 = vpop.f32.mrb[46].mxu1 }
 0x155   : > { %v3775_v32 = vpack.c.bf16 %v2396_v22, %v2395_v20  ;;  %3852 = vst [vmem:[%s4402_s17 + $0xa8] sm:$0xff] %v3620_v25   ;;  %v2209_v37 = vmul.f32 0.1, %v2081_v27  ;;  %v2273_v38 = vmul.f32 0.1, %v2145_v28  ;;  %v2082_v39 = vadd.f32 %v4030_v35, %v4387_v8  ;;  %v1309_v41 = vpop.f32.mrb[47].mxu0 }
 0x156   : > { %3884 = vst [vmem:[%s4402_s17 + $0x1a8] sm:$0xff] %v3780_v26   ;;  %v2146_v40 = vadd.f32 %v4094_v36, %v4387_v8  ;;  %v1565_v42 = vpop.f32.mrb[47].mxu1  ;;  %3851 = vst [vmem:[%s4402_s17 + $0xa0] sm:$0xff] %v3615_v31   ;;  %v2207_v43 = vmul.f32 0.1, %v2079_v33  ;;  %v2080_v45 = vadd.f32 %v4387_v8, %v1309_v41 }
 0x157   : > { %3883 = vst [vmem:[%s4402_s17 + $0x1a0] sm:$0xff] %v3775_v32   ;;  %v2271_v44 = vmul.f32 0.1, %v2143_v34  ;;  %v2144_v46 = vadd.f32 %v4387_v8, %v1565_v42  ;;  %v2210_v47 = vmul.f32 0.1, %v2082_v39  ;;  %v2337_v51 = vmax.f32 %v2081_v27, %v2209_v37 }
 0x158   : > { %v2274_v48 = vmul.f32 0.1, %v2146_v40  ;;  %v2208_v49 = vmul.f32 0.1, %v2080_v45  ;;  %v2401_v52 = vmax.f32 %v2145_v28, %v2273_v38  ;;  %v2335_v55 = vmax.f32 %v2079_v33, %v2207_v43 }
 0x159   : > { %v2272_v50 = vmul.f32 0.1, %v2144_v46  ;;  %v2338_v53 = vmax.f32 %v2082_v39, %v2210_v47  ;;  %v2399_v56 = vmax.f32 %v2143_v34, %v2271_v44 }
 0x15a   : > { %v2402_v54 = vmax.f32 %v2146_v40, %v2274_v48  ;;  %v2336_v57 = vmax.f32 %v2080_v45, %v2208_v49  ;;  %v4033_v59 = vpop.f32.mrb[48].mxu0  ;;  %v4097_v60 = vpop.f32.mrb[48].mxu1 }
 0x15b   : > { %v2400_v58 = vmax.f32 %v2144_v46, %v2272_v50  ;;  %v3630_v61 = vpack.c.bf16 %v2338_v53, %v2337_v51  ;;  %v2085_v63 = vadd.f32 %v4033_v59, %v4387_v8  ;;  %v2149_v0 = vadd.f32 %v4097_v60, %v4387_v8  ;;  %v1322_v1 = vpop.f32.mrb[49].mxu0  ;;  %v1578_v2 = vpop.f32.mrb[49].mxu1 }
 0x15c   : > { %v3790_v62 = vpack.c.bf16 %v2402_v54, %v2401_v52  ;;  %v3625_v3 = vpack.c.bf16 %v2336_v57, %v2335_v55  ;;  %v2083_v5 = vadd.f32 %v4387_v8, %v1322_v1  ;;  %v2147_v6 = vadd.f32 %v4387_v8, %v1578_v2  ;;  %v4034_v7 = vpop.f32.mrb[50].mxu0  ;;  %v4098_v9 = vpop.f32.mrb[50].mxu1 }
 0x15d   : > { %v3785_v4 = vpack.c.bf16 %v2400_v58, %v2399_v56  ;;  %3854 = vst [vmem:[%s4402_s17 + $0xb8] sm:$0xff] %v3630_v61   ;;  %v2213_v10 = vmul.f32 0.1, %v2085_v63  ;;  %v2277_v11 = vmul.f32 0.1, %v2149_v0  ;;  %v2086_v12 = vadd.f32 %v4034_v7, %v4387_v8  ;;  %v1325_v14 = vpop.f32.mrb[51].mxu0 }
 0x15e   : > { %3886 = vst [vmem:[%s4402_s17 + $0x1b8] sm:$0xff] %v3790_v62   ;;  %v2150_v13 = vadd.f32 %v4098_v9, %v4387_v8  ;;  %v1581_v15 = vpop.f32.mrb[51].mxu1  ;;  %3853 = vst [vmem:[%s4402_s17 + $0xb0] sm:$0xff] %v3625_v3   ;;  %v2211_v16 = vmul.f32 0.1, %v2083_v5  ;;  %v2084_v18 = vadd.f32 %v4387_v8, %v1325_v14 }
 0x15f   : > { %3885 = vst [vmem:[%s4402_s17 + $0x1b0] sm:$0xff] %v3785_v4   ;;  %v2275_v17 = vmul.f32 0.1, %v2147_v6  ;;  %v2148_v19 = vadd.f32 %v4387_v8, %v1581_v15  ;;  %v2214_v20 = vmul.f32 0.1, %v2086_v12  ;;  %v2341_v24 = vmax.f32 %v2085_v63, %v2213_v10 }
 0x160   : > { %v2278_v21 = vmul.f32 0.1, %v2150_v13  ;;  %v2212_v22 = vmul.f32 0.1, %v2084_v18  ;;  %v2405_v25 = vmax.f32 %v2149_v0, %v2277_v11  ;;  %v2339_v28 = vmax.f32 %v2083_v5, %v2211_v16  ;;  %v4551_v8 = vld [vmem:[%s4604_s2] ss:$0 sm:$0xff] }
 0x161   : > { %v2276_v23 = vmul.f32 0.1, %v2148_v19  ;;  %v2342_v26 = vmax.f32 %v2086_v12, %v2214_v20  ;;  %v2403_v29 = vmax.f32 %v2147_v6, %v2275_v17 }
 0x162   : > { %v2406_v27 = vmax.f32 %v2150_v13, %v2278_v21  ;;  %v2340_v30 = vmax.f32 %v2084_v18, %v2212_v22  ;;  %v4037_v32 = vpop.f32.mrb[52].mxu0  ;;  %v4101_v33 = vpop.f32.mrb[52].mxu1 }
 0x163   : > { %v2404_v31 = vmax.f32 %v2148_v19, %v2276_v23  ;;  %v3640_v34 = vpack.c.bf16 %v2342_v26, %v2341_v24  ;;  %v2089_v36 = vadd.f32 %v4551_v8, %v4037_v32  ;;  %v2153_v37 = vadd.f32 %v4551_v8, %v4101_v33  ;;  %v1338_v38 = vpop.f32.mrb[53].mxu0  ;;  %v1594_v39 = vpop.f32.mrb[53].mxu1 }
 0x164   : > { %v3800_v35 = vpack.c.bf16 %v2406_v27, %v2405_v25  ;;  %v3635_v40 = vpack.c.bf16 %v2340_v30, %v2339_v28  ;;  %v2087_v42 = vadd.f32 %v4551_v8, %v1338_v38  ;;  %v2151_v43 = vadd.f32 %v4551_v8, %v1594_v39  ;;  %v4038_v44 = vpop.f32.mrb[54].mxu0  ;;  %v4102_v45 = vpop.f32.mrb[54].mxu1 }
 0x165   : > { %v3795_v41 = vpack.c.bf16 %v2404_v31, %v2403_v29  ;;  %3856 = vst [vmem:[%s4402_s17 + $0xc8] sm:$0xff] %v3640_v34   ;;  %v2217_v46 = vmul.f32 0.1, %v2089_v36  ;;  %v2281_v47 = vmul.f32 0.1, %v2153_v37  ;;  %v2090_v48 = vadd.f32 %v4551_v8, %v4038_v44  ;;  %v1341_v50 = vpop.f32.mrb[55].mxu0 }
 0x166   : > { %3888 = vst [vmem:[%s4402_s17 + $0x1c8] sm:$0xff] %v3800_v35   ;;  %v2154_v49 = vadd.f32 %v4551_v8, %v4102_v45  ;;  %v1597_v51 = vpop.f32.mrb[55].mxu1  ;;  %3855 = vst [vmem:[%s4402_s17 + $0xc0] sm:$0xff] %v3635_v40   ;;  %v2215_v52 = vmul.f32 0.1, %v2087_v42  ;;  %v2088_v54 = vadd.f32 %v4551_v8, %v1341_v50 }
 0x167   : > { %3887 = vst [vmem:[%s4402_s17 + $0x1c0] sm:$0xff] %v3795_v41   ;;  %v2279_v53 = vmul.f32 0.1, %v2151_v43  ;;  %v2152_v55 = vadd.f32 %v4551_v8, %v1597_v51  ;;  %v2218_v56 = vmul.f32 0.1, %v2090_v48  ;;  %v2345_v60 = vmax.f32 %v2089_v36, %v2217_v46 }
 0x168   : > { %v2282_v57 = vmul.f32 0.1, %v2154_v49  ;;  %v2216_v58 = vmul.f32 0.1, %v2088_v54  ;;  %v2409_v61 = vmax.f32 %v2153_v37, %v2281_v47  ;;  %v2343_v0 = vmax.f32 %v2087_v42, %v2215_v52 }
 0x169   : > { %v2280_v59 = vmul.f32 0.1, %v2152_v55  ;;  %v2346_v62 = vmax.f32 %v2090_v48, %v2218_v56  ;;  %v2407_v1 = vmax.f32 %v2151_v43, %v2279_v53 }
 0x16a   : > { %v2410_v63 = vmax.f32 %v2154_v49, %v2282_v57  ;;  %v2344_v2 = vmax.f32 %v2088_v54, %v2216_v58  ;;  %v4041_v4 = vpop.f32.mrb[56].mxu0  ;;  %v4105_v5 = vpop.f32.mrb[56].mxu1 }
 0x16b   : > { %v2408_v3 = vmax.f32 %v2152_v55, %v2280_v59  ;;  %v3650_v6 = vpack.c.bf16 %v2346_v62, %v2345_v60  ;;  %v2093_v9 = vadd.f32 %v4551_v8, %v4041_v4  ;;  %v2157_v10 = vadd.f32 %v4551_v8, %v4105_v5  ;;  %v1354_v11 = vpop.f32.mrb[57].mxu0  ;;  %v1610_v12 = vpop.f32.mrb[57].mxu1 }
 0x16c   : > { %v3810_v7 = vpack.c.bf16 %v2410_v63, %v2409_v61  ;;  %v3645_v13 = vpack.c.bf16 %v2344_v2, %v2343_v0  ;;  %v2091_v15 = vadd.f32 %v4551_v8, %v1354_v11  ;;  %v2155_v16 = vadd.f32 %v4551_v8, %v1610_v12  ;;  %v4042_v17 = vpop.f32.mrb[58].mxu0  ;;  %v4106_v18 = vpop.f32.mrb[58].mxu1 }
 0x16d   : > { %v3805_v14 = vpack.c.bf16 %v2408_v3, %v2407_v1  ;;  %3858 = vst [vmem:[%s4402_s17 + $0xd8] sm:$0xff] %v3650_v6   ;;  %v2221_v19 = vmul.f32 0.1, %v2093_v9  ;;  %v2285_v20 = vmul.f32 0.1, %v2157_v10  ;;  %v2094_v21 = vadd.f32 %v4551_v8, %v4042_v17  ;;  %v1357_v23 = vpop.f32.mrb[59].mxu0 }
 0x16e   : > { %3890 = vst [vmem:[%s4402_s17 + $0x1d8] sm:$0xff] %v3810_v7   ;;  %v2158_v22 = vadd.f32 %v4551_v8, %v4106_v18  ;;  %v1613_v24 = vpop.f32.mrb[59].mxu1  ;;  %3857 = vst [vmem:[%s4402_s17 + $0xd0] sm:$0xff] %v3645_v13   ;;  %v2219_v25 = vmul.f32 0.1, %v2091_v15  ;;  %v2092_v27 = vadd.f32 %v4551_v8, %v1357_v23 }
 0x16f   : > { %3889 = vst [vmem:[%s4402_s17 + $0x1d0] sm:$0xff] %v3805_v14   ;;  %v2283_v26 = vmul.f32 0.1, %v2155_v16  ;;  %v2156_v28 = vadd.f32 %v4551_v8, %v1613_v24  ;;  %v2222_v29 = vmul.f32 0.1, %v2094_v21  ;;  %v2349_v33 = vmax.f32 %v2093_v9, %v2221_v19 }
 0x170   : > { %v2286_v30 = vmul.f32 0.1, %v2158_v22  ;;  %v2220_v31 = vmul.f32 0.1, %v2092_v27  ;;  %v2413_v34 = vmax.f32 %v2157_v10, %v2285_v20  ;;  %v2347_v37 = vmax.f32 %v2091_v15, %v2219_v25 }
 0x171   : > { %v2284_v32 = vmul.f32 0.1, %v2156_v28  ;;  %v2350_v35 = vmax.f32 %v2094_v21, %v2222_v29  ;;  %v2411_v38 = vmax.f32 %v2155_v16, %v2283_v26 }
 0x172   : > { %v2414_v36 = vmax.f32 %v2158_v22, %v2286_v30  ;;  %v2348_v39 = vmax.f32 %v2092_v27, %v2220_v31  ;;  %v4045_v41 = vpop.f32.mrb[60].mxu0  ;;  %v4109_v42 = vpop.f32.mrb[60].mxu1 }
 0x173   : > { %v2412_v40 = vmax.f32 %v2156_v28, %v2284_v32  ;;  %v3660_v43 = vpack.c.bf16 %v2350_v35, %v2349_v33  ;;  %v2097_v45 = vadd.f32 %v4551_v8, %v4045_v41  ;;  %v2161_v46 = vadd.f32 %v4551_v8, %v4109_v42  ;;  %v1370_v47 = vpop.f32.mrb[61].mxu0  ;;  %v1626_v48 = vpop.f32.mrb[61].mxu1 }
 0x174   : > { %v3820_v44 = vpack.c.bf16 %v2414_v36, %v2413_v34  ;;  %v3655_v49 = vpack.c.bf16 %v2348_v39, %v2347_v37  ;;  %v2095_v51 = vadd.f32 %v4551_v8, %v1370_v47  ;;  %v2159_v52 = vadd.f32 %v4551_v8, %v1626_v48  ;;  %v4046_v53 = vpop.f32.mrb[62].mxu0  ;;  %v4110_v54 = vpop.f32.mrb[62].mxu1 }
 0x175   : > { %v3815_v50 = vpack.c.bf16 %v2412_v40, %v2411_v38  ;;  %3860 = vst [vmem:[%s4402_s17 + $0xe8] sm:$0xff] %v3660_v43   ;;  %v2225_v55 = vmul.f32 0.1, %v2097_v45  ;;  %v2289_v56 = vmul.f32 0.1, %v2161_v46  ;;  %v2098_v57 = vadd.f32 %v4551_v8, %v4046_v53  ;;  %v1373_v59 = vpop.f32.mrb[63].mxu0 }
 0x176   : > { %3892 = vst [vmem:[%s4402_s17 + $0x1e8] sm:$0xff] %v3820_v44   ;;  %v2162_v58 = vadd.f32 %v4551_v8, %v4110_v54  ;;  %v1629_v60 = vpop.f32.mrb[63].mxu1  ;;  %3859 = vst [vmem:[%s4402_s17 + $0xe0] sm:$0xff] %v3655_v49   ;;  %v2223_v61 = vmul.f32 0.1, %v2095_v51  ;;  %v2096_v63 = vadd.f32 %v4551_v8, %v1373_v59 }
 0x177   : > { %3891 = vst [vmem:[%s4402_s17 + $0x1e0] sm:$0xff] %v3815_v50   ;;  %v2287_v62 = vmul.f32 0.1, %v2159_v52  ;;  %v2160_v0 = vadd.f32 %v4551_v8, %v1629_v60  ;;  %v2226_v1 = vmul.f32 0.1, %v2098_v57  ;;  %v2353_v5 = vmax.f32 %v2097_v45, %v2225_v55 }
 0x178   : > { %v2290_v2 = vmul.f32 0.1, %v2162_v58  ;;  %v2224_v3 = vmul.f32 0.1, %v2096_v63  ;;  %v2417_v6 = vmax.f32 %v2161_v46, %v2289_v56  ;;  %v2351_v10 = vmax.f32 %v2095_v51, %v2223_v61 }
 0x179   : > { %v2288_v4 = vmul.f32 0.1, %v2160_v0  ;;  %v2354_v7 = vmax.f32 %v2098_v57, %v2226_v1  ;;  %v2415_v11 = vmax.f32 %v2159_v52, %v2287_v62 }
 0x17a   : > { %v2418_v9 = vmax.f32 %v2162_v58, %v2290_v2  ;;  %v2352_v12 = vmax.f32 %v2096_v63, %v2224_v3 }
 0x17b   : > { %v2416_v13 = vmax.f32 %v2160_v0, %v2288_v4  ;;  %v3670_v14 = vpack.c.bf16 %v2354_v7, %v2353_v5 }
 0x17c   : > { %v3830_v15 = vpack.c.bf16 %v2418_v9, %v2417_v6  ;;  %v3665_v16 = vpack.c.bf16 %v2352_v12, %v2351_v10 }
 0x17d   : > { %v3825_v8 = vpack.c.bf16 %v2416_v13, %v2415_v11  ;;  %3862 = vst [vmem:[%s4402_s17 + $0xf8] sm:$0xff] %v3670_v14  }
 0x17e   : > { %3894 = vst [vmem:[%s4402_s17 + $0x1f8] sm:$0xff] %v3830_v15   ;;  %3861 = vst [vmem:[%s4402_s17 + $0xf0] sm:$0xff] %v3665_v16  }
 0x17f   : > { %3893 = vst [vmem:[%s4402_s17 + $0x1f0] sm:$0xff] %v3825_v8  }
 0x180 PF: > { %s13_s14 = sadd.s32 1, %s4246_s14   ;;  %s4606_s12 = smov %s4242_s13 }
 0x181   : > { %p10_p5 = scmp.ge.s32.totalorder %s13_s14, 4   ;;  %s4607_s13 = smov %s4609_s15 }
 0x183   :  { %12 = sbr.rel (!%p10_p5) target bundleno = 2 (0x2), region = 76 }

// kernel: _lambda_.21
= control target key start
LH: loop header
LB: loop body
LE: loop exit
PB: predicated region body
PF: predicated region fallthrough
CT: control target
= control target key end

     0   :  { %s2315_s1 = inlined_call_operand.vmem [shape: bf16[128,128], index: 1, kind: input, shape index: {}]   ;;  %s2316_s0 = inlined_call_operand.vmem [shape: bf16[512,128], index: 0, kind: input, shape index: {}]   ;;  %s2317_s2 = inlined_call_operand.vmem [shape: f32[1,128], index: 2, kind: input, shape index: {}]   ;;  %s2318_s3 = inlined_call_operand.vmem [shape: bf16[512,128], index: 3, kind: output, shape index: {}]  }
   0x1   :  { %v1970_v0 = vld [vmem:[%s2315_s1] sm:$0xff]   ;;  %v1971_v1 = vld [vmem:[%s2315_s1 + $0x8] sm:$0xff]   ;;  %v1972_v2 = vld [vmem:[%s2315_s1 + $0x10] sm:$0xff]  }
   0x2   :  { %1874 = vmatprep.subr.bf16.mxu0 %v1970_v0  ;;  %1954 = vmatprep.subr.bf16.mxu1 %v1970_v0  ;;  %v1973_v3 = vld [vmem:[%s2315_s1 + $0x18] sm:$0xff]   ;;  %v1978_v4 = vld [vmem:[%s2316_s0] sm:$0xff]   ;;  %v1975_v7 = vld [vmem:[%s2315_s1 + $0x28] sm:$0xff]  }
   0x3   :  { %1875 = vmatpush3.bf16.msra.mxu0 %v1970_v0  ;;  %1962 = vmatpush3.bf16.msra.mxu1 %v1970_v0  ;;  %v1979_v5 = vld [vmem:[%s2316_s0 + $0x80] sm:$0xff]   ;;  %v1976_v8 = vld [vmem:[%s2315_s1 + $0x30] sm:$0xff]   ;;  %v1977_v9 = vld [vmem:[%s2315_s1 + $0x38] sm:$0xff]  }
   0x4   :  { %1876 = vmatprep.subr.bf16.mxu0 %v1971_v1  ;;  %1955 = vmatprep.subr.bf16.mxu1 %v1971_v1  ;;  %v1974_v6 = vld [vmem:[%s2315_s1 + $0x20] sm:$0xff]   ;;  %v1980_v10 = vld [vmem:[%s2316_s0 + $0x8] sm:$0xff]   ;;  %v1982_v12 = vld [vmem:[%s2316_s0 + $0x10] sm:$0xff]  }
   0x5   :  { %1890 = vmatprep.mubr.bf16.mxu0 %v1978_v4  ;;  %1922 = vmatprep.mubr.bf16.mxu1 %v1979_v5  ;;  %v1981_v11 = vld [vmem:[%s2316_s0 + $0x88] sm:$0xff]   ;;  %v1983_v13 = vld [vmem:[%s2316_s0 + $0x90] sm:$0xff]   ;;  %v1984_v14 = vld [vmem:[%s2316_s0 + $0x18] sm:$0xff]  }
   0x6   :  { %v1985_v15 = vld [vmem:[%s2316_s0 + $0x98] sm:$0xff]   ;;  %v1986_v16 = vld [vmem:[%s2316_s0 + $0x20] sm:$0xff]   ;;  %v1988_v18 = vld [vmem:[%s2316_s0 + $0x28] sm:$0xff]  }
   0x7   :  { %1877 = vmatpush3.bf16.msra.mxu0 %v1971_v1  ;;  %1963 = vmatpush3.bf16.msra.mxu1 %v1971_v1  ;;  %v1987_v17 = vld [vmem:[%s2316_s0 + $0xa0] sm:$0xff]   ;;  %v1989_v19 = vld [vmem:[%s2316_s0 + $0xa8] sm:$0xff]   ;;  %v1990_v20 = vld [vmem:[%s2316_s0 + $0x30] sm:$0xff]  }
   0x8   :  { %1878 = vmatprep.subr.bf16.mxu0 %v1972_v2  ;;  %1956 = vmatprep.subr.bf16.mxu1 %v1972_v2  ;;  %v1991_v21 = vld [vmem:[%s2316_s0 + $0xb0] sm:$0xff]   ;;  %v1992_v22 = vld [vmem:[%s2316_s0 + $0x38] sm:$0xff]   ;;  %v1994_v24 = vld [vmem:[%s2316_s0 + $0x40] sm:$0xff]  }
   0x9   :  { %v1993_v23 = vld [vmem:[%s2316_s0 + $0xb8] sm:$0xff]   ;;  %v1995_v25 = vld [vmem:[%s2316_s0 + $0xc0] sm:$0xff]   ;;  %v1996_v26 = vld [vmem:[%s2316_s0 + $0x48] sm:$0xff]  }
   0xa   :  { %v1997_v27 = vld [vmem:[%s2316_s0 + $0xc8] sm:$0xff]   ;;  %v1998_v28 = vld [vmem:[%s2316_s0 + $0x50] sm:$0xff]   ;;  %v2000_v30 = vld [vmem:[%s2316_s0 + $0x58] sm:$0xff]  }
   0xb   :  { %1879 = vmatpush3.bf16.msra.mxu0 %v1972_v2  ;;  %1964 = vmatpush3.bf16.msra.mxu1 %v1972_v2  ;;  %v1999_v29 = vld [vmem:[%s2316_s0 + $0xd0] sm:$0xff]   ;;  %v2001_v31 = vld [vmem:[%s2316_s0 + $0xd8] sm:$0xff]   ;;  %v2002_v32 = vld [vmem:[%s2316_s0 + $0x60] sm:$0xff]  }
   0xc   :  { %1880 = vmatprep.subr.bf16.mxu0 %v1973_v3  ;;  %1957 = vmatprep.subr.bf16.mxu1 %v1973_v3  ;;  %v2003_v33 = vld [vmem:[%s2316_s0 + $0xe0] sm:$0xff]   ;;  %v2004_v34 = vld [vmem:[%s2316_s0 + $0x68] sm:$0xff]   ;;  %v2006_v36 = vld [vmem:[%s2316_s0 + $0x70] sm:$0xff]  }
   0xd   :  { %v2005_v35 = vld [vmem:[%s2316_s0 + $0xe8] sm:$0xff]   ;;  %v2007_v37 = vld [vmem:[%s2316_s0 + $0xf0] sm:$0xff]   ;;  %v2008_v38 = vld [vmem:[%s2316_s0 + $0x78] sm:$0xff]  }
   0xe   :  { %v2009_v39 = vld [vmem:[%s2316_s0 + $0xf8] sm:$0xff]   ;;  %v2153_v40 = vld [vmem:[%s2317_s2] ss:$0 sm:$0xff] }
   0xf   :  { %1881 = vmatpush3.bf16.msra.mxu0 %v1973_v3  ;;  %1965 = vmatpush3.bf16.msra.mxu1 %v1973_v3 }
  0x10   :  { %1882 = vmatprep.subr.bf16.mxu0 %v1974_v6  ;;  %1958 = vmatprep.subr.bf16.mxu1 %v1974_v6 }
  0x13   :  { %1883 = vmatpush3.bf16.msra.mxu0 %v1974_v6  ;;  %1966 = vmatpush3.bf16.msra.mxu1 %v1974_v6 }
  0x14   :  { %1884 = vmatprep.subr.bf16.mxu0 %v1975_v7  ;;  %1959 = vmatprep.subr.bf16.mxu1 %v1975_v7 }
  0x17   :  { %1885 = vmatpush3.bf16.msra.mxu0 %v1975_v7  ;;  %1967 = vmatpush3.bf16.msra.mxu1 %v1975_v7 }
  0x18   :  { %1886 = vmatprep.subr.bf16.mxu0 %v1976_v8  ;;  %1960 = vmatprep.subr.bf16.mxu1 %v1976_v8 }
  0x1b   :  { %1887 = vmatpush3.bf16.msra.mxu0 %v1976_v8  ;;  %1968 = vmatpush3.bf16.msra.mxu1 %v1976_v8 }
  0x1c   :  { %1888 = vmatprep.subr.bf16.mxu0 %v1977_v9  ;;  %1961 = vmatprep.subr.bf16.mxu1 %v1977_v9 }
  0x1f   :  { %1889 = vmatpush3.bf16.msra.mxu0 %v1977_v9  ;;  %1969 = vmatpush3.bf16.msra.mxu1 %v1977_v9 }
  0x22   :  { %1891 = vmatmul.mubr.bf16.vlgmr.msra.gmra.mrb[0].mxu0 %v1980_v10  ;;  %1923 = vmatmul.mubr.bf16.vlgmr.msra.gmra.mrb[0].mxu1 %v1981_v11 }
  0x23   :  { %1894 = vmatprep.mubr.bf16.mxu0 %v1982_v12  ;;  %1926 = vmatprep.mubr.bf16.mxu1 %v1983_v13 }
  0x2a   :  { %1895 = vmatmul.mubr.bf16.gmra.mrb[4].mxu0 %v1984_v14  ;;  %1927 = vmatmul.mubr.bf16.gmra.mrb[4].mxu1 %v1985_v15 }
  0x2b   :  { %1898 = vmatprep.mubr.bf16.mxu0 %v1986_v16  ;;  %1930 = vmatprep.mubr.bf16.mxu1 %v1987_v17 }
  0x32   :  { %1899 = vmatmul.mubr.bf16.gmra.mrb[8].mxu0 %v1988_v18  ;;  %1931 = vmatmul.mubr.bf16.gmra.mrb[8].mxu1 %v1989_v19 }
  0x33   :  { %1902 = vmatprep.mubr.bf16.mxu0 %v1990_v20  ;;  %1934 = vmatprep.mubr.bf16.mxu1 %v1991_v21 }
  0x3a   :  { %1903 = vmatmul.mubr.bf16.gmra.mrb[12].mxu0 %v1992_v22  ;;  %1935 = vmatmul.mubr.bf16.gmra.mrb[12].mxu1 %v1993_v23 }
  0x3b   :  { %1906 = vmatprep.mubr.bf16.mxu0 %v1994_v24  ;;  %1938 = vmatprep.mubr.bf16.mxu1 %v1995_v25 }
  0x42   :  { %1907 = vmatmul.mubr.bf16.gmra.mrb[16].mxu0 %v1996_v26  ;;  %1939 = vmatmul.mubr.bf16.gmra.mrb[16].mxu1 %v1997_v27 }
  0x43   :  { %1910 = vmatprep.mubr.bf16.mxu0 %v1998_v28  ;;  %1942 = vmatprep.mubr.bf16.mxu1 %v1999_v29 }
  0x4a   :  { %1911 = vmatmul.mubr.bf16.gmra.mrb[20].mxu0 %v2000_v30  ;;  %1943 = vmatmul.mubr.bf16.gmra.mrb[20].mxu1 %v2001_v31 }
  0x4b   :  { %1914 = vmatprep.mubr.bf16.mxu0 %v2002_v32  ;;  %1946 = vmatprep.mubr.bf16.mxu1 %v2003_v33 }
  0x52   :  { %1915 = vmatmul.mubr.bf16.gmra.mrb[24].mxu0 %v2004_v34  ;;  %1947 = vmatmul.mubr.bf16.gmra.mrb[24].mxu1 %v2005_v35 }
  0x53   :  { %1918 = vmatprep.mubr.bf16.mxu0 %v2006_v36  ;;  %1950 = vmatprep.mubr.bf16.mxu1 %v2007_v37 }
  0x5a   :  { %1919 = vmatmul.mubr.bf16.gmra.mrb[28].mxu0 %v2008_v38  ;;  %1951 = vmatmul.mubr.bf16.gmra.mrb[28].mxu1 %v2009_v39 }
  0xf5   :  { %v1892_v41 = vpop.f32.mrb[0].mxu0  ;;  %v1924_v42 = vpop.f32.mrb[0].mxu1 }
  0xf6   :  { %v960_v43 = vadd.f32 %v1892_v41, %v2153_v40  ;;  %v992_v44 = vadd.f32 %v1924_v42, %v2153_v40  ;;  %v501_v45 = vpop.f32.mrb[1].mxu0  ;;  %v629_v46 = vpop.f32.mrb[1].mxu1 }
  0xf7   :  { %v958_v47 = vadd.f32 %v2153_v40, %v501_v45  ;;  %v990_v48 = vadd.f32 %v2153_v40, %v629_v46  ;;  %v1893_v49 = vpop.f32.mrb[2].mxu0  ;;  %v1925_v50 = vpop.f32.mrb[2].mxu1 }
  0xf8   :  { %v1024_v51 = vmul.f32 0.1, %v960_v43  ;;  %v1056_v52 = vmul.f32 0.1, %v992_v44  ;;  %v961_v53 = vadd.f32 %v1893_v49, %v2153_v40  ;;  %v993_v54 = vadd.f32 %v1925_v50, %v2153_v40  ;;  %v504_v55 = vpop.f32.mrb[3].mxu0  ;;  %v632_v56 = vpop.f32.mrb[3].mxu1 }
  0xf9   :  { %v1022_v57 = vmul.f32 0.1, %v958_v47  ;;  %v1054_v58 = vmul.f32 0.1, %v990_v48  ;;  %v959_v59 = vadd.f32 %v2153_v40, %v504_v55  ;;  %v991_v60 = vadd.f32 %v2153_v40, %v632_v56 }
  0xfa   :  { %v1025_v61 = vmul.f32 0.1, %v961_v53  ;;  %v1057_v62 = vmul.f32 0.1, %v993_v54  ;;  %v1088_v1 = vmax.f32 %v960_v43, %v1024_v51  ;;  %v1120_v2 = vmax.f32 %v992_v44, %v1056_v52 }
  0xfb   :  { %v1023_v63 = vmul.f32 0.1, %v959_v59  ;;  %v1055_v0 = vmul.f32 0.1, %v991_v60  ;;  %v1086_v5 = vmax.f32 %v958_v47, %v1022_v57  ;;  %v1118_v6 = vmax.f32 %v990_v48, %v1054_v58 }
  0xfc   :  { %v1089_v3 = vmax.f32 %v961_v53, %v1025_v61  ;;  %v1121_v4 = vmax.f32 %v993_v54, %v1057_v62 }
  0xfd   :  { %v1087_v7 = vmax.f32 %v959_v59, %v1023_v63  ;;  %v1119_v8 = vmax.f32 %v991_v60, %v1055_v0  ;;  %v1896_v9 = vpop.f32.mrb[4].mxu0  ;;  %v1928_v10 = vpop.f32.mrb[4].mxu1 }
  0xfe   :  { %v1651_v11 = vpack.c.bf16 %v1089_v3, %v1088_v1  ;;  %v1731_v12 = vpack.c.bf16 %v1121_v4, %v1120_v2  ;;  %v964_v13 = vadd.f32 %v1896_v9, %v2153_v40  ;;  %v996_v14 = vadd.f32 %v1928_v10, %v2153_v40  ;;  %v517_v15 = vpop.f32.mrb[5].mxu0  ;;  %v645_v16 = vpop.f32.mrb[5].mxu1 }
  0xff   :  { %v1646_v17 = vpack.c.bf16 %v1087_v7, %v1086_v5  ;;  %v1726_v18 = vpack.c.bf16 %v1119_v8, %v1118_v6  ;;  %v962_v19 = vadd.f32 %v2153_v40, %v517_v15  ;;  %v994_v20 = vadd.f32 %v2153_v40, %v645_v16  ;;  %v1897_v21 = vpop.f32.mrb[6].mxu0  ;;  %v1929_v22 = vpop.f32.mrb[6].mxu1 }
 0x100   :  { %1803 = vst [vmem:[%s2318_s3 + $0x8] sm:$0xff] %v1651_v11   ;;  %1819 = vst [vmem:[%s2318_s3 + $0x88] sm:$0xff] %v1731_v12   ;;  %v1028_v23 = vmul.f32 0.1, %v964_v13  ;;  %v1060_v24 = vmul.f32 0.1, %v996_v14  ;;  %v965_v25 = vadd.f32 %v1897_v21, %v2153_v40  ;;  %v997_v26 = vadd.f32 %v1929_v22, %v2153_v40 }
 0x101   :  { %v520_v27 = vpop.f32.mrb[7].mxu0  ;;  %v648_v28 = vpop.f32.mrb[7].mxu1  ;;  %1647 = vst [vmem:[%s2318_s3] sm:$0xff] %v1646_v17   ;;  %1818 = vst [vmem:[%s2318_s3 + $0x80] sm:$0xff] %v1726_v18   ;;  %v1026_v29 = vmul.f32 0.1, %v962_v19 }
 0x102   :  { %v1058_v30 = vmul.f32 0.1, %v994_v20  ;;  %v963_v31 = vadd.f32 %v2153_v40, %v520_v27  ;;  %v995_v32 = vadd.f32 %v2153_v40, %v648_v28  ;;  %v1029_v33 = vmul.f32 0.1, %v965_v25 }
 0x103   :  { %v1061_v34 = vmul.f32 0.1, %v997_v26  ;;  %v1092_v37 = vmax.f32 %v964_v13, %v1028_v23  ;;  %v1124_v38 = vmax.f32 %v996_v14, %v1060_v24  ;;  %v1090_v42 = vmax.f32 %v962_v19, %v1026_v29 }
 0x104   :  { %v1027_v35 = vmul.f32 0.1, %v963_v31  ;;  %v1059_v36 = vmul.f32 0.1, %v995_v32  ;;  %v1093_v39 = vmax.f32 %v965_v25, %v1029_v33  ;;  %v1122_v43 = vmax.f32 %v994_v20, %v1058_v30 }
 0x105   :  { %v1125_v41 = vmax.f32 %v997_v26, %v1061_v34  ;;  %v1900_v46 = vpop.f32.mrb[8].mxu0  ;;  %v1932_v47 = vpop.f32.mrb[8].mxu1 }
 0x106   :  { %v1091_v44 = vmax.f32 %v963_v31, %v1027_v35  ;;  %v1123_v45 = vmax.f32 %v995_v32, %v1059_v36  ;;  %v1661_v48 = vpack.c.bf16 %v1093_v39, %v1092_v37  ;;  %v968_v50 = vadd.f32 %v1900_v46, %v2153_v40  ;;  %v533_v52 = vpop.f32.mrb[9].mxu0  ;;  %v661_v53 = vpop.f32.mrb[9].mxu1 }
 0x107   :  { %v1741_v49 = vpack.c.bf16 %v1125_v41, %v1124_v38  ;;  %v1000_v51 = vadd.f32 %v1932_v47, %v2153_v40  ;;  %v966_v56 = vadd.f32 %v2153_v40, %v533_v52  ;;  %v998_v57 = vadd.f32 %v2153_v40, %v661_v53  ;;  %v1901_v58 = vpop.f32.mrb[10].mxu0  ;;  %v1933_v59 = vpop.f32.mrb[10].mxu1 }
 0x108   :  { %v1656_v54 = vpack.c.bf16 %v1091_v44, %v1090_v42  ;;  %v1736_v55 = vpack.c.bf16 %v1123_v45, %v1122_v43  ;;  %1805 = vst [vmem:[%s2318_s3 + $0x18] sm:$0xff] %v1661_v48   ;;  %v1032_v60 = vmul.f32 0.1, %v968_v50  ;;  %v969_v62 = vadd.f32 %v1901_v58, %v2153_v40  ;;  %v536_v0 = vpop.f32.mrb[11].mxu0  ;;  %v664_v1 = vpop.f32.mrb[11].mxu1 }
 0x109   :  { %1821 = vst [vmem:[%s2318_s3 + $0x98] sm:$0xff] %v1741_v49   ;;  %v1064_v61 = vmul.f32 0.1, %v1000_v51  ;;  %v1001_v63 = vadd.f32 %v1933_v59, %v2153_v40  ;;  %v1030_v2 = vmul.f32 0.1, %v966_v56  ;;  %v967_v4 = vadd.f32 %v2153_v40, %v536_v0 }
 0x10a   :  { %1804 = vst [vmem:[%s2318_s3 + $0x10] sm:$0xff] %v1656_v54   ;;  %1820 = vst [vmem:[%s2318_s3 + $0x90] sm:$0xff] %v1736_v55   ;;  %v1062_v3 = vmul.f32 0.1, %v998_v57  ;;  %v999_v5 = vadd.f32 %v2153_v40, %v664_v1  ;;  %v1033_v6 = vmul.f32 0.1, %v969_v62  ;;  %v1096_v10 = vmax.f32 %v968_v50, %v1032_v60 }
 0x10b   :  { %v1065_v7 = vmul.f32 0.1, %v1001_v63  ;;  %v1031_v8 = vmul.f32 0.1, %v967_v4  ;;  %v1128_v11 = vmax.f32 %v1000_v51, %v1064_v61  ;;  %v1094_v14 = vmax.f32 %v966_v56, %v1030_v2 }
 0x10c   :  { %v1063_v9 = vmul.f32 0.1, %v999_v5  ;;  %v1097_v12 = vmax.f32 %v969_v62, %v1033_v6  ;;  %v1126_v15 = vmax.f32 %v998_v57, %v1062_v3 }
 0x10d   :  { %v1129_v13 = vmax.f32 %v1001_v63, %v1065_v7  ;;  %v1095_v16 = vmax.f32 %v967_v4, %v1031_v8  ;;  %v1904_v18 = vpop.f32.mrb[12].mxu0  ;;  %v1936_v19 = vpop.f32.mrb[12].mxu1 }
 0x10e   :  { %v1127_v17 = vmax.f32 %v999_v5, %v1063_v9  ;;  %v1671_v20 = vpack.c.bf16 %v1097_v12, %v1096_v10  ;;  %v972_v22 = vadd.f32 %v1904_v18, %v2153_v40  ;;  %v1004_v23 = vadd.f32 %v1936_v19, %v2153_v40  ;;  %v549_v24 = vpop.f32.mrb[13].mxu0  ;;  %v677_v25 = vpop.f32.mrb[13].mxu1 }
 0x10f   :  { %v1751_v21 = vpack.c.bf16 %v1129_v13, %v1128_v11  ;;  %v1666_v26 = vpack.c.bf16 %v1095_v16, %v1094_v14  ;;  %v970_v28 = vadd.f32 %v2153_v40, %v549_v24  ;;  %v1002_v29 = vadd.f32 %v2153_v40, %v677_v25  ;;  %v1905_v30 = vpop.f32.mrb[14].mxu0  ;;  %v1937_v31 = vpop.f32.mrb[14].mxu1 }
 0x110   :  { %v1746_v27 = vpack.c.bf16 %v1127_v17, %v1126_v15  ;;  %1807 = vst [vmem:[%s2318_s3 + $0x28] sm:$0xff] %v1671_v20   ;;  %v1036_v32 = vmul.f32 0.1, %v972_v22  ;;  %v1068_v33 = vmul.f32 0.1, %v1004_v23  ;;  %v973_v34 = vadd.f32 %v1905_v30, %v2153_v40  ;;  %v552_v36 = vpop.f32.mrb[15].mxu0 }
 0x111   :  { %1823 = vst [vmem:[%s2318_s3 + $0xa8] sm:$0xff] %v1751_v21   ;;  %v1005_v35 = vadd.f32 %v1937_v31, %v2153_v40  ;;  %v680_v37 = vpop.f32.mrb[15].mxu1  ;;  %1806 = vst [vmem:[%s2318_s3 + $0x20] sm:$0xff] %v1666_v26   ;;  %v1034_v38 = vmul.f32 0.1, %v970_v28  ;;  %v971_v41 = vadd.f32 %v2153_v40, %v552_v36 }
 0x112   :  { %1822 = vst [vmem:[%s2318_s3 + $0xa0] sm:$0xff] %v1746_v27   ;;  %v1066_v39 = vmul.f32 0.1, %v1002_v29  ;;  %v1003_v42 = vadd.f32 %v2153_v40, %v680_v37  ;;  %v1037_v43 = vmul.f32 0.1, %v973_v34  ;;  %v1100_v47 = vmax.f32 %v972_v22, %v1036_v32 }
 0x113   :  { %v1069_v44 = vmul.f32 0.1, %v1005_v35  ;;  %v1035_v45 = vmul.f32 0.1, %v971_v41  ;;  %v1132_v48 = vmax.f32 %v1004_v23, %v1068_v33  ;;  %v1098_v51 = vmax.f32 %v970_v28, %v1034_v38 }
 0x114   :  { %v1067_v46 = vmul.f32 0.1, %v1003_v42  ;;  %v1101_v49 = vmax.f32 %v973_v34, %v1037_v43  ;;  %v1130_v52 = vmax.f32 %v1002_v29, %v1066_v39 }
 0x115   :  { %v1133_v50 = vmax.f32 %v1005_v35, %v1069_v44  ;;  %v1099_v53 = vmax.f32 %v971_v41, %v1035_v45  ;;  %v1908_v55 = vpop.f32.mrb[16].mxu0  ;;  %v1940_v56 = vpop.f32.mrb[16].mxu1 }
 0x116   :  { %v1131_v54 = vmax.f32 %v1003_v42, %v1067_v46  ;;  %v1681_v57 = vpack.c.bf16 %v1101_v49, %v1100_v47  ;;  %v976_v59 = vadd.f32 %v1908_v55, %v2153_v40  ;;  %v1008_v60 = vadd.f32 %v1940_v56, %v2153_v40  ;;  %v565_v61 = vpop.f32.mrb[17].mxu0  ;;  %v693_v62 = vpop.f32.mrb[17].mxu1 }
 0x117   :  { %v1761_v58 = vpack.c.bf16 %v1133_v50, %v1132_v48  ;;  %v1676_v63 = vpack.c.bf16 %v1099_v53, %v1098_v51  ;;  %v974_v1 = vadd.f32 %v2153_v40, %v565_v61  ;;  %v1006_v2 = vadd.f32 %v2153_v40, %v693_v62  ;;  %v1909_v3 = vpop.f32.mrb[18].mxu0  ;;  %v1941_v4 = vpop.f32.mrb[18].mxu1 }
 0x118   :  { %v1756_v0 = vpack.c.bf16 %v1131_v54, %v1130_v52  ;;  %1809 = vst [vmem:[%s2318_s3 + $0x38] sm:$0xff] %v1681_v57   ;;  %v1040_v5 = vmul.f32 0.1, %v976_v59  ;;  %v1072_v6 = vmul.f32 0.1, %v1008_v60  ;;  %v977_v7 = vadd.f32 %v1909_v3, %v2153_v40  ;;  %v568_v9 = vpop.f32.mrb[19].mxu0 }
 0x119   :  { %1825 = vst [vmem:[%s2318_s3 + $0xb8] sm:$0xff] %v1761_v58   ;;  %v1009_v8 = vadd.f32 %v1941_v4, %v2153_v40  ;;  %v696_v10 = vpop.f32.mrb[19].mxu1  ;;  %1808 = vst [vmem:[%s2318_s3 + $0x30] sm:$0xff] %v1676_v63   ;;  %v1038_v11 = vmul.f32 0.1, %v974_v1  ;;  %v975_v13 = vadd.f32 %v2153_v40, %v568_v9 }
 0x11a   :  { %1824 = vst [vmem:[%s2318_s3 + $0xb0] sm:$0xff] %v1756_v0   ;;  %v1070_v12 = vmul.f32 0.1, %v1006_v2  ;;  %v1007_v14 = vadd.f32 %v2153_v40, %v696_v10  ;;  %v1041_v15 = vmul.f32 0.1, %v977_v7  ;;  %v1104_v19 = vmax.f32 %v976_v59, %v1040_v5 }
 0x11b   :  { %v1073_v16 = vmul.f32 0.1, %v1009_v8  ;;  %v1039_v17 = vmul.f32 0.1, %v975_v13  ;;  %v1136_v20 = vmax.f32 %v1008_v60, %v1072_v6  ;;  %v1102_v23 = vmax.f32 %v974_v1, %v1038_v11 }
 0x11c   :  { %v1071_v18 = vmul.f32 0.1, %v1007_v14  ;;  %v1105_v21 = vmax.f32 %v977_v7, %v1041_v15  ;;  %v1134_v24 = vmax.f32 %v1006_v2, %v1070_v12 }
 0x11d   :  { %v1137_v22 = vmax.f32 %v1009_v8, %v1073_v16  ;;  %v1103_v25 = vmax.f32 %v975_v13, %v1039_v17  ;;  %v1912_v27 = vpop.f32.mrb[20].mxu0  ;;  %v1944_v28 = vpop.f32.mrb[20].mxu1 }
 0x11e   :  { %v1135_v26 = vmax.f32 %v1007_v14, %v1071_v18  ;;  %v1691_v29 = vpack.c.bf16 %v1105_v21, %v1104_v19  ;;  %v980_v31 = vadd.f32 %v1912_v27, %v2153_v40  ;;  %v1012_v32 = vadd.f32 %v1944_v28, %v2153_v40  ;;  %v581_v33 = vpop.f32.mrb[21].mxu0  ;;  %v709_v34 = vpop.f32.mrb[21].mxu1 }
 0x11f   :  { %v1771_v30 = vpack.c.bf16 %v1137_v22, %v1136_v20  ;;  %v1686_v35 = vpack.c.bf16 %v1103_v25, %v1102_v23  ;;  %v978_v37 = vadd.f32 %v2153_v40, %v581_v33  ;;  %v1010_v38 = vadd.f32 %v2153_v40, %v709_v34  ;;  %v1913_v39 = vpop.f32.mrb[22].mxu0  ;;  %v1945_v41 = vpop.f32.mrb[22].mxu1 }
 0x120   :  { %v1766_v36 = vpack.c.bf16 %v1135_v26, %v1134_v24  ;;  %1811 = vst [vmem:[%s2318_s3 + $0x48] sm:$0xff] %v1691_v29   ;;  %v1044_v42 = vmul.f32 0.1, %v980_v31  ;;  %v1076_v43 = vmul.f32 0.1, %v1012_v32  ;;  %v981_v44 = vadd.f32 %v1913_v39, %v2153_v40  ;;  %v584_v46 = vpop.f32.mrb[23].mxu0 }
 0x121   :  { %1827 = vst [vmem:[%s2318_s3 + $0xc8] sm:$0xff] %v1771_v30   ;;  %v1013_v45 = vadd.f32 %v1945_v41, %v2153_v40  ;;  %v712_v47 = vpop.f32.mrb[23].mxu1  ;;  %1810 = vst [vmem:[%s2318_s3 + $0x40] sm:$0xff] %v1686_v35   ;;  %v1042_v48 = vmul.f32 0.1, %v978_v37  ;;  %v979_v50 = vadd.f32 %v2153_v40, %v584_v46 }
 0x122   :  { %1826 = vst [vmem:[%s2318_s3 + $0xc0] sm:$0xff] %v1766_v36   ;;  %v1074_v49 = vmul.f32 0.1, %v1010_v38  ;;  %v1011_v51 = vadd.f32 %v2153_v40, %v712_v47  ;;  %v1045_v52 = vmul.f32 0.1, %v981_v44  ;;  %v1108_v56 = vmax.f32 %v980_v31, %v1044_v42 }
 0x123   :  { %v1077_v53 = vmul.f32 0.1, %v1013_v45  ;;  %v1043_v54 = vmul.f32 0.1, %v979_v50  ;;  %v1140_v57 = vmax.f32 %v1012_v32, %v1076_v43  ;;  %v1106_v60 = vmax.f32 %v978_v37, %v1042_v48 }
 0x124   :  { %v1075_v55 = vmul.f32 0.1, %v1011_v51  ;;  %v1109_v58 = vmax.f32 %v981_v44, %v1045_v52  ;;  %v1138_v61 = vmax.f32 %v1010_v38, %v1074_v49 }
 0x125   :  { %v1141_v59 = vmax.f32 %v1013_v45, %v1077_v53  ;;  %v1107_v62 = vmax.f32 %v979_v50, %v1043_v54  ;;  %v1916_v0 = vpop.f32.mrb[24].mxu0  ;;  %v1948_v1 = vpop.f32.mrb[24].mxu1 }
 0x126   :  { %v1139_v63 = vmax.f32 %v1011_v51, %v1075_v55  ;;  %v1701_v2 = vpack.c.bf16 %v1109_v58, %v1108_v56  ;;  %v984_v4 = vadd.f32 %v1916_v0, %v2153_v40  ;;  %v1016_v5 = vadd.f32 %v1948_v1, %v2153_v40  ;;  %v597_v6 = vpop.f32.mrb[25].mxu0  ;;  %v725_v7 = vpop.f32.mrb[25].mxu1 }
 0x127   :  { %v1781_v3 = vpack.c.bf16 %v1141_v59, %v1140_v57  ;;  %v1696_v8 = vpack.c.bf16 %v1107_v62, %v1106_v60  ;;  %v982_v10 = vadd.f32 %v2153_v40, %v597_v6  ;;  %v1014_v11 = vadd.f32 %v2153_v40, %v725_v7  ;;  %v1917_v12 = vpop.f32.mrb[26].mxu0  ;;  %v1949_v13 = vpop.f32.mrb[26].mxu1 }
 0x128   :  { %v1776_v9 = vpack.c.bf16 %v1139_v63, %v1138_v61  ;;  %1813 = vst [vmem:[%s2318_s3 + $0x58] sm:$0xff] %v1701_v2   ;;  %v1048_v14 = vmul.f32 0.1, %v984_v4  ;;  %v1080_v15 = vmul.f32 0.1, %v1016_v5  ;;  %v985_v16 = vadd.f32 %v1917_v12, %v2153_v40  ;;  %v600_v18 = vpop.f32.mrb[27].mxu0 }
 0x129   :  { %1829 = vst [vmem:[%s2318_s3 + $0xd8] sm:$0xff] %v1781_v3   ;;  %v1017_v17 = vadd.f32 %v1949_v13, %v2153_v40  ;;  %v728_v19 = vpop.f32.mrb[27].mxu1  ;;  %1812 = vst [vmem:[%s2318_s3 + $0x50] sm:$0xff] %v1696_v8   ;;  %v1046_v20 = vmul.f32 0.1, %v982_v10  ;;  %v983_v22 = vadd.f32 %v2153_v40, %v600_v18 }
 0x12a   :  { %1828 = vst [vmem:[%s2318_s3 + $0xd0] sm:$0xff] %v1776_v9   ;;  %v1078_v21 = vmul.f32 0.1, %v1014_v11  ;;  %v1015_v23 = vadd.f32 %v2153_v40, %v728_v19  ;;  %v1049_v24 = vmul.f32 0.1, %v985_v16  ;;  %v1112_v28 = vmax.f32 %v984_v4, %v1048_v14 }
 0x12b   :  { %v1081_v25 = vmul.f32 0.1, %v1017_v17  ;;  %v1047_v26 = vmul.f32 0.1, %v983_v22  ;;  %v1144_v29 = vmax.f32 %v1016_v5, %v1080_v15  ;;  %v1110_v32 = vmax.f32 %v982_v10, %v1046_v20 }
 0x12c   :  { %v1079_v27 = vmul.f32 0.1, %v1015_v23  ;;  %v1113_v30 = vmax.f32 %v985_v16, %v1049_v24  ;;  %v1142_v33 = vmax.f32 %v1014_v11, %v1078_v21 }
 0x12d   :  { %v1145_v31 = vmax.f32 %v1017_v17, %v1081_v25  ;;  %v1111_v34 = vmax.f32 %v983_v22, %v1047_v26  ;;  %v1920_v36 = vpop.f32.mrb[28].mxu0  ;;  %v1952_v37 = vpop.f32.mrb[28].mxu1 }
 0x12e   :  { %v1143_v35 = vmax.f32 %v1015_v23, %v1079_v27  ;;  %v1711_v38 = vpack.c.bf16 %v1113_v30, %v1112_v28  ;;  %v988_v41 = vadd.f32 %v1920_v36, %v2153_v40  ;;  %v1020_v42 = vadd.f32 %v1952_v37, %v2153_v40  ;;  %v613_v43 = vpop.f32.mrb[29].mxu0  ;;  %v741_v44 = vpop.f32.mrb[29].mxu1 }
 0x12f   :  { %v1791_v39 = vpack.c.bf16 %v1145_v31, %v1144_v29  ;;  %v1706_v45 = vpack.c.bf16 %v1111_v34, %v1110_v32  ;;  %v986_v47 = vadd.f32 %v2153_v40, %v613_v43  ;;  %v1018_v48 = vadd.f32 %v2153_v40, %v741_v44  ;;  %v1921_v49 = vpop.f32.mrb[30].mxu0  ;;  %v1953_v50 = vpop.f32.mrb[30].mxu1 }
 0x130   :  { %v1786_v46 = vpack.c.bf16 %v1143_v35, %v1142_v33  ;;  %1815 = vst [vmem:[%s2318_s3 + $0x68] sm:$0xff] %v1711_v38   ;;  %v1052_v51 = vmul.f32 0.1, %v988_v41  ;;  %v1084_v52 = vmul.f32 0.1, %v1020_v42  ;;  %v989_v53 = vadd.f32 %v1921_v49, %v2153_v40  ;;  %v616_v55 = vpop.f32.mrb[31].mxu0 }
 0x131   :  { %1831 = vst [vmem:[%s2318_s3 + $0xe8] sm:$0xff] %v1791_v39   ;;  %v1021_v54 = vadd.f32 %v1953_v50, %v2153_v40  ;;  %v744_v56 = vpop.f32.mrb[31].mxu1  ;;  %1814 = vst [vmem:[%s2318_s3 + $0x60] sm:$0xff] %v1706_v45   ;;  %v1050_v57 = vmul.f32 0.1, %v986_v47  ;;  %v987_v59 = vadd.f32 %v2153_v40, %v616_v55 }
 0x132   :  { %1830 = vst [vmem:[%s2318_s3 + $0xe0] sm:$0xff] %v1786_v46   ;;  %v1082_v58 = vmul.f32 0.1, %v1018_v48  ;;  %v1019_v60 = vadd.f32 %v2153_v40, %v744_v56  ;;  %v1053_v61 = vmul.f32 0.1, %v989_v53  ;;  %v1116_v1 = vmax.f32 %v988_v41, %v1052_v51 }
 0x133   :  { %v1085_v62 = vmul.f32 0.1, %v1021_v54  ;;  %v1051_v63 = vmul.f32 0.1, %v987_v59  ;;  %v1148_v2 = vmax.f32 %v1020_v42, %v1084_v52  ;;  %v1114_v5 = vmax.f32 %v986_v47, %v1050_v57 }
 0x134   :  { %v1083_v0 = vmul.f32 0.1, %v1019_v60  ;;  %v1117_v3 = vmax.f32 %v989_v53, %v1053_v61  ;;  %v1146_v6 = vmax.f32 %v1018_v48, %v1082_v58 }
 0x135   :  { %v1149_v4 = vmax.f32 %v1021_v54, %v1085_v62  ;;  %v1115_v7 = vmax.f32 %v987_v59, %v1051_v63 }
 0x136   :  { %v1147_v8 = vmax.f32 %v1019_v60, %v1083_v0  ;;  %v1721_v9 = vpack.c.bf16 %v1117_v3, %v1116_v1 }
 0x137   :  { %v1801_v10 = vpack.c.bf16 %v1149_v4, %v1148_v2  ;;  %v1716_v11 = vpack.c.bf16 %v1115_v7, %v1114_v5 }
 0x138   :  { %v1796_v12 = vpack.c.bf16 %v1147_v8, %v1146_v6  ;;  %1817 = vst [vmem:[%s2318_s3 + $0x78] sm:$0xff] %v1721_v9  }
 0x139   :  { %1833 = vst [vmem:[%s2318_s3 + $0xf8] sm:$0xff] %v1801_v10   ;;  %1816 = vst [vmem:[%s2318_s3 + $0x70] sm:$0xff] %v1716_v11  }
 0x13a   :  { %1832 = vst [vmem:[%s2318_s3 + $0xf0] sm:$0xff] %v1796_v12  }

// kernel: _lambda_.23
= control target key start
LH: loop header
LB: loop body
LE: loop exit
PB: predicated region body
PF: predicated region fallthrough
CT: control target
= control target key end

     0   :  { %s3058_s1 = inlined_call_operand.vmem [shape: bf16[128,128], index: 1, kind: input, shape index: {}]   ;;  %s3059_s0 = inlined_call_operand.vmem [shape: bf16[512,128], index: 0, kind: input, shape index: {}]   ;;  %s3060_s3 = inlined_call_operand.vmem [shape: bf16[512,128], index: 3, kind: input, shape index: {}]   ;;  %s3061_s2 = inlined_call_operand.vmem [shape: f32[1,128], index: 2, kind: input, shape index: {}]   ;;  %s3062_s4 = inlined_call_operand.vmem [shape: bf16[512,128], index: 4, kind: output, shape index: {}]  }
   0x1   :  { %v2324_v0 = vld [vmem:[%s3058_s1] sm:$0xff]   ;;  %v2325_v1 = vld [vmem:[%s3058_s1 + $0x8] sm:$0xff]   ;;  %v2326_v2 = vld [vmem:[%s3058_s1 + $0x10] sm:$0xff]  }
   0x2   :  { %2228 = vmatprep.subr.bf16.mxu0 %v2324_v0  ;;  %2308 = vmatprep.subr.bf16.mxu1 %v2324_v0  ;;  %v2327_v3 = vld [vmem:[%s3058_s1 + $0x18] sm:$0xff]   ;;  %v2332_v4 = vld [vmem:[%s3059_s0] sm:$0xff]   ;;  %v2329_v7 = vld [vmem:[%s3058_s1 + $0x28] sm:$0xff]  }
   0x3   :  { %2229 = vmatpush3.bf16.msra.mxu0 %v2324_v0  ;;  %2316 = vmatpush3.bf16.msra.mxu1 %v2324_v0  ;;  %v2333_v5 = vld [vmem:[%s3059_s0 + $0x80] sm:$0xff]   ;;  %v2330_v8 = vld [vmem:[%s3058_s1 + $0x30] sm:$0xff]   ;;  %v2331_v9 = vld [vmem:[%s3058_s1 + $0x38] sm:$0xff]  }
   0x4   :  { %2230 = vmatprep.subr.bf16.mxu0 %v2325_v1  ;;  %2309 = vmatprep.subr.bf16.mxu1 %v2325_v1  ;;  %v2328_v6 = vld [vmem:[%s3058_s1 + $0x20] sm:$0xff]   ;;  %v2334_v10 = vld [vmem:[%s3059_s0 + $0x8] sm:$0xff]   ;;  %v2336_v12 = vld [vmem:[%s3059_s0 + $0x10] sm:$0xff]  }
   0x5   :  { %2244 = vmatprep.mubr.bf16.mxu0 %v2332_v4  ;;  %2276 = vmatprep.mubr.bf16.mxu1 %v2333_v5  ;;  %v2335_v11 = vld [vmem:[%s3059_s0 + $0x88] sm:$0xff]   ;;  %v2337_v13 = vld [vmem:[%s3059_s0 + $0x90] sm:$0xff]   ;;  %v2338_v14 = vld [vmem:[%s3059_s0 + $0x18] sm:$0xff]  }
   0x6   :  { %v2339_v15 = vld [vmem:[%s3059_s0 + $0x98] sm:$0xff]   ;;  %v2340_v16 = vld [vmem:[%s3059_s0 + $0x20] sm:$0xff]   ;;  %v2342_v18 = vld [vmem:[%s3059_s0 + $0x28] sm:$0xff]  }
   0x7   :  { %2231 = vmatpush3.bf16.msra.mxu0 %v2325_v1  ;;  %2317 = vmatpush3.bf16.msra.mxu1 %v2325_v1  ;;  %v2341_v17 = vld [vmem:[%s3059_s0 + $0xa0] sm:$0xff]   ;;  %v2343_v19 = vld [vmem:[%s3059_s0 + $0xa8] sm:$0xff]   ;;  %v2344_v20 = vld [vmem:[%s3059_s0 + $0x30] sm:$0xff]  }
   0x8   :  { %2232 = vmatprep.subr.bf16.mxu0 %v2326_v2  ;;  %2310 = vmatprep.subr.bf16.mxu1 %v2326_v2  ;;  %v2345_v21 = vld [vmem:[%s3059_s0 + $0xb0] sm:$0xff]   ;;  %v2346_v22 = vld [vmem:[%s3059_s0 + $0x38] sm:$0xff]   ;;  %v2348_v24 = vld [vmem:[%s3059_s0 + $0x40] sm:$0xff]  }
   0x9   :  { %v2347_v23 = vld [vmem:[%s3059_s0 + $0xb8] sm:$0xff]   ;;  %v2349_v25 = vld [vmem:[%s3059_s0 + $0xc0] sm:$0xff]   ;;  %v2350_v26 = vld [vmem:[%s3059_s0 + $0x48] sm:$0xff]  }
   0xa   :  { %v2351_v27 = vld [vmem:[%s3059_s0 + $0xc8] sm:$0xff]   ;;  %v2352_v28 = vld [vmem:[%s3059_s0 + $0x50] sm:$0xff]   ;;  %v2354_v30 = vld [vmem:[%s3059_s0 + $0x58] sm:$0xff]  }
   0xb   :  { %2233 = vmatpush3.bf16.msra.mxu0 %v2326_v2  ;;  %2318 = vmatpush3.bf16.msra.mxu1 %v2326_v2  ;;  %v2353_v29 = vld [vmem:[%s3059_s0 + $0xd0] sm:$0xff]   ;;  %v2355_v31 = vld [vmem:[%s3059_s0 + $0xd8] sm:$0xff]   ;;  %v2356_v32 = vld [vmem:[%s3059_s0 + $0x60] sm:$0xff]  }
   0xc   :  { %2234 = vmatprep.subr.bf16.mxu0 %v2327_v3  ;;  %2311 = vmatprep.subr.bf16.mxu1 %v2327_v3  ;;  %v2357_v33 = vld [vmem:[%s3059_s0 + $0xe0] sm:$0xff]   ;;  %v2358_v34 = vld [vmem:[%s3059_s0 + $0x68] sm:$0xff]   ;;  %v2360_v36 = vld [vmem:[%s3059_s0 + $0x70] sm:$0xff]  }
   0xd   :  { %v2359_v35 = vld [vmem:[%s3059_s0 + $0xe8] sm:$0xff]   ;;  %v2361_v37 = vld [vmem:[%s3059_s0 + $0xf0] sm:$0xff]   ;;  %v2362_v38 = vld [vmem:[%s3059_s0 + $0x78] sm:$0xff]  }
   0xe   :  { %v2363_v39 = vld [vmem:[%s3059_s0 + $0xf8] sm:$0xff]   ;;  %v2512_v40 = vld [vmem:[%s3060_s3 + $0x8] sm:$0xff]   ;;  %v2522_v42 = vld [vmem:[%s3060_s3] sm:$0xff]  }
   0xf   :  { %2235 = vmatpush3.bf16.msra.mxu0 %v2327_v3  ;;  %2319 = vmatpush3.bf16.msra.mxu1 %v2327_v3  ;;  %v2517_v41 = vld [vmem:[%s3060_s3 + $0x88] sm:$0xff]   ;;  %v2527_v43 = vld [vmem:[%s3060_s3 + $0x80] sm:$0xff]   ;;  %v2532_v44 = vld [vmem:[%s3060_s3 + $0x18] sm:$0xff]   ;;  %v1844_v47 = vunpack.c.l.bf16 %v2512_v40  ;;  %v1840_v49 = vunpack.c.l.bf16 %v2522_v42  ;;  %v1845_v52 = vunpack.c.h.bf16 %v2512_v40  ;;  %v1841_v54 = vunpack.c.h.bf16 %v2522_v42 }
  0x10   :  { %2236 = vmatprep.subr.bf16.mxu0 %v2328_v6  ;;  %2312 = vmatprep.subr.bf16.mxu1 %v2328_v6  ;;  %v2537_v45 = vld [vmem:[%s3060_s3 + $0x98] sm:$0xff]   ;;  %v2542_v46 = vld [vmem:[%s3060_s3 + $0x10] sm:$0xff]   ;;  %v1908_v48 = vunpack.c.l.bf16 %v2517_v41  ;;  %v1904_v51 = vunpack.c.l.bf16 %v2527_v43  ;;  %v1909_v53 = vunpack.c.h.bf16 %v2517_v41  ;;  %v2559_v55 = vld [vmem:[%s3060_s3 + $0x28] sm:$0xff]   ;;  %v1905_v58 = vunpack.c.h.bf16 %v2527_v43 }
  0x11   :  { %v2550_v50 = vld [vmem:[%s3060_s3 + $0x90] sm:$0xff]   ;;  %v2564_v56 = vld [vmem:[%s3060_s3 + $0xa8] sm:$0xff]   ;;  %v2569_v57 = vld [vmem:[%s3060_s3 + $0x20] sm:$0xff]   ;;  %v1852_v59 = vunpack.c.l.bf16 %v2532_v44 }
  0x12   :  { %v2578_v62 = vld [vmem:[%s3060_s3 + $0xa0] sm:$0xff]   ;;  %v2587_v3 = vld [vmem:[%s3060_s3 + $0x38] sm:$0xff]   ;;  %v2597_v5 = vld [vmem:[%s3060_s3 + $0x30] sm:$0xff]  }
  0x13   :  { %2237 = vmatpush3.bf16.msra.mxu0 %v2328_v6  ;;  %2320 = vmatpush3.bf16.msra.mxu1 %v2328_v6  ;;  %v2592_v4 = vld [vmem:[%s3060_s3 + $0xb8] sm:$0xff]  }
  0x14   :  { %2238 = vmatprep.subr.bf16.mxu0 %v2329_v7  ;;  %2313 = vmatprep.subr.bf16.mxu1 %v2329_v7 }
  0x17   :  { %2239 = vmatpush3.bf16.msra.mxu0 %v2329_v7  ;;  %2321 = vmatpush3.bf16.msra.mxu1 %v2329_v7 }
  0x18   :  { %2240 = vmatprep.subr.bf16.mxu0 %v2330_v8  ;;  %2314 = vmatprep.subr.bf16.mxu1 %v2330_v8 }
  0x1b   :  { %2241 = vmatpush3.bf16.msra.mxu0 %v2330_v8  ;;  %2322 = vmatpush3.bf16.msra.mxu1 %v2330_v8 }
  0x1c   :  { %2242 = vmatprep.subr.bf16.mxu0 %v2331_v9  ;;  %2315 = vmatprep.subr.bf16.mxu1 %v2331_v9 }
  0x1f   :  { %2243 = vmatpush3.bf16.msra.mxu0 %v2331_v9  ;;  %2323 = vmatpush3.bf16.msra.mxu1 %v2331_v9 }
  0x22   :  { %2245 = vmatmul.mubr.bf16.vlgmr.msra.gmra.mrb[0].mxu0 %v2334_v10  ;;  %2277 = vmatmul.mubr.bf16.vlgmr.msra.gmra.mrb[0].mxu1 %v2335_v11  ;;  %v2606_v10 = vld [vmem:[%s3060_s3 + $0xb0] sm:$0xff]  }
  0x23   :  { %2248 = vmatprep.mubr.bf16.mxu0 %v2336_v12  ;;  %2280 = vmatprep.mubr.bf16.mxu1 %v2337_v13 }
  0x2a   :  { %2249 = vmatmul.mubr.bf16.gmra.mrb[4].mxu0 %v2338_v14  ;;  %2281 = vmatmul.mubr.bf16.gmra.mrb[4].mxu1 %v2339_v15  ;;  %v2615_v15 = vld [vmem:[%s3060_s3 + $0x48] sm:$0xff]  }
  0x2b   :  { %2252 = vmatprep.mubr.bf16.mxu0 %v2340_v16  ;;  %2284 = vmatprep.mubr.bf16.mxu1 %v2341_v17  ;;  %v2620_v16 = vld [vmem:[%s3060_s3 + $0xc8] sm:$0xff]   ;;  %v2625_v17 = vld [vmem:[%s3060_s3 + $0x40] sm:$0xff]  }
  0x32   :  { %2253 = vmatmul.mubr.bf16.gmra.mrb[8].mxu0 %v2342_v18  ;;  %2285 = vmatmul.mubr.bf16.gmra.mrb[8].mxu1 %v2343_v19 }
  0x33   :  { %2256 = vmatprep.mubr.bf16.mxu0 %v2344_v20  ;;  %2288 = vmatprep.mubr.bf16.mxu1 %v2345_v21 }
  0x3a   :  { %2257 = vmatmul.mubr.bf16.gmra.mrb[12].mxu0 %v2346_v22  ;;  %2289 = vmatmul.mubr.bf16.gmra.mrb[12].mxu1 %v2347_v23  ;;  %v2634_v22 = vld [vmem:[%s3060_s3 + $0xc0] sm:$0xff]  }
  0x3b   :  { %2260 = vmatprep.mubr.bf16.mxu0 %v2348_v24  ;;  %2292 = vmatprep.mubr.bf16.mxu1 %v2349_v25 }
  0x42   :  { %2261 = vmatmul.mubr.bf16.gmra.mrb[16].mxu0 %v2350_v26  ;;  %2293 = vmatmul.mubr.bf16.gmra.mrb[16].mxu1 %v2351_v27  ;;  %v2643_v27 = vld [vmem:[%s3060_s3 + $0x58] sm:$0xff]  }
  0x43   :  { %2264 = vmatprep.mubr.bf16.mxu0 %v2352_v28  ;;  %2296 = vmatprep.mubr.bf16.mxu1 %v2353_v29  ;;  %v2648_v28 = vld [vmem:[%s3060_s3 + $0xd8] sm:$0xff]   ;;  %v2653_v29 = vld [vmem:[%s3060_s3 + $0x50] sm:$0xff]  }
  0x4a   :  { %2265 = vmatmul.mubr.bf16.gmra.mrb[20].mxu0 %v2354_v30  ;;  %2297 = vmatmul.mubr.bf16.gmra.mrb[20].mxu1 %v2355_v31  ;;  %v2695_v30 = vld [vmem:[%s3060_s3 + $0xe0] sm:$0xff]  }
  0x4b   :  { %2268 = vmatprep.mubr.bf16.mxu0 %v2356_v32  ;;  %2300 = vmatprep.mubr.bf16.mxu1 %v2357_v33  ;;  %v2676_v33 = vld [vmem:[%s3060_s3 + $0xe8] sm:$0xff]  }
  0x52   :  { %2269 = vmatmul.mubr.bf16.gmra.mrb[24].mxu0 %v2358_v34  ;;  %2301 = vmatmul.mubr.bf16.gmra.mrb[24].mxu1 %v2359_v35  ;;  %v2662_v34 = vld [vmem:[%s3060_s3 + $0xd0] sm:$0xff]   ;;  %v2681_v35 = vld [vmem:[%s3060_s3 + $0x60] sm:$0xff]  }
  0x53   :  { %2272 = vmatprep.mubr.bf16.mxu0 %v2360_v36  ;;  %2304 = vmatprep.mubr.bf16.mxu1 %v2361_v37  ;;  %v2686_v37 = vld [vmem:[%s3061_s2] ss:$0 sm:$0xff] }
  0x5a   :  { %2273 = vmatmul.mubr.bf16.gmra.mrb[28].mxu0 %v2362_v38  ;;  %2305 = vmatmul.mubr.bf16.gmra.mrb[28].mxu1 %v2363_v39  ;;  %v2671_v39 = vld [vmem:[%s3060_s3 + $0x68] sm:$0xff]  }
  0xf5   :  { %v2246_v38 = vpop.f32.mrb[0].mxu0  ;;  %v2278_v21 = vpop.f32.mrb[0].mxu1 }
  0xf6   :  { %v963_v19 = vadd.f32 %v2246_v38, %v2686_v37  ;;  %v995_v23 = vadd.f32 %v2278_v21, %v2686_v37  ;;  %v504_v18 = vpop.f32.mrb[1].mxu0  ;;  %v632_v26 = vpop.f32.mrb[1].mxu1 }
  0xf7   :  { %v961_v14 = vadd.f32 %v2686_v37, %v504_v18  ;;  %v993_v36 = vadd.f32 %v2686_v37, %v632_v26  ;;  %v2247_v11 = vpop.f32.mrb[2].mxu0  ;;  %v2279_v32 = vpop.f32.mrb[2].mxu1 }
  0xf8   :  { %v1027_v9 = vmul.f32 0.1, %v963_v19  ;;  %v1059_v38 = vmul.f32 0.1, %v995_v23  ;;  %v964_v21 = vadd.f32 %v2247_v11, %v2686_v37  ;;  %v996_v13 = vadd.f32 %v2279_v32, %v2686_v37  ;;  %v507_v12 = vpop.f32.mrb[3].mxu0  ;;  %v635_v25 = vpop.f32.mrb[3].mxu1 }
  0xf9   :  { %v1025_v8 = vmul.f32 0.1, %v961_v14  ;;  %v1057_v24 = vmul.f32 0.1, %v993_v36  ;;  %v962_v18 = vadd.f32 %v2686_v37, %v507_v12  ;;  %v994_v26 = vadd.f32 %v2686_v37, %v635_v25 }
  0xfa   :  { %v1091_v7 = vmax.f32 %v963_v19, %v1027_v9  ;;  %v1123_v6 = vmax.f32 %v995_v23, %v1059_v38  ;;  %v1028_v2 = vmul.f32 0.1, %v964_v21  ;;  %v1060_v31 = vmul.f32 0.1, %v996_v13 }
  0xfb   :  { %v1089_v1 = vmax.f32 %v961_v14, %v1025_v8  ;;  %v1121_v20 = vmax.f32 %v993_v36, %v1057_v24  ;;  %v1026_v0 = vmul.f32 0.1, %v962_v18  ;;  %v1058_v63 = vmul.f32 0.1, %v994_v26 }
  0xfc   :  { %v1283_v11 = vadd.f32 %v1844_v47, %v1091_v7  ;;  %v1315_v32 = vadd.f32 %v1908_v48, %v1123_v6  ;;  %v1092_v61 = vmax.f32 %v964_v21, %v1028_v2  ;;  %v1124_v60 = vmax.f32 %v996_v13, %v1060_v31 }
  0xfd   :  { %v1281_v12 = vadd.f32 %v1840_v49, %v1089_v1  ;;  %v1313_v9 = vadd.f32 %v1904_v51, %v1121_v20  ;;  %v1090_v19 = vmax.f32 %v962_v18, %v1026_v0  ;;  %v1122_v23 = vmax.f32 %v994_v26, %v1058_v63  ;;  %v2250_v8 = vpop.f32.mrb[4].mxu0  ;;  %v2282_v14 = vpop.f32.mrb[4].mxu1 }
  0xfe   :  { %v1284_v24 = vadd.f32 %v1845_v52, %v1092_v61  ;;  %v1316_v47 = vadd.f32 %v1909_v53, %v1124_v60  ;;  %v967_v48 = vadd.f32 %v2250_v8, %v2686_v37  ;;  %v999_v2 = vadd.f32 %v2282_v14, %v2686_v37  ;;  %v520_v6 = vpop.f32.mrb[5].mxu0  ;;  %v648_v7 = vpop.f32.mrb[5].mxu1 }
  0xff   :  { %v1282_v49 = vadd.f32 %v1841_v54, %v1090_v19  ;;  %v1314_v51 = vadd.f32 %v1905_v58, %v1122_v23  ;;  %v965_v63 = vadd.f32 %v2686_v37, %v520_v6  ;;  %v997_v40 = vadd.f32 %v2686_v37, %v648_v7  ;;  %v2251_v52 = vpop.f32.mrb[6].mxu0  ;;  %v2283_v61 = vpop.f32.mrb[6].mxu1 }
 0x100   :  { %v1974_v41 = vpack.c.bf16 %v1284_v24, %v1283_v11  ;;  %v2054_v53 = vpack.c.bf16 %v1316_v47, %v1315_v32  ;;  %v1031_v60 = vmul.f32 0.1, %v967_v48  ;;  %v1063_v0 = vmul.f32 0.1, %v999_v2  ;;  %v523_v1 = vpop.f32.mrb[7].mxu0  ;;  %v651_v13 = vpop.f32.mrb[7].mxu1 }
 0x101   :  { %v1969_v20 = vpack.c.bf16 %v1282_v49, %v1281_v12  ;;  %v2049_v25 = vpack.c.bf16 %v1314_v51, %v1313_v9  ;;  %v1029_v31 = vmul.f32 0.1, %v965_v63  ;;  %v1061_v42 = vmul.f32 0.1, %v997_v40 }
 0x102   :  { %2157 = vst [vmem:[%s3062_s4 + $0x8] sm:$0xff] %v1974_v41   ;;  %2173 = vst [vmem:[%s3062_s4 + $0x88] sm:$0xff] %v2054_v53   ;;  %v1095_v43 = vmax.f32 %v967_v48, %v1031_v60  ;;  %v1127_v54 = vmax.f32 %v999_v2, %v1063_v0  ;;  %v968_v58 = vadd.f32 %v2251_v52, %v2686_v37  ;;  %v3063_v32 = vunpack.c.l.bf16 %v2537_v45 }
 0x103   :  { %v1000_v36 = vadd.f32 %v2283_v61, %v2686_v37  ;;  %1970 = vst [vmem:[%s3062_s4] sm:$0xff] %v1969_v20   ;;  %2172 = vst [vmem:[%s3062_s4 + $0x80] sm:$0xff] %v2049_v25   ;;  %v1093_v38 = vmax.f32 %v965_v63, %v1029_v31  ;;  %v1125_v21 = vmax.f32 %v997_v40, %v1061_v42  ;;  %v3064_v23 = vunpack.c.l.bf16 %v2542_v46 }
 0x104   :  { %v966_v18 = vadd.f32 %v2686_v37, %v523_v1  ;;  %v998_v26 = vadd.f32 %v2686_v37, %v651_v13  ;;  %v1287_v11 = vadd.f32 %v1852_v59, %v1095_v43  ;;  %v1319_v12 = vadd.f32 %v3063_v32, %v1127_v54  ;;  %v2772_v1 = vld [vmem:[%s3060_s3 + $0x78] sm:$0xff]  }
 0x105   :  { %v1032_v9 = vmul.f32 0.1, %v968_v58  ;;  %v1064_v19 = vmul.f32 0.1, %v1000_v36  ;;  %v1285_v8 = vadd.f32 %v3064_v23, %v1093_v38  ;;  %v3065_v14 = vunpack.c.l.bf16 %v2550_v50  ;;  %v2254_v2 = vpop.f32.mrb[8].mxu0  ;;  %v2286_v6 = vpop.f32.mrb[8].mxu1 }
 0x106   :  { %v1030_v47 = vmul.f32 0.1, %v966_v18  ;;  %v1062_v48 = vmul.f32 0.1, %v998_v26  ;;  %v971_v51 = vadd.f32 %v2254_v2, %v2686_v37  ;;  %v1003_v59 = vadd.f32 %v2286_v6, %v2686_v37  ;;  %v536_v63 = vpop.f32.mrb[9].mxu0  ;;  %v664_v40 = vpop.f32.mrb[9].mxu1 }
 0x107   :  { %v1317_v24 = vadd.f32 %v3065_v14, %v1125_v21  ;;  %v1096_v7 = vmax.f32 %v968_v58, %v1032_v9  ;;  %v1128_v49 = vmax.f32 %v1000_v36, %v1064_v19  ;;  %v2764_v41 = vadd.f32 %v2686_v37, %v536_v63  ;;  %v2255_v60 = vpop.f32.mrb[10].mxu0  ;;  %v2287_v0 = vpop.f32.mrb[10].mxu1 }
 0x108   :  { %v1094_v52 = vmax.f32 %v966_v18, %v1030_v47  ;;  %v1126_v61 = vmax.f32 %v998_v26, %v1062_v48  ;;  %v2767_v53 = vadd.f32 %v2686_v37, %v664_v40  ;;  %v3066_v13 = vunpack.c.h.bf16 %v2532_v44  ;;  %v539_v54 = vpop.f32.mrb[11].mxu0  ;;  %v667_v58 = vpop.f32.mrb[11].mxu1 }
 0x109   :  { %v3067_v25 = vunpack.c.h.bf16 %v2537_v45  ;;  %v1035_v42 = vmul.f32 0.1, %v971_v51  ;;  %v1067_v43 = vmul.f32 0.1, %v1003_v59  ;;  %v3068_v36 = vunpack.c.h.bf16 %v2542_v46 }
 0x10a   :  { %v1288_v20 = vadd.f32 %v3066_v13, %v1096_v7  ;;  %v3069_v21 = vunpack.c.h.bf16 %v2550_v50  ;;  %v1033_v26 = vmul.f32 0.1, %v2764_v41  ;;  %v1065_v32 = vmul.f32 0.1, %v2767_v53 }
 0x10b   :  { %v1320_v31 = vadd.f32 %v3067_v25, %v1128_v49  ;;  %v1286_v38 = vadd.f32 %v3068_v36, %v1094_v52  ;;  %v1099_v19 = vmax.f32 %v971_v51, %v1035_v42  ;;  %v1131_v23 = vmax.f32 %v1003_v59, %v1067_v43 }
 0x10c   :  { %v1318_v18 = vadd.f32 %v3069_v21, %v1126_v61  ;;  %v1984_v9 = vpack.c.bf16 %v1288_v20, %v1287_v11  ;;  %v1953_v47 = vunpack.c.h.bf16 %v2695_v30  ;;  %v1900_v48 = vunpack.c.l.bf16 %v2772_v1 }
 0x10d   :  { %v2064_v44 = vpack.c.bf16 %v1320_v31, %v1319_v12  ;;  %v1979_v45 = vpack.c.bf16 %v1286_v38, %v1285_v8  ;;  %v1097_v46 = vmax.f32 %v2764_v41, %v1033_v26  ;;  %v1129_v50 = vmax.f32 %v2767_v53, %v1065_v32  ;;  %v2258_v51 = vpop.f32.mrb[12].mxu0  ;;  %v2290_v59 = vpop.f32.mrb[12].mxu1 }
 0x10e   :  { %v2059_v14 = vpack.c.bf16 %v1318_v18, %v1317_v24  ;;  %2159 = vst [vmem:[%s3062_s4 + $0x18] sm:$0xff] %v1984_v9   ;;  %v972_v11 = vadd.f32 %v2255_v60, %v2686_v37  ;;  %v1004_v12 = vadd.f32 %v2287_v0, %v2686_v37  ;;  %v3070_v8 = vunpack.c.l.bf16 %v2559_v55  ;;  %v552_v41 = vpop.f32.mrb[13].mxu0  ;;  %v680_v53 = vpop.f32.mrb[13].mxu1 }
 0x10f   :  { %2175 = vst [vmem:[%s3062_s4 + $0x98] sm:$0xff] %v2064_v44   ;;  %2158 = vst [vmem:[%s3062_s4 + $0x10] sm:$0xff] %v1979_v45   ;;  %v3071_v2 = vunpack.c.l.bf16 %v2564_v56  ;;  %v970_v7 = vadd.f32 %v2686_v37, %v539_v54  ;;  %v1002_v49 = vadd.f32 %v2686_v37, %v667_v58  ;;  %v975_v52 = vadd.f32 %v2258_v51, %v2686_v37  ;;  %v2259_v25 = vpop.f32.mrb[14].mxu0  ;;  %v2291_v31 = vpop.f32.mrb[14].mxu1 }
 0x110   :  { %2174 = vst [vmem:[%s3062_s4 + $0x90] sm:$0xff] %v2059_v14   ;;  %v1291_v24 = vadd.f32 %v3070_v8, %v1099_v19  ;;  %v1036_v63 = vmul.f32 0.1, %v972_v11  ;;  %v1068_v40 = vmul.f32 0.1, %v1004_v12  ;;  %v1007_v61 = vadd.f32 %v2290_v59, %v2686_v37  ;;  %v555_v36 = vpop.f32.mrb[15].mxu0 }
 0x111   :  { %v1323_v6 = vadd.f32 %v3071_v2, %v1131_v23  ;;  %v1034_v60 = vmul.f32 0.1, %v970_v7  ;;  %v1066_v0 = vmul.f32 0.1, %v1002_v49  ;;  %v2811_v13 = vadd.f32 %v2686_v37, %v552_v41  ;;  %v683_v38 = vpop.f32.mrb[15].mxu1 }
 0x112   :  { %v2814_v20 = vadd.f32 %v2686_v37, %v680_v53  ;;  %v1100_v42 = vmax.f32 %v972_v11, %v1036_v63  ;;  %v1132_v43 = vmax.f32 %v1004_v12, %v1068_v40  ;;  %v1039_v54 = vmul.f32 0.1, %v975_v52 }
 0x113   :  { %v1071_v58 = vmul.f32 0.1, %v1007_v61  ;;  %v1098_v21 = vmax.f32 %v970_v7, %v1034_v60  ;;  %v1130_v18 = vmax.f32 %v1002_v49, %v1066_v0  ;;  %v1037_v26 = vmul.f32 0.1, %v2811_v13 }
 0x114   :  { %v1069_v32 = vmul.f32 0.1, %v2814_v20  ;;  %v3072_v9 = vunpack.c.h.bf16 %v2559_v55  ;;  %v3073_v19 = vunpack.c.h.bf16 %v2564_v56  ;;  %v1103_v45 = vmax.f32 %v975_v52, %v1039_v54 }
 0x115   :  { %v1135_v14 = vmax.f32 %v1007_v61, %v1071_v58  ;;  %v3074_v11 = vunpack.c.l.bf16 %v2569_v57  ;;  %v3075_v8 = vunpack.c.l.bf16 %v2578_v62  ;;  %v3076_v7 = vunpack.c.h.bf16 %v2569_v57  ;;  %v2262_v60 = vpop.f32.mrb[16].mxu0  ;;  %v2294_v57 = vpop.f32.mrb[16].mxu1 }
 0x116   :  { %v1292_v44 = vadd.f32 %v3072_v9, %v1100_v42  ;;  %v1324_v23 = vadd.f32 %v3073_v19, %v1132_v43  ;;  %v3077_v51 = vunpack.c.h.bf16 %v2578_v62  ;;  %v1101_v40 = vmax.f32 %v2811_v13, %v1037_v26  ;;  %v568_v13 = vpop.f32.mrb[17].mxu0 }
 0x117   :  { %v1289_v12 = vadd.f32 %v3074_v11, %v1097_v46  ;;  %v1321_v2 = vadd.f32 %v3075_v8, %v1129_v50  ;;  %v1290_v49 = vadd.f32 %v3076_v7, %v1098_v21  ;;  %v1133_v56 = vmax.f32 %v2814_v20, %v1069_v32  ;;  %v696_v20 = vpop.f32.mrb[17].mxu1  ;;  %v2263_v54 = vpop.f32.mrb[18].mxu0 }
 0x118   :  { %v1322_v59 = vadd.f32 %v3077_v51, %v1130_v18  ;;  %v1994_v63 = vpack.c.bf16 %v1292_v44, %v1291_v24  ;;  %v2074_v55 = vpack.c.bf16 %v1324_v23, %v1323_v6  ;;  %v3078_v41 = vunpack.c.l.bf16 %v2587_v3  ;;  %v2295_v58 = vpop.f32.mrb[18].mxu1  ;;  %v571_v11 = vpop.f32.mrb[19].mxu0 }
 0x119   :  { %v1989_v52 = vpack.c.bf16 %v1290_v49, %v1289_v12  ;;  %v3079_v53 = vunpack.c.l.bf16 %v2592_v4  ;;  %v976_v62 = vadd.f32 %v2259_v25, %v2686_v37  ;;  %v1008_v24 = vadd.f32 %v2291_v31, %v2686_v37  ;;  %v699_v12 = vpop.f32.mrb[19].mxu1 }
 0x11a   :  { %v2069_v61 = vpack.c.bf16 %v1322_v59, %v1321_v2  ;;  %v1295_v46 = vadd.f32 %v3078_v41, %v1103_v45  ;;  %2161 = vst [vmem:[%s3062_s4 + $0x28] sm:$0xff] %v1994_v63   ;;  %2177 = vst [vmem:[%s3062_s4 + $0xa8] sm:$0xff] %v2074_v55   ;;  %v974_v6 = vadd.f32 %v2686_v37, %v555_v36  ;;  %v3080_v51 = vunpack.c.l.bf16 %v2597_v5 }
 0x11b   :  { %v1327_v50 = vadd.f32 %v3079_v53, %v1135_v14  ;;  %v1006_v0 = vadd.f32 %v2686_v37, %v683_v38  ;;  %2160 = vst [vmem:[%s3062_s4 + $0x20] sm:$0xff] %v1989_v52   ;;  %v979_v42 = vadd.f32 %v2262_v60, %v2686_v37  ;;  %v1011_v25 = vadd.f32 %v2294_v57, %v2686_v37 }
 0x11c   :  { %2176 = vst [vmem:[%s3062_s4 + $0xa0] sm:$0xff] %v2069_v61   ;;  %v2855_v31 = vadd.f32 %v2686_v37, %v568_v13  ;;  %v2858_v43 = vadd.f32 %v2686_v37, %v696_v20  ;;  %v1040_v36 = vmul.f32 0.1, %v976_v62  ;;  %v1072_v38 = vmul.f32 0.1, %v1008_v24 }
 0x11d   :  { %v1038_v21 = vmul.f32 0.1, %v974_v6  ;;  %v980_v18 = vadd.f32 %v2263_v54, %v2686_v37  ;;  %v1070_v26 = vmul.f32 0.1, %v1006_v0  ;;  %v1043_v32 = vmul.f32 0.1, %v979_v42 }
 0x11e   :  { %v1075_v9 = vmul.f32 0.1, %v1011_v25  ;;  %v1012_v44 = vadd.f32 %v2295_v58, %v2686_v37  ;;  %v1104_v19 = vmax.f32 %v976_v62, %v1040_v36  ;;  %v1136_v23 = vmax.f32 %v1008_v24, %v1072_v38  ;;  %v2266_v13 = vpop.f32.mrb[20].mxu0 }
 0x11f   :  { %v1102_v45 = vmax.f32 %v974_v6, %v1038_v21  ;;  %v1041_v14 = vmul.f32 0.1, %v2855_v31  ;;  %v1134_v8 = vmax.f32 %v1006_v0, %v1070_v26  ;;  %v1107_v2 = vmax.f32 %v979_v42, %v1043_v32  ;;  %v584_v54 = vpop.f32.mrb[21].mxu0 }
 0x120   :  { %v1139_v7 = vmax.f32 %v1011_v25, %v1075_v9  ;;  %v1073_v49 = vmul.f32 0.1, %v2858_v43  ;;  %v1293_v59 = vadd.f32 %v3080_v51, %v1101_v40  ;;  %v3081_v63 = vunpack.c.h.bf16 %v2587_v3  ;;  %v2298_v3 = vpop.f32.mrb[20].mxu1  ;;  %v2267_v21 = vpop.f32.mrb[22].mxu0 }
 0x121   :  { %v3082_v52 = vunpack.c.h.bf16 %v2592_v4  ;;  %v3083_v41 = vunpack.c.h.bf16 %v2597_v5  ;;  %v3084_v60 = vunpack.c.l.bf16 %v2606_v10  ;;  %v3085_v62 = vunpack.c.h.bf16 %v2606_v10  ;;  %v712_v58 = vpop.f32.mrb[21].mxu1  ;;  %v587_v32 = vpop.f32.mrb[23].mxu0 }
 0x122   :  { %v1296_v55 = vadd.f32 %v3081_v63, %v1104_v19  ;;  %v3086_v6 = vunpack.c.l.bf16 %v2615_v15  ;;  %v1105_v40 = vmax.f32 %v2855_v31, %v1041_v14  ;;  %v3087_v25 = vunpack.c.l.bf16 %v2620_v16  ;;  %v2299_v26 = vpop.f32.mrb[22].mxu1 }
 0x123   :  { %v1328_v61 = vadd.f32 %v3082_v52, %v1136_v23  ;;  %v1294_v53 = vadd.f32 %v3083_v41, %v1102_v45  ;;  %v1325_v57 = vadd.f32 %v3084_v60, %v1133_v56  ;;  %v1326_v24 = vadd.f32 %v3085_v62, %v1134_v8  ;;  %v715_v9 = vpop.f32.mrb[23].mxu1 }
 0x124   :  { %v1299_v0 = vadd.f32 %v3086_v6, %v1107_v2  ;;  %v2004_v20 = vpack.c.bf16 %v1296_v55, %v1295_v46  ;;  %v1331_v5 = vadd.f32 %v3087_v25, %v1139_v7  ;;  %v1137_v56 = vmax.f32 %v2858_v43, %v1073_v49 }
 0x125   :  { %v2084_v42 = vpack.c.bf16 %v1328_v61, %v1327_v50  ;;  %v1999_v4 = vpack.c.bf16 %v1294_v53, %v1293_v59  ;;  %v2079_v36 = vpack.c.bf16 %v1326_v24, %v1325_v57  ;;  %v1044_v10 = vmul.f32 0.1, %v980_v18  ;;  %v2270_v24 = vpop.f32.mrb[24].mxu0 }
 0x126   :  { %v1076_v38 = vmul.f32 0.1, %v1012_v44  ;;  %2163 = vst [vmem:[%s3062_s4 + $0x38] sm:$0xff] %v2004_v20   ;;  %v978_v46 = vadd.f32 %v2686_v37, %v571_v11  ;;  %v1010_v50 = vadd.f32 %v2686_v37, %v699_v12  ;;  %v983_v31 = vadd.f32 %v2266_v13, %v2686_v37  ;;  %v2909_v11 = vld [vmem:[%s3060_s3 + $0xf8] sm:$0xff]  }
 0x127   :  { %2179 = vst [vmem:[%s3062_s4 + $0xb8] sm:$0xff] %v2084_v42   ;;  %2162 = vst [vmem:[%s3062_s4 + $0x30] sm:$0xff] %v1999_v4   ;;  %v2895_v43 = vadd.f32 %v2298_v3, %v2686_v37  ;;  %v1108_v19 = vmax.f32 %v980_v18, %v1044_v10  ;;  %v2901_v45 = vadd.f32 %v2686_v37, %v584_v54  ;;  %v3088_v49 = vunpack.c.h.bf16 %v2615_v15  ;;  %v2302_v15 = vpop.f32.mrb[24].mxu1  ;;  %v600_v54 = vpop.f32.mrb[25].mxu0 }
 0x128   :  { %2178 = vst [vmem:[%s3062_s4 + $0xb0] sm:$0xff] %v2079_v36   ;;  %v1140_v23 = vmax.f32 %v1012_v44, %v1076_v38  ;;  %v2904_v14 = vadd.f32 %v2686_v37, %v712_v58  ;;  %v1042_v12 = vmul.f32 0.1, %v978_v46  ;;  %v1074_v8 = vmul.f32 0.1, %v1010_v50  ;;  %v728_v58 = vpop.f32.mrb[25].mxu1 }
 0x129   :  { %v1047_v2 = vmul.f32 0.1, %v983_v31  ;;  %v984_v7 = vadd.f32 %v2267_v21, %v2686_v37  ;;  %v1300_v18 = vadd.f32 %v3088_v49, %v1108_v19  ;;  %v3089_v44 = vunpack.c.h.bf16 %v2620_v16  ;;  %v2271_v36 = vpop.f32.mrb[26].mxu0 }
 0x12a   :  { %v1079_v59 = vmul.f32 0.1, %v2895_v43  ;;  %v1045_v63 = vmul.f32 0.1, %v2901_v45  ;;  %v1106_v55 = vmax.f32 %v978_v46, %v1042_v12  ;;  %v1138_v52 = vmax.f32 %v1010_v50, %v1074_v8  ;;  %v603_v50 = vpop.f32.mrb[27].mxu0 }
 0x12b   :  { %v1332_v51 = vadd.f32 %v3089_v44, %v1140_v23  ;;  %v1111_v61 = vmax.f32 %v983_v31, %v1047_v2  ;;  %v1077_v41 = vmul.f32 0.1, %v2904_v14  ;;  %v3090_v53 = vunpack.c.l.bf16 %v2625_v17 }
 0x12c   :  { %v2014_v57 = vpack.c.bf16 %v1300_v18, %v1299_v0  ;;  %v1964_v6 = vunpack.c.l.bf16 %v2909_v11  ;;  %v3091_v16 = vunpack.c.l.bf16 %v2634_v22  ;;  %v3092_v3 = vunpack.c.h.bf16 %v2625_v17 }
 0x12d   :  { %v1297_v60 = vadd.f32 %v3090_v53, %v1105_v40  ;;  %v2094_v62 = vpack.c.bf16 %v1332_v51, %v1331_v5  ;;  %v3093_v42 = vunpack.c.h.bf16 %v2634_v22  ;;  %v1143_v25 = vmax.f32 %v2895_v43, %v1079_v59 }
 0x12e   :  { %v1329_v13 = vadd.f32 %v3091_v16, %v1137_v56  ;;  %v1298_v20 = vadd.f32 %v3092_v3, %v1106_v55  ;;  %2165 = vst [vmem:[%s3062_s4 + $0x48] sm:$0xff] %v2014_v57   ;;  %v3094_v0 = vunpack.c.l.bf16 %v2643_v27  ;;  %v1109_v17 = vmax.f32 %v2901_v45, %v1045_v63  ;;  %v2303_v56 = vpop.f32.mrb[26].mxu1  ;;  %v2274_v57 = vpop.f32.mrb[28].mxu0 }
 0x12f   :  { %v1330_v4 = vadd.f32 %v3093_v42, %v1138_v52  ;;  %2181 = vst [vmem:[%s3062_s4 + $0xc8] sm:$0xff] %v2094_v62   ;;  %v1048_v5 = vmul.f32 0.1, %v984_v7  ;;  %v1016_v22 = vadd.f32 %v2299_v26, %v2686_v37  ;;  %v1141_v21 = vmax.f32 %v2904_v14, %v1077_v41  ;;  %v731_v31 = vpop.f32.mrb[27].mxu1  ;;  %v2946_v26 = vld [vmem:[%s3060_s3 + $0x70] sm:$0xff]   ;;  %v616_v42 = vpop.f32.mrb[29].mxu0 }
 0x130   :  { %v1303_v40 = vadd.f32 %v3094_v0, %v1111_v61  ;;  %v2009_v10 = vpack.c.bf16 %v1298_v20, %v1297_v60  ;;  %v982_v46 = vadd.f32 %v2686_v37, %v587_v32  ;;  %v1014_v23 = vadd.f32 %v2686_v37, %v715_v9  ;;  %v2306_v62 = vpop.f32.mrb[28].mxu1 }
 0x131   :  { %v2089_v38 = vpack.c.bf16 %v1330_v4, %v1329_v13  ;;  %v1112_v43 = vmax.f32 %v984_v7, %v1048_v5  ;;  %v1080_v19 = vmul.f32 0.1, %v1016_v22  ;;  %v987_v12 = vadd.f32 %v2270_v24, %v2686_v37 }
 0x132   :  { %2164 = vst [vmem:[%s3062_s4 + $0x40] sm:$0xff] %v2009_v10   ;;  %v1046_v32 = vmul.f32 0.1, %v982_v46  ;;  %v1019_v45 = vadd.f32 %v2302_v15, %v2686_v37  ;;  %v985_v9 = vadd.f32 %v2686_v37, %v600_v54  ;;  %v2957_v14 = vadd.f32 %v2686_v37, %v728_v58 }
 0x133   :  { %2180 = vst [vmem:[%s3062_s4 + $0xc0] sm:$0xff] %v2089_v38   ;;  %v3095_v8 = vunpack.c.h.bf16 %v2643_v27  ;;  %v1144_v7 = vmax.f32 %v1016_v22, %v1080_v19  ;;  %v1078_v49 = vmul.f32 0.1, %v1014_v23  ;;  %v1051_v18 = vmul.f32 0.1, %v987_v12  ;;  %v2969_v27 = vld [vmem:[%s3060_s3 + $0xf0] sm:$0xff]  }
 0x134   :  { %v1110_v44 = vmax.f32 %v982_v46, %v1046_v32  ;;  %v1083_v51 = vmul.f32 0.1, %v1019_v45  ;;  %v1049_v59 = vmul.f32 0.1, %v985_v9  ;;  %v1896_v63 = vunpack.c.l.bf16 %v2946_v26 }
 0x135   :  { %v1304_v2 = vadd.f32 %v3095_v8, %v1112_v43  ;;  %v3096_v55 = vunpack.c.l.bf16 %v2648_v28  ;;  %v3097_v41 = vunpack.c.h.bf16 %v2648_v28  ;;  %v1142_v60 = vmax.f32 %v1014_v23, %v1078_v49  ;;  %v744_v28 = vpop.f32.mrb[29].mxu1 }
 0x136   :  { %v3098_v24 = vunpack.c.l.bf16 %v2653_v29  ;;  %v3099_v16 = vunpack.c.h.bf16 %v2653_v29  ;;  %v1115_v3 = vmax.f32 %v987_v12, %v1051_v18  ;;  %v1081_v20 = vmul.f32 0.1, %v2957_v14  ;;  %v2275_v29 = vpop.f32.mrb[30].mxu0 }
 0x137   :  { %v1335_v52 = vadd.f32 %v3096_v55, %v1143_v25  ;;  %v2024_v61 = vpack.c.bf16 %v1304_v2, %v1303_v40  ;;  %v1336_v53 = vadd.f32 %v3097_v41, %v1144_v7  ;;  %v3100_v4 = vunpack.c.l.bf16 %v2662_v34  ;;  %v619_v46 = vpop.f32.mrb[31].mxu0 }
 0x138   :  { %v1301_v15 = vadd.f32 %v3098_v24, %v1109_v17  ;;  %v1302_v13 = vadd.f32 %v3099_v16, %v1110_v44  ;;  %v3101_v58 = vunpack.c.h.bf16 %v2662_v34  ;;  %v988_v40 = vadd.f32 %v2271_v36, %v2686_v37  ;;  %v2307_v17 = vpop.f32.mrb[30].mxu1 }
 0x139   :  { %v1333_v25 = vadd.f32 %v3100_v4, %v1141_v21  ;;  %2167 = vst [vmem:[%s3062_s4 + $0x58] sm:$0xff] %v2024_v61   ;;  %v2104_v54 = vpack.c.bf16 %v1336_v53, %v1335_v52  ;;  %v1147_v22 = vmax.f32 %v1019_v45, %v1083_v51  ;;  %v1113_v10 = vmax.f32 %v985_v9, %v1049_v59  ;;  %v747_v43 = vpop.f32.mrb[31].mxu1 }
 0x13a   :  { %v1334_v0 = vadd.f32 %v3101_v58, %v1142_v60  ;;  %v2019_v5 = vpack.c.bf16 %v1302_v13, %v1301_v15  ;;  %v1960_v38 = vunpack.c.l.bf16 %v2969_v27  ;;  %v1052_v19 = vmul.f32 0.1, %v988_v40 }
 0x13b   :  { %2183 = vst [vmem:[%s3062_s4 + $0xd8] sm:$0xff] %v2104_v54   ;;  %v1020_v34 = vadd.f32 %v2303_v56, %v2686_v37  ;;  %v986_v23 = vadd.f32 %v2686_v37, %v603_v50  ;;  %v3102_v36 = vunpack.c.l.bf16 %v2671_v39  ;;  %v1145_v32 = vmax.f32 %v2957_v14, %v1081_v20 }
 0x13c   :  { %v2099_v21 = vpack.c.bf16 %v1334_v0, %v1333_v25  ;;  %2166 = vst [vmem:[%s3062_s4 + $0x50] sm:$0xff] %v2019_v5   ;;  %v1018_v45 = vadd.f32 %v2686_v37, %v731_v31  ;;  %v991_v9 = vadd.f32 %v2274_v57, %v2686_v37  ;;  %v1116_v56 = vmax.f32 %v988_v40, %v1052_v19 }
 0x13d   :  { %v1307_v12 = vadd.f32 %v3102_v36, %v1115_v3  ;;  %v1084_v8 = vmul.f32 0.1, %v1020_v34  ;;  %v1050_v50 = vmul.f32 0.1, %v986_v23  ;;  %v1023_v2 = vadd.f32 %v2306_v62, %v2686_v37 }
 0x13e   :  { %2182 = vst [vmem:[%s3062_s4 + $0xd0] sm:$0xff] %v2099_v21   ;;  %v1082_v7 = vmul.f32 0.1, %v1018_v45  ;;  %v1055_v49 = vmul.f32 0.1, %v991_v9  ;;  %v989_v18 = vadd.f32 %v2686_v37, %v616_v42  ;;  %v1021_v44 = vadd.f32 %v2686_v37, %v744_v28 }
 0x13f   :  { %v3103_v14 = vunpack.c.h.bf16 %v2671_v39  ;;  %v1148_v51 = vmax.f32 %v1020_v34, %v1084_v8  ;;  %v1114_v59 = vmax.f32 %v986_v23, %v1050_v50  ;;  %v992_v55 = vadd.f32 %v2275_v29, %v2686_v37 }
 0x140   :  { %v3104_v52 = vunpack.c.l.bf16 %v2676_v33  ;;  %v3105_v41 = vunpack.c.l.bf16 %v2681_v35  ;;  %v1146_v60 = vmax.f32 %v1018_v45, %v1082_v7  ;;  %v1901_v57 = vunpack.c.h.bf16 %v2772_v1 }
 0x141   :  { %v1308_v31 = vadd.f32 %v3103_v14, %v1116_v56  ;;  %v3106_v62 = vunpack.c.l.bf16 %v2695_v30  ;;  %v3107_v39 = vunpack.c.h.bf16 %v2676_v33  ;;  %v3108_v13 = vunpack.c.h.bf16 %v2681_v35 }
 0x142   :  { %v1339_v61 = vadd.f32 %v3104_v52, %v1147_v22  ;;  %v1305_v53 = vadd.f32 %v3105_v41, %v1113_v10  ;;  %v1338_v20 = vadd.f32 %v1953_v47, %v1146_v60  ;;  %v1119_v42 = vmax.f32 %v991_v9, %v1055_v49 }
 0x143   :  { %v1337_v24 = vadd.f32 %v3106_v62, %v1145_v32  ;;  %v2034_v15 = vpack.c.bf16 %v1308_v31, %v1307_v12  ;;  %v1340_v16 = vadd.f32 %v3107_v39, %v1148_v51  ;;  %v1306_v3 = vadd.f32 %v3108_v13, %v1114_v59 }
 0x144   :  { %v1087_v28 = vmul.f32 0.1, %v1023_v2  ;;  %v1053_v4 = vmul.f32 0.1, %v989_v18  ;;  %v1085_v58 = vmul.f32 0.1, %v1021_v44  ;;  %v1024_v33 = vadd.f32 %v2307_v17, %v2686_v37 }
 0x145   :  { %2169 = vst [vmem:[%s3062_s4 + $0x68] sm:$0xff] %v2034_v15   ;;  %v2114_v25 = vpack.c.bf16 %v1340_v16, %v1339_v61  ;;  %v2029_v54 = vpack.c.bf16 %v1306_v3, %v1305_v53  ;;  %v1056_v0 = vmul.f32 0.1, %v992_v55  ;;  %v2109_v40 = vpack.c.bf16 %v1338_v20, %v1337_v24 }
 0x146   :  { %v1965_v35 = vunpack.c.h.bf16 %v2909_v11  ;;  %v990_v29 = vadd.f32 %v2686_v37, %v619_v46  ;;  %v1897_v47 = vunpack.c.h.bf16 %v2946_v26  ;;  %v1022_v5 = vadd.f32 %v2686_v37, %v747_v43 }
 0x147   :  { %2185 = vst [vmem:[%s3062_s4 + $0xe8] sm:$0xff] %v2114_v25   ;;  %2168 = vst [vmem:[%s3062_s4 + $0x60] sm:$0xff] %v2029_v54   ;;  %v1120_v30 = vmax.f32 %v992_v55, %v1056_v0  ;;  %v1961_v22 = vunpack.c.h.bf16 %v2969_v27  ;;  %v1151_v17 = vmax.f32 %v1023_v2, %v1087_v28  ;;  %v1117_v10 = vmax.f32 %v989_v18, %v1053_v4 }
 0x148   :  { %2184 = vst [vmem:[%s3062_s4 + $0xe0] sm:$0xff] %v2109_v40   ;;  %v1088_v46 = vmul.f32 0.1, %v1024_v33  ;;  %v1054_v21 = vmul.f32 0.1, %v990_v29  ;;  %v1311_v19 = vadd.f32 %v1900_v48, %v1119_v42  ;;  %v1149_v34 = vmax.f32 %v1021_v44, %v1085_v58 }
 0x149   :  { %v1312_v23 = vadd.f32 %v1901_v57, %v1120_v30  ;;  %v1086_v36 = vmul.f32 0.1, %v1022_v5  ;;  %v1343_v43 = vadd.f32 %v1964_v6, %v1151_v17  ;;  %v1309_v9 = vadd.f32 %v1896_v63, %v1117_v10 }
 0x14a   :  { %v1152_v12 = vmax.f32 %v1024_v33, %v1088_v46  ;;  %v1118_v32 = vmax.f32 %v990_v29, %v1054_v21  ;;  %v1341_v50 = vadd.f32 %v1960_v38, %v1149_v34 }
 0x14b   :  { %v2044_v45 = vpack.c.bf16 %v1312_v23, %v1311_v19  ;;  %v1150_v37 = vmax.f32 %v1022_v5, %v1086_v36 }
 0x14c   :  { %v1344_v56 = vadd.f32 %v1965_v35, %v1152_v12  ;;  %v1310_v8 = vadd.f32 %v1897_v47, %v1118_v32 }
 0x14d   :  { %2171 = vst [vmem:[%s3062_s4 + $0x78] sm:$0xff] %v2044_v45   ;;  %v1342_v1 = vadd.f32 %v1961_v22, %v1150_v37 }
 0x14e   :  { %v2124_v48 = vpack.c.bf16 %v1344_v56, %v1343_v43  ;;  %v2039_v2 = vpack.c.bf16 %v1310_v8, %v1309_v9 }
 0x14f   :  { %v2119_v7 = vpack.c.bf16 %v1342_v1, %v1341_v50 }
 0x150   :  { %2187 = vst [vmem:[%s3062_s4 + $0xf8] sm:$0xff] %v2124_v48   ;;  %2170 = vst [vmem:[%s3062_s4 + $0x70] sm:$0xff] %v2039_v2  }
 0x151   :  { %2186 = vst [vmem:[%s3062_s4 + $0xf0] sm:$0xff] %v2119_v7  }

// kernel: _lambda_.25
= control target key start
LH: loop header
LB: loop body
LE: loop exit
PB: predicated region body
PF: predicated region fallthrough
CT: control target
= control target key end

     0   :  { %s737_s1 = inlined_call_operand.vmem [shape: bf16[128,128], index: 1, kind: input, shape index: {}]   ;;  %s738_s0 = inlined_call_operand.vmem [shape: bf16[128,128], index: 0, kind: input, shape index: {}]   ;;  %s739_s2 = inlined_call_operand.vmem [shape: f32[1,128], index: 2, kind: input, shape index: {}]   ;;  %s740_s3 = inlined_call_operand.vmem [shape: bf16[128,128], index: 3, kind: output, shape index: {}]  }
   0x1   :  { %v626_v0 = vld [vmem:[%s737_s1] sm:$0xff]   ;;  %v627_v1 = vld [vmem:[%s737_s1 + $0x8] sm:$0xff]   ;;  %v628_v2 = vld [vmem:[%s737_s1 + $0x10] sm:$0xff]  }
   0x2   :  { %578 = vmatprep.subr.bf16.mxu0 %v626_v0  ;;  %610 = vmatprep.subr.bf16.mxu1 %v626_v0  ;;  %v629_v3 = vld [vmem:[%s737_s1 + $0x18] sm:$0xff]   ;;  %v634_v4 = vld [vmem:[%s738_s0] sm:$0xff]   ;;  %v631_v7 = vld [vmem:[%s737_s1 + $0x28] sm:$0xff]  }
   0x3   :  { %579 = vmatpush3.bf16.msra.mxu0 %v626_v0  ;;  %618 = vmatpush3.bf16.msra.mxu1 %v626_v0  ;;  %v635_v5 = vld [vmem:[%s738_s0 + $0x20] sm:$0xff]   ;;  %v632_v8 = vld [vmem:[%s737_s1 + $0x30] sm:$0xff]   ;;  %v633_v9 = vld [vmem:[%s737_s1 + $0x38] sm:$0xff]  }
   0x4   :  { %580 = vmatprep.subr.bf16.mxu0 %v627_v1  ;;  %611 = vmatprep.subr.bf16.mxu1 %v627_v1  ;;  %v630_v6 = vld [vmem:[%s737_s1 + $0x20] sm:$0xff]   ;;  %v636_v10 = vld [vmem:[%s738_s0 + $0x8] sm:$0xff]   ;;  %v638_v12 = vld [vmem:[%s738_s0 + $0x10] sm:$0xff]  }
   0x5   :  { %594 = vmatprep.mubr.bf16.mxu0 %v634_v4  ;;  %602 = vmatprep.mubr.bf16.mxu1 %v635_v5  ;;  %v637_v11 = vld [vmem:[%s738_s0 + $0x28] sm:$0xff]   ;;  %v639_v13 = vld [vmem:[%s738_s0 + $0x30] sm:$0xff]   ;;  %v640_v14 = vld [vmem:[%s738_s0 + $0x18] sm:$0xff]  }
   0x6   :  { %v641_v15 = vld [vmem:[%s738_s0 + $0x38] sm:$0xff]   ;;  %v482_v16 = vld [vmem:[%s739_s2] ss:$0 sm:$0xff] }
   0x7   :  { %581 = vmatpush3.bf16.msra.mxu0 %v627_v1  ;;  %619 = vmatpush3.bf16.msra.mxu1 %v627_v1 }
   0x8   :  { %582 = vmatprep.subr.bf16.mxu0 %v628_v2  ;;  %612 = vmatprep.subr.bf16.mxu1 %v628_v2 }
   0xb   :  { %583 = vmatpush3.bf16.msra.mxu0 %v628_v2  ;;  %620 = vmatpush3.bf16.msra.mxu1 %v628_v2 }
   0xc   :  { %584 = vmatprep.subr.bf16.mxu0 %v629_v3  ;;  %613 = vmatprep.subr.bf16.mxu1 %v629_v3 }
   0xf   :  { %585 = vmatpush3.bf16.msra.mxu0 %v629_v3  ;;  %621 = vmatpush3.bf16.msra.mxu1 %v629_v3 }
  0x10   :  { %586 = vmatprep.subr.bf16.mxu0 %v630_v6  ;;  %614 = vmatprep.subr.bf16.mxu1 %v630_v6 }
  0x13   :  { %587 = vmatpush3.bf16.msra.mxu0 %v630_v6  ;;  %622 = vmatpush3.bf16.msra.mxu1 %v630_v6 }
  0x14   :  { %588 = vmatprep.subr.bf16.mxu0 %v631_v7  ;;  %615 = vmatprep.subr.bf16.mxu1 %v631_v7 }
  0x17   :  { %589 = vmatpush3.bf16.msra.mxu0 %v631_v7  ;;  %623 = vmatpush3.bf16.msra.mxu1 %v631_v7 }
  0x18   :  { %590 = vmatprep.subr.bf16.mxu0 %v632_v8  ;;  %616 = vmatprep.subr.bf16.mxu1 %v632_v8 }
  0x1b   :  { %591 = vmatpush3.bf16.msra.mxu0 %v632_v8  ;;  %624 = vmatpush3.bf16.msra.mxu1 %v632_v8 }
  0x1c   :  { %592 = vmatprep.subr.bf16.mxu0 %v633_v9  ;;  %617 = vmatprep.subr.bf16.mxu1 %v633_v9 }
  0x1f   :  { %593 = vmatpush3.bf16.msra.mxu0 %v633_v9  ;;  %625 = vmatpush3.bf16.msra.mxu1 %v633_v9 }
  0x22   :  { %595 = vmatmul.mubr.bf16.vlgmr.msra.gmra.mrb[0].mxu0 %v636_v10  ;;  %603 = vmatmul.mubr.bf16.vlgmr.msra.gmra.mrb[0].mxu1 %v637_v11 }
  0x23   :  { %598 = vmatprep.mubr.bf16.mxu0 %v638_v12  ;;  %606 = vmatprep.mubr.bf16.mxu1 %v639_v13 }
  0x2a   :  { %599 = vmatmul.mubr.bf16.gmra.mrb[4].mxu0 %v640_v14  ;;  %607 = vmatmul.mubr.bf16.gmra.mrb[4].mxu1 %v641_v15 }
  0xf5   :  { %v596_v17 = vpop.f32.mrb[0].mxu0  ;;  %v604_v18 = vpop.f32.mrb[0].mxu1 }
  0xf6   :  { %v336_v19 = vadd.f32 %v596_v17, %v482_v16  ;;  %v344_v20 = vadd.f32 %v604_v18, %v482_v16  ;;  %v213_v21 = vpop.f32.mrb[1].mxu0  ;;  %v245_v22 = vpop.f32.mrb[1].mxu1 }
  0xf7   :  { %v334_v23 = vadd.f32 %v482_v16, %v213_v21  ;;  %v342_v24 = vadd.f32 %v482_v16, %v245_v22  ;;  %v597_v25 = vpop.f32.mrb[2].mxu0  ;;  %v605_v26 = vpop.f32.mrb[2].mxu1 }
  0xf8   :  { %v352_v27 = vmul.f32 0.1, %v336_v19  ;;  %v360_v28 = vmul.f32 0.1, %v344_v20  ;;  %v337_v29 = vadd.f32 %v597_v25, %v482_v16  ;;  %v345_v30 = vadd.f32 %v605_v26, %v482_v16  ;;  %v216_v31 = vpop.f32.mrb[3].mxu0  ;;  %v248_v32 = vpop.f32.mrb[3].mxu1 }
  0xf9   :  { %v350_v33 = vmul.f32 0.1, %v334_v23  ;;  %v358_v34 = vmul.f32 0.1, %v342_v24  ;;  %v335_v35 = vadd.f32 %v482_v16, %v216_v31  ;;  %v343_v36 = vadd.f32 %v482_v16, %v248_v32 }
  0xfa   :  { %v353_v37 = vmul.f32 0.1, %v337_v29  ;;  %v361_v38 = vmul.f32 0.1, %v345_v30  ;;  %v368_v41 = vmax.f32 %v336_v19, %v352_v27  ;;  %v376_v42 = vmax.f32 %v344_v20, %v360_v28 }
  0xfb   :  { %v351_v39 = vmul.f32 0.1, %v335_v35  ;;  %v359_v40 = vmul.f32 0.1, %v343_v36  ;;  %v366_v45 = vmax.f32 %v334_v23, %v350_v33  ;;  %v374_v46 = vmax.f32 %v342_v24, %v358_v34 }
  0xfc   :  { %v369_v43 = vmax.f32 %v337_v29, %v353_v37  ;;  %v377_v44 = vmax.f32 %v345_v30, %v361_v38 }
  0xfd   :  { %v367_v47 = vmax.f32 %v335_v35, %v351_v39  ;;  %v375_v48 = vmax.f32 %v343_v36, %v359_v40  ;;  %v600_v49 = vpop.f32.mrb[4].mxu0  ;;  %v608_v50 = vpop.f32.mrb[4].mxu1 }
  0xfe   :  { %v523_v51 = vpack.c.bf16 %v369_v43, %v368_v41  ;;  %v543_v52 = vpack.c.bf16 %v377_v44, %v376_v42  ;;  %v340_v53 = vadd.f32 %v600_v49, %v482_v16  ;;  %v348_v54 = vadd.f32 %v608_v50, %v482_v16  ;;  %v229_v55 = vpop.f32.mrb[5].mxu0  ;;  %v261_v56 = vpop.f32.mrb[5].mxu1 }
  0xff   :  { %v518_v57 = vpack.c.bf16 %v367_v47, %v366_v45  ;;  %v538_v58 = vpack.c.bf16 %v375_v48, %v374_v46  ;;  %v338_v59 = vadd.f32 %v482_v16, %v229_v55  ;;  %v346_v60 = vadd.f32 %v482_v16, %v261_v56  ;;  %v601_v61 = vpop.f32.mrb[6].mxu0  ;;  %v609_v62 = vpop.f32.mrb[6].mxu1 }
 0x100   :  { %555 = vst [vmem:[%s740_s3 + $0x8] sm:$0xff] %v523_v51   ;;  %559 = vst [vmem:[%s740_s3 + $0x28] sm:$0xff] %v543_v52   ;;  %v356_v63 = vmul.f32 0.1, %v340_v53  ;;  %v364_v0 = vmul.f32 0.1, %v348_v54  ;;  %v341_v1 = vadd.f32 %v601_v61, %v482_v16  ;;  %v349_v2 = vadd.f32 %v609_v62, %v482_v16 }
 0x101   :  { %v232_v3 = vpop.f32.mrb[7].mxu0  ;;  %v264_v4 = vpop.f32.mrb[7].mxu1  ;;  %519 = vst [vmem:[%s740_s3] sm:$0xff] %v518_v57   ;;  %558 = vst [vmem:[%s740_s3 + $0x20] sm:$0xff] %v538_v58   ;;  %v354_v5 = vmul.f32 0.1, %v338_v59 }
 0x102   :  { %v362_v6 = vmul.f32 0.1, %v346_v60  ;;  %v339_v7 = vadd.f32 %v482_v16, %v232_v3  ;;  %v347_v8 = vadd.f32 %v482_v16, %v264_v4  ;;  %v357_v9 = vmul.f32 0.1, %v341_v1 }
 0x103   :  { %v365_v10 = vmul.f32 0.1, %v349_v2  ;;  %v372_v13 = vmax.f32 %v340_v53, %v356_v63  ;;  %v380_v14 = vmax.f32 %v348_v54, %v364_v0  ;;  %v370_v18 = vmax.f32 %v338_v59, %v354_v5 }
 0x104   :  { %v355_v11 = vmul.f32 0.1, %v339_v7  ;;  %v363_v12 = vmul.f32 0.1, %v347_v8  ;;  %v373_v15 = vmax.f32 %v341_v1, %v357_v9  ;;  %v378_v19 = vmax.f32 %v346_v60, %v362_v6 }
 0x105   :  { %v381_v17 = vmax.f32 %v349_v2, %v365_v10 }
 0x106   :  { %v371_v20 = vmax.f32 %v339_v7, %v355_v11  ;;  %v379_v21 = vmax.f32 %v347_v8, %v363_v12  ;;  %v533_v22 = vpack.c.bf16 %v373_v15, %v372_v13 }
 0x107   :  { %v553_v23 = vpack.c.bf16 %v381_v17, %v380_v14 }
 0x108   :  { %v528_v24 = vpack.c.bf16 %v371_v20, %v370_v18  ;;  %v548_v25 = vpack.c.bf16 %v379_v21, %v378_v19  ;;  %557 = vst [vmem:[%s740_s3 + $0x18] sm:$0xff] %v533_v22  }
 0x109   :  { %561 = vst [vmem:[%s740_s3 + $0x38] sm:$0xff] %v553_v23  }
 0x10a   :  { %556 = vst [vmem:[%s740_s3 + $0x10] sm:$0xff] %v528_v24   ;;  %560 = vst [vmem:[%s740_s3 + $0x30] sm:$0xff] %v548_v25  }

// kernel: _lambda_.24
= control target key start
LH: loop header
LB: loop body
LE: loop exit
PB: predicated region body
PF: predicated region fallthrough
CT: control target
= control target key end

     0   :  { %s955_s1 = inlined_call_operand.vmem [shape: bf16[256,128], index: 1, kind: input, shape index: {}]   ;;  %s956_s0 = inlined_call_operand.vmem [shape: bf16[128,256], index: 0, kind: input, shape index: {}]   ;;  %s957_s2 = inlined_call_operand.vmem [shape: f32[1,128], index: 2, kind: input, shape index: {}]   ;;  %s958_s3 = inlined_call_operand.vmem [shape: bf16[128,128], index: 3, kind: output, shape index: {}]  }
   0x1   :  { %v754_v0 = vld [vmem:[%s955_s1 + $0x40] sm:$0xff]   ;;  %v756_v2 = vld [vmem:[%s955_s1 + $0x48] sm:$0xff]   ;;  %v758_v4 = vld [vmem:[%s955_s1 + $0x50] sm:$0xff]  }
   0x2   :  { %v755_v1 = vld [vmem:[%s955_s1] sm:$0xff]   ;;  %674 = vmatprep.subr.bf16.mxu0 %v754_v0  ;;  %738 = vmatprep.subr.bf16.mxu1 %v754_v0  ;;  %v757_v3 = vld [vmem:[%s955_s1 + $0x8] sm:$0xff]   ;;  %v759_v5 = vld [vmem:[%s955_s1 + $0x10] sm:$0xff]  }
   0x3   :  { %675 = vmatpush3.bf16.msra.mxu0 %v755_v1  ;;  %746 = vmatpush3.bf16.msra.mxu1 %v755_v1  ;;  %v760_v6 = vld [vmem:[%s955_s1 + $0x58] sm:$0xff]   ;;  %v762_v8 = vld [vmem:[%s955_s1 + $0x60] sm:$0xff]   ;;  %v764_v10 = vld [vmem:[%s955_s1 + $0x68] sm:$0xff]  }
   0x4   :  { %676 = vmatprep.subr.bf16.mxu0 %v756_v2  ;;  %739 = vmatprep.subr.bf16.mxu1 %v756_v2  ;;  %v761_v7 = vld [vmem:[%s955_s1 + $0x18] sm:$0xff]   ;;  %v763_v9 = vld [vmem:[%s955_s1 + $0x20] sm:$0xff]   ;;  %v765_v13 = vld [vmem:[%s955_s1 + $0x28] sm:$0xff]  }
   0x5   :  { %v772_v11 = vld [vmem:[%s956_s0 + $0x4] ss:$8 sps:$4 sm:$0xff]   ;;  %v766_v14 = vld [vmem:[%s955_s1 + $0x70] sm:$0xff]   ;;  %v768_v16 = vld [vmem:[%s955_s1 + $0x78] sm:$0xff]  }
   0x6   :  { %v775_v12 = vld [vmem:[%s956_s0 + $0x44] ss:$8 sps:$4 sm:$0xff]   ;;  %307 = vmatprep.mubr.bf16.mxu0 %v772_v11  ;;  %v767_v15 = vld [vmem:[%s955_s1 + $0x30] sm:$0xff]   ;;  %v769_v17 = vld [vmem:[%s955_s1 + $0x38] sm:$0xff]  }
   0x7   :  { %677 = vmatpush3.bf16.msra.mxu0 %v757_v3  ;;  %747 = vmatpush3.bf16.msra.mxu1 %v757_v3  ;;  %v770_v18 = vld [vmem:[%s956_s0] ss:$8 sps:$4 sm:$0xff]   ;;  %v776_v20 = vld [vmem:[%s956_s0 + $0x14] ss:$8 sps:$4 sm:$0xff]   ;;  %v780_v22 = vld [vmem:[%s956_s0 + $0x10] ss:$8 sps:$4 sm:$0xff]  }
   0x8   :  { %678 = vmatprep.subr.bf16.mxu0 %v758_v4  ;;  %740 = vmatprep.subr.bf16.mxu1 %v758_v4  ;;  %v773_v19 = vld [vmem:[%s956_s0 + $0x40] ss:$8 sps:$4 sm:$0xff]   ;;  %v778_v21 = vld [vmem:[%s956_s0 + $0x54] ss:$8 sps:$4 sm:$0xff]   ;;  %v781_v23 = vld [vmem:[%s956_s0 + $0x50] ss:$8 sps:$4 sm:$0xff]  }
   0x9   :  { %339 = vmatprep.mubr.bf16.mxu1 %v775_v12  ;;  %v782_v24 = vld [vmem:[%s956_s0 + $0x24] ss:$8 sps:$4 sm:$0xff]   ;;  %v786_v26 = vld [vmem:[%s956_s0 + $0x20] ss:$8 sps:$4 sm:$0xff]   ;;  %v788_v28 = vld [vmem:[%s956_s0 + $0x34] ss:$8 sps:$4 sm:$0xff]  }
   0xa   :  { %v784_v25 = vld [vmem:[%s956_s0 + $0x64] ss:$8 sps:$4 sm:$0xff]   ;;  %v787_v27 = vld [vmem:[%s956_s0 + $0x60] ss:$8 sps:$4 sm:$0xff]   ;;  %v790_v29 = vld [vmem:[%s956_s0 + $0x74] ss:$8 sps:$4 sm:$0xff]  }
   0xb   :  { %679 = vmatpush3.bf16.msra.mxu0 %v759_v5  ;;  %748 = vmatpush3.bf16.msra.mxu1 %v759_v5  ;;  %v792_v30 = vld [vmem:[%s956_s0 + $0x30] ss:$8 sps:$4 sm:$0xff]   ;;  %v913_v35 = vld [vmem:[%s957_s2] ss:$0 sm:$0xff] }
   0xc   :  { %680 = vmatprep.subr.bf16.mxu0 %v760_v6  ;;  %741 = vmatprep.subr.bf16.mxu1 %v760_v6  ;;  %v793_v31 = vld [vmem:[%s956_s0 + $0x70] ss:$8 sps:$4 sm:$0xff]  }
   0xf   :  { %681 = vmatpush3.bf16.msra.mxu0 %v761_v7  ;;  %749 = vmatpush3.bf16.msra.mxu1 %v761_v7 }
  0x10   :  { %682 = vmatprep.subr.bf16.mxu0 %v762_v8  ;;  %742 = vmatprep.subr.bf16.mxu1 %v762_v8 }
  0x13   :  { %683 = vmatpush3.bf16.msra.mxu0 %v763_v9  ;;  %750 = vmatpush3.bf16.msra.mxu1 %v763_v9 }
  0x14   :  { %684 = vmatprep.subr.bf16.mxu0 %v764_v10  ;;  %743 = vmatprep.subr.bf16.mxu1 %v764_v10 }
  0x17   :  { %685 = vmatpush3.bf16.msra.mxu0 %v765_v13  ;;  %751 = vmatpush3.bf16.msra.mxu1 %v765_v13 }
  0x18   :  { %686 = vmatprep.subr.bf16.mxu0 %v766_v14  ;;  %744 = vmatprep.subr.bf16.mxu1 %v766_v14 }
  0x1b   :  { %687 = vmatpush3.bf16.msra.mxu0 %v767_v15  ;;  %752 = vmatpush3.bf16.msra.mxu1 %v767_v15 }
  0x1c   :  { %688 = vmatprep.subr.bf16.mxu0 %v768_v16  ;;  %745 = vmatprep.subr.bf16.mxu1 %v768_v16 }
  0x1f   :  { %689 = vmatpush3.bf16.msra.mxu0 %v769_v17  ;;  %753 = vmatpush3.bf16.msra.mxu1 %v769_v17 }
  0x22   :  { %308 = vmatmul.mubr.bf16.vlgmr.msra.gmra.mrb[0].mxu0 %v770_v18  ;;  %340 = vmatmul.mubr.bf16.vlgmr.msra.gmra.mrb[0].mxu1 %v773_v19 }
  0x23   :  { %315 = vmatprep.mubr.bf16.mxu0 %v776_v20  ;;  %347 = vmatprep.mubr.bf16.mxu1 %v778_v21 }
  0x2a   :  { %316 = vmatmul.mubr.bf16.gmra.mrb[4].mxu0 %v780_v22  ;;  %348 = vmatmul.mubr.bf16.gmra.mrb[4].mxu1 %v781_v23 }
  0x2b   :  { %323 = vmatprep.mubr.bf16.mxu0 %v782_v24  ;;  %355 = vmatprep.mubr.bf16.mxu1 %v784_v25 }
  0x32   :  { %324 = vmatmul.mubr.bf16.gmra.mrb[8].mxu0 %v786_v26  ;;  %356 = vmatmul.mubr.bf16.gmra.mrb[8].mxu1 %v787_v27 }
  0x33   :  { %331 = vmatprep.mubr.bf16.mxu0 %v788_v28  ;;  %363 = vmatprep.mubr.bf16.mxu1 %v790_v29 }
  0x3a   :  { %332 = vmatmul.mubr.bf16.gmra.mrb[12].mxu0 %v792_v30  ;;  %364 = vmatmul.mubr.bf16.gmra.mrb[12].mxu1 %v793_v31 }
  0xf5   :  { %v690_v32 = vpop.f32.mrb[0].mxu0  ;;  %v714_v33 = vpop.f32.mrb[0].mxu1 }
  0xf6   :  { %v691_v34 = vpop.f32.mrb[1].mxu0  ;;  %v715_v36 = vpop.f32.mrb[1].mxu1 }
  0xf7   :  { %v692_v37 = vadd.f32 %v691_v34, %v690_v32  ;;  %v716_v38 = vadd.f32 %v715_v36, %v714_v33  ;;  %v693_v39 = vpop.f32.mrb[2].mxu0  ;;  %v717_v40 = vpop.f32.mrb[2].mxu1 }
  0xf8   :  { %v694_v41 = vpop.f32.mrb[3].mxu0  ;;  %v718_v42 = vpop.f32.mrb[3].mxu1 }
  0xf9   :  { %v430_v43 = vadd.f32 %v692_v37, %v913_v35  ;;  %v438_v44 = vadd.f32 %v716_v38, %v913_v35  ;;  %v695_v45 = vadd.f32 %v694_v41, %v693_v39  ;;  %v719_v46 = vadd.f32 %v718_v42, %v717_v40 }
  0xfb   :  { %v446_v47 = vmul.f32 0.1, %v430_v43  ;;  %v454_v48 = vmul.f32 0.1, %v438_v44  ;;  %v431_v49 = vadd.f32 %v695_v45, %v913_v35  ;;  %v439_v50 = vadd.f32 %v719_v46, %v913_v35 }
  0xfd   :  { %v447_v51 = vmul.f32 0.1, %v431_v49  ;;  %v455_v52 = vmul.f32 0.1, %v439_v50  ;;  %v696_v53 = vpop.f32.mrb[4].mxu0  ;;  %v720_v54 = vpop.f32.mrb[4].mxu1  ;;  %v462_v55 = vmax.f32 %v430_v43, %v446_v47  ;;  %v470_v56 = vmax.f32 %v438_v44, %v454_v48 }
  0xfe   :  { %v697_v57 = vpop.f32.mrb[5].mxu0  ;;  %v721_v58 = vpop.f32.mrb[5].mxu1 }
  0xff   :  { %v463_v59 = vmax.f32 %v431_v49, %v447_v51  ;;  %v471_v60 = vmax.f32 %v439_v50, %v455_v52  ;;  %v698_v61 = vadd.f32 %v697_v57, %v696_v53  ;;  %v722_v62 = vadd.f32 %v721_v58, %v720_v54  ;;  %v699_v63 = vpop.f32.mrb[6].mxu0  ;;  %v723_v0 = vpop.f32.mrb[6].mxu1 }
 0x100   :  { %v700_v1 = vpop.f32.mrb[7].mxu0  ;;  %v724_v2 = vpop.f32.mrb[7].mxu1 }
 0x101   :  { %v630_v3 = vpack.c.bf16 %v463_v59, %v462_v55  ;;  %v650_v4 = vpack.c.bf16 %v471_v60, %v470_v56  ;;  %v432_v5 = vadd.f32 %v698_v61, %v913_v35  ;;  %v440_v6 = vadd.f32 %v722_v62, %v913_v35 }
 0x102   :  { %v701_v7 = vadd.f32 %v700_v1, %v699_v63  ;;  %v725_v8 = vadd.f32 %v724_v2, %v723_v0 }
 0x103   :  { %631 = vst [vmem:[%s958_s3] sm:$0xff] %v630_v3   ;;  %670 = vst [vmem:[%s958_s3 + $0x20] sm:$0xff] %v650_v4   ;;  %v448_v9 = vmul.f32 0.1, %v432_v5  ;;  %v456_v10 = vmul.f32 0.1, %v440_v6 }
 0x104   :  { %v433_v11 = vadd.f32 %v701_v7, %v913_v35  ;;  %v441_v12 = vadd.f32 %v725_v8, %v913_v35 }
 0x105   :  { %v702_v13 = vpop.f32.mrb[8].mxu0  ;;  %v726_v14 = vpop.f32.mrb[8].mxu1  ;;  %v464_v23 = vmax.f32 %v432_v5, %v448_v9  ;;  %v472_v24 = vmax.f32 %v440_v6, %v456_v10 }
 0x106   :  { %v449_v15 = vmul.f32 0.1, %v433_v11  ;;  %v457_v16 = vmul.f32 0.1, %v441_v12  ;;  %v703_v17 = vpop.f32.mrb[9].mxu0  ;;  %v727_v18 = vpop.f32.mrb[9].mxu1 }
 0x107   :  { %v704_v19 = vadd.f32 %v703_v17, %v702_v13  ;;  %v728_v20 = vadd.f32 %v727_v18, %v726_v14  ;;  %v705_v21 = vpop.f32.mrb[10].mxu0  ;;  %v729_v22 = vpop.f32.mrb[10].mxu1 }
 0x108   :  { %v465_v25 = vmax.f32 %v433_v11, %v449_v15  ;;  %v473_v26 = vmax.f32 %v441_v12, %v457_v16  ;;  %v706_v27 = vpop.f32.mrb[11].mxu0  ;;  %v730_v28 = vpop.f32.mrb[11].mxu1 }
 0x109   :  { %v434_v29 = vadd.f32 %v704_v19, %v913_v35  ;;  %v442_v30 = vadd.f32 %v728_v20, %v913_v35  ;;  %v707_v31 = vadd.f32 %v706_v27, %v705_v21  ;;  %v731_v32 = vadd.f32 %v730_v28, %v729_v22 }
 0x10a   :  { %v635_v33 = vpack.c.bf16 %v465_v25, %v464_v23  ;;  %v655_v34 = vpack.c.bf16 %v473_v26, %v472_v24 }
 0x10b   :  { %v450_v36 = vmul.f32 0.1, %v434_v29  ;;  %v458_v37 = vmul.f32 0.1, %v442_v30  ;;  %v435_v38 = vadd.f32 %v707_v31, %v913_v35  ;;  %v443_v39 = vadd.f32 %v731_v32, %v913_v35 }
 0x10c   :  { %667 = vst [vmem:[%s958_s3 + $0x8] sm:$0xff] %v635_v33   ;;  %671 = vst [vmem:[%s958_s3 + $0x28] sm:$0xff] %v655_v34  }
 0x10d   :  { %v451_v40 = vmul.f32 0.1, %v435_v38  ;;  %v459_v41 = vmul.f32 0.1, %v443_v39  ;;  %v708_v42 = vpop.f32.mrb[12].mxu0  ;;  %v732_v43 = vpop.f32.mrb[12].mxu1  ;;  %v466_v44 = vmax.f32 %v434_v29, %v450_v36  ;;  %v474_v45 = vmax.f32 %v442_v30, %v458_v37 }
 0x10e   :  { %v709_v46 = vpop.f32.mrb[13].mxu0  ;;  %v733_v47 = vpop.f32.mrb[13].mxu1 }
 0x10f   :  { %v467_v48 = vmax.f32 %v435_v38, %v451_v40  ;;  %v475_v49 = vmax.f32 %v443_v39, %v459_v41  ;;  %v710_v50 = vadd.f32 %v709_v46, %v708_v42  ;;  %v734_v51 = vadd.f32 %v733_v47, %v732_v43  ;;  %v711_v52 = vpop.f32.mrb[14].mxu0  ;;  %v735_v53 = vpop.f32.mrb[14].mxu1 }
 0x110   :  { %v712_v54 = vpop.f32.mrb[15].mxu0  ;;  %v736_v55 = vpop.f32.mrb[15].mxu1 }
 0x111   :  { %v640_v56 = vpack.c.bf16 %v467_v48, %v466_v44  ;;  %v660_v57 = vpack.c.bf16 %v475_v49, %v474_v45  ;;  %v436_v58 = vadd.f32 %v710_v50, %v913_v35  ;;  %v444_v59 = vadd.f32 %v734_v51, %v913_v35 }
 0x112   :  { %v713_v60 = vadd.f32 %v712_v54, %v711_v52  ;;  %v737_v61 = vadd.f32 %v736_v55, %v735_v53 }
 0x113   :  { %668 = vst [vmem:[%s958_s3 + $0x10] sm:$0xff] %v640_v56   ;;  %672 = vst [vmem:[%s958_s3 + $0x30] sm:$0xff] %v660_v57   ;;  %v452_v62 = vmul.f32 0.1, %v436_v58  ;;  %v460_v63 = vmul.f32 0.1, %v444_v59 }
 0x114   :  { %v437_v0 = vadd.f32 %v713_v60, %v913_v35  ;;  %v445_v1 = vadd.f32 %v737_v61, %v913_v35 }
 0x115   :  { %v468_v4 = vmax.f32 %v436_v58, %v452_v62  ;;  %v476_v5 = vmax.f32 %v444_v59, %v460_v63 }
 0x116   :  { %v453_v2 = vmul.f32 0.1, %v437_v0  ;;  %v461_v3 = vmul.f32 0.1, %v445_v1 }
 0x118   :  { %v469_v6 = vmax.f32 %v437_v0, %v453_v2  ;;  %v477_v7 = vmax.f32 %v445_v1, %v461_v3 }
 0x11a   :  { %v645_v8 = vpack.c.bf16 %v469_v6, %v468_v4  ;;  %v665_v9 = vpack.c.bf16 %v477_v7, %v476_v5 }
 0x11c   :  { %669 = vst [vmem:[%s958_s3 + $0x18] sm:$0xff] %v645_v8   ;;  %673 = vst [vmem:[%s958_s3 + $0x38] sm:$0xff] %v665_v9  }

// kernel: _lambda_.26
= control target key start
LH: loop header
LB: loop body
LE: loop exit
PB: predicated region body
PF: predicated region fallthrough
CT: control target
= control target key end

     0   :  { %s1074_s1 = inlined_call_operand.vmem [shape: bf16[256,128], index: 1, kind: input, shape index: {}]   ;;  %s1075_s0 = inlined_call_operand.vmem [shape: bf16[128,256], index: 0, kind: input, shape index: {}]   ;;  %s1076_s2 = inlined_call_operand.vmem [shape: f32[1,128], index: 2, kind: input, shape index: {}]   ;;  %s1077_s3 = inlined_call_operand.vmem [shape: bf16[128,128], index: 3, kind: input, shape index: {}]   ;;  %s1078_s4 = inlined_call_operand.vmem [shape: bf16[128,128], index: 4, kind: output, shape index: {}]  }
   0x1   :  { %v844_v0 = vld [vmem:[%s1074_s1 + $0x40] sm:$0xff]   ;;  %v846_v2 = vld [vmem:[%s1074_s1 + $0x48] sm:$0xff]   ;;  %v848_v4 = vld [vmem:[%s1074_s1 + $0x50] sm:$0xff]  }
   0x2   :  { %v845_v1 = vld [vmem:[%s1074_s1] sm:$0xff]   ;;  %764 = vmatprep.subr.bf16.mxu0 %v844_v0  ;;  %828 = vmatprep.subr.bf16.mxu1 %v844_v0  ;;  %v847_v3 = vld [vmem:[%s1074_s1 + $0x8] sm:$0xff]   ;;  %v849_v5 = vld [vmem:[%s1074_s1 + $0x10] sm:$0xff]  }
   0x3   :  { %765 = vmatpush3.bf16.msra.mxu0 %v845_v1  ;;  %836 = vmatpush3.bf16.msra.mxu1 %v845_v1  ;;  %v850_v6 = vld [vmem:[%s1074_s1 + $0x58] sm:$0xff]   ;;  %v852_v8 = vld [vmem:[%s1074_s1 + $0x60] sm:$0xff]   ;;  %v854_v10 = vld [vmem:[%s1074_s1 + $0x68] sm:$0xff]  }
   0x4   :  { %766 = vmatprep.subr.bf16.mxu0 %v846_v2  ;;  %829 = vmatprep.subr.bf16.mxu1 %v846_v2  ;;  %v851_v7 = vld [vmem:[%s1074_s1 + $0x18] sm:$0xff]   ;;  %v853_v9 = vld [vmem:[%s1074_s1 + $0x20] sm:$0xff]   ;;  %v855_v13 = vld [vmem:[%s1074_s1 + $0x28] sm:$0xff]  }
   0x5   :  { %v862_v11 = vld [vmem:[%s1075_s0 + $0x4] ss:$8 sps:$4 sm:$0xff]   ;;  %v856_v14 = vld [vmem:[%s1074_s1 + $0x70] sm:$0xff]   ;;  %v858_v16 = vld [vmem:[%s1074_s1 + $0x78] sm:$0xff]  }
   0x6   :  { %v865_v12 = vld [vmem:[%s1075_s0 + $0x44] ss:$8 sps:$4 sm:$0xff]   ;;  %310 = vmatprep.mubr.bf16.mxu0 %v862_v11  ;;  %v857_v15 = vld [vmem:[%s1074_s1 + $0x30] sm:$0xff]   ;;  %v859_v17 = vld [vmem:[%s1074_s1 + $0x38] sm:$0xff]  }
   0x7   :  { %767 = vmatpush3.bf16.msra.mxu0 %v847_v3  ;;  %837 = vmatpush3.bf16.msra.mxu1 %v847_v3  ;;  %v860_v18 = vld [vmem:[%s1075_s0] ss:$8 sps:$4 sm:$0xff]   ;;  %v866_v20 = vld [vmem:[%s1075_s0 + $0x14] ss:$8 sps:$4 sm:$0xff]   ;;  %v870_v22 = vld [vmem:[%s1075_s0 + $0x10] ss:$8 sps:$4 sm:$0xff]  }
   0x8   :  { %768 = vmatprep.subr.bf16.mxu0 %v848_v4  ;;  %830 = vmatprep.subr.bf16.mxu1 %v848_v4  ;;  %v863_v19 = vld [vmem:[%s1075_s0 + $0x40] ss:$8 sps:$4 sm:$0xff]   ;;  %v868_v21 = vld [vmem:[%s1075_s0 + $0x54] ss:$8 sps:$4 sm:$0xff]   ;;  %v871_v23 = vld [vmem:[%s1075_s0 + $0x50] ss:$8 sps:$4 sm:$0xff]  }
   0x9   :  { %342 = vmatprep.mubr.bf16.mxu1 %v865_v12  ;;  %v872_v24 = vld [vmem:[%s1075_s0 + $0x24] ss:$8 sps:$4 sm:$0xff]   ;;  %v876_v26 = vld [vmem:[%s1075_s0 + $0x20] ss:$8 sps:$4 sm:$0xff]   ;;  %v878_v28 = vld [vmem:[%s1075_s0 + $0x34] ss:$8 sps:$4 sm:$0xff]  }
   0xa   :  { %v874_v25 = vld [vmem:[%s1075_s0 + $0x64] ss:$8 sps:$4 sm:$0xff]   ;;  %v877_v27 = vld [vmem:[%s1075_s0 + $0x60] ss:$8 sps:$4 sm:$0xff]   ;;  %v880_v29 = vld [vmem:[%s1075_s0 + $0x74] ss:$8 sps:$4 sm:$0xff]  }
   0xb   :  { %769 = vmatpush3.bf16.msra.mxu0 %v849_v5  ;;  %838 = vmatpush3.bf16.msra.mxu1 %v849_v5  ;;  %v882_v30 = vld [vmem:[%s1075_s0 + $0x30] ss:$8 sps:$4 sm:$0xff]   ;;  %v1008_v35 = vld [vmem:[%s1076_s2] ss:$0 sm:$0xff] }
   0xc   :  { %770 = vmatprep.subr.bf16.mxu0 %v850_v6  ;;  %831 = vmatprep.subr.bf16.mxu1 %v850_v6  ;;  %v883_v31 = vld [vmem:[%s1075_s0 + $0x70] ss:$8 sps:$4 sm:$0xff]   ;;  %v679_v44 = vld [vmem:[%s1077_s3] sm:$0xff]  }
   0xd   :  { %v753_v46 = vld [vmem:[%s1077_s3 + $0x20] sm:$0xff]   ;;  %v680_v53 = vunpack.c.l.bf16 %v679_v44  ;;  %v681_v55 = vunpack.c.h.bf16 %v679_v44 }
   0xe   :  { %v696_v54 = vunpack.c.l.bf16 %v753_v46  ;;  %v697_v56 = vunpack.c.h.bf16 %v753_v46 }
   0xf   :  { %771 = vmatpush3.bf16.msra.mxu0 %v851_v7  ;;  %839 = vmatpush3.bf16.msra.mxu1 %v851_v7 }
  0x10   :  { %772 = vmatprep.subr.bf16.mxu0 %v852_v8  ;;  %832 = vmatprep.subr.bf16.mxu1 %v852_v8 }
  0x13   :  { %773 = vmatpush3.bf16.msra.mxu0 %v853_v9  ;;  %840 = vmatpush3.bf16.msra.mxu1 %v853_v9 }
  0x14   :  { %774 = vmatprep.subr.bf16.mxu0 %v854_v10  ;;  %833 = vmatprep.subr.bf16.mxu1 %v854_v10 }
  0x17   :  { %775 = vmatpush3.bf16.msra.mxu0 %v855_v13  ;;  %841 = vmatpush3.bf16.msra.mxu1 %v855_v13  ;;  %v750_v13 = vld [vmem:[%s1077_s3 + $0x8] sm:$0xff]  }
  0x18   :  { %776 = vmatprep.subr.bf16.mxu0 %v856_v14  ;;  %834 = vmatprep.subr.bf16.mxu1 %v856_v14  ;;  %v754_v14 = vld [vmem:[%s1077_s3 + $0x28] sm:$0xff]  }
  0x1b   :  { %777 = vmatpush3.bf16.msra.mxu0 %v857_v15  ;;  %842 = vmatpush3.bf16.msra.mxu1 %v857_v15 }
  0x1c   :  { %778 = vmatprep.subr.bf16.mxu0 %v858_v16  ;;  %835 = vmatprep.subr.bf16.mxu1 %v858_v16 }
  0x1f   :  { %779 = vmatpush3.bf16.msra.mxu0 %v859_v17  ;;  %843 = vmatpush3.bf16.msra.mxu1 %v859_v17 }
  0x22   :  { %311 = vmatmul.mubr.bf16.vlgmr.msra.gmra.mrb[0].mxu0 %v860_v18  ;;  %343 = vmatmul.mubr.bf16.vlgmr.msra.gmra.mrb[0].mxu1 %v863_v19 }
  0x23   :  { %318 = vmatprep.mubr.bf16.mxu0 %v866_v20  ;;  %350 = vmatprep.mubr.bf16.mxu1 %v868_v21 }
  0x2a   :  { %319 = vmatmul.mubr.bf16.gmra.mrb[4].mxu0 %v870_v22  ;;  %351 = vmatmul.mubr.bf16.gmra.mrb[4].mxu1 %v871_v23 }
  0x2b   :  { %326 = vmatprep.mubr.bf16.mxu0 %v872_v24  ;;  %358 = vmatprep.mubr.bf16.mxu1 %v874_v25  ;;  %v684_v24 = vunpack.c.l.bf16 %v750_v13 }
  0x32   :  { %327 = vmatmul.mubr.bf16.gmra.mrb[8].mxu0 %v876_v26  ;;  %359 = vmatmul.mubr.bf16.gmra.mrb[8].mxu1 %v877_v27  ;;  %v700_v26 = vunpack.c.l.bf16 %v754_v14 }
  0x33   :  { %334 = vmatprep.mubr.bf16.mxu0 %v878_v28  ;;  %366 = vmatprep.mubr.bf16.mxu1 %v880_v29  ;;  %v685_v28 = vunpack.c.h.bf16 %v750_v13 }
  0x3a   :  { %335 = vmatmul.mubr.bf16.gmra.mrb[12].mxu0 %v882_v30  ;;  %367 = vmatmul.mubr.bf16.gmra.mrb[12].mxu1 %v883_v31  ;;  %v701_v30 = vunpack.c.h.bf16 %v754_v14 }
  0xf5   :  { %v780_v32 = vpop.f32.mrb[0].mxu0  ;;  %v804_v33 = vpop.f32.mrb[0].mxu1 }
  0xf6   :  { %v781_v34 = vpop.f32.mrb[1].mxu0  ;;  %v805_v36 = vpop.f32.mrb[1].mxu1 }
  0xf7   :  { %v782_v37 = vadd.f32 %v781_v34, %v780_v32  ;;  %v806_v38 = vadd.f32 %v805_v36, %v804_v33  ;;  %v783_v39 = vpop.f32.mrb[2].mxu0  ;;  %v807_v40 = vpop.f32.mrb[2].mxu1 }
  0xf8   :  { %v784_v41 = vpop.f32.mrb[3].mxu0  ;;  %v808_v42 = vpop.f32.mrb[3].mxu1 }
  0xf9   :  { %v433_v43 = vadd.f32 %v782_v37, %v1008_v35  ;;  %v441_v45 = vadd.f32 %v806_v38, %v1008_v35  ;;  %v785_v47 = vadd.f32 %v784_v41, %v783_v39  ;;  %v809_v48 = vadd.f32 %v808_v42, %v807_v40 }
  0xfb   :  { %v449_v49 = vmul.f32 0.1, %v433_v43  ;;  %v457_v50 = vmul.f32 0.1, %v441_v45  ;;  %v434_v51 = vadd.f32 %v785_v47, %v1008_v35  ;;  %v442_v52 = vadd.f32 %v809_v48, %v1008_v35 }
  0xfd   :  { %v465_v57 = vmax.f32 %v433_v43, %v449_v49  ;;  %v473_v58 = vmax.f32 %v441_v45, %v457_v50  ;;  %v450_v59 = vmul.f32 0.1, %v434_v51  ;;  %v458_v60 = vmul.f32 0.1, %v442_v52  ;;  %v786_v61 = vpop.f32.mrb[4].mxu0  ;;  %v810_v62 = vpop.f32.mrb[4].mxu1 }
  0xfe   :  { %v787_v63 = vpop.f32.mrb[5].mxu0  ;;  %v811_v0 = vpop.f32.mrb[5].mxu1 }
  0xff   :  { %v466_v1 = vmax.f32 %v434_v51, %v450_v59  ;;  %v474_v2 = vmax.f32 %v442_v52, %v458_v60  ;;  %v789_v3 = vpop.f32.mrb[6].mxu0  ;;  %v813_v4 = vpop.f32.mrb[6].mxu1  ;;  %v513_v5 = vadd.f32 %v680_v53, %v465_v57  ;;  %v521_v6 = vadd.f32 %v696_v54, %v473_v58  ;;  %v751_v52 = vld [vmem:[%s1077_s3 + $0x10] sm:$0xff]  }
 0x100   :  { %v788_v7 = vadd.f32 %v787_v63, %v786_v61  ;;  %v812_v8 = vadd.f32 %v811_v0, %v810_v62  ;;  %v790_v9 = vpop.f32.mrb[7].mxu0  ;;  %v814_v10 = vpop.f32.mrb[7].mxu1  ;;  %v755_v53 = vld [vmem:[%s1077_s3 + $0x30] sm:$0xff]   ;;  %v688_v62 = vunpack.c.l.bf16 %v751_v52  ;;  %v689_v0 = vunpack.c.h.bf16 %v751_v52 }
 0x101   :  { %v514_v11 = vadd.f32 %v681_v55, %v466_v1  ;;  %v522_v12 = vadd.f32 %v697_v56, %v474_v2  ;;  %v791_v15 = vadd.f32 %v790_v9, %v789_v3  ;;  %v815_v16 = vadd.f32 %v814_v10, %v813_v4  ;;  %v752_v4 = vld [vmem:[%s1077_s3 + $0x18] sm:$0xff]  }
 0x102   :  { %v435_v17 = vadd.f32 %v788_v7, %v1008_v35  ;;  %v443_v18 = vadd.f32 %v812_v8, %v1008_v35  ;;  %v704_v63 = vunpack.c.l.bf16 %v755_v53  ;;  %v705_v1 = vunpack.c.h.bf16 %v755_v53 }
 0x103   :  { %v713_v19 = vpack.c.bf16 %v514_v11, %v513_v5  ;;  %v733_v20 = vpack.c.bf16 %v522_v12, %v521_v6  ;;  %v436_v21 = vadd.f32 %v791_v15, %v1008_v35  ;;  %v444_v22 = vadd.f32 %v815_v16, %v1008_v35  ;;  %v756_v5 = vld [vmem:[%s1077_s3 + $0x38] sm:$0xff]  }
 0x104   :  { %v451_v23 = vmul.f32 0.1, %v435_v17  ;;  %v459_v25 = vmul.f32 0.1, %v443_v18 }
 0x105   :  { %714 = vst [vmem:[%s1078_s4] sm:$0xff] %v713_v19   ;;  %760 = vst [vmem:[%s1078_s4 + $0x20] sm:$0xff] %v733_v20   ;;  %v452_v27 = vmul.f32 0.1, %v436_v21  ;;  %v460_v29 = vmul.f32 0.1, %v444_v22  ;;  %v792_v31 = vpop.f32.mrb[8].mxu0  ;;  %v708_v19 = vunpack.c.l.bf16 %v756_v5 }
 0x106   :  { %v816_v32 = vpop.f32.mrb[8].mxu1  ;;  %v467_v33 = vmax.f32 %v435_v17, %v451_v23  ;;  %v475_v34 = vmax.f32 %v443_v18, %v459_v25  ;;  %v793_v36 = vpop.f32.mrb[9].mxu0  ;;  %v692_v18 = vunpack.c.l.bf16 %v752_v4 }
 0x107   :  { %v817_v37 = vpop.f32.mrb[9].mxu1  ;;  %v468_v38 = vmax.f32 %v436_v21, %v452_v27  ;;  %v476_v39 = vmax.f32 %v444_v22, %v460_v29  ;;  %v794_v40 = vadd.f32 %v793_v36, %v792_v31  ;;  %v795_v42 = vpop.f32.mrb[10].mxu0 }
 0x108   :  { %v818_v41 = vadd.f32 %v817_v37, %v816_v32  ;;  %v819_v43 = vpop.f32.mrb[10].mxu1  ;;  %v515_v44 = vadd.f32 %v684_v24, %v467_v33  ;;  %v523_v45 = vadd.f32 %v700_v26, %v475_v34  ;;  %v796_v46 = vpop.f32.mrb[11].mxu0  ;;  %v693_v37 = vunpack.c.h.bf16 %v752_v4 }
 0x109   :  { %v820_v47 = vpop.f32.mrb[11].mxu1  ;;  %v516_v48 = vadd.f32 %v685_v28, %v468_v38  ;;  %v524_v49 = vadd.f32 %v701_v30, %v476_v39  ;;  %v437_v50 = vadd.f32 %v794_v40, %v1008_v35  ;;  %v797_v54 = vadd.f32 %v796_v46, %v795_v42 }
 0x10a   :  { %v445_v51 = vadd.f32 %v818_v41, %v1008_v35  ;;  %v821_v55 = vadd.f32 %v820_v47, %v819_v43  ;;  %v709_v38 = vunpack.c.h.bf16 %v756_v5 }
 0x10b   :  { %v718_v56 = vpack.c.bf16 %v516_v48, %v515_v44  ;;  %v738_v57 = vpack.c.bf16 %v524_v49, %v523_v45  ;;  %v453_v58 = vmul.f32 0.1, %v437_v50  ;;  %v438_v60 = vadd.f32 %v797_v54, %v1008_v35 }
 0x10c   :  { %v461_v59 = vmul.f32 0.1, %v445_v51  ;;  %v446_v61 = vadd.f32 %v821_v55, %v1008_v35 }
 0x10d   :  { %757 = vst [vmem:[%s1078_s4 + $0x8] sm:$0xff] %v718_v56   ;;  %761 = vst [vmem:[%s1078_s4 + $0x28] sm:$0xff] %v738_v57   ;;  %v798_v2 = vpop.f32.mrb[12].mxu0  ;;  %v822_v3 = vpop.f32.mrb[12].mxu1  ;;  %v469_v6 = vmax.f32 %v437_v50, %v453_v58  ;;  %v454_v8 = vmul.f32 0.1, %v438_v60 }
 0x10e   :  { %v477_v7 = vmax.f32 %v445_v51, %v461_v59  ;;  %v462_v9 = vmul.f32 0.1, %v446_v61  ;;  %v799_v10 = vpop.f32.mrb[13].mxu0  ;;  %v823_v11 = vpop.f32.mrb[13].mxu1 }
 0x10f   :  { %v800_v12 = vadd.f32 %v799_v10, %v798_v2  ;;  %v824_v13 = vadd.f32 %v823_v11, %v822_v3  ;;  %v801_v14 = vpop.f32.mrb[14].mxu0  ;;  %v825_v15 = vpop.f32.mrb[14].mxu1  ;;  %v470_v16 = vmax.f32 %v438_v60, %v454_v8  ;;  %v517_v26 = vadd.f32 %v688_v62, %v469_v6 }
 0x110   :  { %v478_v17 = vmax.f32 %v446_v61, %v462_v9  ;;  %v802_v20 = vpop.f32.mrb[15].mxu0  ;;  %v826_v21 = vpop.f32.mrb[15].mxu1  ;;  %v525_v27 = vadd.f32 %v704_v63, %v477_v7 }
 0x111   :  { %v439_v22 = vadd.f32 %v800_v12, %v1008_v35  ;;  %v447_v23 = vadd.f32 %v824_v13, %v1008_v35  ;;  %v803_v24 = vadd.f32 %v802_v20, %v801_v14  ;;  %v827_v25 = vadd.f32 %v826_v21, %v825_v15 }
 0x112   :  { %v518_v28 = vadd.f32 %v689_v0, %v470_v16  ;;  %v526_v29 = vadd.f32 %v705_v1, %v478_v17 }
 0x113   :  { %v455_v30 = vmul.f32 0.1, %v439_v22  ;;  %v463_v31 = vmul.f32 0.1, %v447_v23  ;;  %v440_v32 = vadd.f32 %v803_v24, %v1008_v35  ;;  %v448_v33 = vadd.f32 %v827_v25, %v1008_v35 }
 0x114   :  { %v723_v34 = vpack.c.bf16 %v518_v28, %v517_v26  ;;  %v743_v36 = vpack.c.bf16 %v526_v29, %v525_v27 }
 0x115   :  { %v471_v39 = vmax.f32 %v439_v22, %v455_v30  ;;  %v479_v40 = vmax.f32 %v447_v23, %v463_v31  ;;  %v456_v41 = vmul.f32 0.1, %v440_v32  ;;  %v464_v42 = vmul.f32 0.1, %v448_v33 }
 0x116   :  { %758 = vst [vmem:[%s1078_s4 + $0x10] sm:$0xff] %v723_v34   ;;  %762 = vst [vmem:[%s1078_s4 + $0x30] sm:$0xff] %v743_v36  }
 0x117   :  { %v472_v43 = vmax.f32 %v440_v32, %v456_v41  ;;  %v480_v44 = vmax.f32 %v448_v33, %v464_v42  ;;  %v519_v45 = vadd.f32 %v692_v18, %v471_v39  ;;  %v527_v35 = vadd.f32 %v708_v19, %v479_v40 }
 0x119   :  { %v520_v46 = vadd.f32 %v693_v37, %v472_v43  ;;  %v528_v47 = vadd.f32 %v709_v38, %v480_v44 }
 0x11b   :  { %v728_v48 = vpack.c.bf16 %v520_v46, %v519_v45  ;;  %v748_v49 = vpack.c.bf16 %v528_v47, %v527_v35 }
 0x11d   :  { %759 = vst [vmem:[%s1078_s4 + $0x18] sm:$0xff] %v728_v48   ;;  %763 = vst [vmem:[%s1078_s4 + $0x38] sm:$0xff] %v748_v49  }

// kernel: _lambda_.28
= control target key start
LH: loop header
LB: loop body
LE: loop exit
PB: predicated region body
PF: predicated region fallthrough
CT: control target
= control target key end

     0   :  { %s343_s1 = inlined_call_operand.vmem [shape: bf16[128,128], index: 1, kind: input, shape index: {}]   ;;  %s344_s0 = inlined_call_operand.vmem [shape: bf16[32,128], index: 0, kind: input, shape index: {}]   ;;  %s345_s2 = inlined_call_operand.vmem [shape: f32[1,128], index: 2, kind: input, shape index: {}]   ;;  %s346_s3 = inlined_call_operand.vmem [shape: bf16[32,128], index: 3, kind: output, shape index: {}]  }
   0x1   :  { %v274_v0 = vld [vmem:[%s343_s1] sm:$0xff]   ;;  %v275_v1 = vld [vmem:[%s343_s1 + $0x8] sm:$0xff]   ;;  %v276_v2 = vld [vmem:[%s343_s1 + $0x10] sm:$0xff]  }
   0x2   :  { %254 = vmatprep.subr.bf16.mxu0 %v274_v0  ;;  %v277_v3 = vld [vmem:[%s343_s1 + $0x18] sm:$0xff]   ;;  %v282_v4 = vld [vmem:[%s344_s0] sm:$0xff]   ;;  %v279_v6 = vld [vmem:[%s343_s1 + $0x28] sm:$0xff]  }
   0x3   :  { %255 = vmatpush3.bf16.msra.mxu0 %v274_v0  ;;  %270 = vmatprep.mubr.bf16.mxu0 %v282_v4  ;;  %v278_v5 = vld [vmem:[%s343_s1 + $0x20] sm:$0xff]   ;;  %v280_v7 = vld [vmem:[%s343_s1 + $0x30] sm:$0xff]   ;;  %v281_v8 = vld [vmem:[%s343_s1 + $0x38] sm:$0xff]  }
   0x4   :  { %256 = vmatprep.subr.bf16.mxu0 %v275_v1  ;;  %v283_v9 = vld [vmem:[%s344_s0 + $0x8] sm:$0xff]   ;;  %v224_v10 = vld [vmem:[%s345_s2] ss:$0 sm:$0xff] }
   0x7   :  { %257 = vmatpush3.bf16.msra.mxu0 %v275_v1 }
   0x8   :  { %258 = vmatprep.subr.bf16.mxu0 %v276_v2 }
   0xb   :  { %259 = vmatpush3.bf16.msra.mxu0 %v276_v2 }
   0xc   :  { %260 = vmatprep.subr.bf16.mxu0 %v277_v3 }
   0xf   :  { %261 = vmatpush3.bf16.msra.mxu0 %v277_v3 }
  0x10   :  { %262 = vmatprep.subr.bf16.mxu0 %v278_v5 }
  0x13   :  { %263 = vmatpush3.bf16.msra.mxu0 %v278_v5 }
  0x14   :  { %264 = vmatprep.subr.bf16.mxu0 %v279_v6 }
  0x17   :  { %265 = vmatpush3.bf16.msra.mxu0 %v279_v6 }
  0x18   :  { %266 = vmatprep.subr.bf16.mxu0 %v280_v7 }
  0x1b   :  { %267 = vmatpush3.bf16.msra.mxu0 %v280_v7 }
  0x1c   :  { %268 = vmatprep.subr.bf16.mxu0 %v281_v8 }
  0x1f   :  { %269 = vmatpush3.bf16.msra.mxu0 %v281_v8 }
  0x22   :  { %271 = vmatmul.mubr.bf16.vlgmr.msra.gmra.mrb[0].mxu0 %v283_v9 }
  0xf5   :  { %v272_v11 = vpop.f32.mrb[0].mxu0 }
  0xf6   :  { %v180_v12 = vadd.f32 %v272_v11, %v224_v10  ;;  %v141_v13 = vpop.f32.mrb[1].mxu0 }
  0xf7   :  { %v178_v14 = vadd.f32 %v224_v10, %v141_v13  ;;  %v273_v15 = vpop.f32.mrb[2].mxu0 }
  0xf8   :  { %v184_v16 = vmul.f32 0.1, %v180_v12  ;;  %v181_v17 = vadd.f32 %v273_v15, %v224_v10  ;;  %v144_v18 = vpop.f32.mrb[3].mxu0 }
  0xf9   :  { %v182_v19 = vmul.f32 0.1, %v178_v14  ;;  %v179_v20 = vadd.f32 %v224_v10, %v144_v18 }
  0xfa   :  { %v185_v21 = vmul.f32 0.1, %v181_v17  ;;  %v188_v23 = vmax.f32 %v180_v12, %v184_v16 }
  0xfb   :  { %v183_v22 = vmul.f32 0.1, %v179_v20  ;;  %v186_v25 = vmax.f32 %v178_v14, %v182_v19 }
  0xfc   :  { %v189_v24 = vmax.f32 %v181_v17, %v185_v21 }
  0xfd   :  { %v187_v26 = vmax.f32 %v179_v20, %v183_v22 }
  0xfe   :  { %v241_v27 = vpack.c.bf16 %v189_v24, %v188_v23 }
  0xff   :  { %v236_v28 = vpack.c.bf16 %v187_v26, %v186_v25 }
 0x100   :  { %243 = vst [vmem:[%s346_s3 + $0x8] sm:$0xff] %v241_v27  }
 0x101   :  { %237 = vst [vmem:[%s346_s3] sm:$0xff] %v236_v28  }

// kernel: _lambda_.27
= control target key start
LH: loop header
LB: loop body
LE: loop exit
PB: predicated region body
PF: predicated region fallthrough
CT: control target
= control target key end

     0   :  { %s800_s12 = smov 0   ;;  %s802_s13 = smov 0   ;;  %s893_s0 = inlined_call_operand.vmem [shape: bf16[32,384], index: 0, kind: input, shape index: {}]   ;;  %s894_s1 = inlined_call_operand.vmem [shape: bf16[384,128], index: 1, kind: input, shape index: {}]   ;;  %s895_s2 = inlined_call_operand.vmem [shape: f32[1,128], index: 2, kind: input, shape index: {}]   ;;  %s896_s3 = inlined_call_operand.vmem [shape: bf16[32,128], index: 3, kind: output, shape index: {}]  }
   0x1   :  { %s804_s14 = smov 0   ;;  %s806_s15 = smov 0  }
   0x2   :  { %s808_s16 = smov 0  }
   0x3 LB: > { %s25_s17 = sadd.s32 1, %s773_s15  ;;  %p48_p1 = scmp.ne.s32.totalorder %s765_s13, %s761_s12  ;;  %s777_s16 = sphi %s808_s16, %s13_s16   ;;  %s773_s15 = sphi %s806_s15, %s900_s15   ;;  %s769_s14 = sphi %s804_s14, %s899_s14   ;;  %s765_s13 = sphi %s802_s13, %s898_s13   ;;  %s761_s12 = sphi %s800_s12, %s897_s12  }
   0x4   : > { %p26_p0 = scmp.ge.s32.totalorder %s25_s17, 3  ;;  %p49_p2 = scmp.eq.s32.totalorder %s777_s16, 0 }
   0x5   : > { %s41_s19 = sadd.s32 1, %s765_s13  ;;  %p615_p5 = scmp.ge.s32.totalorder %s777_s16, 3 }
   0x6   : > { %s902_s17 = smov (%p26_p0, %s25_s17), 0  ;;  %p50_p3 = por %p49_p2, %p48_p1 }
   0x7   : > { %s37_s18 = ssub.s32 %s773_s15, %s902_s17  ;;  %162 = sbr.rel (%p615_p5) target bundleno = 21 (0x15), region = 20 }
   0x8   : > { %p39_p4 = scmp.eq.s32.totalorder %s37_s18, 0 }
   0xa   : > { %s835_s20 = scalar_select %p39_p4, %s765_s13, %s41_s19  }
   0xe   : > { %165 = sbr.rel (!%p50_p3) target bundleno = 21 (0x15), region = 24  ;;  %s167_s21 = sand.u32 (%p50_p3), 1, %s765_s13  }
   0xf   : > { %s617_s22 = sshll.u32 (%p50_p3), %s773_s15, 2  ;;  %s616_s23 = sshll.u32 (%p50_p3), %s167_s21, 4 }
  0x10   : > { %s174_s26 = scalar_lea.vmem (%p50_p3), %s893_s0, %s617_s22  ;;  %s169_s27 = scalar_lea.vmem (%p50_p3), [#allocation3], %s616_s23 }
  0x11   : > { %v190_v0 = vld [vmem:[%s174_s26] sm:$0xf] (%p50_p3)  ;;  %v192_v1 = vld [vmem:[%s174_s26 + $0xc] sm:$0xf] (%p50_p3)  ;;  %v194_v2 = vld [vmem:[%s174_s26 + $0x18] sm:$0xf] (%p50_p3) }
  0x12   : > { %191 = vst [vmem:[%s169_s27] sm:$0xf] (%p50_p3), %v190_v0  ;;  %193 = vst [vmem:[%s169_s27 + $0x4] sm:$0xf] (%p50_p3), %v192_v1  ;;  %v196_v3 = vld [vmem:[%s174_s26 + $0x24] sm:$0xf] (%p50_p3) }
  0x13   : > { %195 = vst [vmem:[%s169_s27 + $0x8] sm:$0xf] (%p50_p3), %v194_v2  ;;  %197 = vst [vmem:[%s169_s27 + $0xc] sm:$0xf] (%p50_p3), %v196_v3 }
  0x15 PF: > { %p618_p6 = scmp.ge.s32.totalorder %s777_s16, 1  ;;  %p239_p7 = scmp.lt.s32.totalorder %s777_s16, 4 }
  0x17   : > { %p240_p8 = pnand %p618_p6, %p239_p7 }
  0x18   : > { %s246_s28 = sand.u32 (!%p240_p8), 1, %s761_s12   ;;  %s620_s29 = sshll.u32 (!%p240_p8), %s769_s14, 4 }
  0x19   : > { %243 = sbr.rel (%p240_p8) target bundleno = 306 (0x132), region = 69  ;;  %s847_s30 = sshll.u32 (!%p240_p8), %s246_s28, 4 }
  0x1a   : > { %p285_p9 = scmp.lt.s32.totalorder (!%p240_p8), %s620_s29, 47  ;;  %s248_s8 = scalar_lea.vmem (!%p240_p8), [#allocation3], %s847_s30 }
  0x1b   : > { %p622_p10 = scmp.ne.s32.totalorder (!%p240_p8), %s769_s14, 0 }
  0x20   : > { %s904_s29 = smov (!%p285_p9, %s620_s29), 47  ;;  %309 = sbr.rel (%p622_p10) target bundleno = 39 (0x27), region = 77 }
  0x21   : > { %s621_s4 = sshll.u32 %s904_s29, 2  ;;  %v779_v4 = vmov (!%p622_p10), 0.0  }
  0x22   : > { %s852_s7 = scalar_lea.vmem %s894_s1, %s621_s4  ;;  %310 = vst [vmem:[#allocation2] sm:$0xff] (!%p622_p10), %v779_v4  ;;  %311 = vst [vmem:[#allocation2 + $0x8] sm:$0xff] (!%p622_p10), %v779_v4 }
  0x23   : > { %312 = vst [vmem:[#allocation2 + $0x10] sm:$0xff] (!%p622_p10), %v779_v4  ;;  %313 = vst [vmem:[#allocation2 + $0x18] sm:$0xff] (!%p622_p10), %v779_v4 }
  0x27 PF: > { %v729_v5 = vld [vmem:[%s852_s7] sm:$0xff]   ;;  %v730_v6 = vld [vmem:[%s852_s7 + $0x8] sm:$0xff]   ;;  %v731_v7 = vld [vmem:[%s852_s7 + $0x10] sm:$0xff]   ;;  %p633_p11 = scmp.ne.s32.totalorder %s769_s14, 2 }
  0x28   : > { %668 = vmatprep.subr.bf16.mxu0 %v729_v5  ;;  %v732_v8 = vld [vmem:[%s852_s7 + $0x18] sm:$0xff]   ;;  %v737_v9 = vld [vmem:[%s248_s8] sm:$0xff]   ;;  %v734_v11 = vld [vmem:[%s852_s7 + $0x28] sm:$0xff]  }
  0x29   : > { %669 = vmatpush3.bf16.msra.mxu0 %v729_v5  ;;  %684 = vmatprep.mubr.bf16.mxu0 %v737_v9  ;;  %v733_v10 = vld [vmem:[%s852_s7 + $0x20] sm:$0xff]   ;;  %v735_v12 = vld [vmem:[%s852_s7 + $0x30] sm:$0xff]   ;;  %v736_v13 = vld [vmem:[%s852_s7 + $0x38] sm:$0xff]  }
  0x2a   : > { %670 = vmatprep.subr.bf16.mxu0 %v730_v6  ;;  %v738_v14 = vld [vmem:[%s248_s8 + $0x8] sm:$0xff]   ;;  %v316_v15 = vld [vmem:[#allocation2 + $0x10] sm:$0xff]  ;;  %v314_v16 = vld [vmem:[#allocation2] sm:$0xff] }
  0x2b   : > { %v317_v18 = vld [vmem:[#allocation2 + $0x18] sm:$0xff]  ;;  %v315_v21 = vld [vmem:[#allocation2 + $0x8] sm:$0xff]  ;;  %v634_v29 = vld [vmem:[%s895_s2] ss:$0 sm:$0xff] (!%p633_p11) }
  0x2d   : > { %671 = vmatpush3.bf16.msra.mxu0 %v730_v6 }
  0x2e   : > { %672 = vmatprep.subr.bf16.mxu0 %v731_v7 }
  0x31   : > { %673 = vmatpush3.bf16.msra.mxu0 %v731_v7 }
  0x32   : > { %674 = vmatprep.subr.bf16.mxu0 %v732_v8 }
  0x35   : > { %675 = vmatpush3.bf16.msra.mxu0 %v732_v8 }
  0x36   : > { %676 = vmatprep.subr.bf16.mxu0 %v733_v10 }
  0x39   : > { %677 = vmatpush3.bf16.msra.mxu0 %v733_v10 }
  0x3a   : > { %678 = vmatprep.subr.bf16.mxu0 %v734_v11 }
  0x3d   : > { %679 = vmatpush3.bf16.msra.mxu0 %v734_v11 }
  0x3e   : > { %680 = vmatprep.subr.bf16.mxu0 %v735_v12 }
  0x41   : > { %681 = vmatpush3.bf16.msra.mxu0 %v735_v12 }
  0x42   : > { %682 = vmatprep.subr.bf16.mxu0 %v736_v13 }
  0x45   : > { %683 = vmatpush3.bf16.msra.mxu0 %v736_v13 }
  0x48   : > { %685 = vmatmul.mubr.bf16.vlgmr.msra.gmra.mrb[0].mxu0 %v738_v14 }
 0x11b   : > { %v686_v17 = vpop.f32.mrb[0].mxu0  ;;  %458 = sbr.rel (%p633_p11) target bundleno = 306 (0x132), region = 81 }
 0x11c   : > { %v449_v19 = vadd.f32 %v686_v17, %v316_v15  ;;  %v432_v20 = vpop.f32.mrb[1].mxu0 }
 0x11d   : > { %v447_v22 = vadd.f32 %v432_v20, %v314_v16  ;;  %v687_v23 = vpop.f32.mrb[2].mxu0 }
 0x11e   : > { %453 = vst [vmem:[#allocation2 + $0x10] sm:$0xff] %v449_v19  ;;  %v450_v24 = vadd.f32 %v687_v23, %v317_v18  ;;  %v435_v25 = vpop.f32.mrb[3].mxu0 }
 0x11f   : > { %451 = vst [vmem:[#allocation2] sm:$0xff] %v447_v22  ;;  %v448_v26 = vadd.f32 %v435_v25, %v315_v21 }
 0x120   : > { %454 = vst [vmem:[#allocation2 + $0x18] sm:$0xff] %v450_v24 }
 0x121   : > { %452 = vst [vmem:[#allocation2 + $0x8] sm:$0xff] %v448_v26 }
 0x125   : > { %v461_v32 = vld [vmem:[#allocation2 + $0x10] sm:$0xff] }
 0x126   : > { %v459_v27 = vld [vmem:[#allocation2] sm:$0xff]  ;;  %v472_v34 = vadd.f32 %v634_v29, %v461_v32 }
 0x127   : > { %v470_v30 = vadd.f32 %v634_v29, %v459_v27  ;;  %v462_v33 = vld [vmem:[#allocation2 + $0x18] sm:$0xff] }
 0x128   : > { %v460_v28 = vld [vmem:[#allocation2 + $0x8] sm:$0xff]  ;;  %v473_v35 = vadd.f32 %v634_v29, %v462_v33  ;;  %v476_v38 = vmul.f32 0.1, %v472_v34 }
 0x129   : > { %v471_v31 = vadd.f32 %v634_v29, %v460_v28  ;;  %v474_v36 = vmul.f32 0.1, %v470_v30 }
 0x12a   : > { %v477_v39 = vmul.f32 0.1, %v473_v35  ;;  %v480_v42 = vmax.f32 %v472_v34, %v476_v38 }
 0x12b   : > { %v475_v37 = vmul.f32 0.1, %v471_v31  ;;  %v478_v40 = vmax.f32 %v470_v30, %v474_v36 }
 0x12c   : > { %v481_v43 = vmax.f32 %v473_v35, %v477_v39 }
 0x12d   : > { %v479_v41 = vmax.f32 %v471_v31, %v475_v37 }
 0x12e   : > { %v655_v45 = vpack.c.bf16 %v481_v43, %v480_v42 }
 0x12f   : > { %v650_v44 = vpack.c.bf16 %v479_v41, %v478_v40 }
 0x130   : > { %657 = vst [vmem:[%s896_s3 + $0x8] sm:$0xff] %v655_v45  }
 0x131   : > { %651 = vst [vmem:[%s896_s3] sm:$0xff] %v650_v44  }
 0x132 PF: > { %s13_s16 = sadd.s32 1, %s777_s16   ;;  %s897_s12 = smov %s765_s13 }
 0x133   : > { %p10_p12 = scmp.ge.s32.totalorder %s13_s16, 5   ;;  %s898_s13 = smov %s835_s20 }
 0x134   : > { %s899_s14 = smov %s773_s15  ;;  %s900_s15 = smov %s902_s17 }
 0x135   :  { %12 = sbr.rel (!%p10_p12) target bundleno = 3 (0x3), region = 122 }

// kernel: _lambda_.29
= control target key start
LH: loop header
LB: loop body
LE: loop exit
PB: predicated region body
PF: predicated region fallthrough
CT: control target
= control target key end

     0   :  { %s905_s15 = smov 0   ;;  %s907_s16 = smov 0   ;;  %s1004_s0 = inlined_call_operand.vmem [shape: bf16[32,384], index: 0, kind: input, shape index: {}]   ;;  %s1005_s1 = inlined_call_operand.vmem [shape: bf16[384,128], index: 1, kind: input, shape index: {}]   ;;  %s1006_s2 = inlined_call_operand.vmem [shape: f32[1,128], index: 2, kind: input, shape index: {}]   ;;  %s1007_s3 = inlined_call_operand.vmem [shape: bf16[32,128], index: 3, kind: input, shape index: {}]   ;;  %s1008_s4 = inlined_call_operand.vmem [shape: bf16[32,128], index: 4, kind: output, shape index: {}]  }
   0x1   :  { %s909_s17 = smov 0   ;;  %s911_s18 = smov 0  }
   0x2   :  { %s913_s19 = smov 0  }
   0x3 LB: > { %s26_s20 = sadd.s32 1, %s873_s18  ;;  %p49_p1 = scmp.ne.s32.totalorder %s865_s16, %s861_s15  ;;  %s877_s19 = sphi %s913_s19, %s14_s19   ;;  %s873_s18 = sphi %s911_s18, %s1012_s18   ;;  %s869_s17 = sphi %s909_s17, %s1011_s17   ;;  %s865_s16 = sphi %s907_s16, %s1010_s16   ;;  %s861_s15 = sphi %s905_s15, %s1009_s15  }
   0x4   : > { %p27_p0 = scmp.ge.s32.totalorder %s26_s20, 3  ;;  %p50_p2 = scmp.eq.s32.totalorder %s877_s19, 0 }
   0x5   : > { %s42_s22 = sadd.s32 1, %s865_s16  ;;  %p706_p5 = scmp.ge.s32.totalorder %s877_s19, 3 }
   0x6   : > { %s1014_s20 = smov (%p27_p0, %s26_s20), 0  ;;  %p51_p3 = por %p50_p2, %p49_p1 }
   0x7   : > { %s38_s21 = ssub.s32 %s873_s18, %s1014_s20  ;;  %203 = sbr.rel (%p706_p5) target bundleno = 21 (0x15), region = 24 }
   0x8   : > { %p40_p4 = scmp.eq.s32.totalorder %s38_s21, 0 }
   0xa   : > { %s940_s23 = scalar_select %p40_p4, %s865_s16, %s42_s22  }
   0xe   : > { %206 = sbr.rel (!%p51_p3) target bundleno = 21 (0x15), region = 28  ;;  %s208_s24 = sand.u32 (%p51_p3), 1, %s865_s16  }
   0xf   : > { %s708_s25 = sshll.u32 (%p51_p3), %s873_s18, 2  ;;  %s707_s26 = sshll.u32 (%p51_p3), %s208_s24, 4 }
  0x10   : > { %s215_s29 = scalar_lea.vmem (%p51_p3), %s1004_s0, %s708_s25  ;;  %s210_s30 = scalar_lea.vmem (%p51_p3), [#allocation3], %s707_s26 }
  0x11   : > { %v231_v0 = vld [vmem:[%s215_s29] sm:$0xf] (%p51_p3)  ;;  %v233_v1 = vld [vmem:[%s215_s29 + $0xc] sm:$0xf] (%p51_p3)  ;;  %v235_v2 = vld [vmem:[%s215_s29 + $0x18] sm:$0xf] (%p51_p3) }
  0x12   : > { %232 = vst [vmem:[%s210_s30] sm:$0xf] (%p51_p3), %v231_v0  ;;  %234 = vst [vmem:[%s210_s30 + $0x4] sm:$0xf] (%p51_p3), %v233_v1  ;;  %v237_v3 = vld [vmem:[%s215_s29 + $0x24] sm:$0xf] (%p51_p3) }
  0x13   : > { %236 = vst [vmem:[%s210_s30 + $0x8] sm:$0xf] (%p51_p3), %v235_v2  ;;  %238 = vst [vmem:[%s210_s30 + $0xc] sm:$0xf] (%p51_p3), %v237_v3 }
  0x15 PF: > { %p709_p6 = scmp.ge.s32.totalorder %s877_s19, 1  ;;  %p280_p7 = scmp.lt.s32.totalorder %s877_s19, 4 }
  0x17   : > { %p281_p8 = pnand %p709_p6, %p280_p7 }
  0x18   : > { %s287_s5 = sand.u32 (!%p281_p8), 1, %s861_s15   ;;  %s711_s6 = sshll.u32 (!%p281_p8), %s869_s17, 4 }
  0x19   : > { %284 = sbr.rel (%p281_p8) target bundleno = 308 (0x134), region = 73  ;;  %s952_s7 = sshll.u32 (!%p281_p8), %s287_s5, 4 }
  0x1a   : > { %p336_p9 = scmp.lt.s32.totalorder (!%p281_p8), %s711_s6, 47  ;;  %s289_s12 = scalar_lea.vmem (!%p281_p8), [#allocation3], %s952_s7 }
  0x1b   : > { %p713_p10 = scmp.ne.s32.totalorder (!%p281_p8), %s869_s17, 0 }
  0x20   : > { %s1016_s6 = smov (!%p336_p9, %s711_s6), 47  ;;  %369 = sbr.rel (%p713_p10) target bundleno = 39 (0x27), region = 81 }
  0x21   : > { %s712_s8 = sshll.u32 %s1016_s6, 2  ;;  %v879_v4 = vmov (!%p713_p10), 0.0  }
  0x22   : > { %s957_s11 = scalar_lea.vmem %s1005_s1, %s712_s8  ;;  %370 = vst [vmem:[#allocation2] sm:$0xff] (!%p713_p10), %v879_v4  ;;  %371 = vst [vmem:[#allocation2 + $0x8] sm:$0xff] (!%p713_p10), %v879_v4 }
  0x23   : > { %372 = vst [vmem:[#allocation2 + $0x10] sm:$0xff] (!%p713_p10), %v879_v4  ;;  %373 = vst [vmem:[#allocation2 + $0x18] sm:$0xff] (!%p713_p10), %v879_v4 }
  0x27 PF: > { %v829_v5 = vld [vmem:[%s957_s11] sm:$0xff]   ;;  %v830_v6 = vld [vmem:[%s957_s11 + $0x8] sm:$0xff]   ;;  %v831_v7 = vld [vmem:[%s957_s11 + $0x10] sm:$0xff]   ;;  %p724_p11 = scmp.ne.s32.totalorder %s869_s17, 2 }
  0x28   : > { %768 = vmatprep.subr.bf16.mxu0 %v829_v5  ;;  %v832_v8 = vld [vmem:[%s957_s11 + $0x18] sm:$0xff]   ;;  %v837_v9 = vld [vmem:[%s289_s12] sm:$0xff]   ;;  %v834_v11 = vld [vmem:[%s957_s11 + $0x28] sm:$0xff]  }
  0x29   : > { %769 = vmatpush3.bf16.msra.mxu0 %v829_v5  ;;  %784 = vmatprep.mubr.bf16.mxu0 %v837_v9  ;;  %v833_v10 = vld [vmem:[%s957_s11 + $0x20] sm:$0xff]   ;;  %v835_v12 = vld [vmem:[%s957_s11 + $0x30] sm:$0xff]   ;;  %v836_v13 = vld [vmem:[%s957_s11 + $0x38] sm:$0xff]  }
  0x2a   : > { %770 = vmatprep.subr.bf16.mxu0 %v830_v6  ;;  %v838_v14 = vld [vmem:[%s289_s12 + $0x8] sm:$0xff]   ;;  %v376_v15 = vld [vmem:[#allocation2 + $0x10] sm:$0xff]  ;;  %v374_v16 = vld [vmem:[#allocation2] sm:$0xff] }
  0x2b   : > { %v377_v18 = vld [vmem:[#allocation2 + $0x18] sm:$0xff]  ;;  %v375_v21 = vld [vmem:[#allocation2 + $0x8] sm:$0xff]  ;;  %v725_v29 = vld [vmem:[%s1006_s2] ss:$0 sm:$0xff] (!%p724_p11) }
  0x2c   : > { %v739_v32 = vld [vmem:[%s1007_s3] sm:$0xff] (!%p724_p11)   ;;  %v756_v37 = vld [vmem:[%s1007_s3 + $0x8] sm:$0xff] (!%p724_p11)  }
  0x2d   : > { %771 = vmatpush3.bf16.msra.mxu0 %v830_v6  ;;  %v740_v40 = vunpack.c.l.bf16 (!%p724_p11), %v739_v32  ;;  %v741_v41 = vunpack.c.h.bf16 (!%p724_p11), %v739_v32  ;;  %v744_v44 = vunpack.c.l.bf16 (!%p724_p11), %v756_v37  ;;  %v745_v45 = vunpack.c.h.bf16 (!%p724_p11), %v756_v37 }
  0x2e   : > { %772 = vmatprep.subr.bf16.mxu0 %v831_v7 }
  0x31   : > { %773 = vmatpush3.bf16.msra.mxu0 %v831_v7 }
  0x32   : > { %774 = vmatprep.subr.bf16.mxu0 %v832_v8 }
  0x35   : > { %775 = vmatpush3.bf16.msra.mxu0 %v832_v8 }
  0x36   : > { %776 = vmatprep.subr.bf16.mxu0 %v833_v10 }
  0x39   : > { %777 = vmatpush3.bf16.msra.mxu0 %v833_v10 }
  0x3a   : > { %778 = vmatprep.subr.bf16.mxu0 %v834_v11 }
  0x3d   : > { %779 = vmatpush3.bf16.msra.mxu0 %v834_v11 }
  0x3e   : > { %780 = vmatprep.subr.bf16.mxu0 %v835_v12 }
  0x41   : > { %781 = vmatpush3.bf16.msra.mxu0 %v835_v12 }
  0x42   : > { %782 = vmatprep.subr.bf16.mxu0 %v836_v13 }
  0x45   : > { %783 = vmatpush3.bf16.msra.mxu0 %v836_v13 }
  0x48   : > { %785 = vmatmul.mubr.bf16.vlgmr.msra.gmra.mrb[0].mxu0 %v838_v14 }
 0x11b   : > { %v786_v17 = vpop.f32.mrb[0].mxu0  ;;  %518 = sbr.rel (%p724_p11) target bundleno = 308 (0x134), region = 85 }
 0x11c   : > { %v509_v19 = vadd.f32 %v786_v17, %v376_v15  ;;  %v492_v20 = vpop.f32.mrb[1].mxu0 }
 0x11d   : > { %v507_v22 = vadd.f32 %v492_v20, %v374_v16  ;;  %v787_v23 = vpop.f32.mrb[2].mxu0 }
 0x11e   : > { %513 = vst [vmem:[#allocation2 + $0x10] sm:$0xff] %v509_v19  ;;  %v510_v24 = vadd.f32 %v787_v23, %v377_v18  ;;  %v495_v25 = vpop.f32.mrb[3].mxu0 }
 0x11f   : > { %511 = vst [vmem:[#allocation2] sm:$0xff] %v507_v22  ;;  %v508_v26 = vadd.f32 %v495_v25, %v375_v21 }
 0x120   : > { %514 = vst [vmem:[#allocation2 + $0x18] sm:$0xff] %v510_v24 }
 0x121   : > { %512 = vst [vmem:[#allocation2 + $0x8] sm:$0xff] %v508_v26 }
 0x125   : > { %v521_v33 = vld [vmem:[#allocation2 + $0x10] sm:$0xff] }
 0x126   : > { %v519_v27 = vld [vmem:[#allocation2] sm:$0xff]  ;;  %v532_v35 = vadd.f32 %v725_v29, %v521_v33 }
 0x127   : > { %v530_v30 = vadd.f32 %v725_v29, %v519_v27  ;;  %v522_v34 = vld [vmem:[#allocation2 + $0x18] sm:$0xff] }
 0x128   : > { %v520_v28 = vld [vmem:[#allocation2 + $0x8] sm:$0xff]  ;;  %v533_v36 = vadd.f32 %v725_v29, %v522_v34  ;;  %v536_v42 = vmul.f32 0.1, %v532_v35 }
 0x129   : > { %v531_v31 = vadd.f32 %v725_v29, %v520_v28  ;;  %v534_v38 = vmul.f32 0.1, %v530_v30 }
 0x12a   : > { %v537_v43 = vmul.f32 0.1, %v533_v36  ;;  %v540_v48 = vmax.f32 %v532_v35, %v536_v42 }
 0x12b   : > { %v535_v39 = vmul.f32 0.1, %v531_v31  ;;  %v538_v46 = vmax.f32 %v530_v30, %v534_v38 }
 0x12c   : > { %v541_v49 = vmax.f32 %v533_v36, %v537_v43  ;;  %v552_v52 = vadd.f32 %v744_v44, %v540_v48 }
 0x12d   : > { %v539_v47 = vmax.f32 %v531_v31, %v535_v39  ;;  %v550_v50 = vadd.f32 %v740_v40, %v538_v46 }
 0x12e   : > { %v553_v53 = vadd.f32 %v745_v45, %v541_v49 }
 0x12f   : > { %v551_v51 = vadd.f32 %v741_v41, %v539_v47 }
 0x130   : > { %v754_v55 = vpack.c.bf16 %v553_v53, %v552_v52 }
 0x131   : > { %v749_v54 = vpack.c.bf16 %v551_v51, %v550_v50 }
 0x132   : > { %757 = vst [vmem:[%s1008_s4 + $0x8] sm:$0xff] %v754_v55  }
 0x133   : > { %750 = vst [vmem:[%s1008_s4] sm:$0xff] %v749_v54  }
 0x134 PF: > { %s14_s19 = sadd.s32 1, %s877_s19   ;;  %s1009_s15 = smov %s865_s16 }
 0x135   : > { %p11_p12 = scmp.ge.s32.totalorder %s14_s19, 5   ;;  %s1010_s16 = smov %s940_s23 }
 0x136   : > { %s1011_s17 = smov %s873_s18  ;;  %s1012_s18 = smov %s1014_s20 }
 0x137   :  { %13 = sbr.rel (!%p11_p12) target bundleno = 3 (0x3), region = 129 }

// kernel: _lambda_.33
= control target key start
LH: loop header
LB: loop body
LE: loop exit
PB: predicated region body
PF: predicated region fallthrough
CT: control target
= control target key end

     0   :  { %v231_v0 = vmov 0.0   ;;  %vm232_vm0 = vmmov 0   ;;  %s286_s1 = inlined_call_operand.vmem [shape: bf16[128,128], index: 1, kind: input, shape index: {}]   ;;  %s287_s0 = inlined_call_operand.vmem [shape: bf16[16,128], index: 0, kind: input, shape index: {}]   ;;  %s288_s2 = inlined_call_operand.vmem [shape: f32[1,128], index: 2, kind: input, shape index: {}]   ;;  %s289_s3 = inlined_call_operand.vmem [shape: bf16[16,128], index: 3, kind: output, shape index: {}]  }
   0x1   :  { %200 = vmatprep.subr.bf16.mxu0 %v231_v0  ;;  %v222_v1 = vld [vmem:[%s286_s1] sm:$0xff]   ;;  %216 = vmatprep.mubr.msk.bf16.mxu0 %vm232_vm0, %v231_v0  ;;  %v223_v2 = vld [vmem:[%s286_s1 + $0x8] sm:$0xff]   ;;  %v224_v3 = vld [vmem:[%s286_s1 + $0x10] sm:$0xff]  }
   0x2   :  { %201 = vmatpush3.bf16.msra.mxu0 %v222_v1  ;;  %v225_v4 = vld [vmem:[%s286_s1 + $0x18] sm:$0xff]   ;;  %v226_v5 = vld [vmem:[%s286_s1 + $0x20] sm:$0xff]   ;;  %v227_v6 = vld [vmem:[%s286_s1 + $0x28] sm:$0xff]  }
   0x3   :  { %202 = vmatprep.subr.bf16.mxu0 %v231_v0  ;;  %v228_v7 = vld [vmem:[%s286_s1 + $0x30] sm:$0xff]   ;;  %v229_v8 = vld [vmem:[%s286_s1 + $0x38] sm:$0xff]   ;;  %v230_v9 = vld [vmem:[%s287_s0] sm:$0xff]  }
   0x4   :  { %v181_v10 = vld [vmem:[%s288_s2] ss:$0 sm:$0xff] }
   0x6   :  { %203 = vmatpush3.bf16.msra.mxu0 %v223_v2 }
   0x7   :  { %204 = vmatprep.subr.bf16.mxu0 %v231_v0 }
   0xa   :  { %205 = vmatpush3.bf16.msra.mxu0 %v224_v3 }
   0xb   :  { %206 = vmatprep.subr.bf16.mxu0 %v231_v0 }
   0xe   :  { %207 = vmatpush3.bf16.msra.mxu0 %v225_v4 }
   0xf   :  { %208 = vmatprep.subr.bf16.mxu0 %v231_v0 }
  0x12   :  { %209 = vmatpush3.bf16.msra.mxu0 %v226_v5 }
  0x13   :  { %210 = vmatprep.subr.bf16.mxu0 %v231_v0 }
  0x16   :  { %211 = vmatpush3.bf16.msra.mxu0 %v227_v6 }
  0x17   :  { %212 = vmatprep.subr.bf16.mxu0 %v231_v0 }
  0x1a   :  { %213 = vmatpush3.bf16.msra.mxu0 %v228_v7 }
  0x1b   :  { %214 = vmatprep.subr.bf16.mxu0 %v231_v0 }
  0x1e   :  { %215 = vmatpush3.bf16.msra.mxu0 %v229_v8 }
  0x21   :  { %217 = vmatmul.mubr.bf16.vlgmr.msra.gmra.mrb[0].mxu0 %v230_v9 }
  0xf4   :  { %v129_v11 = vpop.f32.mrb[0].mxu0 }
  0xf5   :  { %v152_v12 = vadd.f32 %v181_v10, %v129_v11  ;;  %v218_v13 = vpop.f32.mrb[1].mxu0 }
  0xf6   :  { %v132_v14 = vpop.f32.mrb[2].mxu0 }
  0xf7   :  { %v154_v15 = vmul.f32 0.1, %v152_v12  ;;  %v153_v16 = vadd.f32 %v181_v10, %v132_v14  ;;  %v219_v17 = vpop.f32.mrb[3].mxu0 }
  0xf9   :  { %v155_v18 = vmul.f32 0.1, %v153_v16  ;;  %v156_v19 = vmax.f32 %v152_v12, %v154_v15 }
  0xfb   :  { %v157_v20 = vmax.f32 %v153_v16, %v155_v18 }
  0xfd   :  { %v189_v21 = vpack.c.bf16 %v157_v20, %v156_v19 }
  0xff   :  { %190 = vst [vmem:[%s289_s3] sm:$0xff] %v189_v21  }

// kernel: _lambda_.32
= control target key start
LH: loop header
LB: loop body
LE: loop exit
PB: predicated region body
PF: predicated region fallthrough
CT: control target
= control target key end

     0   :  { %s741_s12 = smov 0   ;;  %s743_s13 = smov 0   ;;  %s829_s0 = inlined_call_operand.vmem [shape: bf16[16,640], index: 0, kind: input, shape index: {}]   ;;  %s830_s1 = inlined_call_operand.vmem [shape: bf16[640,128], index: 1, kind: input, shape index: {}]   ;;  %s831_s2 = inlined_call_operand.vmem [shape: f32[1,128], index: 2, kind: input, shape index: {}]   ;;  %s832_s3 = inlined_call_operand.vmem [shape: bf16[16,128], index: 3, kind: output, shape index: {}]  }
   0x1   :  { %s745_s14 = smov 0   ;;  %s747_s15 = smov 0  }
   0x2   :  { %s749_s16 = smov 0  }
   0x3 LB: > { %s25_s17 = sadd.s32 1, %s712_s15  ;;  %p48_p1 = scmp.ne.s32.totalorder %s704_s13, %s700_s12  ;;  %s716_s16 = sphi %s749_s16, %s13_s16   ;;  %s712_s15 = sphi %s747_s15, %s836_s15   ;;  %s708_s14 = sphi %s745_s14, %s835_s14   ;;  %s704_s13 = sphi %s743_s13, %s834_s13   ;;  %s700_s12 = sphi %s741_s12, %s833_s12  }
   0x4   : > { %p26_p0 = scmp.ge.s32.totalorder %s25_s17, 5  ;;  %p49_p2 = scmp.eq.s32.totalorder %s716_s16, 0 }
   0x5   : > { %s41_s19 = sadd.s32 1, %s704_s13  ;;  %p565_p5 = scmp.ge.s32.totalorder %s716_s16, 5 }
   0x6   : > { %s838_s17 = smov (%p26_p0, %s25_s17), 0  ;;  %p50_p3 = por %p49_p2, %p48_p1 }
   0x7   : > { %s37_s18 = ssub.s32 %s712_s15, %s838_s17  ;;  %162 = sbr.rel (%p565_p5) target bundleno = 21 (0x15), region = 20 }
   0x8   : > { %p39_p4 = scmp.eq.s32.totalorder %s37_s18, 0 }
   0xa   : > { %s776_s20 = scalar_select %p39_p4, %s704_s13, %s41_s19  }
   0xe   : > { %165 = sbr.rel (!%p50_p3) target bundleno = 21 (0x15), region = 24  ;;  %s167_s21 = sand.u32 (%p50_p3), 1, %s704_s13  }
   0xf   : > { %s567_s22 = sshll.u32 (%p50_p3), %s712_s15, 2  ;;  %s566_s23 = sshll.u32 (%p50_p3), %s167_s21, 3 }
  0x10   : > { %s174_s26 = scalar_lea.vmem (%p50_p3), %s829_s0, %s567_s22  ;;  %s169_s27 = scalar_lea.vmem (%p50_p3), [#allocation3], %s566_s23 }
  0x11   : > { %v190_v0 = vld [vmem:[%s174_s26] sm:$0xf] (%p50_p3)  ;;  %v192_v1 = vld [vmem:[%s174_s26 + $0x14] sm:$0xf] (%p50_p3) }
  0x12   : > { %191 = vst [vmem:[%s169_s27] sm:$0xf] (%p50_p3), %v190_v0  ;;  %193 = vst [vmem:[%s169_s27 + $0x4] sm:$0xf] (%p50_p3), %v192_v1 }
  0x15 PF: > { %p568_p6 = scmp.ge.s32.totalorder %s716_s16, 1  ;;  %p231_p7 = scmp.lt.s32.totalorder %s716_s16, 6 }
  0x17   : > { %p232_p8 = pnand %p568_p6, %p231_p7 }
  0x18   : > { %s238_s28 = sand.u32 (!%p232_p8), 1, %s700_s12   ;;  %s570_s29 = sshll.u32 (!%p232_p8), %s708_s14, 4 }
  0x19   : > { %235 = sbr.rel (%p232_p8) target bundleno = 305 (0x131), region = 69  ;;  %s788_s30 = sshll.u32 (!%p232_p8), %s238_s28, 3 }
  0x1a   : > { %p277_p9 = scmp.lt.s32.totalorder (!%p232_p8), %s570_s29, 79  ;;  %s240_s8 = scalar_lea.vmem (!%p232_p8), [#allocation3], %s788_s30 }
  0x1b   : > { %p572_p10 = scmp.ne.s32.totalorder (!%p232_p8), %s708_s14, 0 }
  0x20   : > { %s840_s29 = smov (!%p277_p9, %s570_s29), 79  ;;  %301 = sbr.rel (%p572_p10) target bundleno = 39 (0x27), region = 77 }
  0x21   : > { %s571_s4 = sshll.u32 %s840_s29, 2  ;;  %v718_v2 = vmov (!%p572_p10), 0.0  }
  0x22   : > { %s793_s7 = scalar_lea.vmem %s830_s1, %s571_s4  ;;  %302 = vst [vmem:[#allocation2] sm:$0xff] (!%p572_p10), %v718_v2  ;;  %303 = vst [vmem:[#allocation2 + $0x8] sm:$0xff] (!%p572_p10), %v718_v2 }
  0x27 PF: > { %v669_v3 = vld [vmem:[%s793_s7] sm:$0xff]   ;;  %v719_v4 = vmov 0.0   ;;  %v670_v5 = vld [vmem:[%s793_s7 + $0x8] sm:$0xff]   ;;  %vm720_vm0 = vmmov 0   ;;  %v671_v6 = vld [vmem:[%s793_s7 + $0x10] sm:$0xff]   ;;  %p582_p11 = scmp.ne.s32.totalorder %s708_s14, 4 }
  0x28   : > { %606 = vmatprep.subr.bf16.mxu0 %v719_v4  ;;  %622 = vmatprep.mubr.msk.bf16.mxu0 %vm720_vm0, %v719_v4  ;;  %v672_v7 = vld [vmem:[%s793_s7 + $0x18] sm:$0xff]   ;;  %v673_v8 = vld [vmem:[%s793_s7 + $0x20] sm:$0xff]   ;;  %v674_v9 = vld [vmem:[%s793_s7 + $0x28] sm:$0xff]  }
  0x29   : > { %607 = vmatpush3.bf16.msra.mxu0 %v669_v3  ;;  %v675_v10 = vld [vmem:[%s793_s7 + $0x30] sm:$0xff]   ;;  %v676_v11 = vld [vmem:[%s793_s7 + $0x38] sm:$0xff]   ;;  %v304_v13 = vld [vmem:[#allocation2] sm:$0xff] }
  0x2a   : > { %608 = vmatprep.subr.bf16.mxu0 %v719_v4  ;;  %v677_v12 = vld [vmem:[%s240_s8] sm:$0xff]   ;;  %v305_v15 = vld [vmem:[#allocation2 + $0x8] sm:$0xff]  ;;  %v583_v23 = vld [vmem:[%s831_s2] ss:$0 sm:$0xff] (!%p582_p11) }
  0x2d   : > { %609 = vmatpush3.bf16.msra.mxu0 %v670_v5 }
  0x2e   : > { %610 = vmatprep.subr.bf16.mxu0 %v719_v4 }
  0x31   : > { %611 = vmatpush3.bf16.msra.mxu0 %v671_v6 }
  0x32   : > { %612 = vmatprep.subr.bf16.mxu0 %v719_v4 }
  0x35   : > { %613 = vmatpush3.bf16.msra.mxu0 %v672_v7 }
  0x36   : > { %614 = vmatprep.subr.bf16.mxu0 %v719_v4 }
  0x39   : > { %615 = vmatpush3.bf16.msra.mxu0 %v673_v8 }
  0x3a   : > { %616 = vmatprep.subr.bf16.mxu0 %v719_v4 }
  0x3d   : > { %617 = vmatpush3.bf16.msra.mxu0 %v674_v9 }
  0x3e   : > { %618 = vmatprep.subr.bf16.mxu0 %v719_v4 }
  0x41   : > { %619 = vmatpush3.bf16.msra.mxu0 %v675_v10 }
  0x42   : > { %620 = vmatprep.subr.bf16.mxu0 %v719_v4 }
  0x45   : > { %621 = vmatpush3.bf16.msra.mxu0 %v676_v11 }
  0x48   : > { %623 = vmatmul.mubr.bf16.vlgmr.msra.gmra.mrb[0].mxu0 %v677_v12 }
 0x11a   : > { %426 = sbr.rel (%p582_p11) target bundleno = 305 (0x131), region = 81 }
 0x11b   : > { %v412_v14 = vpop.f32.mrb[0].mxu0 }
 0x11c   : > { %v419_v16 = vadd.f32 %v412_v14, %v304_v13  ;;  %v624_v17 = vpop.f32.mrb[1].mxu0 }
 0x11d   : > { %v415_v18 = vpop.f32.mrb[2].mxu0 }
 0x11e   : > { %421 = vst [vmem:[#allocation2] sm:$0xff] %v419_v16  ;;  %v420_v19 = vadd.f32 %v415_v18, %v305_v15  ;;  %v625_v20 = vpop.f32.mrb[3].mxu0 }
 0x120   : > { %422 = vst [vmem:[#allocation2 + $0x8] sm:$0xff] %v420_v19 }
 0x125   : > { %v427_v21 = vld [vmem:[#allocation2] sm:$0xff] }
 0x126   : > { %v436_v24 = vadd.f32 %v583_v23, %v427_v21 }
 0x127   : > { %v428_v22 = vld [vmem:[#allocation2 + $0x8] sm:$0xff] }
 0x128   : > { %v437_v25 = vadd.f32 %v583_v23, %v428_v22  ;;  %v438_v26 = vmul.f32 0.1, %v436_v24 }
 0x12a   : > { %v439_v27 = vmul.f32 0.1, %v437_v25  ;;  %v440_v28 = vmax.f32 %v436_v24, %v438_v26 }
 0x12c   : > { %v441_v29 = vmax.f32 %v437_v25, %v439_v27 }
 0x12e   : > { %v595_v30 = vpack.c.bf16 %v441_v29, %v440_v28 }
 0x130   : > { %596 = vst [vmem:[%s832_s3] sm:$0xff] %v595_v30  }
 0x131 PF: > { %s13_s16 = sadd.s32 1, %s716_s16   ;;  %s833_s12 = smov %s704_s13 }
 0x132   : > { %p10_p12 = scmp.ge.s32.totalorder %s13_s16, 7   ;;  %s834_s13 = smov %s776_s20 }
 0x133   : > { %s835_s14 = smov %s712_s15  ;;  %s836_s15 = smov %s838_s17 }
 0x134   :  { %12 = sbr.rel (!%p10_p12) target bundleno = 3 (0x3), region = 122 }

// kernel: _lambda_.34
= control target key start
LH: loop header
LB: loop body
LE: loop exit
PB: predicated region body
PF: predicated region fallthrough
CT: control target
= control target key end

     0   :  { %s835_s15 = smov 0   ;;  %s837_s16 = smov 0   ;;  %s926_s0 = inlined_call_operand.vmem [shape: bf16[16,640], index: 0, kind: input, shape index: {}]   ;;  %s927_s1 = inlined_call_operand.vmem [shape: bf16[640,128], index: 1, kind: input, shape index: {}]   ;;  %s928_s2 = inlined_call_operand.vmem [shape: f32[1,128], index: 2, kind: input, shape index: {}]   ;;  %s929_s3 = inlined_call_operand.vmem [shape: bf16[16,128], index: 3, kind: input, shape index: {}]   ;;  %s930_s4 = inlined_call_operand.vmem [shape: bf16[16,128], index: 4, kind: output, shape index: {}]  }
   0x1   :  { %s839_s17 = smov 0   ;;  %s841_s18 = smov 0  }
   0x2   :  { %s843_s19 = smov 0  }
   0x3 LB: > { %s26_s20 = sadd.s32 1, %s801_s18  ;;  %p49_p1 = scmp.ne.s32.totalorder %s793_s16, %s789_s15  ;;  %s805_s19 = sphi %s843_s19, %s14_s19   ;;  %s801_s18 = sphi %s841_s18, %s934_s18   ;;  %s797_s17 = sphi %s839_s17, %s933_s17   ;;  %s793_s16 = sphi %s837_s16, %s932_s16   ;;  %s789_s15 = sphi %s835_s15, %s931_s15  }
   0x4   : > { %p27_p0 = scmp.ge.s32.totalorder %s26_s20, 5  ;;  %p50_p2 = scmp.eq.s32.totalorder %s805_s19, 0 }
   0x5   : > { %s42_s22 = sadd.s32 1, %s793_s16  ;;  %p650_p5 = scmp.ge.s32.totalorder %s805_s19, 5 }
   0x6   : > { %s936_s20 = smov (%p27_p0, %s26_s20), 0  ;;  %p51_p3 = por %p50_p2, %p49_p1 }
   0x7   : > { %s38_s21 = ssub.s32 %s801_s18, %s936_s20  ;;  %203 = sbr.rel (%p650_p5) target bundleno = 21 (0x15), region = 24 }
   0x8   : > { %p40_p4 = scmp.eq.s32.totalorder %s38_s21, 0 }
   0xa   : > { %s870_s23 = scalar_select %p40_p4, %s793_s16, %s42_s22  }
   0xe   : > { %206 = sbr.rel (!%p51_p3) target bundleno = 21 (0x15), region = 28  ;;  %s208_s24 = sand.u32 (%p51_p3), 1, %s793_s16  }
   0xf   : > { %s652_s25 = sshll.u32 (%p51_p3), %s801_s18, 2  ;;  %s651_s26 = sshll.u32 (%p51_p3), %s208_s24, 3 }
  0x10   : > { %s215_s29 = scalar_lea.vmem (%p51_p3), %s926_s0, %s652_s25  ;;  %s210_s30 = scalar_lea.vmem (%p51_p3), [#allocation3], %s651_s26 }
  0x11   : > { %v231_v0 = vld [vmem:[%s215_s29] sm:$0xf] (%p51_p3)  ;;  %v233_v1 = vld [vmem:[%s215_s29 + $0x14] sm:$0xf] (%p51_p3) }
  0x12   : > { %232 = vst [vmem:[%s210_s30] sm:$0xf] (%p51_p3), %v231_v0  ;;  %234 = vst [vmem:[%s210_s30 + $0x4] sm:$0xf] (%p51_p3), %v233_v1 }
  0x15 PF: > { %p653_p6 = scmp.ge.s32.totalorder %s805_s19, 1  ;;  %p272_p7 = scmp.lt.s32.totalorder %s805_s19, 6 }
  0x17   : > { %p273_p8 = pnand %p653_p6, %p272_p7 }
  0x18   : > { %s279_s5 = sand.u32 (!%p273_p8), 1, %s789_s15   ;;  %s655_s6 = sshll.u32 (!%p273_p8), %s797_s17, 4 }
  0x19   : > { %276 = sbr.rel (%p273_p8) target bundleno = 307 (0x133), region = 73  ;;  %s882_s7 = sshll.u32 (!%p273_p8), %s279_s5, 3 }
  0x1a   : > { %p328_p9 = scmp.lt.s32.totalorder (!%p273_p8), %s655_s6, 79  ;;  %s281_s12 = scalar_lea.vmem (!%p273_p8), [#allocation3], %s882_s7 }
  0x1b   : > { %p657_p10 = scmp.ne.s32.totalorder (!%p273_p8), %s797_s17, 0 }
  0x20   : > { %s938_s6 = smov (!%p328_p9, %s655_s6), 79  ;;  %361 = sbr.rel (%p657_p10) target bundleno = 39 (0x27), region = 81 }
  0x21   : > { %s656_s8 = sshll.u32 %s938_s6, 2  ;;  %v807_v2 = vmov (!%p657_p10), 0.0  }
  0x22   : > { %s887_s11 = scalar_lea.vmem %s927_s1, %s656_s8  ;;  %362 = vst [vmem:[#allocation2] sm:$0xff] (!%p657_p10), %v807_v2  ;;  %363 = vst [vmem:[#allocation2 + $0x8] sm:$0xff] (!%p657_p10), %v807_v2 }
  0x27 PF: > { %v758_v3 = vld [vmem:[%s887_s11] sm:$0xff]   ;;  %v808_v4 = vmov 0.0   ;;  %v759_v5 = vld [vmem:[%s887_s11 + $0x8] sm:$0xff]   ;;  %vm809_vm0 = vmmov 0   ;;  %v760_v6 = vld [vmem:[%s887_s11 + $0x10] sm:$0xff]   ;;  %p667_p11 = scmp.ne.s32.totalorder %s797_s17, 4 }
  0x28   : > { %695 = vmatprep.subr.bf16.mxu0 %v808_v4  ;;  %711 = vmatprep.mubr.msk.bf16.mxu0 %vm809_vm0, %v808_v4  ;;  %v761_v7 = vld [vmem:[%s887_s11 + $0x18] sm:$0xff]   ;;  %v762_v8 = vld [vmem:[%s887_s11 + $0x20] sm:$0xff]   ;;  %v763_v9 = vld [vmem:[%s887_s11 + $0x28] sm:$0xff]  }
  0x29   : > { %696 = vmatpush3.bf16.msra.mxu0 %v758_v3  ;;  %v764_v10 = vld [vmem:[%s887_s11 + $0x30] sm:$0xff]   ;;  %v765_v11 = vld [vmem:[%s887_s11 + $0x38] sm:$0xff]   ;;  %v364_v13 = vld [vmem:[#allocation2] sm:$0xff] }
  0x2a   : > { %697 = vmatprep.subr.bf16.mxu0 %v808_v4  ;;  %v766_v12 = vld [vmem:[%s281_s12] sm:$0xff]   ;;  %v365_v15 = vld [vmem:[#allocation2 + $0x8] sm:$0xff]  ;;  %v668_v23 = vld [vmem:[%s928_s2] ss:$0 sm:$0xff] (!%p667_p11) }
  0x2b   : > { %v678_v26 = vld [vmem:[%s929_s3] sm:$0xff] (!%p667_p11)  }
  0x2c   : > { %v679_v29 = vunpack.c.l.bf16 (!%p667_p11), %v678_v26  ;;  %v680_v30 = vunpack.c.h.bf16 (!%p667_p11), %v678_v26 }
  0x2d   : > { %698 = vmatpush3.bf16.msra.mxu0 %v759_v5 }
  0x2e   : > { %699 = vmatprep.subr.bf16.mxu0 %v808_v4 }
  0x31   : > { %700 = vmatpush3.bf16.msra.mxu0 %v760_v6 }
  0x32   : > { %701 = vmatprep.subr.bf16.mxu0 %v808_v4 }
  0x35   : > { %702 = vmatpush3.bf16.msra.mxu0 %v761_v7 }
  0x36   : > { %703 = vmatprep.subr.bf16.mxu0 %v808_v4 }
  0x39   : > { %704 = vmatpush3.bf16.msra.mxu0 %v762_v8 }
  0x3a   : > { %705 = vmatprep.subr.bf16.mxu0 %v808_v4 }
  0x3d   : > { %706 = vmatpush3.bf16.msra.mxu0 %v763_v9 }
  0x3e   : > { %707 = vmatprep.subr.bf16.mxu0 %v808_v4 }
  0x41   : > { %708 = vmatpush3.bf16.msra.mxu0 %v764_v10 }
  0x42   : > { %709 = vmatprep.subr.bf16.mxu0 %v808_v4 }
  0x45   : > { %710 = vmatpush3.bf16.msra.mxu0 %v765_v11 }
  0x48   : > { %712 = vmatmul.mubr.bf16.vlgmr.msra.gmra.mrb[0].mxu0 %v766_v12 }
 0x11a   : > { %486 = sbr.rel (%p667_p11) target bundleno = 307 (0x133), region = 85 }
 0x11b   : > { %v472_v14 = vpop.f32.mrb[0].mxu0 }
 0x11c   : > { %v479_v16 = vadd.f32 %v472_v14, %v364_v13  ;;  %v713_v17 = vpop.f32.mrb[1].mxu0 }
 0x11d   : > { %v475_v18 = vpop.f32.mrb[2].mxu0 }
 0x11e   : > { %481 = vst [vmem:[#allocation2] sm:$0xff] %v479_v16  ;;  %v480_v19 = vadd.f32 %v475_v18, %v365_v15  ;;  %v714_v20 = vpop.f32.mrb[3].mxu0 }
 0x120   : > { %482 = vst [vmem:[#allocation2 + $0x8] sm:$0xff] %v480_v19 }
 0x125   : > { %v487_v21 = vld [vmem:[#allocation2] sm:$0xff] }
 0x126   : > { %v496_v24 = vadd.f32 %v668_v23, %v487_v21 }
 0x127   : > { %v488_v22 = vld [vmem:[#allocation2 + $0x8] sm:$0xff] }
 0x128   : > { %v497_v25 = vadd.f32 %v668_v23, %v488_v22  ;;  %v498_v27 = vmul.f32 0.1, %v496_v24 }
 0x12a   : > { %v499_v28 = vmul.f32 0.1, %v497_v25  ;;  %v500_v31 = vmax.f32 %v496_v24, %v498_v27 }
 0x12c   : > { %v501_v32 = vmax.f32 %v497_v25, %v499_v28  ;;  %v506_v33 = vadd.f32 %v679_v29, %v500_v31 }
 0x12e   : > { %v507_v34 = vadd.f32 %v680_v30, %v501_v32 }
 0x130   : > { %v684_v35 = vpack.c.bf16 %v507_v34, %v506_v33 }
 0x132   : > { %685 = vst [vmem:[%s930_s4] sm:$0xff] %v684_v35  }
 0x133 PF: > { %s14_s19 = sadd.s32 1, %s805_s19   ;;  %s931_s15 = smov %s793_s16 }
 0x134   : > { %p11_p12 = scmp.ge.s32.totalorder %s14_s19, 7   ;;  %s932_s16 = smov %s870_s23 }
 0x135   : > { %s933_s17 = smov %s801_s18  ;;  %s934_s18 = smov %s936_s20 }
 0x136   :  { %13 = sbr.rel (!%p11_p12) target bundleno = 3 (0x3), region = 129 }

// kernel: _lambda_.37
= control target key start
LH: loop header
LB: loop body
LE: loop exit
PB: predicated region body
PF: predicated region fallthrough
CT: control target
= control target key end

     0   :  { %s819_s12 = smov 0   ;;  %s821_s13 = smov 0   ;;  %s918_s0 = inlined_call_operand.vmem [shape: bf16[16,1152], index: 0, kind: input, shape index: {}]   ;;  %s919_s1 = inlined_call_operand.vmem [shape: bf16[1152,256], index: 1, kind: input, shape index: {}]   ;;  %s920_s2 = inlined_call_operand.vmem [shape: f32[1,256], index: 2, kind: input, shape index: {}]   ;;  %s921_s3 = inlined_call_operand.vmem [shape: bf16[16,256], index: 3, kind: output, shape index: {}]  }
   0x1   :  { %s823_s14 = smov 0   ;;  %s825_s15 = smov 0  }
   0x2   :  { %s827_s16 = smov 0  }
   0x3 LB: > { %s25_s17 = sadd.s32 1, %s791_s15  ;;  %p48_p1 = scmp.ne.s32.totalorder %s783_s13, %s779_s12  ;;  %s795_s16 = sphi %s827_s16, %s13_s16   ;;  %s791_s15 = sphi %s825_s15, %s925_s15   ;;  %s787_s14 = sphi %s823_s14, %s924_s14   ;;  %s783_s13 = sphi %s821_s13, %s923_s13   ;;  %s779_s12 = sphi %s819_s12, %s922_s12  }
   0x4   : > { %p26_p0 = scmp.ge.s32.totalorder %s25_s17, 9  ;;  %p49_p2 = scmp.eq.s32.totalorder %s795_s16, 0 }
   0x5   : > { %s41_s19 = sadd.s32 1, %s783_s13  ;;  %p654_p5 = scmp.ge.s32.totalorder %s795_s16, 9 }
   0x6   : > { %s927_s17 = smov (%p26_p0, %s25_s17), 0  ;;  %p50_p3 = por %p49_p2, %p48_p1 }
   0x7   : > { %s37_s18 = ssub.s32 %s791_s15, %s927_s17  ;;  %164 = sbr.rel (%p654_p5) target bundleno = 21 (0x15), region = 20 }
   0x8   : > { %p39_p4 = scmp.eq.s32.totalorder %s37_s18, 0 }
   0xa   : > { %s854_s20 = scalar_select %p39_p4, %s783_s13, %s41_s19  }
   0xe   : > { %167 = sbr.rel (!%p50_p3) target bundleno = 21 (0x15), region = 24  ;;  %s169_s21 = sand.u32 (%p50_p3), 1, %s783_s13  }
   0xf   : > { %s656_s22 = sshll.u32 (%p50_p3), %s791_s15, 2  ;;  %s655_s23 = sshll.u32 (%p50_p3), %s169_s21, 3 }
  0x10   : > { %s176_s26 = scalar_lea.vmem (%p50_p3), %s918_s0, %s656_s22  ;;  %s171_s27 = scalar_lea.vmem (%p50_p3), [#allocation3], %s655_s23 }
  0x11   : > { %v192_v0 = vld [vmem:[%s176_s26] sm:$0xf] (%p50_p3)  ;;  %v194_v1 = vld [vmem:[%s176_s26 + $0x24] sm:$0xf] (%p50_p3) }
  0x12   : > { %193 = vst [vmem:[%s171_s27] sm:$0xf] (%p50_p3), %v192_v0  ;;  %195 = vst [vmem:[%s171_s27 + $0x4] sm:$0xf] (%p50_p3), %v194_v1 }
  0x15 PF: > { %p657_p6 = scmp.ge.s32.totalorder %s795_s16, 1  ;;  %p236_p7 = scmp.lt.s32.totalorder %s795_s16, 10 }
  0x17   : > { %p237_p8 = pnand %p657_p6, %p236_p7 }
  0x18   : > { %s243_s28 = sand.u32 (!%p237_p8), 1, %s779_s12   ;;  %s659_s29 = sshll.u32 (!%p237_p8), %s787_s14, 4 }
  0x19   : > { %240 = sbr.rel (%p237_p8) target bundleno = 306 (0x132), region = 69  ;;  %s866_s30 = sshll.u32 (!%p237_p8), %s243_s28, 3 }
  0x1a   : > { %p288_p9 = scmp.lt.s32.totalorder (!%p237_p8), %s659_s29, 143  ;;  %s245_s8 = scalar_lea.vmem (!%p237_p8), [#allocation3], %s866_s30 }
  0x1b   : > { %p662_p10 = scmp.ne.s32.totalorder (!%p237_p8), %s787_s14, 0 }
  0x20   : > { %s929_s29 = smov (!%p288_p9, %s659_s29), 143  ;;  %319 = sbr.rel (%p662_p10) target bundleno = 39 (0x27), region = 77 }
  0x21   : > { %s687_s4 = sshll.u32 %s929_s29, 3  ;;  %v797_v2 = vmov (!%p662_p10), 0.0  }
  0x22   : > { %s871_s7 = scalar_lea.vmem %s919_s1, %s687_s4  ;;  %320 = vst [vmem:[#allocation2] sm:$0xff] (!%p662_p10), %v797_v2  ;;  %321 = vst [vmem:[#allocation2 + $0x8] sm:$0xff] (!%p662_p10), %v797_v2 }
  0x23   : > { %322 = vst [vmem:[#allocation2 + $0x10] sm:$0xff] (!%p662_p10), %v797_v2  ;;  %323 = vst [vmem:[#allocation2 + $0x18] sm:$0xff] (!%p662_p10), %v797_v2 }
  0x27 PF: > { %v732_v3 = vld [vmem:[%s871_s7 + $0x4] ss:$8 sps:$4 sm:$0xff]   ;;  %v734_v4 = vld [vmem:[%s871_s7] ss:$8 sps:$4 sm:$0xff]   ;;  %v798_v5 = vmov 0   ;;  %p680_p11 = scmp.ne.s32.totalorder %s787_s14, 8 }
  0x28   : > { %464 = vmatprep.mubr.bf16.mxu0 %v798_v5  ;;  %432 = vmatprep.subr.bf16.mxu0 %v732_v3  ;;  %v735_v6 = vld [vmem:[%s871_s7 + $0x14] ss:$8 sps:$4 sm:$0xff]   ;;  %v737_v7 = vld [vmem:[%s871_s7 + $0x10] ss:$8 sps:$4 sm:$0xff]   ;;  %v738_v8 = vld [vmem:[%s871_s7 + $0x24] ss:$8 sps:$4 sm:$0xff]   ;;  %v493_v33 = vlaneseq (!%p680_p11) }
  0x29   : > { %433 = vmatpush1.bf16.msra.mxu0 %v734_v4  ;;  %v740_v9 = vld [vmem:[%s871_s7 + $0x20] ss:$8 sps:$4 sm:$0xff]   ;;  %v741_v10 = vld [vmem:[%s871_s7 + $0x34] ss:$8 sps:$4 sm:$0xff]   ;;  %v743_v11 = vld [vmem:[%s871_s7 + $0x30] ss:$8 sps:$4 sm:$0xff]  }
  0x2a   : > { %434 = vmatprep.subr.bf16.mxu0 %v735_v6  ;;  %v744_v12 = vld [vmem:[%s871_s7 + $0x44] ss:$8 sps:$4 sm:$0xff]   ;;  %v746_v13 = vld [vmem:[%s871_s7 + $0x40] ss:$8 sps:$4 sm:$0xff]   ;;  %v747_v14 = vld [vmem:[%s871_s7 + $0x54] ss:$8 sps:$4 sm:$0xff]  }
  0x2b   : > { %v749_v15 = vld [vmem:[%s871_s7 + $0x50] ss:$8 sps:$4 sm:$0xff]   ;;  %v750_v16 = vld [vmem:[%s871_s7 + $0x64] ss:$8 sps:$4 sm:$0xff]   ;;  %v752_v17 = vld [vmem:[%s871_s7 + $0x60] ss:$8 sps:$4 sm:$0xff]  }
  0x2c   : > { %v753_v18 = vld [vmem:[%s871_s7 + $0x74] ss:$8 sps:$4 sm:$0xff]   ;;  %v755_v19 = vld [vmem:[%s871_s7 + $0x70] ss:$8 sps:$4 sm:$0xff]   ;;  %v756_v20 = vld [vmem:[%s245_s8] sm:$0xff]   ;;  %v494_v34 = vshrl.u32 (!%p680_p11), %v493_v33, 7 }
  0x2d   : > { %435 = vmatpush1.bf16.msra.mxu0 %v737_v7  ;;  %v324_v21 = vld [vmem:[#allocation2] sm:$0xff]  ;;  %v325_v22 = vld [vmem:[#allocation2 + $0x8] sm:$0xff]  ;;  %v326_v24 = vld [vmem:[#allocation2 + $0x10] sm:$0xff] }
  0x2e   : > { %436 = vmatprep.subr.bf16.mxu0 %v738_v8  ;;  %v327_v27 = vld [vmem:[#allocation2 + $0x18] sm:$0xff]  ;;  %v491_v35 = vld [vmem:[%s920_s2] sm:$0x3] (!%p680_p11)  ;;  %v495_v37 = vsub.s32 (!%p680_p11), 0, %v494_v34  ;;  %v499_v38 = vsub.s32 (!%p680_p11), 1, %v494_v34 }
  0x30   : > { %v496_v42 = vrot.slane (!%p680_p11), %v491_v35, %v495_v37  ;;  %v500_v43 = vrot.slane (!%p680_p11), %v491_v35, %v499_v38 }
  0x31   : > { %437 = vmatpush1.bf16.msra.mxu0 %v740_v9 }
  0x32   : > { %438 = vmatprep.subr.bf16.mxu0 %v741_v10 }
  0x35   : > { %439 = vmatpush1.bf16.msra.mxu0 %v743_v11 }
  0x36   : > { %440 = vmatprep.subr.bf16.mxu0 %v744_v12 }
  0x39   : > { %441 = vmatpush1.bf16.msra.mxu0 %v746_v13 }
  0x3a   : > { %442 = vmatprep.subr.bf16.mxu0 %v747_v14 }
  0x3d   : > { %443 = vmatpush1.bf16.msra.mxu0 %v749_v15 }
  0x3e   : > { %444 = vmatprep.subr.bf16.mxu0 %v750_v16 }
  0x41   : > { %445 = vmatpush1.bf16.msra.mxu0 %v752_v17 }
  0x42   : > { %446 = vmatprep.subr.bf16.mxu0 %v753_v18 }
  0x45   : > { %447 = vmatpush1.bf16.msra.mxu0 %v755_v19 }
  0x48   : > { %465 = vmatmul.mubr.bf16.vlgmr.msra.gmra.mrb[0].mxu0 %v756_v20 }
 0x11b   : > { %v466_v23 = vpop.f32.mrb[0].mxu0  ;;  %486 = sbr.rel (%p680_p11) target bundleno = 306 (0x132), region = 81 }
 0x11c   : > { %v475_v25 = vadd.f32 %v466_v23, %v324_v21  ;;  %v468_v26 = vpop.f32.mrb[1].mxu0 }
 0x11d   : > { %v476_v28 = vadd.f32 %v468_v26, %v325_v22  ;;  %v470_v29 = vpop.f32.mrb[2].mxu0 }
 0x11e   : > { %479 = vst [vmem:[#allocation2] sm:$0xff] %v475_v25  ;;  %v477_v30 = vadd.f32 %v470_v29, %v326_v24  ;;  %v472_v31 = vpop.f32.mrb[3].mxu0 }
 0x11f   : > { %480 = vst [vmem:[#allocation2 + $0x8] sm:$0xff] %v476_v28  ;;  %v478_v32 = vadd.f32 %v472_v31, %v327_v27 }
 0x120   : > { %481 = vst [vmem:[#allocation2 + $0x10] sm:$0xff] %v477_v30 }
 0x121   : > { %482 = vst [vmem:[#allocation2 + $0x18] sm:$0xff] %v478_v32 }
 0x125   : > { %v487_v36 = vld [vmem:[#allocation2] sm:$0xff] }
 0x126   : > { %v488_v39 = vld [vmem:[#allocation2 + $0x8] sm:$0xff]  ;;  %v503_v44 = vadd.f32 %v496_v42, %v487_v36 }
 0x127   : > { %v489_v40 = vld [vmem:[#allocation2 + $0x10] sm:$0xff]  ;;  %v504_v45 = vadd.f32 %v500_v43, %v488_v39 }
 0x128   : > { %v490_v41 = vld [vmem:[#allocation2 + $0x18] sm:$0xff]  ;;  %v505_v46 = vadd.f32 %v496_v42, %v489_v40  ;;  %v507_v48 = vmul.f32 0.1, %v503_v44 }
 0x129   : > { %v506_v47 = vadd.f32 %v500_v43, %v490_v41  ;;  %v508_v49 = vmul.f32 0.1, %v504_v45 }
 0x12a   : > { %v509_v50 = vmul.f32 0.1, %v505_v46  ;;  %v511_v52 = vmax.f32 %v503_v44, %v507_v48 }
 0x12b   : > { %v510_v51 = vmul.f32 0.1, %v506_v47  ;;  %v512_v53 = vmax.f32 %v504_v45, %v508_v49 }
 0x12c   : > { %v513_v54 = vmax.f32 %v505_v46, %v509_v50 }
 0x12d   : > { %v514_v55 = vmax.f32 %v506_v47, %v510_v51  ;;  %v688_v56 = vpack.c.bf16 %v512_v53, %v511_v52 }
 0x12f   : > { %v689_v57 = vpack.c.bf16 %v514_v55, %v513_v54  ;;  %527 = vst [vmem:[%s921_s3] sm:$0xff] %v688_v56 }
 0x131   : > { %528 = vst [vmem:[%s921_s3 + $0x8] sm:$0xff] %v689_v57 }
 0x132 PF: > { %s13_s16 = sadd.s32 1, %s795_s16   ;;  %s922_s12 = smov %s783_s13 }
 0x133   : > { %p10_p12 = scmp.ge.s32.totalorder %s13_s16, 11   ;;  %s923_s13 = smov %s854_s20 }
 0x134   : > { %s924_s14 = smov %s791_s15  ;;  %s925_s15 = smov %s927_s17 }
 0x135   :  { %12 = sbr.rel (!%p10_p12) target bundleno = 3 (0x3), region = 122 }

// kernel: _lambda_.38
= control target key start
LH: loop header
LB: loop body
LE: loop exit
PB: predicated region body
PF: predicated region fallthrough
CT: control target
= control target key end

     0   :  { %s389_s1 = inlined_call_operand.vmem [shape: bf16[256,128], index: 1, kind: input, shape index: {}]   ;;  %s390_s0 = inlined_call_operand.vmem [shape: bf16[16,256], index: 0, kind: input, shape index: {}]   ;;  %s391_s2 = inlined_call_operand.vmem [shape: f32[1,128], index: 2, kind: input, shape index: {}]   ;;  %s392_s3 = inlined_call_operand.vmem [shape: bf16[16,128], index: 3, kind: output, shape index: {}]  }
   0x1   :  { %v290_v0 = vld [vmem:[%s389_s1 + $0x40] sm:$0xff]   ;;  %v292_v2 = vld [vmem:[%s389_s1 + $0x48] sm:$0xff]   ;;  %v294_v4 = vld [vmem:[%s389_s1 + $0x50] sm:$0xff]  }
   0x2   :  { %v291_v1 = vld [vmem:[%s389_s1] sm:$0xff]   ;;  %268 = vmatprep.subr.bf16.mxu0 %v290_v0  ;;  %v293_v3 = vld [vmem:[%s389_s1 + $0x8] sm:$0xff]   ;;  %v295_v5 = vld [vmem:[%s389_s1 + $0x10] sm:$0xff]  }
   0x3   :  { %269 = vmatpush3.bf16.msra.mxu0 %v291_v1  ;;  %v296_v6 = vld [vmem:[%s389_s1 + $0x58] sm:$0xff]   ;;  %v298_v8 = vld [vmem:[%s389_s1 + $0x60] sm:$0xff]   ;;  %v300_v10 = vld [vmem:[%s389_s1 + $0x68] sm:$0xff]  }
   0x4   :  { %270 = vmatprep.subr.bf16.mxu0 %v292_v2  ;;  %v297_v7 = vld [vmem:[%s389_s1 + $0x18] sm:$0xff]   ;;  %v299_v9 = vld [vmem:[%s389_s1 + $0x20] sm:$0xff]   ;;  %v301_v12 = vld [vmem:[%s389_s1 + $0x28] sm:$0xff]  }
   0x5   :  { %v308_v11 = vld [vmem:[%s390_s0 + $0x4] ss:$8 sps:$4 sm:$0xff]   ;;  %v302_v13 = vld [vmem:[%s389_s1 + $0x70] sm:$0xff]   ;;  %v304_v15 = vld [vmem:[%s389_s1 + $0x78] sm:$0xff]  }
   0x6   :  { %195 = vmatprep.mubr.bf16.mxu0 %v308_v11  ;;  %v303_v14 = vld [vmem:[%s389_s1 + $0x30] sm:$0xff]   ;;  %v305_v16 = vld [vmem:[%s389_s1 + $0x38] sm:$0xff]   ;;  %v306_v17 = vld [vmem:[%s390_s0] ss:$8 sps:$4 sm:$0xff]  }
   0x7   :  { %271 = vmatpush3.bf16.msra.mxu0 %v293_v3  ;;  %v258_v20 = vld [vmem:[%s391_s2] ss:$0 sm:$0xff] }
   0x8   :  { %272 = vmatprep.subr.bf16.mxu0 %v294_v4 }
   0xb   :  { %273 = vmatpush3.bf16.msra.mxu0 %v295_v5 }
   0xc   :  { %274 = vmatprep.subr.bf16.mxu0 %v296_v6 }
   0xf   :  { %275 = vmatpush3.bf16.msra.mxu0 %v297_v7 }
  0x10   :  { %276 = vmatprep.subr.bf16.mxu0 %v298_v8 }
  0x13   :  { %277 = vmatpush3.bf16.msra.mxu0 %v299_v9 }
  0x14   :  { %278 = vmatprep.subr.bf16.mxu0 %v300_v10 }
  0x17   :  { %279 = vmatpush3.bf16.msra.mxu0 %v301_v12 }
  0x18   :  { %280 = vmatprep.subr.bf16.mxu0 %v302_v13 }
  0x1b   :  { %281 = vmatpush3.bf16.msra.mxu0 %v303_v14 }
  0x1c   :  { %282 = vmatprep.subr.bf16.mxu0 %v304_v15 }
  0x1f   :  { %283 = vmatpush3.bf16.msra.mxu0 %v305_v16 }
  0x22   :  { %196 = vmatmul.mubr.bf16.vlgmr.msra.gmra.mrb[0].mxu0 %v306_v17 }
  0xf5   :  { %v284_v18 = vpop.f32.mrb[0].mxu0 }
  0xf6   :  { %v285_v19 = vpop.f32.mrb[1].mxu0 }
  0xf7   :  { %v286_v21 = vadd.f32 %v285_v19, %v284_v18  ;;  %v287_v22 = vpop.f32.mrb[2].mxu0 }
  0xf8   :  { %v288_v23 = vpop.f32.mrb[3].mxu0 }
  0xf9   :  { %v220_v24 = vadd.f32 %v286_v21, %v258_v20  ;;  %v289_v25 = vadd.f32 %v288_v23, %v287_v22 }
  0xfb   :  { %v222_v26 = vmul.f32 0.1, %v220_v24  ;;  %v221_v27 = vadd.f32 %v289_v25, %v258_v20 }
  0xfd   :  { %v223_v28 = vmul.f32 0.1, %v221_v27  ;;  %v224_v29 = vmax.f32 %v220_v24, %v222_v26 }
  0xff   :  { %v225_v30 = vmax.f32 %v221_v27, %v223_v28 }
 0x101   :  { %v266_v31 = vpack.c.bf16 %v225_v30, %v224_v29 }
 0x103   :  { %267 = vst [vmem:[%s392_s3] sm:$0xff] %v266_v31  }

// kernel: _lambda_.39
= control target key start
LH: loop header
LB: loop body
LE: loop exit
PB: predicated region body
PF: predicated region fallthrough
CT: control target
= control target key end

     0   :  { %s924_s15 = smov 0   ;;  %s926_s16 = smov 0   ;;  %s1029_s0 = inlined_call_operand.vmem [shape: bf16[16,1152], index: 0, kind: input, shape index: {}]   ;;  %s1030_s1 = inlined_call_operand.vmem [shape: bf16[1152,256], index: 1, kind: input, shape index: {}]   ;;  %s1031_s2 = inlined_call_operand.vmem [shape: f32[1,256], index: 2, kind: input, shape index: {}]   ;;  %s1032_s3 = inlined_call_operand.vmem [shape: bf16[16,256], index: 3, kind: input, shape index: {}]   ;;  %s1033_s4 = inlined_call_operand.vmem [shape: bf16[16,256], index: 4, kind: output, shape index: {}]  }
   0x1   :  { %s928_s17 = smov 0   ;;  %s930_s18 = smov 0  }
   0x2   :  { %s932_s19 = smov 0  }
   0x3 LB: > { %s26_s20 = sadd.s32 1, %s891_s18  ;;  %p49_p1 = scmp.ne.s32.totalorder %s883_s16, %s879_s15  ;;  %s895_s19 = sphi %s932_s19, %s14_s19   ;;  %s891_s18 = sphi %s930_s18, %s1037_s18   ;;  %s887_s17 = sphi %s928_s17, %s1036_s17   ;;  %s883_s16 = sphi %s926_s16, %s1035_s16   ;;  %s879_s15 = sphi %s924_s15, %s1034_s15  }
   0x4   : > { %p27_p0 = scmp.ge.s32.totalorder %s26_s20, 9  ;;  %p50_p2 = scmp.eq.s32.totalorder %s895_s19, 0 }
   0x5   : > { %s42_s22 = sadd.s32 1, %s883_s16  ;;  %p754_p5 = scmp.ge.s32.totalorder %s895_s19, 9 }
   0x6   : > { %s1039_s20 = smov (%p27_p0, %s26_s20), 0  ;;  %p51_p3 = por %p50_p2, %p49_p1 }
   0x7   : > { %s38_s21 = ssub.s32 %s891_s18, %s1039_s20  ;;  %208 = sbr.rel (%p754_p5) target bundleno = 21 (0x15), region = 24 }
   0x8   : > { %p40_p4 = scmp.eq.s32.totalorder %s38_s21, 0 }
   0xa   : > { %s959_s23 = scalar_select %p40_p4, %s883_s16, %s42_s22  }
   0xe   : > { %211 = sbr.rel (!%p51_p3) target bundleno = 21 (0x15), region = 28  ;;  %s213_s24 = sand.u32 (%p51_p3), 1, %s883_s16  }
   0xf   : > { %s756_s25 = sshll.u32 (%p51_p3), %s891_s18, 2  ;;  %s755_s26 = sshll.u32 (%p51_p3), %s213_s24, 3 }
  0x10   : > { %s220_s29 = scalar_lea.vmem (%p51_p3), %s1029_s0, %s756_s25  ;;  %s215_s30 = scalar_lea.vmem (%p51_p3), [#allocation3], %s755_s26 }
  0x11   : > { %v236_v0 = vld [vmem:[%s220_s29] sm:$0xf] (%p51_p3)  ;;  %v238_v1 = vld [vmem:[%s220_s29 + $0x24] sm:$0xf] (%p51_p3) }
  0x12   : > { %237 = vst [vmem:[%s215_s30] sm:$0xf] (%p51_p3), %v236_v0  ;;  %239 = vst [vmem:[%s215_s30 + $0x4] sm:$0xf] (%p51_p3), %v238_v1 }
  0x15 PF: > { %p757_p6 = scmp.ge.s32.totalorder %s895_s19, 1  ;;  %p280_p7 = scmp.lt.s32.totalorder %s895_s19, 10 }
  0x17   : > { %p281_p8 = pnand %p757_p6, %p280_p7 }
  0x18   : > { %s287_s5 = sand.u32 (!%p281_p8), 1, %s879_s15   ;;  %s759_s6 = sshll.u32 (!%p281_p8), %s887_s17, 4 }
  0x19   : > { %284 = sbr.rel (%p281_p8) target bundleno = 308 (0x134), region = 73  ;;  %s971_s7 = sshll.u32 (!%p281_p8), %s287_s5, 3 }
  0x1a   : > { %p344_p9 = scmp.lt.s32.totalorder (!%p281_p8), %s759_s6, 143  ;;  %s289_s12 = scalar_lea.vmem (!%p281_p8), [#allocation3], %s971_s7 }
  0x1b   : > { %p762_p10 = scmp.ne.s32.totalorder (!%p281_p8), %s887_s17, 0 }
  0x20   : > { %s1041_s6 = smov (!%p344_p9, %s759_s6), 143  ;;  %387 = sbr.rel (%p762_p10) target bundleno = 39 (0x27), region = 81 }
  0x21   : > { %s787_s8 = sshll.u32 %s1041_s6, 3  ;;  %v897_v2 = vmov (!%p762_p10), 0.0  }
  0x22   : > { %s976_s11 = scalar_lea.vmem %s1030_s1, %s787_s8  ;;  %388 = vst [vmem:[#allocation2] sm:$0xff] (!%p762_p10), %v897_v2  ;;  %389 = vst [vmem:[#allocation2 + $0x8] sm:$0xff] (!%p762_p10), %v897_v2 }
  0x23   : > { %390 = vst [vmem:[#allocation2 + $0x10] sm:$0xff] (!%p762_p10), %v897_v2  ;;  %391 = vst [vmem:[#allocation2 + $0x18] sm:$0xff] (!%p762_p10), %v897_v2 }
  0x27 PF: > { %v832_v3 = vld [vmem:[%s976_s11 + $0x4] ss:$8 sps:$4 sm:$0xff]   ;;  %v834_v4 = vld [vmem:[%s976_s11] ss:$8 sps:$4 sm:$0xff]   ;;  %v898_v5 = vmov 0   ;;  %p780_p11 = scmp.ne.s32.totalorder %s887_s17, 8 }
  0x28   : > { %532 = vmatprep.mubr.bf16.mxu0 %v898_v5  ;;  %500 = vmatprep.subr.bf16.mxu0 %v832_v3  ;;  %v835_v6 = vld [vmem:[%s976_s11 + $0x14] ss:$8 sps:$4 sm:$0xff]   ;;  %v837_v7 = vld [vmem:[%s976_s11 + $0x10] ss:$8 sps:$4 sm:$0xff]   ;;  %v838_v8 = vld [vmem:[%s976_s11 + $0x24] ss:$8 sps:$4 sm:$0xff]   ;;  %v561_v33 = vlaneseq (!%p780_p11) }
  0x29   : > { %501 = vmatpush1.bf16.msra.mxu0 %v834_v4  ;;  %v840_v9 = vld [vmem:[%s976_s11 + $0x20] ss:$8 sps:$4 sm:$0xff]   ;;  %v841_v10 = vld [vmem:[%s976_s11 + $0x34] ss:$8 sps:$4 sm:$0xff]   ;;  %v843_v11 = vld [vmem:[%s976_s11 + $0x30] ss:$8 sps:$4 sm:$0xff]  }
  0x2a   : > { %502 = vmatprep.subr.bf16.mxu0 %v835_v6  ;;  %v844_v12 = vld [vmem:[%s976_s11 + $0x44] ss:$8 sps:$4 sm:$0xff]   ;;  %v846_v13 = vld [vmem:[%s976_s11 + $0x40] ss:$8 sps:$4 sm:$0xff]   ;;  %v847_v14 = vld [vmem:[%s976_s11 + $0x54] ss:$8 sps:$4 sm:$0xff]  }
  0x2b   : > { %v849_v15 = vld [vmem:[%s976_s11 + $0x50] ss:$8 sps:$4 sm:$0xff]   ;;  %v850_v16 = vld [vmem:[%s976_s11 + $0x64] ss:$8 sps:$4 sm:$0xff]   ;;  %v852_v17 = vld [vmem:[%s976_s11 + $0x60] ss:$8 sps:$4 sm:$0xff]  }
  0x2c   : > { %v853_v18 = vld [vmem:[%s976_s11 + $0x74] ss:$8 sps:$4 sm:$0xff]   ;;  %v855_v19 = vld [vmem:[%s976_s11 + $0x70] ss:$8 sps:$4 sm:$0xff]   ;;  %v856_v20 = vld [vmem:[%s289_s12] sm:$0xff]   ;;  %v562_v34 = vshrl.u32 (!%p780_p11), %v561_v33, 7 }
  0x2d   : > { %503 = vmatpush1.bf16.msra.mxu0 %v837_v7  ;;  %v392_v21 = vld [vmem:[#allocation2] sm:$0xff]  ;;  %v393_v22 = vld [vmem:[#allocation2 + $0x8] sm:$0xff]  ;;  %v394_v24 = vld [vmem:[#allocation2 + $0x10] sm:$0xff] }
  0x2e   : > { %504 = vmatprep.subr.bf16.mxu0 %v838_v8  ;;  %v395_v27 = vld [vmem:[#allocation2 + $0x18] sm:$0xff]  ;;  %v559_v35 = vld [vmem:[%s1031_s2] sm:$0x3] (!%p780_p11)  ;;  %v563_v37 = vsub.s32 (!%p780_p11), 0, %v562_v34  ;;  %v567_v38 = vsub.s32 (!%p780_p11), 1, %v562_v34  ;;  %v584_v45 = vld [vmem:[%s1032_s3 + $0x8] sm:$0xff] (!%p780_p11) }
  0x2f   : > { %v583_v44 = vld [vmem:[%s1032_s3] sm:$0xff] (!%p780_p11)  ;;  %v587_v55 = vunpack.c.l.bf16 (!%p780_p11), %v584_v45  ;;  %v588_v57 = vunpack.c.h.bf16 (!%p780_p11), %v584_v45 }
  0x30   : > { %v564_v42 = vrot.slane (!%p780_p11), %v559_v35, %v563_v37  ;;  %v568_v43 = vrot.slane (!%p780_p11), %v559_v35, %v567_v38  ;;  %v585_v50 = vunpack.c.l.bf16 (!%p780_p11), %v583_v44  ;;  %v586_v51 = vunpack.c.h.bf16 (!%p780_p11), %v583_v44 }
  0x31   : > { %505 = vmatpush1.bf16.msra.mxu0 %v840_v9 }
  0x32   : > { %506 = vmatprep.subr.bf16.mxu0 %v841_v10 }
  0x35   : > { %507 = vmatpush1.bf16.msra.mxu0 %v843_v11 }
  0x36   : > { %508 = vmatprep.subr.bf16.mxu0 %v844_v12 }
  0x39   : > { %509 = vmatpush1.bf16.msra.mxu0 %v846_v13 }
  0x3a   : > { %510 = vmatprep.subr.bf16.mxu0 %v847_v14 }
  0x3d   : > { %511 = vmatpush1.bf16.msra.mxu0 %v849_v15 }
  0x3e   : > { %512 = vmatprep.subr.bf16.mxu0 %v850_v16 }
  0x41   : > { %513 = vmatpush1.bf16.msra.mxu0 %v852_v17 }
  0x42   : > { %514 = vmatprep.subr.bf16.mxu0 %v853_v18 }
  0x45   : > { %515 = vmatpush1.bf16.msra.mxu0 %v855_v19 }
  0x48   : > { %533 = vmatmul.mubr.bf16.vlgmr.msra.gmra.mrb[0].mxu0 %v856_v20 }
 0x11b   : > { %v534_v23 = vpop.f32.mrb[0].mxu0  ;;  %554 = sbr.rel (%p780_p11) target bundleno = 308 (0x134), region = 85 }
 0x11c   : > { %v543_v25 = vadd.f32 %v534_v23, %v392_v21  ;;  %v536_v26 = vpop.f32.mrb[1].mxu0 }
 0x11d   : > { %v544_v28 = vadd.f32 %v536_v26, %v393_v22  ;;  %v538_v29 = vpop.f32.mrb[2].mxu0 }
 0x11e   : > { %547 = vst [vmem:[#allocation2] sm:$0xff] %v543_v25  ;;  %v545_v30 = vadd.f32 %v538_v29, %v394_v24  ;;  %v540_v31 = vpop.f32.mrb[3].mxu0 }
 0x11f   : > { %548 = vst [vmem:[#allocation2 + $0x8] sm:$0xff] %v544_v28  ;;  %v546_v32 = vadd.f32 %v540_v31, %v395_v27 }
 0x120   : > { %549 = vst [vmem:[#allocation2 + $0x10] sm:$0xff] %v545_v30 }
 0x121   : > { %550 = vst [vmem:[#allocation2 + $0x18] sm:$0xff] %v546_v32 }
 0x125   : > { %v555_v36 = vld [vmem:[#allocation2] sm:$0xff] }
 0x126   : > { %v556_v39 = vld [vmem:[#allocation2 + $0x8] sm:$0xff]  ;;  %v571_v46 = vadd.f32 %v564_v42, %v555_v36 }
 0x127   : > { %v557_v40 = vld [vmem:[#allocation2 + $0x10] sm:$0xff]  ;;  %v572_v47 = vadd.f32 %v568_v43, %v556_v39 }
 0x128   : > { %v558_v41 = vld [vmem:[#allocation2 + $0x18] sm:$0xff]  ;;  %v573_v48 = vadd.f32 %v564_v42, %v557_v40  ;;  %v575_v52 = vmul.f32 0.1, %v571_v46 }
 0x129   : > { %v574_v49 = vadd.f32 %v568_v43, %v558_v41  ;;  %v576_v53 = vmul.f32 0.1, %v572_v47 }
 0x12a   : > { %v577_v54 = vmul.f32 0.1, %v573_v48  ;;  %v579_v58 = vmax.f32 %v571_v46, %v575_v52 }
 0x12b   : > { %v578_v56 = vmul.f32 0.1, %v574_v49  ;;  %v580_v59 = vmax.f32 %v572_v47, %v576_v53 }
 0x12c   : > { %v581_v60 = vmax.f32 %v573_v48, %v577_v54  ;;  %v589_v62 = vadd.f32 %v585_v50, %v579_v58 }
 0x12d   : > { %v582_v61 = vmax.f32 %v574_v49, %v578_v56  ;;  %v590_v63 = vadd.f32 %v586_v51, %v580_v59 }
 0x12e   : > { %v591_v0 = vadd.f32 %v587_v55, %v581_v60 }
 0x12f   : > { %v592_v1 = vadd.f32 %v588_v57, %v582_v61  ;;  %v788_v2 = vpack.c.bf16 %v590_v63, %v589_v62 }
 0x131   : > { %v789_v3 = vpack.c.bf16 %v592_v1, %v591_v0  ;;  %605 = vst [vmem:[%s1033_s4] sm:$0xff] %v788_v2 }
 0x133   : > { %606 = vst [vmem:[%s1033_s4 + $0x8] sm:$0xff] %v789_v3 }
 0x134 PF: > { %s14_s19 = sadd.s32 1, %s895_s19   ;;  %s1034_s15 = smov %s883_s16 }
 0x135   : > { %p11_p12 = scmp.ge.s32.totalorder %s14_s19, 11   ;;  %s1035_s16 = smov %s959_s23 }
 0x136   : > { %s1036_s17 = smov %s891_s18  ;;  %s1037_s18 = smov %s1039_s20 }
 0x137   :  { %13 = sbr.rel (!%p11_p12) target bundleno = 3 (0x3), region = 129 }

</bundles_post_ra>
